<compile_context>
chip_gen: v5e
topology: v5e:2x2
jax: 0.10.0
libtpu: 0.0.40
codegen_flags: <defaults>
</compile_context>

<pallas_src>
import jax
import jax.numpy as jnp
from jax.experimental import pallas as pl
from jax.experimental.pallas import tpu as pltpu

# ----------------------------- model hyper-params (small) --------------------
BATCH = 2
CHANNELS = 3
FRAMES = 4             # temporal extent of the input video
IMG = 16               # spatial size
PATCH = 4              # spatial patch size            -> h = w = 4
T_PATCH = 2            # temporal patch size           -> t = 2
DIM = 32               # token dim
DIM_HEAD = 8
HEADS = 4
INNER = HEADS * DIM_HEAD                 # 32
SPATIAL_DEPTH = 2
TEMPORAL_DEPTH = 2
TOTAL_DEPTH = SPATIAL_DEPTH + TEMPORAL_DEPTH
FF_MULT = 4
FF_DIM = DIM * FF_MULT                   # 128 (lane dense FF hidden)
N_CLASS = 5
N_PAD = 128                              # classifier lanes padded to 128
H_TOK = IMG // PATCH
W_TOK = IMG // PATCH
HW_TOK = H_TOK * W_TOK                   # 16
T_TOK = FRAMES // T_PATCH                # 2
SEQ = T_TOK * HW_TOK                     # 32 -- all tokens of one batch element
PATCH_DIM = CHANNELS * T_PATCH * PATCH * PATCH   # 96
FLAT_DIM = HW_TOK * DIM                          # 512 (analog of 294912)
ATTN_SCALE = DIM_HEAD ** -0.5
NEG_INF = -1e9


# ----------------------------- in-kernel building blocks ----------------------
def _ln(x, g, b):
    x = x.astype(jnp.float32)
    mu = jnp.mean(x, axis=-1, keepdims=True)
    var = jnp.mean(jnp.square(x - mu), axis=-1, keepdims=True)
    return (x - mu) * jax.lax.rsqrt(var + 1e-5) * g + b


def _attn_block(x, lnp, w_q, w_k, w_v, w_o, bias):
    # x: (SEQ, DIM); lnp: (4, DIM); w_q/k/v: (HEADS, DIM, DIM_HEAD);
    # w_o: (HEADS, DIM_HEAD, DIM); bias: (SEQ, SEQ) additive block mask
    # (0 inside the allowed spatial/temporal block, -1e9 outside), so one masked
    # softmax over all 32 tokens is exactly equivalent to per-sequence attention.
    h = _ln(x, lnp[0:1, :], lnp[1:2, :])
    hb = jnp.broadcast_to(h[None], (HEADS, SEQ, DIM))
    # head-batched projections: batch dim leading, standard (b,m,k)x(b,k,n) form
    q = jnp.einsum('hld,hdk->hlk', hb, w_q, preferred_element_type=jnp.float32)
    k = jnp.einsum('hld,hdk->hlk', hb, w_k, preferred_element_type=jnp.float32)
    v = jnp.einsum('hld,hdk->hlk', hb, w_v, preferred_element_type=jnp.float32)
    s = jnp.einsum('hqd,hkd->hqk', q, k,
                   preferred_element_type=jnp.float32) * ATTN_SCALE   # (H,L,L)
    s = s + bias                                   # broadcast over heads
    s = s - jnp.max(s, axis=-1, keepdims=True)
    p = jnp.exp(s)
    p = p * pl.reciprocal(jnp.sum(p, axis=-1, keepdims=True), approx=True)
    o = jnp.einsum('hqk,hkd->hqd', p, v, preferred_element_type=jnp.float32)
    oh = jnp.einsum('hqd,hdn->hqn', o, w_o, preferred_element_type=jnp.float32)
    return x + jnp.sum(oh, axis=0)                 # fold heads (no concat)


def _ff_block(x, lnp, w1, b1, w2, b2):
    h = _ln(x, lnp[2:3, :], lnp[3:4, :])
    h = jnp.dot(h, w1, preferred_element_type=jnp.float32) + b1       # (L, 128)
    # TODO(synk): PyTorch nn.GELU defaults to the exact erf form; tanh approx used.
    h = jax.nn.gelu(h, approximate=True)
    return x + jnp.dot(h, w2, preferred_element_type=jnp.float32) + b2


# ----------------------------- fused kernel -----------------------------------
def _fused_evaluate_kernel(
        patches_ref, bias_ref,
        pe_ln_ref, pe_w_ref, pe_misc_ref,
        ln_ref, wq_ref, wk_ref, wv_ref, wo_ref,
        wff1_ref, bff1_ref, wff2_ref, bff2_ref,
        fin_ref, wcls_ref, bcls_ref,
        out_ref):
    # One batch element per grid step; every intermediate stays in VMEM/vregs.
    pe_ln = pe_ln_ref[...]                                   # (2, PATCH_DIM)
    pe_misc = pe_misc_ref[...]                               # (3, DIM)
    fin = fin_ref[...]                                       # (2, 2, DIM)

    # ---- patch embed: LN + Linear + LN on the full (32, 96) slab -------------
    x = patches_ref[0].astype(jnp.float32)                   # (SEQ, PATCH_DIM)
    x = _ln(x, pe_ln[0:1, :], pe_ln[1:2, :])
    x = jnp.dot(x, pe_w_ref[...], preferred_element_type=jnp.float32) + pe_misc[0:1, :]
    x = _ln(x, pe_misc[1:2, :], pe_misc[2:3, :])

    sp_bias = bias_ref[0]                                    # within-frame mask
    tp_bias = bias_ref[1]                                    # within-position mask

    # ---- spatial transformer (block-diag attention over each frame) ----------
    for l in range(SPATIAL_DEPTH):
        x = _attn_block(x, ln_ref[l], wq_ref[l], wk_ref[l], wv_ref[l],
                        wo_ref[l], sp_bias)
        x = _ff_block(x, ln_ref[l], wff1_ref[l], bff1_ref[l],
                      wff2_ref[l], bff2_ref[l])
    x = _ln(x, fin[0, 0:1, :], fin[0, 1:2, :])

    # ---- temporal transformer (attention within each spatial position) -------
    for l in range(SPATIAL_DEPTH, TOTAL_DEPTH):
        x = _attn_block(x, ln_ref[l], wq_ref[l], wk_ref[l], wv_ref[l],
                        wo_ref[l], tp_bias)
        x = _ff_block(x, ln_ref[l], wff1_ref[l], bff1_ref[l],
                      wff2_ref[l], bff2_ref[l])
    x = _ln(x, fin[1, 0:1, :], fin[1, 1:2, :])

    # ---- temporal mean (torch.mean(x, dim=1) of the (B,t,h,w,D) encoder out) -
    m = jnp.mean(x.reshape(T_TOK, HW_TOK, DIM), axis=0)      # (HW_TOK, DIM)

    # ---- mean -> flatten -> Linear: logits = sum_s m[s] @ W[s*DIM:(s+1)*DIM] -
    # TODO(synk): at real CTViT scale (FLAT_DIM=294912) this becomes a tiled
    #             matmul over a reduction grid axis with a VMEM accumulator.
    logits = bcls_ref[...].astype(jnp.float32)               # (1, N_PAD)
    for s in range(HW_TOK):
        logits = logits + jnp.dot(m[s:s + 1, :], wcls_ref[s],
                                  preferred_element_type=jnp.float32)
    out_ref[0] = logits.astype(out_ref.dtype)                # lane-dense (1,128)


# ----------------------------- pallas_call wrapper -----------------------------
def _bcast_spec(arr):
    rank = arr.ndim
    return pl.BlockSpec(arr.shape, lambda i, _r=rank: (0,) * _r)


def _attention_bias():
    ids = jnp.arange(SEQ)
    frame = ids // HW_TOK
    pos = ids % HW_TOK
    sp = jnp.where(frame[:, None] == frame[None, :], 0.0, NEG_INF)
    tp = jnp.where(pos[:, None] == pos[None, :], 0.0, NEG_INF)
    return jnp.stack([sp, tp]).astype(jnp.float32)            # (2, SEQ, SEQ)


def evaluate_forward(params, x):
    # x: (B, C, T, H, W) -- PyTorch NCTHW video layout
    B = x.shape[0]
    t, h, w = FRAMES // T_PATCH, IMG // PATCH, IMG // PATCH
    # patch rearrange: b c (t pt) (h p1) (w p2) -> b (t h w) (c pt p1 p2)
    p = x.reshape(B, CHANNELS, t, T_PATCH, h, PATCH, w, PATCH)
    p = p.transpose(0, 2, 4, 6, 1, 3, 5, 7)
    patches = p.reshape(B, SEQ, PATCH_DIM)

    weights = [
        _attention_bias(),
        params["pe_ln"], params["pe_w"], params["pe_misc"],
        params["ln"], params["w_q"], params["w_k"], params["w_v"], params["w_o"],
        params["w_ff1"], params["b_ff1"], params["w_ff2"], params["b_ff2"],
        params["fin_ln"], params["w_cls"], params["b_cls"],
    ]
    in_specs = [pl.BlockSpec((1, SEQ, PATCH_DIM), lambda i: (i, 0, 0))]
    in_specs += [_bcast_spec(wt) for wt in weights]

    out = pl.pallas_call(
        _fused_evaluate_kernel,
        out_shape=jax.ShapeDtypeStruct((B, 1, N_PAD), jnp.float32),
        grid=(B,),
        in_specs=in_specs,
        out_specs=pl.BlockSpec((1, 1, N_PAD), lambda i: (i, 0, 0)),
        compiler_params=pltpu.CompilerParams(
            dimension_semantics=("parallel",)),
    )(patches, *weights)
    return out.reshape(B, N_PAD)[:, :N_CLASS]


# ----------------------------- deterministic init ------------------------------
def init_params(key):
    keys = iter(jax.random.split(key, 16))

    def dense(shape, scale=0.02):
        return (scale * jax.random.normal(next(keys), shape)).astype(jnp.float32)

    # per-layer LN params packed as (depth, 4, DIM): [ln1_g, ln1_b, ln2_g, ln2_b]
    ln = jnp.tile(
        jnp.stack([jnp.ones((DIM,)), jnp.zeros((DIM,)),
                   jnp.ones((DIM,)), jnp.zeros((DIM,))])[None],
        (TOTAL_DEPTH, 1, 1)).astype(jnp.float32)

    w_cls = dense((FLAT_DIM, N_CLASS))
    w_cls = jnp.pad(w_cls, ((0, 0), (0, N_PAD - N_CLASS)))
    w_cls = w_cls.reshape(HW_TOK, DIM, N_PAD)
    b_cls = jnp.zeros((1, N_PAD), jnp.float32)

    return {
        # patch embed: LN(96) gamma/beta ; Linear(96->32) ; [bias, LN(32) g, b]
        "pe_ln": jnp.stack([jnp.ones((PATCH_DIM,)),
                            jnp.zeros((PATCH_DIM,))]).astype(jnp.float32),
        "pe_w": dense((PATCH_DIM, DIM)),
        "pe_misc": jnp.stack([jnp.zeros((DIM,)), jnp.ones((DIM,)),
                              jnp.zeros((DIM,))]).astype(jnp.float32),
        # transformer stacks: layers 0..1 spatial, 2..3 temporal
        "ln": ln,
        "w_q": dense((TOTAL_DEPTH, HEADS, DIM, DIM_HEAD)),
        "w_k": dense((TOTAL_DEPTH, HEADS, DIM, DIM_HEAD)),
        "w_v": dense((TOTAL_DEPTH, HEADS, DIM, DIM_HEAD)),
        "w_o": dense((TOTAL_DEPTH, HEADS, DIM_HEAD, DIM)),
        "w_ff1": dense((TOTAL_DEPTH, DIM, FF_DIM)),
        "b_ff1": jnp.zeros((TOTAL_DEPTH, 1, FF_DIM), jnp.float32),
        "w_ff2": dense((TOTAL_DEPTH, FF_DIM, DIM)),
        "b_ff2": jnp.zeros((TOTAL_DEPTH, 1, DIM), jnp.float32),
        # final LNs: [0] after spatial stack, [1] after temporal stack
        "fin_ln": jnp.tile(jnp.stack([jnp.ones((DIM,)),
                                      jnp.zeros((DIM,))])[None],
                           (2, 1, 1)).astype(jnp.float32),
        "w_cls": w_cls,
        "b_cls": b_cls,
    }


# ----------------------------- main ---------------------------------------------
if __name__ == "__main__":
    key = jax.random.PRNGKey(0)
    pkey, xkey = jax.random.split(key)
    params = init_params(pkey)
    # input video, PyTorch layout (B, C, T, H, W)
    x = jax.random.normal(xkey, (BATCH, CHANNELS, FRAMES, IMG, IMG), jnp.float32)

    fwd = jax.jit(evaluate_forward)
    out = jax.block_until_ready(fwd(params, x))
    assert out.shape == (BATCH, N_CLASS), out.shape
    assert bool(jnp.all(jnp.isfinite(out)))
    print("KERNEL_OK")
</pallas_src>

<mosaic_0001>
module attributes {stable_mosaic.version = 11 : i64} {
  func.func @_fused_evaluate_kernel(%arg0: i32, %arg1: memref<1x32x96xf32, #tpu.memory_space<vmem>>, %arg2: memref<2x32x32xf32, #tpu.memory_space<vmem>>, %arg3: memref<2x96xf32, #tpu.memory_space<vmem>>, %arg4: memref<96x32xf32, #tpu.memory_space<vmem>>, %arg5: memref<3x32xf32, #tpu.memory_space<vmem>>, %arg6: memref<4x4x32xf32, #tpu.memory_space<vmem>>, %arg7: memref<4x4x32x8xf32, #tpu.memory_space<vmem>>, %arg8: memref<4x4x32x8xf32, #tpu.memory_space<vmem>>, %arg9: memref<4x4x32x8xf32, #tpu.memory_space<vmem>>, %arg10: memref<4x4x8x32xf32, #tpu.memory_space<vmem>>, %arg11: memref<4x32x128xf32, #tpu.memory_space<vmem>>, %arg12: memref<4x1x128xf32, #tpu.memory_space<vmem>>, %arg13: memref<4x128x32xf32, #tpu.memory_space<vmem>>, %arg14: memref<4x1x32xf32, #tpu.memory_space<vmem>>, %arg15: memref<2x2x32xf32, #tpu.memory_space<vmem>>, %arg16: memref<16x32x128xf32, #tpu.memory_space<vmem>>, %arg17: memref<1x128xf32, #tpu.memory_space<vmem>>, %arg18: memref<1x1x128xf32, #tpu.memory_space<vmem>>) attributes {dimension_semantics = [#tpu.dimension_semantics<parallel>], iteration_bounds = array<i64: 2>, scalar_prefetch = 0 : i64, scratch_operands = 0 : i64, tpu.core_type = #tpu.core_type<tc>, window_params = [{transform_indices = @transform_0, window_bounds = array<i64: 1, 32, 96>}, {pipeline_mode = #tpu.pipeline_mode<synchronous>, transform_indices = @transform_1, window_bounds = array<i64: 2, 32, 32>}, {pipeline_mode = #tpu.pipeline_mode<synchronous>, transform_indices = @transform_2, window_bounds = array<i64: 2, 96>}, {pipeline_mode = #tpu.pipeline_mode<synchronous>, transform_indices = @transform_3, window_bounds = array<i64: 96, 32>}, {pipeline_mode = #tpu.pipeline_mode<synchronous>, transform_indices = @transform_4, window_bounds = array<i64: 3, 32>}, {pipeline_mode = #tpu.pipeline_mode<synchronous>, transform_indices = @transform_5, window_bounds = array<i64: 4, 4, 32>}, {pipeline_mode = #tpu.pipeline_mode<synchronous>, transform_indices = @transform_6, window_bounds = array<i64: 4, 4, 32, 8>}, {pipeline_mode = #tpu.pipeline_mode<synchronous>, transform_indices = @transform_7, window_bounds = array<i64: 4, 4, 32, 8>}, {pipeline_mode = #tpu.pipeline_mode<synchronous>, transform_indices = @transform_8, window_bounds = array<i64: 4, 4, 32, 8>}, {pipeline_mode = #tpu.pipeline_mode<synchronous>, transform_indices = @transform_9, window_bounds = array<i64: 4, 4, 8, 32>}, {pipeline_mode = #tpu.pipeline_mode<synchronous>, transform_indices = @transform_10, window_bounds = array<i64: 4, 32, 128>}, {pipeline_mode = #tpu.pipeline_mode<synchronous>, transform_indices = @transform_11, window_bounds = array<i64: 4, 1, 128>}, {pipeline_mode = #tpu.pipeline_mode<synchronous>, transform_indices = @transform_12, window_bounds = array<i64: 4, 128, 32>}, {pipeline_mode = #tpu.pipeline_mode<synchronous>, transform_indices = @transform_13, window_bounds = array<i64: 4, 1, 32>}, {pipeline_mode = #tpu.pipeline_mode<synchronous>, transform_indices = @transform_14, window_bounds = array<i64: 2, 2, 32>}, {pipeline_mode = #tpu.pipeline_mode<synchronous>, transform_indices = @transform_15, window_bounds = array<i64: 16, 32, 128>}, {pipeline_mode = #tpu.pipeline_mode<synchronous>, transform_indices = @transform_16, window_bounds = array<i64: 1, 128>}, {transform_indices = @transform_17, window_bounds = array<i64: 1, 1, 128>}]} {
    %c0 = arith.constant 0 : index
    %c0_0 = arith.constant 0 : index
    %0 = vector.load %arg3[%c0, %c0_0] : memref<2x96xf32, #tpu.memory_space<vmem>>, vector<2x96xf32>
    %c0_1 = arith.constant 0 : index
    %c0_2 = arith.constant 0 : index
    %1 = vector.load %arg5[%c0_1, %c0_2] : memref<3x32xf32, #tpu.memory_space<vmem>>, vector<3x32xf32>
    %c0_3 = arith.constant 0 : index
    %c0_4 = arith.constant 0 : index
    %c0_5 = arith.constant 0 : index
    %2 = vector.load %arg15[%c0_3, %c0_4, %c0_5] : memref<2x2x32xf32, #tpu.memory_space<vmem>>, vector<2x2x32xf32>
    %c0_6 = arith.constant 0 : index
    %c0_7 = arith.constant 0 : index
    %c0_8 = arith.constant 0 : index
    %3 = vector.load %arg1[%c0_6, %c0_7, %c0_8] : memref<1x32x96xf32, #tpu.memory_space<vmem>>, vector<1x32x96xf32>
    %4 = vector.shape_cast %3 : vector<1x32x96xf32> to vector<32x96xf32>
    %5 = vector.extract_strided_slice %0 {offsets = [0, 0], sizes = [1, 96], strides = [1, 1]} : vector<2x96xf32> to vector<1x96xf32>
    %6 = vector.extract_strided_slice %0 {offsets = [1, 0], sizes = [1, 96], strides = [1, 1]} : vector<2x96xf32> to vector<1x96xf32>
    %cst = arith.constant dense<0.000000e+00> : vector<32xf32>
    %7 = vector.multi_reduction <add>, %4, %cst [1] : vector<32x96xf32> to vector<32xf32>
    %8 = vector.shape_cast %7 : vector<32xf32> to vector<32x1xf32>
    %cst_9 = arith.constant 9.600000e+01 : f32
    %9 = vector.broadcast %cst_9 : f32 to vector<32x1xf32>
    %10 = arith.divf %8, %9 : vector<32x1xf32>
    %11 = vector.broadcast %10 : vector<32x1xf32> to vector<32x96xf32>
    %12 = arith.subf %4, %11 : vector<32x96xf32>
    %13 = arith.mulf %12, %12 : vector<32x96xf32>
    %cst_10 = arith.constant dense<0.000000e+00> : vector<32xf32>
    %14 = vector.multi_reduction <add>, %13, %cst_10 [1] : vector<32x96xf32> to vector<32xf32>
    %15 = vector.shape_cast %14 : vector<32xf32> to vector<32x1xf32>
    %cst_11 = arith.constant 9.600000e+01 : f32
    %16 = vector.broadcast %cst_11 : f32 to vector<32x1xf32>
    %17 = arith.divf %15, %16 : vector<32x1xf32>
    %18 = vector.broadcast %10 : vector<32x1xf32> to vector<32x96xf32>
    %19 = arith.subf %4, %18 : vector<32x96xf32>
    %cst_12 = arith.constant 9.99999974E-6 : f32
    %20 = vector.broadcast %cst_12 : f32 to vector<32x1xf32>
    %21 = arith.addf %17, %20 : vector<32x1xf32>
    %22 = math.rsqrt %21 : vector<32x1xf32>
    %23 = vector.broadcast %22 : vector<32x1xf32> to vector<32x96xf32>
    %24 = arith.mulf %19, %23 : vector<32x96xf32>
    %25 = vector.broadcast %5 : vector<1x96xf32> to vector<32x96xf32>
    %26 = arith.mulf %24, %25 : vector<32x96xf32>
    %27 = vector.broadcast %6 : vector<1x96xf32> to vector<32x96xf32>
    %28 = arith.addf %26, %27 : vector<32x96xf32>
    %c0_13 = arith.constant 0 : index
    %c0_14 = arith.constant 0 : index
    %29 = vector.load %arg4[%c0_13, %c0_14] : memref<96x32xf32, #tpu.memory_space<vmem>>, vector<96x32xf32>
    %cst_15 = arith.constant dense<0.000000e+00> : vector<32x32xf32>
    %30 = tpu.matmul %28, %29, %cst_15 {dimension_numbers = #tpu.dot_dimension_numbers<[1], [0], [0], [1], [0, 0, 1, 1], [], []>} : vector<32x96xf32>, vector<96x32xf32>, vector<32x32xf32> -> vector<32x32xf32>
    %31 = vector.extract_strided_slice %1 {offsets = [0, 0], sizes = [1, 32], strides = [1, 1]} : vector<3x32xf32> to vector<1x32xf32>
    %32 = vector.broadcast %31 : vector<1x32xf32> to vector<32x32xf32>
    %33 = arith.addf %30, %32 : vector<32x32xf32>
    %34 = vector.extract_strided_slice %1 {offsets = [1, 0], sizes = [1, 32], strides = [1, 1]} : vector<3x32xf32> to vector<1x32xf32>
    %35 = vector.extract_strided_slice %1 {offsets = [2, 0], sizes = [1, 32], strides = [1, 1]} : vector<3x32xf32> to vector<1x32xf32>
    %cst_16 = arith.constant dense<0.000000e+00> : vector<32xf32>
    %36 = vector.multi_reduction <add>, %33, %cst_16 [1] : vector<32x32xf32> to vector<32xf32>
    %37 = vector.shape_cast %36 : vector<32xf32> to vector<32x1xf32>
    %cst_17 = arith.constant 3.200000e+01 : f32
    %38 = vector.broadcast %cst_17 : f32 to vector<32x1xf32>
    %39 = arith.divf %37, %38 : vector<32x1xf32>
    %40 = vector.broadcast %39 : vector<32x1xf32> to vector<32x32xf32>
    %41 = arith.subf %33, %40 : vector<32x32xf32>
    %42 = arith.mulf %41, %41 : vector<32x32xf32>
    %cst_18 = arith.constant dense<0.000000e+00> : vector<32xf32>
    %43 = vector.multi_reduction <add>, %42, %cst_18 [1] : vector<32x32xf32> to vector<32xf32>
    %44 = vector.shape_cast %43 : vector<32xf32> to vector<32x1xf32>
    %cst_19 = arith.constant 3.200000e+01 : f32
    %45 = vector.broadcast %cst_19 : f32 to vector<32x1xf32>
    %46 = arith.divf %44, %45 : vector<32x1xf32>
    %47 = vector.broadcast %39 : vector<32x1xf32> to vector<32x32xf32>
    %48 = arith.subf %33, %47 : vector<32x32xf32>
    %cst_20 = arith.constant 9.99999974E-6 : f32
    %49 = vector.broadcast %cst_20 : f32 to vector<32x1xf32>
    %50 = arith.addf %46, %49 : vector<32x1xf32>
    %51 = math.rsqrt %50 : vector<32x1xf32>
    %52 = vector.broadcast %51 : vector<32x1xf32> to vector<32x32xf32>
    %53 = arith.mulf %48, %52 : vector<32x32xf32>
    %54 = vector.broadcast %34 : vector<1x32xf32> to vector<32x32xf32>
    %55 = arith.mulf %53, %54 : vector<32x32xf32>
    %56 = vector.broadcast %35 : vector<1x32xf32> to vector<32x32xf32>
    %57 = arith.addf %55, %56 : vector<32x32xf32>
    %c0_21 = arith.constant 0 : index
    %c0_22 = arith.constant 0 : index
    %c0_23 = arith.constant 0 : index
    %58 = vector.load %arg2[%c0_21, %c0_22, %c0_23] : memref<2x32x32xf32, #tpu.memory_space<vmem>>, vector<1x32x32xf32>
    %59 = vector.shape_cast %58 : vector<1x32x32xf32> to vector<32x32xf32>
    %c1 = arith.constant 1 : index
    %c0_24 = arith.constant 0 : index
    %c0_25 = arith.constant 0 : index
    %60 = vector.load %arg2[%c1, %c0_24, %c0_25] : memref<2x32x32xf32, #tpu.memory_space<vmem>>, vector<1x32x32xf32>
    %61 = vector.shape_cast %60 : vector<1x32x32xf32> to vector<32x32xf32>
    %c0_26 = arith.constant 0 : index
    %c0_27 = arith.constant 0 : index
    %c0_28 = arith.constant 0 : index
    %62 = vector.load %arg6[%c0_26, %c0_27, %c0_28] : memref<4x4x32xf32, #tpu.memory_space<vmem>>, vector<1x4x32xf32>
    %63 = vector.shape_cast %62 : vector<1x4x32xf32> to vector<4x32xf32>
    %c0_29 = arith.constant 0 : index
    %c0_30 = arith.constant 0 : index
    %c0_31 = arith.constant 0 : index
    %c0_32 = arith.constant 0 : index
    %64 = vector.load %arg7[%c0_29, %c0_30, %c0_31, %c0_32] : memref<4x4x32x8xf32, #tpu.memory_space<vmem>>, vector<1x4x32x8xf32>
    %65 = vector.shape_cast %64 : vector<1x4x32x8xf32> to vector<4x32x8xf32>
    %c0_33 = arith.constant 0 : index
    %c0_34 = arith.constant 0 : index
    %c0_35 = arith.constant 0 : index
    %c0_36 = arith.constant 0 : index
    %66 = vector.load %arg8[%c0_33, %c0_34, %c0_35, %c0_36] : memref<4x4x32x8xf32, #tpu.memory_space<vmem>>, vector<1x4x32x8xf32>
    %67 = vector.shape_cast %66 : vector<1x4x32x8xf32> to vector<4x32x8xf32>
    %c0_37 = arith.constant 0 : index
    %c0_38 = arith.constant 0 : index
    %c0_39 = arith.constant 0 : index
    %c0_40 = arith.constant 0 : index
    %68 = vector.load %arg9[%c0_37, %c0_38, %c0_39, %c0_40] : memref<4x4x32x8xf32, #tpu.memory_space<vmem>>, vector<1x4x32x8xf32>
    %69 = vector.shape_cast %68 : vector<1x4x32x8xf32> to vector<4x32x8xf32>
    %c0_41 = arith.constant 0 : index
    %c0_42 = arith.constant 0 : index
    %c0_43 = arith.constant 0 : index
    %c0_44 = arith.constant 0 : index
    %70 = vector.load %arg10[%c0_41, %c0_42, %c0_43, %c0_44] : memref<4x4x8x32xf32, #tpu.memory_space<vmem>>, vector<1x4x8x32xf32>
    %71 = vector.shape_cast %70 : vector<1x4x8x32xf32> to vector<4x8x32xf32>
    %72 = vector.extract_strided_slice %63 {offsets = [0, 0], sizes = [1, 32], strides = [1, 1]} : vector<4x32xf32> to vector<1x32xf32>
    %73 = vector.extract_strided_slice %63 {offsets = [1, 0], sizes = [1, 32], strides = [1, 1]} : vector<4x32xf32> to vector<1x32xf32>
    %cst_45 = arith.constant dense<0.000000e+00> : vector<32xf32>
    %74 = vector.multi_reduction <add>, %57, %cst_45 [1] : vector<32x32xf32> to vector<32xf32>
    %75 = vector.shape_cast %74 : vector<32xf32> to vector<32x1xf32>
    %cst_46 = arith.constant 3.200000e+01 : f32
    %76 = vector.broadcast %cst_46 : f32 to vector<32x1xf32>
    %77 = arith.divf %75, %76 : vector<32x1xf32>
    %78 = vector.broadcast %77 : vector<32x1xf32> to vector<32x32xf32>
    %79 = arith.subf %57, %78 : vector<32x32xf32>
    %80 = arith.mulf %79, %79 : vector<32x32xf32>
    %cst_47 = arith.constant dense<0.000000e+00> : vector<32xf32>
    %81 = vector.multi_reduction <add>, %80, %cst_47 [1] : vector<32x32xf32> to vector<32xf32>
    %82 = vector.shape_cast %81 : vector<32xf32> to vector<32x1xf32>
    %cst_48 = arith.constant 3.200000e+01 : f32
    %83 = vector.broadcast %cst_48 : f32 to vector<32x1xf32>
    %84 = arith.divf %82, %83 : vector<32x1xf32>
    %85 = vector.broadcast %77 : vector<32x1xf32> to vector<32x32xf32>
    %86 = arith.subf %57, %85 : vector<32x32xf32>
    %cst_49 = arith.constant 9.99999974E-6 : f32
    %87 = vector.broadcast %cst_49 : f32 to vector<32x1xf32>
    %88 = arith.addf %84, %87 : vector<32x1xf32>
    %89 = math.rsqrt %88 : vector<32x1xf32>
    %90 = vector.broadcast %89 : vector<32x1xf32> to vector<32x32xf32>
    %91 = arith.mulf %86, %90 : vector<32x32xf32>
    %92 = vector.broadcast %72 : vector<1x32xf32> to vector<32x32xf32>
    %93 = arith.mulf %91, %92 : vector<32x32xf32>
    %94 = vector.broadcast %73 : vector<1x32xf32> to vector<32x32xf32>
    %95 = arith.addf %93, %94 : vector<32x32xf32>
    %96 = vector.shape_cast %95 : vector<32x32xf32> to vector<1x32x32xf32>
    %97 = vector.shape_cast %96 : vector<1x32x32xf32> to vector<1x32x32xf32>
    %98 = vector.broadcast %97 : vector<1x32x32xf32> to vector<4x32x32xf32>
    "tpu.trace_start"() <{level = 10 : i32, message = "hld,hdk->hlk"}> : () -> ()
    %cst_50 = arith.constant dense<0.000000e+00> : vector<4x32x8xf32>
    %99 = tpu.matmul %98, %65, %cst_50 {dimension_numbers = #tpu.dot_dimension_numbers<[2], [1], [1], [2], [0, 0, 0, 1, 1, 2], [0], [0]>} : vector<4x32x32xf32>, vector<4x32x8xf32>, vector<4x32x8xf32> -> vector<4x32x8xf32>
    %cst_51 = arith.constant dense<0.000000e+00> : vector<4x32x8xf32>
    %100 = tpu.matmul %98, %67, %cst_51 {dimension_numbers = #tpu.dot_dimension_numbers<[2], [1], [1], [2], [0, 0, 0, 1, 1, 2], [0], [0]>} : vector<4x32x32xf32>, vector<4x32x8xf32>, vector<4x32x8xf32> -> vector<4x32x8xf32>
    %cst_52 = arith.constant dense<0.000000e+00> : vector<4x32x8xf32>
    %101 = tpu.matmul %98, %69, %cst_52 {dimension_numbers = #tpu.dot_dimension_numbers<[2], [1], [1], [2], [0, 0, 0, 1, 1, 2], [0], [0]>} : vector<4x32x32xf32>, vector<4x32x8xf32>, vector<4x32x8xf32> -> vector<4x32x8xf32>
    "tpu.trace_stop"() : () -> ()
    "tpu.trace_start"() <{level = 10 : i32, message = "hqd,hkd->hqk"}> : () -> ()
    %cst_53 = arith.constant dense<0.000000e+00> : vector<4x32x32xf32>
    %102 = tpu.matmul %99, %100, %cst_53 {dimension_numbers = #tpu.dot_dimension_numbers<[2], [2], [1], [1], [0, 0, 0, 1, 1, 1], [0], [0]>} : vector<4x32x8xf32>, vector<4x32x8xf32>, vector<4x32x32xf32> -> vector<4x32x32xf32>
    "tpu.trace_stop"() : () -> ()
    %cst_54 = arith.constant 0.353553385 : f32
    %103 = vector.broadcast %cst_54 : f32 to vector<4x32x32xf32>
    %104 = arith.mulf %102, %103 : vector<4x32x32xf32>
    %105 = vector.shape_cast %59 : vector<32x32xf32> to vector<1x32x32xf32>
    %106 = vector.broadcast %105 : vector<1x32x32xf32> to vector<4x32x32xf32>
    %107 = arith.addf %104, %106 : vector<4x32x32xf32>
    %cst_55 = arith.constant dense<0xFF800000> : vector<4x32xf32>
    %108 = vector.multi_reduction <maximumf>, %107, %cst_55 [2] : vector<4x32x32xf32> to vector<4x32xf32>
    %109 = vector.shape_cast %108 : vector<4x32xf32> to vector<4x32x1xf32>
    %110 = vector.broadcast %109 : vector<4x32x1xf32> to vector<4x32x32xf32>
    %111 = arith.subf %107, %110 : vector<4x32x32xf32>
    %112 = math.exp %111 : vector<4x32x32xf32>
    %cst_56 = arith.constant dense<0.000000e+00> : vector<4x32xf32>
    %113 = vector.multi_reduction <add>, %112, %cst_56 [2] : vector<4x32x32xf32> to vector<4x32xf32>
    %114 = vector.shape_cast %113 : vector<4x32xf32> to vector<4x32x1xf32>
    %115 = tpu.reciprocal %114 {approx = true} : vector<4x32x1xf32> -> vector<4x32x1xf32>
    %116 = vector.broadcast %115 : vector<4x32x1xf32> to vector<4x32x32xf32>
    %117 = arith.mulf %112, %116 : vector<4x32x32xf32>
    "tpu.trace_start"() <{level = 10 : i32, message = "hqk,hkd->hqd"}> : () -> ()
    %cst_57 = arith.constant dense<0.000000e+00> : vector<4x32x8xf32>
    %118 = tpu.matmul %117, %101, %cst_57 {dimension_numbers = #tpu.dot_dimension_numbers<[2], [1], [1], [2], [0, 0, 0, 1, 1, 2], [0], [0]>} : vector<4x32x32xf32>, vector<4x32x8xf32>, vector<4x32x8xf32> -> vector<4x32x8xf32>
    "tpu.trace_stop"() : () -> ()
    "tpu.trace_start"() <{level = 10 : i32, message = "hqd,hdn->hqn"}> : () -> ()
    %cst_58 = arith.constant dense<0.000000e+00> : vector<4x32x32xf32>
    %119 = tpu.matmul %118, %71, %cst_58 {dimension_numbers = #tpu.dot_dimension_numbers<[2], [1], [1], [2], [0, 0, 0, 1, 1, 2], [0], [0]>} : vector<4x32x8xf32>, vector<4x8x32xf32>, vector<4x32x32xf32> -> vector<4x32x32xf32>
    "tpu.trace_stop"() : () -> ()
    %cst_59 = arith.constant dense<0.000000e+00> : vector<32x32xf32>
    %120 = vector.multi_reduction <add>, %119, %cst_59 [0] : vector<4x32x32xf32> to vector<32x32xf32>
    %121 = arith.addf %57, %120 : vector<32x32xf32>
    %c0_60 = arith.constant 0 : index
    %c0_61 = arith.constant 0 : index
    %c0_62 = arith.constant 0 : index
    %122 = vector.load %arg6[%c0_60, %c0_61, %c0_62] : memref<4x4x32xf32, #tpu.memory_space<vmem>>, vector<1x4x32xf32>
    %123 = vector.shape_cast %122 : vector<1x4x32xf32> to vector<4x32xf32>
    %c0_63 = arith.constant 0 : index
    %c0_64 = arith.constant 0 : index
    %c0_65 = arith.constant 0 : index
    %124 = vector.load %arg11[%c0_63, %c0_64, %c0_65] : memref<4x32x128xf32, #tpu.memory_space<vmem>>, vector<1x32x128xf32>
    %125 = vector.shape_cast %124 : vector<1x32x128xf32> to vector<32x128xf32>
    %c0_66 = arith.constant 0 : index
    %c0_67 = arith.constant 0 : index
    %c0_68 = arith.constant 0 : index
    %126 = vector.load %arg12[%c0_66, %c0_67, %c0_68] : memref<4x1x128xf32, #tpu.memory_space<vmem>>, vector<1x1x128xf32>
    %127 = vector.shape_cast %126 : vector<1x1x128xf32> to vector<1x128xf32>
    %c0_69 = arith.constant 0 : index
    %c0_70 = arith.constant 0 : index
    %c0_71 = arith.constant 0 : index
    %128 = vector.load %arg13[%c0_69, %c0_70, %c0_71] : memref<4x128x32xf32, #tpu.memory_space<vmem>>, vector<1x128x32xf32>
    %129 = vector.shape_cast %128 : vector<1x128x32xf32> to vector<128x32xf32>
    %c0_72 = arith.constant 0 : index
    %c0_73 = arith.constant 0 : index
    %c0_74 = arith.constant 0 : index
    %130 = vector.load %arg14[%c0_72, %c0_73, %c0_74] : memref<4x1x32xf32, #tpu.memory_space<vmem>>, vector<1x1x32xf32>
    %131 = vector.shape_cast %130 : vector<1x1x32xf32> to vector<1x32xf32>
    %132 = vector.extract_strided_slice %123 {offsets = [2, 0], sizes = [1, 32], strides = [1, 1]} : vector<4x32xf32> to vector<1x32xf32>
    %133 = vector.extract_strided_slice %123 {offsets = [3, 0], sizes = [1, 32], strides = [1, 1]} : vector<4x32xf32> to vector<1x32xf32>
    %cst_75 = arith.constant dense<0.000000e+00> : vector<32xf32>
    %134 = vector.multi_reduction <add>, %121, %cst_75 [1] : vector<32x32xf32> to vector<32xf32>
    %135 = vector.shape_cast %134 : vector<32xf32> to vector<32x1xf32>
    %cst_76 = arith.constant 3.200000e+01 : f32
    %136 = vector.broadcast %cst_76 : f32 to vector<32x1xf32>
    %137 = arith.divf %135, %136 : vector<32x1xf32>
    %138 = vector.broadcast %137 : vector<32x1xf32> to vector<32x32xf32>
    %139 = arith.subf %121, %138 : vector<32x32xf32>
    %140 = arith.mulf %139, %139 : vector<32x32xf32>
    %cst_77 = arith.constant dense<0.000000e+00> : vector<32xf32>
    %141 = vector.multi_reduction <add>, %140, %cst_77 [1] : vector<32x32xf32> to vector<32xf32>
    %142 = vector.shape_cast %141 : vector<32xf32> to vector<32x1xf32>
    %cst_78 = arith.constant 3.200000e+01 : f32
    %143 = vector.broadcast %cst_78 : f32 to vector<32x1xf32>
    %144 = arith.divf %142, %143 : vector<32x1xf32>
    %145 = vector.broadcast %137 : vector<32x1xf32> to vector<32x32xf32>
    %146 = arith.subf %121, %145 : vector<32x32xf32>
    %cst_79 = arith.constant 9.99999974E-6 : f32
    %147 = vector.broadcast %cst_79 : f32 to vector<32x1xf32>
    %148 = arith.addf %144, %147 : vector<32x1xf32>
    %149 = math.rsqrt %148 : vector<32x1xf32>
    %150 = vector.broadcast %149 : vector<32x1xf32> to vector<32x32xf32>
    %151 = arith.mulf %146, %150 : vector<32x32xf32>
    %152 = vector.broadcast %132 : vector<1x32xf32> to vector<32x32xf32>
    %153 = arith.mulf %151, %152 : vector<32x32xf32>
    %154 = vector.broadcast %133 : vector<1x32xf32> to vector<32x32xf32>
    %155 = arith.addf %153, %154 : vector<32x32xf32>
    %cst_80 = arith.constant dense<0.000000e+00> : vector<32x128xf32>
    %156 = tpu.matmul %155, %125, %cst_80 {dimension_numbers = #tpu.dot_dimension_numbers<[1], [0], [0], [1], [0, 0, 1, 1], [], []>} : vector<32x32xf32>, vector<32x128xf32>, vector<32x128xf32> -> vector<32x128xf32>
    %157 = vector.broadcast %127 : vector<1x128xf32> to vector<32x128xf32>
    %158 = arith.addf %156, %157 : vector<32x128xf32>
    %159 = arith.mulf %158, %158 : vector<32x128xf32>
    %160 = arith.mulf %158, %159 : vector<32x128xf32>
    %cst_81 = arith.constant 4.471500e-02 : f32
    %161 = vector.broadcast %cst_81 : f32 to vector<32x128xf32>
    %162 = arith.mulf %161, %160 : vector<32x128xf32>
    %163 = arith.addf %158, %162 : vector<32x128xf32>
    %cst_82 = arith.constant 0.797884583 : f32
    %164 = vector.broadcast %cst_82 : f32 to vector<32x128xf32>
    %165 = arith.mulf %164, %163 : vector<32x128xf32>
    %166 = math.tanh %165 : vector<32x128xf32>
    %cst_83 = arith.constant 1.000000e+00 : f32
    %167 = vector.broadcast %cst_83 : f32 to vector<32x128xf32>
    %168 = arith.addf %167, %166 : vector<32x128xf32>
    %cst_84 = arith.constant 5.000000e-01 : f32
    %169 = vector.broadcast %cst_84 : f32 to vector<32x128xf32>
    %170 = arith.mulf %169, %168 : vector<32x128xf32>
    %171 = arith.mulf %158, %170 : vector<32x128xf32>
    %cst_85 = arith.constant dense<0.000000e+00> : vector<32x32xf32>
    %172 = tpu.matmul %171, %129, %cst_85 {dimension_numbers = #tpu.dot_dimension_numbers<[1], [0], [0], [1], [0, 0, 1, 1], [], []>} : vector<32x128xf32>, vector<128x32xf32>, vector<32x32xf32> -> vector<32x32xf32>
    %173 = arith.addf %121, %172 : vector<32x32xf32>
    %174 = vector.broadcast %131 : vector<1x32xf32> to vector<32x32xf32>
    %175 = arith.addf %173, %174 : vector<32x32xf32>
    %c1_86 = arith.constant 1 : index
    %c0_87 = arith.constant 0 : index
    %c0_88 = arith.constant 0 : index
    %176 = vector.load %arg6[%c1_86, %c0_87, %c0_88] : memref<4x4x32xf32, #tpu.memory_space<vmem>>, vector<1x4x32xf32>
    %177 = vector.shape_cast %176 : vector<1x4x32xf32> to vector<4x32xf32>
    %c1_89 = arith.constant 1 : index
    %c0_90 = arith.constant 0 : index
    %c0_91 = arith.constant 0 : index
    %c0_92 = arith.constant 0 : index
    %178 = vector.load %arg7[%c1_89, %c0_90, %c0_91, %c0_92] : memref<4x4x32x8xf32, #tpu.memory_space<vmem>>, vector<1x4x32x8xf32>
    %179 = vector.shape_cast %178 : vector<1x4x32x8xf32> to vector<4x32x8xf32>
    %c1_93 = arith.constant 1 : index
    %c0_94 = arith.constant 0 : index
    %c0_95 = arith.constant 0 : index
    %c0_96 = arith.constant 0 : index
    %180 = vector.load %arg8[%c1_93, %c0_94, %c0_95, %c0_96] : memref<4x4x32x8xf32, #tpu.memory_space<vmem>>, vector<1x4x32x8xf32>
    %181 = vector.shape_cast %180 : vector<1x4x32x8xf32> to vector<4x32x8xf32>
    %c1_97 = arith.constant 1 : index
    %c0_98 = arith.constant 0 : index
    %c0_99 = arith.constant 0 : index
    %c0_100 = arith.constant 0 : index
    %182 = vector.load %arg9[%c1_97, %c0_98, %c0_99, %c0_100] : memref<4x4x32x8xf32, #tpu.memory_space<vmem>>, vector<1x4x32x8xf32>
    %183 = vector.shape_cast %182 : vector<1x4x32x8xf32> to vector<4x32x8xf32>
    %c1_101 = arith.constant 1 : index
    %c0_102 = arith.constant 0 : index
    %c0_103 = arith.constant 0 : index
    %c0_104 = arith.constant 0 : index
    %184 = vector.load %arg10[%c1_101, %c0_102, %c0_103, %c0_104] : memref<4x4x8x32xf32, #tpu.memory_space<vmem>>, vector<1x4x8x32xf32>
    %185 = vector.shape_cast %184 : vector<1x4x8x32xf32> to vector<4x8x32xf32>
    %186 = vector.extract_strided_slice %177 {offsets = [0, 0], sizes = [1, 32], strides = [1, 1]} : vector<4x32xf32> to vector<1x32xf32>
    %187 = vector.extract_strided_slice %177 {offsets = [1, 0], sizes = [1, 32], strides = [1, 1]} : vector<4x32xf32> to vector<1x32xf32>
    %cst_105 = arith.constant dense<0.000000e+00> : vector<32xf32>
    %188 = vector.multi_reduction <add>, %175, %cst_105 [1] : vector<32x32xf32> to vector<32xf32>
    %189 = vector.shape_cast %188 : vector<32xf32> to vector<32x1xf32>
    %cst_106 = arith.constant 3.200000e+01 : f32
    %190 = vector.broadcast %cst_106 : f32 to vector<32x1xf32>
    %191 = arith.divf %189, %190 : vector<32x1xf32>
    %192 = vector.broadcast %191 : vector<32x1xf32> to vector<32x32xf32>
    %193 = arith.subf %175, %192 : vector<32x32xf32>
    %194 = arith.mulf %193, %193 : vector<32x32xf32>
    %cst_107 = arith.constant dense<0.000000e+00> : vector<32xf32>
    %195 = vector.multi_reduction <add>, %194, %cst_107 [1] : vector<32x32xf32> to vector<32xf32>
    %196 = vector.shape_cast %195 : vector<32xf32> to vector<32x1xf32>
    %cst_108 = arith.constant 3.200000e+01 : f32
    %197 = vector.broadcast %cst_108 : f32 to vector<32x1xf32>
    %198 = arith.divf %196, %197 : vector<32x1xf32>
    %199 = vector.broadcast %191 : vector<32x1xf32> to vector<32x32xf32>
    %200 = arith.subf %175, %199 : vector<32x32xf32>
    %cst_109 = arith.constant 9.99999974E-6 : f32
    %201 = vector.broadcast %cst_109 : f32 to vector<32x1xf32>
    %202 = arith.addf %198, %201 : vector<32x1xf32>
    %203 = math.rsqrt %202 : vector<32x1xf32>
    %204 = vector.broadcast %203 : vector<32x1xf32> to vector<32x32xf32>
    %205 = arith.mulf %200, %204 : vector<32x32xf32>
    %206 = vector.broadcast %186 : vector<1x32xf32> to vector<32x32xf32>
    %207 = arith.mulf %205, %206 : vector<32x32xf32>
    %208 = vector.broadcast %187 : vector<1x32xf32> to vector<32x32xf32>
    %209 = arith.addf %207, %208 : vector<32x32xf32>
    %210 = vector.shape_cast %209 : vector<32x32xf32> to vector<1x32x32xf32>
    %211 = vector.shape_cast %210 : vector<1x32x32xf32> to vector<1x32x32xf32>
    %212 = vector.broadcast %211 : vector<1x32x32xf32> to vector<4x32x32xf32>
    "tpu.trace_start"() <{level = 10 : i32, message = "hld,hdk->hlk"}> : () -> ()
    %cst_110 = arith.constant dense<0.000000e+00> : vector<4x32x8xf32>
    %213 = tpu.matmul %212, %179, %cst_110 {dimension_numbers = #tpu.dot_dimension_numbers<[2], [1], [1], [2], [0, 0, 0, 1, 1, 2], [0], [0]>} : vector<4x32x32xf32>, vector<4x32x8xf32>, vector<4x32x8xf32> -> vector<4x32x8xf32>
    %cst_111 = arith.constant dense<0.000000e+00> : vector<4x32x8xf32>
    %214 = tpu.matmul %212, %181, %cst_111 {dimension_numbers = #tpu.dot_dimension_numbers<[2], [1], [1], [2], [0, 0, 0, 1, 1, 2], [0], [0]>} : vector<4x32x32xf32>, vector<4x32x8xf32>, vector<4x32x8xf32> -> vector<4x32x8xf32>
    %cst_112 = arith.constant dense<0.000000e+00> : vector<4x32x8xf32>
    %215 = tpu.matmul %212, %183, %cst_112 {dimension_numbers = #tpu.dot_dimension_numbers<[2], [1], [1], [2], [0, 0, 0, 1, 1, 2], [0], [0]>} : vector<4x32x32xf32>, vector<4x32x8xf32>, vector<4x32x8xf32> -> vector<4x32x8xf32>
    "tpu.trace_stop"() : () -> ()
    "tpu.trace_start"() <{level = 10 : i32, message = "hqd,hkd->hqk"}> : () -> ()
    %cst_113 = arith.constant dense<0.000000e+00> : vector<4x32x32xf32>
    %216 = tpu.matmul %213, %214, %cst_113 {dimension_numbers = #tpu.dot_dimension_numbers<[2], [2], [1], [1], [0, 0, 0, 1, 1, 1], [0], [0]>} : vector<4x32x8xf32>, vector<4x32x8xf32>, vector<4x32x32xf32> -> vector<4x32x32xf32>
    "tpu.trace_stop"() : () -> ()
    %cst_114 = arith.constant 0.353553385 : f32
    %217 = vector.broadcast %cst_114 : f32 to vector<4x32x32xf32>
    %218 = arith.mulf %216, %217 : vector<4x32x32xf32>
    %219 = vector.shape_cast %59 : vector<32x32xf32> to vector<1x32x32xf32>
    %220 = vector.broadcast %219 : vector<1x32x32xf32> to vector<4x32x32xf32>
    %221 = arith.addf %218, %220 : vector<4x32x32xf32>
    %cst_115 = arith.constant dense<0xFF800000> : vector<4x32xf32>
    %222 = vector.multi_reduction <maximumf>, %221, %cst_115 [2] : vector<4x32x32xf32> to vector<4x32xf32>
    %223 = vector.shape_cast %222 : vector<4x32xf32> to vector<4x32x1xf32>
    %224 = vector.broadcast %223 : vector<4x32x1xf32> to vector<4x32x32xf32>
    %225 = arith.subf %221, %224 : vector<4x32x32xf32>
    %226 = math.exp %225 : vector<4x32x32xf32>
    %cst_116 = arith.constant dense<0.000000e+00> : vector<4x32xf32>
    %227 = vector.multi_reduction <add>, %226, %cst_116 [2] : vector<4x32x32xf32> to vector<4x32xf32>
    %228 = vector.shape_cast %227 : vector<4x32xf32> to vector<4x32x1xf32>
    %229 = tpu.reciprocal %228 {approx = true} : vector<4x32x1xf32> -> vector<4x32x1xf32>
    %230 = vector.broadcast %229 : vector<4x32x1xf32> to vector<4x32x32xf32>
    %231 = arith.mulf %226, %230 : vector<4x32x32xf32>
    "tpu.trace_start"() <{level = 10 : i32, message = "hqk,hkd->hqd"}> : () -> ()
    %cst_117 = arith.constant dense<0.000000e+00> : vector<4x32x8xf32>
    %232 = tpu.matmul %231, %215, %cst_117 {dimension_numbers = #tpu.dot_dimension_numbers<[2], [1], [1], [2], [0, 0, 0, 1, 1, 2], [0], [0]>} : vector<4x32x32xf32>, vector<4x32x8xf32>, vector<4x32x8xf32> -> vector<4x32x8xf32>
    "tpu.trace_stop"() : () -> ()
    "tpu.trace_start"() <{level = 10 : i32, message = "hqd,hdn->hqn"}> : () -> ()
    %cst_118 = arith.constant dense<0.000000e+00> : vector<4x32x32xf32>
    %233 = tpu.matmul %232, %185, %cst_118 {dimension_numbers = #tpu.dot_dimension_numbers<[2], [1], [1], [2], [0, 0, 0, 1, 1, 2], [0], [0]>} : vector<4x32x8xf32>, vector<4x8x32xf32>, vector<4x32x32xf32> -> vector<4x32x32xf32>
    "tpu.trace_stop"() : () -> ()
    %cst_119 = arith.constant dense<0.000000e+00> : vector<32x32xf32>
    %234 = vector.multi_reduction <add>, %233, %cst_119 [0] : vector<4x32x32xf32> to vector<32x32xf32>
    %235 = arith.addf %175, %234 : vector<32x32xf32>
    %c1_120 = arith.constant 1 : index
    %c0_121 = arith.constant 0 : index
    %c0_122 = arith.constant 0 : index
    %236 = vector.load %arg6[%c1_120, %c0_121, %c0_122] : memref<4x4x32xf32, #tpu.memory_space<vmem>>, vector<1x4x32xf32>
    %237 = vector.shape_cast %236 : vector<1x4x32xf32> to vector<4x32xf32>
    %c1_123 = arith.constant 1 : index
    %c0_124 = arith.constant 0 : index
    %c0_125 = arith.constant 0 : index
    %238 = vector.load %arg11[%c1_123, %c0_124, %c0_125] : memref<4x32x128xf32, #tpu.memory_space<vmem>>, vector<1x32x128xf32>
    %239 = vector.shape_cast %238 : vector<1x32x128xf32> to vector<32x128xf32>
    %c1_126 = arith.constant 1 : index
    %c0_127 = arith.constant 0 : index
    %c0_128 = arith.constant 0 : index
    %240 = vector.load %arg12[%c1_126, %c0_127, %c0_128] : memref<4x1x128xf32, #tpu.memory_space<vmem>>, vector<1x1x128xf32>
    %241 = vector.shape_cast %240 : vector<1x1x128xf32> to vector<1x128xf32>
    %c1_129 = arith.constant 1 : index
    %c0_130 = arith.constant 0 : index
    %c0_131 = arith.constant 0 : index
    %242 = vector.load %arg13[%c1_129, %c0_130, %c0_131] : memref<4x128x32xf32, #tpu.memory_space<vmem>>, vector<1x128x32xf32>
    %243 = vector.shape_cast %242 : vector<1x128x32xf32> to vector<128x32xf32>
    %c1_132 = arith.constant 1 : index
    %c0_133 = arith.constant 0 : index
    %c0_134 = arith.constant 0 : index
    %244 = vector.load %arg14[%c1_132, %c0_133, %c0_134] : memref<4x1x32xf32, #tpu.memory_space<vmem>>, vector<1x1x32xf32>
    %245 = vector.shape_cast %244 : vector<1x1x32xf32> to vector<1x32xf32>
    %246 = vector.extract_strided_slice %237 {offsets = [2, 0], sizes = [1, 32], strides = [1, 1]} : vector<4x32xf32> to vector<1x32xf32>
    %247 = vector.extract_strided_slice %237 {offsets = [3, 0], sizes = [1, 32], strides = [1, 1]} : vector<4x32xf32> to vector<1x32xf32>
    %cst_135 = arith.constant dense<0.000000e+00> : vector<32xf32>
    %248 = vector.multi_reduction <add>, %235, %cst_135 [1] : vector<32x32xf32> to vector<32xf32>
    %249 = vector.shape_cast %248 : vector<32xf32> to vector<32x1xf32>
    %cst_136 = arith.constant 3.200000e+01 : f32
    %250 = vector.broadcast %cst_136 : f32 to vector<32x1xf32>
    %251 = arith.divf %249, %250 : vector<32x1xf32>
    %252 = vector.broadcast %251 : vector<32x1xf32> to vector<32x32xf32>
    %253 = arith.subf %235, %252 : vector<32x32xf32>
    %254 = arith.mulf %253, %253 : vector<32x32xf32>
    %cst_137 = arith.constant dense<0.000000e+00> : vector<32xf32>
    %255 = vector.multi_reduction <add>, %254, %cst_137 [1] : vector<32x32xf32> to vector<32xf32>
    %256 = vector.shape_cast %255 : vector<32xf32> to vector<32x1xf32>
    %cst_138 = arith.constant 3.200000e+01 : f32
    %257 = vector.broadcast %cst_138 : f32 to vector<32x1xf32>
    %258 = arith.divf %256, %257 : vector<32x1xf32>
    %259 = vector.broadcast %251 : vector<32x1xf32> to vector<32x32xf32>
    %260 = arith.subf %235, %259 : vector<32x32xf32>
    %cst_139 = arith.constant 9.99999974E-6 : f32
    %261 = vector.broadcast %cst_139 : f32 to vector<32x1xf32>
    %262 = arith.addf %258, %261 : vector<32x1xf32>
    %263 = math.rsqrt %262 : vector<32x1xf32>
    %264 = vector.broadcast %263 : vector<32x1xf32> to vector<32x32xf32>
    %265 = arith.mulf %260, %264 : vector<32x32xf32>
    %266 = vector.broadcast %246 : vector<1x32xf32> to vector<32x32xf32>
    %267 = arith.mulf %265, %266 : vector<32x32xf32>
    %268 = vector.broadcast %247 : vector<1x32xf32> to vector<32x32xf32>
    %269 = arith.addf %267, %268 : vector<32x32xf32>
    %cst_140 = arith.constant dense<0.000000e+00> : vector<32x128xf32>
    %270 = tpu.matmul %269, %239, %cst_140 {dimension_numbers = #tpu.dot_dimension_numbers<[1], [0], [0], [1], [0, 0, 1, 1], [], []>} : vector<32x32xf32>, vector<32x128xf32>, vector<32x128xf32> -> vector<32x128xf32>
    %271 = vector.broadcast %241 : vector<1x128xf32> to vector<32x128xf32>
    %272 = arith.addf %270, %271 : vector<32x128xf32>
    %273 = arith.mulf %272, %272 : vector<32x128xf32>
    %274 = arith.mulf %272, %273 : vector<32x128xf32>
    %cst_141 = arith.constant 4.471500e-02 : f32
    %275 = vector.broadcast %cst_141 : f32 to vector<32x128xf32>
    %276 = arith.mulf %275, %274 : vector<32x128xf32>
    %277 = arith.addf %272, %276 : vector<32x128xf32>
    %cst_142 = arith.constant 0.797884583 : f32
    %278 = vector.broadcast %cst_142 : f32 to vector<32x128xf32>
    %279 = arith.mulf %278, %277 : vector<32x128xf32>
    %280 = math.tanh %279 : vector<32x128xf32>
    %cst_143 = arith.constant 1.000000e+00 : f32
    %281 = vector.broadcast %cst_143 : f32 to vector<32x128xf32>
    %282 = arith.addf %281, %280 : vector<32x128xf32>
    %cst_144 = arith.constant 5.000000e-01 : f32
    %283 = vector.broadcast %cst_144 : f32 to vector<32x128xf32>
    %284 = arith.mulf %283, %282 : vector<32x128xf32>
    %285 = arith.mulf %272, %284 : vector<32x128xf32>
    %cst_145 = arith.constant dense<0.000000e+00> : vector<32x32xf32>
    %286 = tpu.matmul %285, %243, %cst_145 {dimension_numbers = #tpu.dot_dimension_numbers<[1], [0], [0], [1], [0, 0, 1, 1], [], []>} : vector<32x128xf32>, vector<128x32xf32>, vector<32x32xf32> -> vector<32x32xf32>
    %287 = arith.addf %235, %286 : vector<32x32xf32>
    %288 = vector.broadcast %245 : vector<1x32xf32> to vector<32x32xf32>
    %289 = arith.addf %287, %288 : vector<32x32xf32>
    %290 = vector.extract_strided_slice %2 {offsets = [0, 0, 0], sizes = [1, 1, 32], strides = [1, 1, 1]} : vector<2x2x32xf32> to vector<1x1x32xf32>
    %291 = vector.shape_cast %290 : vector<1x1x32xf32> to vector<1x32xf32>
    %292 = vector.extract_strided_slice %2 {offsets = [0, 1, 0], sizes = [1, 1, 32], strides = [1, 1, 1]} : vector<2x2x32xf32> to vector<1x1x32xf32>
    %293 = vector.shape_cast %292 : vector<1x1x32xf32> to vector<1x32xf32>
    %cst_146 = arith.constant dense<0.000000e+00> : vector<32xf32>
    %294 = vector.multi_reduction <add>, %289, %cst_146 [1] : vector<32x32xf32> to vector<32xf32>
    %295 = vector.shape_cast %294 : vector<32xf32> to vector<32x1xf32>
    %cst_147 = arith.constant 3.200000e+01 : f32
    %296 = vector.broadcast %cst_147 : f32 to vector<32x1xf32>
    %297 = arith.divf %295, %296 : vector<32x1xf32>
    %298 = vector.broadcast %297 : vector<32x1xf32> to vector<32x32xf32>
    %299 = arith.subf %289, %298 : vector<32x32xf32>
    %300 = arith.mulf %299, %299 : vector<32x32xf32>
    %cst_148 = arith.constant dense<0.000000e+00> : vector<32xf32>
    %301 = vector.multi_reduction <add>, %300, %cst_148 [1] : vector<32x32xf32> to vector<32xf32>
    %302 = vector.shape_cast %301 : vector<32xf32> to vector<32x1xf32>
    %cst_149 = arith.constant 3.200000e+01 : f32
    %303 = vector.broadcast %cst_149 : f32 to vector<32x1xf32>
    %304 = arith.divf %302, %303 : vector<32x1xf32>
    %305 = vector.broadcast %297 : vector<32x1xf32> to vector<32x32xf32>
    %306 = arith.subf %289, %305 : vector<32x32xf32>
    %cst_150 = arith.constant 9.99999974E-6 : f32
    %307 = vector.broadcast %cst_150 : f32 to vector<32x1xf32>
    %308 = arith.addf %304, %307 : vector<32x1xf32>
    %309 = math.rsqrt %308 : vector<32x1xf32>
    %310 = vector.broadcast %309 : vector<32x1xf32> to vector<32x32xf32>
    %311 = arith.mulf %306, %310 : vector<32x32xf32>
    %312 = vector.broadcast %291 : vector<1x32xf32> to vector<32x32xf32>
    %313 = arith.mulf %311, %312 : vector<32x32xf32>
    %314 = vector.broadcast %293 : vector<1x32xf32> to vector<32x32xf32>
    %315 = arith.addf %313, %314 : vector<32x32xf32>
    %c2 = arith.constant 2 : index
    %c0_151 = arith.constant 0 : index
    %c0_152 = arith.constant 0 : index
    %316 = vector.load %arg6[%c2, %c0_151, %c0_152] : memref<4x4x32xf32, #tpu.memory_space<vmem>>, vector<1x4x32xf32>
    %317 = vector.shape_cast %316 : vector<1x4x32xf32> to vector<4x32xf32>
    %c2_153 = arith.constant 2 : index
    %c0_154 = arith.constant 0 : index
    %c0_155 = arith.constant 0 : index
    %c0_156 = arith.constant 0 : index
    %318 = vector.load %arg7[%c2_153, %c0_154, %c0_155, %c0_156] : memref<4x4x32x8xf32, #tpu.memory_space<vmem>>, vector<1x4x32x8xf32>
    %319 = vector.shape_cast %318 : vector<1x4x32x8xf32> to vector<4x32x8xf32>
    %c2_157 = arith.constant 2 : index
    %c0_158 = arith.constant 0 : index
    %c0_159 = arith.constant 0 : index
    %c0_160 = arith.constant 0 : index
    %320 = vector.load %arg8[%c2_157, %c0_158, %c0_159, %c0_160] : memref<4x4x32x8xf32, #tpu.memory_space<vmem>>, vector<1x4x32x8xf32>
    %321 = vector.shape_cast %320 : vector<1x4x32x8xf32> to vector<4x32x8xf32>
    %c2_161 = arith.constant 2 : index
    %c0_162 = arith.constant 0 : index
    %c0_163 = arith.constant 0 : index
    %c0_164 = arith.constant 0 : index
    %322 = vector.load %arg9[%c2_161, %c0_162, %c0_163, %c0_164] : memref<4x4x32x8xf32, #tpu.memory_space<vmem>>, vector<1x4x32x8xf32>
    %323 = vector.shape_cast %322 : vector<1x4x32x8xf32> to vector<4x32x8xf32>
    %c2_165 = arith.constant 2 : index
    %c0_166 = arith.constant 0 : index
    %c0_167 = arith.constant 0 : index
    %c0_168 = arith.constant 0 : index
    %324 = vector.load %arg10[%c2_165, %c0_166, %c0_167, %c0_168] : memref<4x4x8x32xf32, #tpu.memory_space<vmem>>, vector<1x4x8x32xf32>
    %325 = vector.shape_cast %324 : vector<1x4x8x32xf32> to vector<4x8x32xf32>
    %326 = vector.extract_strided_slice %317 {offsets = [0, 0], sizes = [1, 32], strides = [1, 1]} : vector<4x32xf32> to vector<1x32xf32>
    %327 = vector.extract_strided_slice %317 {offsets = [1, 0], sizes = [1, 32], strides = [1, 1]} : vector<4x32xf32> to vector<1x32xf32>
    %cst_169 = arith.constant dense<0.000000e+00> : vector<32xf32>
    %328 = vector.multi_reduction <add>, %315, %cst_169 [1] : vector<32x32xf32> to vector<32xf32>
    %329 = vector.shape_cast %328 : vector<32xf32> to vector<32x1xf32>
    %cst_170 = arith.constant 3.200000e+01 : f32
    %330 = vector.broadcast %cst_170 : f32 to vector<32x1xf32>
    %331 = arith.divf %329, %330 : vector<32x1xf32>
    %332 = vector.broadcast %331 : vector<32x1xf32> to vector<32x32xf32>
    %333 = arith.subf %315, %332 : vector<32x32xf32>
    %334 = arith.mulf %333, %333 : vector<32x32xf32>
    %cst_171 = arith.constant dense<0.000000e+00> : vector<32xf32>
    %335 = vector.multi_reduction <add>, %334, %cst_171 [1] : vector<32x32xf32> to vector<32xf32>
    %336 = vector.shape_cast %335 : vector<32xf32> to vector<32x1xf32>
    %cst_172 = arith.constant 3.200000e+01 : f32
    %337 = vector.broadcast %cst_172 : f32 to vector<32x1xf32>
    %338 = arith.divf %336, %337 : vector<32x1xf32>
    %339 = vector.broadcast %331 : vector<32x1xf32> to vector<32x32xf32>
    %340 = arith.subf %315, %339 : vector<32x32xf32>
    %cst_173 = arith.constant 9.99999974E-6 : f32
    %341 = vector.broadcast %cst_173 : f32 to vector<32x1xf32>
    %342 = arith.addf %338, %341 : vector<32x1xf32>
    %343 = math.rsqrt %342 : vector<32x1xf32>
    %344 = vector.broadcast %343 : vector<32x1xf32> to vector<32x32xf32>
    %345 = arith.mulf %340, %344 : vector<32x32xf32>
    %346 = vector.broadcast %326 : vector<1x32xf32> to vector<32x32xf32>
    %347 = arith.mulf %345, %346 : vector<32x32xf32>
    %348 = vector.broadcast %327 : vector<1x32xf32> to vector<32x32xf32>
    %349 = arith.addf %347, %348 : vector<32x32xf32>
    %350 = vector.shape_cast %349 : vector<32x32xf32> to vector<1x32x32xf32>
    %351 = vector.shape_cast %350 : vector<1x32x32xf32> to vector<1x32x32xf32>
    %352 = vector.broadcast %351 : vector<1x32x32xf32> to vector<4x32x32xf32>
    "tpu.trace_start"() <{level = 10 : i32, message = "hld,hdk->hlk"}> : () -> ()
    %cst_174 = arith.constant dense<0.000000e+00> : vector<4x32x8xf32>
    %353 = tpu.matmul %352, %319, %cst_174 {dimension_numbers = #tpu.dot_dimension_numbers<[2], [1], [1], [2], [0, 0, 0, 1, 1, 2], [0], [0]>} : vector<4x32x32xf32>, vector<4x32x8xf32>, vector<4x32x8xf32> -> vector<4x32x8xf32>
    %cst_175 = arith.constant dense<0.000000e+00> : vector<4x32x8xf32>
    %354 = tpu.matmul %352, %321, %cst_175 {dimension_numbers = #tpu.dot_dimension_numbers<[2], [1], [1], [2], [0, 0, 0, 1, 1, 2], [0], [0]>} : vector<4x32x32xf32>, vector<4x32x8xf32>, vector<4x32x8xf32> -> vector<4x32x8xf32>
    %cst_176 = arith.constant dense<0.000000e+00> : vector<4x32x8xf32>
    %355 = tpu.matmul %352, %323, %cst_176 {dimension_numbers = #tpu.dot_dimension_numbers<[2], [1], [1], [2], [0, 0, 0, 1, 1, 2], [0], [0]>} : vector<4x32x32xf32>, vector<4x32x8xf32>, vector<4x32x8xf32> -> vector<4x32x8xf32>
    "tpu.trace_stop"() : () -> ()
    "tpu.trace_start"() <{level = 10 : i32, message = "hqd,hkd->hqk"}> : () -> ()
    %cst_177 = arith.constant dense<0.000000e+00> : vector<4x32x32xf32>
    %356 = tpu.matmul %353, %354, %cst_177 {dimension_numbers = #tpu.dot_dimension_numbers<[2], [2], [1], [1], [0, 0, 0, 1, 1, 1], [0], [0]>} : vector<4x32x8xf32>, vector<4x32x8xf32>, vector<4x32x32xf32> -> vector<4x32x32xf32>
    "tpu.trace_stop"() : () -> ()
    %cst_178 = arith.constant 0.353553385 : f32
    %357 = vector.broadcast %cst_178 : f32 to vector<4x32x32xf32>
    %358 = arith.mulf %356, %357 : vector<4x32x32xf32>
    %359 = vector.shape_cast %61 : vector<32x32xf32> to vector<1x32x32xf32>
    %360 = vector.broadcast %359 : vector<1x32x32xf32> to vector<4x32x32xf32>
    %361 = arith.addf %358, %360 : vector<4x32x32xf32>
    %cst_179 = arith.constant dense<0xFF800000> : vector<4x32xf32>
    %362 = vector.multi_reduction <maximumf>, %361, %cst_179 [2] : vector<4x32x32xf32> to vector<4x32xf32>
    %363 = vector.shape_cast %362 : vector<4x32xf32> to vector<4x32x1xf32>
    %364 = vector.broadcast %363 : vector<4x32x1xf32> to vector<4x32x32xf32>
    %365 = arith.subf %361, %364 : vector<4x32x32xf32>
    %366 = math.exp %365 : vector<4x32x32xf32>
    %cst_180 = arith.constant dense<0.000000e+00> : vector<4x32xf32>
    %367 = vector.multi_reduction <add>, %366, %cst_180 [2] : vector<4x32x32xf32> to vector<4x32xf32>
    %368 = vector.shape_cast %367 : vector<4x32xf32> to vector<4x32x1xf32>
    %369 = tpu.reciprocal %368 {approx = true} : vector<4x32x1xf32> -> vector<4x32x1xf32>
    %370 = vector.broadcast %369 : vector<4x32x1xf32> to vector<4x32x32xf32>
    %371 = arith.mulf %366, %370 : vector<4x32x32xf32>
    "tpu.trace_start"() <{level = 10 : i32, message = "hqk,hkd->hqd"}> : () -> ()
    %cst_181 = arith.constant dense<0.000000e+00> : vector<4x32x8xf32>
    %372 = tpu.matmul %371, %355, %cst_181 {dimension_numbers = #tpu.dot_dimension_numbers<[2], [1], [1], [2], [0, 0, 0, 1, 1, 2], [0], [0]>} : vector<4x32x32xf32>, vector<4x32x8xf32>, vector<4x32x8xf32> -> vector<4x32x8xf32>
    "tpu.trace_stop"() : () -> ()
    "tpu.trace_start"() <{level = 10 : i32, message = "hqd,hdn->hqn"}> : () -> ()
    %cst_182 = arith.constant dense<0.000000e+00> : vector<4x32x32xf32>
    %373 = tpu.matmul %372, %325, %cst_182 {dimension_numbers = #tpu.dot_dimension_numbers<[2], [1], [1], [2], [0, 0, 0, 1, 1, 2], [0], [0]>} : vector<4x32x8xf32>, vector<4x8x32xf32>, vector<4x32x32xf32> -> vector<4x32x32xf32>
    "tpu.trace_stop"() : () -> ()
    %cst_183 = arith.constant dense<0.000000e+00> : vector<32x32xf32>
    %374 = vector.multi_reduction <add>, %373, %cst_183 [0] : vector<4x32x32xf32> to vector<32x32xf32>
    %375 = arith.addf %315, %374 : vector<32x32xf32>
    %c2_184 = arith.constant 2 : index
    %c0_185 = arith.constant 0 : index
    %c0_186 = arith.constant 0 : index
    %376 = vector.load %arg6[%c2_184, %c0_185, %c0_186] : memref<4x4x32xf32, #tpu.memory_space<vmem>>, vector<1x4x32xf32>
    %377 = vector.shape_cast %376 : vector<1x4x32xf32> to vector<4x32xf32>
    %c2_187 = arith.constant 2 : index
    %c0_188 = arith.constant 0 : index
    %c0_189 = arith.constant 0 : index
    %378 = vector.load %arg11[%c2_187, %c0_188, %c0_189] : memref<4x32x128xf32, #tpu.memory_space<vmem>>, vector<1x32x128xf32>
    %379 = vector.shape_cast %378 : vector<1x32x128xf32> to vector<32x128xf32>
    %c2_190 = arith.constant 2 : index
    %c0_191 = arith.constant 0 : index
    %c0_192 = arith.constant 0 : index
    %380 = vector.load %arg12[%c2_190, %c0_191, %c0_192] : memref<4x1x128xf32, #tpu.memory_space<vmem>>, vector<1x1x128xf32>
    %381 = vector.shape_cast %380 : vector<1x1x128xf32> to vector<1x128xf32>
    %c2_193 = arith.constant 2 : index
    %c0_194 = arith.constant 0 : index
    %c0_195 = arith.constant 0 : index
    %382 = vector.load %arg13[%c2_193, %c0_194, %c0_195] : memref<4x128x32xf32, #tpu.memory_space<vmem>>, vector<1x128x32xf32>
    %383 = vector.shape_cast %382 : vector<1x128x32xf32> to vector<128x32xf32>
    %c2_196 = arith.constant 2 : index
    %c0_197 = arith.constant 0 : index
    %c0_198 = arith.constant 0 : index
    %384 = vector.load %arg14[%c2_196, %c0_197, %c0_198] : memref<4x1x32xf32, #tpu.memory_space<vmem>>, vector<1x1x32xf32>
    %385 = vector.shape_cast %384 : vector<1x1x32xf32> to vector<1x32xf32>
    %386 = vector.extract_strided_slice %377 {offsets = [2, 0], sizes = [1, 32], strides = [1, 1]} : vector<4x32xf32> to vector<1x32xf32>
    %387 = vector.extract_strided_slice %377 {offsets = [3, 0], sizes = [1, 32], strides = [1, 1]} : vector<4x32xf32> to vector<1x32xf32>
    %cst_199 = arith.constant dense<0.000000e+00> : vector<32xf32>
    %388 = vector.multi_reduction <add>, %375, %cst_199 [1] : vector<32x32xf32> to vector<32xf32>
    %389 = vector.shape_cast %388 : vector<32xf32> to vector<32x1xf32>
    %cst_200 = arith.constant 3.200000e+01 : f32
    %390 = vector.broadcast %cst_200 : f32 to vector<32x1xf32>
    %391 = arith.divf %389, %390 : vector<32x1xf32>
    %392 = vector.broadcast %391 : vector<32x1xf32> to vector<32x32xf32>
    %393 = arith.subf %375, %392 : vector<32x32xf32>
    %394 = arith.mulf %393, %393 : vector<32x32xf32>
    %cst_201 = arith.constant dense<0.000000e+00> : vector<32xf32>
    %395 = vector.multi_reduction <add>, %394, %cst_201 [1] : vector<32x32xf32> to vector<32xf32>
    %396 = vector.shape_cast %395 : vector<32xf32> to vector<32x1xf32>
    %cst_202 = arith.constant 3.200000e+01 : f32
    %397 = vector.broadcast %cst_202 : f32 to vector<32x1xf32>
    %398 = arith.divf %396, %397 : vector<32x1xf32>
    %399 = vector.broadcast %391 : vector<32x1xf32> to vector<32x32xf32>
    %400 = arith.subf %375, %399 : vector<32x32xf32>
    %cst_203 = arith.constant 9.99999974E-6 : f32
    %401 = vector.broadcast %cst_203 : f32 to vector<32x1xf32>
    %402 = arith.addf %398, %401 : vector<32x1xf32>
    %403 = math.rsqrt %402 : vector<32x1xf32>
    %404 = vector.broadcast %403 : vector<32x1xf32> to vector<32x32xf32>
    %405 = arith.mulf %400, %404 : vector<32x32xf32>
    %406 = vector.broadcast %386 : vector<1x32xf32> to vector<32x32xf32>
    %407 = arith.mulf %405, %406 : vector<32x32xf32>
    %408 = vector.broadcast %387 : vector<1x32xf32> to vector<32x32xf32>
    %409 = arith.addf %407, %408 : vector<32x32xf32>
    %cst_204 = arith.constant dense<0.000000e+00> : vector<32x128xf32>
    %410 = tpu.matmul %409, %379, %cst_204 {dimension_numbers = #tpu.dot_dimension_numbers<[1], [0], [0], [1], [0, 0, 1, 1], [], []>} : vector<32x32xf32>, vector<32x128xf32>, vector<32x128xf32> -> vector<32x128xf32>
    %411 = vector.broadcast %381 : vector<1x128xf32> to vector<32x128xf32>
    %412 = arith.addf %410, %411 : vector<32x128xf32>
    %413 = arith.mulf %412, %412 : vector<32x128xf32>
    %414 = arith.mulf %412, %413 : vector<32x128xf32>
    %cst_205 = arith.constant 4.471500e-02 : f32
    %415 = vector.broadcast %cst_205 : f32 to vector<32x128xf32>
    %416 = arith.mulf %415, %414 : vector<32x128xf32>
    %417 = arith.addf %412, %416 : vector<32x128xf32>
    %cst_206 = arith.constant 0.797884583 : f32
    %418 = vector.broadcast %cst_206 : f32 to vector<32x128xf32>
    %419 = arith.mulf %418, %417 : vector<32x128xf32>
    %420 = math.tanh %419 : vector<32x128xf32>
    %cst_207 = arith.constant 1.000000e+00 : f32
    %421 = vector.broadcast %cst_207 : f32 to vector<32x128xf32>
    %422 = arith.addf %421, %420 : vector<32x128xf32>
    %cst_208 = arith.constant 5.000000e-01 : f32
    %423 = vector.broadcast %cst_208 : f32 to vector<32x128xf32>
    %424 = arith.mulf %423, %422 : vector<32x128xf32>
    %425 = arith.mulf %412, %424 : vector<32x128xf32>
    %cst_209 = arith.constant dense<0.000000e+00> : vector<32x32xf32>
    %426 = tpu.matmul %425, %383, %cst_209 {dimension_numbers = #tpu.dot_dimension_numbers<[1], [0], [0], [1], [0, 0, 1, 1], [], []>} : vector<32x128xf32>, vector<128x32xf32>, vector<32x32xf32> -> vector<32x32xf32>
    %427 = arith.addf %375, %426 : vector<32x32xf32>
    %428 = vector.broadcast %385 : vector<1x32xf32> to vector<32x32xf32>
    %429 = arith.addf %427, %428 : vector<32x32xf32>
    %c3 = arith.constant 3 : index
    %c0_210 = arith.constant 0 : index
    %c0_211 = arith.constant 0 : index
    %430 = vector.load %arg6[%c3, %c0_210, %c0_211] : memref<4x4x32xf32, #tpu.memory_space<vmem>>, vector<1x4x32xf32>
    %431 = vector.shape_cast %430 : vector<1x4x32xf32> to vector<4x32xf32>
    %c3_212 = arith.constant 3 : index
    %c0_213 = arith.constant 0 : index
    %c0_214 = arith.constant 0 : index
    %c0_215 = arith.constant 0 : index
    %432 = vector.load %arg7[%c3_212, %c0_213, %c0_214, %c0_215] : memref<4x4x32x8xf32, #tpu.memory_space<vmem>>, vector<1x4x32x8xf32>
    %433 = vector.shape_cast %432 : vector<1x4x32x8xf32> to vector<4x32x8xf32>
    %c3_216 = arith.constant 3 : index
    %c0_217 = arith.constant 0 : index
    %c0_218 = arith.constant 0 : index
    %c0_219 = arith.constant 0 : index
    %434 = vector.load %arg8[%c3_216, %c0_217, %c0_218, %c0_219] : memref<4x4x32x8xf32, #tpu.memory_space<vmem>>, vector<1x4x32x8xf32>
    %435 = vector.shape_cast %434 : vector<1x4x32x8xf32> to vector<4x32x8xf32>
    %c3_220 = arith.constant 3 : index
    %c0_221 = arith.constant 0 : index
    %c0_222 = arith.constant 0 : index
    %c0_223 = arith.constant 0 : index
    %436 = vector.load %arg9[%c3_220, %c0_221, %c0_222, %c0_223] : memref<4x4x32x8xf32, #tpu.memory_space<vmem>>, vector<1x4x32x8xf32>
    %437 = vector.shape_cast %436 : vector<1x4x32x8xf32> to vector<4x32x8xf32>
    %c3_224 = arith.constant 3 : index
    %c0_225 = arith.constant 0 : index
    %c0_226 = arith.constant 0 : index
    %c0_227 = arith.constant 0 : index
    %438 = vector.load %arg10[%c3_224, %c0_225, %c0_226, %c0_227] : memref<4x4x8x32xf32, #tpu.memory_space<vmem>>, vector<1x4x8x32xf32>
    %439 = vector.shape_cast %438 : vector<1x4x8x32xf32> to vector<4x8x32xf32>
    %440 = vector.extract_strided_slice %431 {offsets = [0, 0], sizes = [1, 32], strides = [1, 1]} : vector<4x32xf32> to vector<1x32xf32>
    %441 = vector.extract_strided_slice %431 {offsets = [1, 0], sizes = [1, 32], strides = [1, 1]} : vector<4x32xf32> to vector<1x32xf32>
    %cst_228 = arith.constant dense<0.000000e+00> : vector<32xf32>
    %442 = vector.multi_reduction <add>, %429, %cst_228 [1] : vector<32x32xf32> to vector<32xf32>
    %443 = vector.shape_cast %442 : vector<32xf32> to vector<32x1xf32>
    %cst_229 = arith.constant 3.200000e+01 : f32
    %444 = vector.broadcast %cst_229 : f32 to vector<32x1xf32>
    %445 = arith.divf %443, %444 : vector<32x1xf32>
    %446 = vector.broadcast %445 : vector<32x1xf32> to vector<32x32xf32>
    %447 = arith.subf %429, %446 : vector<32x32xf32>
    %448 = arith.mulf %447, %447 : vector<32x32xf32>
    %cst_230 = arith.constant dense<0.000000e+00> : vector<32xf32>
    %449 = vector.multi_reduction <add>, %448, %cst_230 [1] : vector<32x32xf32> to vector<32xf32>
    %450 = vector.shape_cast %449 : vector<32xf32> to vector<32x1xf32>
    %cst_231 = arith.constant 3.200000e+01 : f32
    %451 = vector.broadcast %cst_231 : f32 to vector<32x1xf32>
    %452 = arith.divf %450, %451 : vector<32x1xf32>
    %453 = vector.broadcast %445 : vector<32x1xf32> to vector<32x32xf32>
    %454 = arith.subf %429, %453 : vector<32x32xf32>
    %cst_232 = arith.constant 9.99999974E-6 : f32
    %455 = vector.broadcast %cst_232 : f32 to vector<32x1xf32>
    %456 = arith.addf %452, %455 : vector<32x1xf32>
    %457 = math.rsqrt %456 : vector<32x1xf32>
    %458 = vector.broadcast %457 : vector<32x1xf32> to vector<32x32xf32>
    %459 = arith.mulf %454, %458 : vector<32x32xf32>
    %460 = vector.broadcast %440 : vector<1x32xf32> to vector<32x32xf32>
    %461 = arith.mulf %459, %460 : vector<32x32xf32>
    %462 = vector.broadcast %441 : vector<1x32xf32> to vector<32x32xf32>
    %463 = arith.addf %461, %462 : vector<32x32xf32>
    %464 = vector.shape_cast %463 : vector<32x32xf32> to vector<1x32x32xf32>
    %465 = vector.shape_cast %464 : vector<1x32x32xf32> to vector<1x32x32xf32>
    %466 = vector.broadcast %465 : vector<1x32x32xf32> to vector<4x32x32xf32>
    "tpu.trace_start"() <{level = 10 : i32, message = "hld,hdk->hlk"}> : () -> ()
    %cst_233 = arith.constant dense<0.000000e+00> : vector<4x32x8xf32>
    %467 = tpu.matmul %466, %433, %cst_233 {dimension_numbers = #tpu.dot_dimension_numbers<[2], [1], [1], [2], [0, 0, 0, 1, 1, 2], [0], [0]>} : vector<4x32x32xf32>, vector<4x32x8xf32>, vector<4x32x8xf32> -> vector<4x32x8xf32>
    %cst_234 = arith.constant dense<0.000000e+00> : vector<4x32x8xf32>
    %468 = tpu.matmul %466, %435, %cst_234 {dimension_numbers = #tpu.dot_dimension_numbers<[2], [1], [1], [2], [0, 0, 0, 1, 1, 2], [0], [0]>} : vector<4x32x32xf32>, vector<4x32x8xf32>, vector<4x32x8xf32> -> vector<4x32x8xf32>
    %cst_235 = arith.constant dense<0.000000e+00> : vector<4x32x8xf32>
    %469 = tpu.matmul %466, %437, %cst_235 {dimension_numbers = #tpu.dot_dimension_numbers<[2], [1], [1], [2], [0, 0, 0, 1, 1, 2], [0], [0]>} : vector<4x32x32xf32>, vector<4x32x8xf32>, vector<4x32x8xf32> -> vector<4x32x8xf32>
    "tpu.trace_stop"() : () -> ()
    "tpu.trace_start"() <{level = 10 : i32, message = "hqd,hkd->hqk"}> : () -> ()
    %cst_236 = arith.constant dense<0.000000e+00> : vector<4x32x32xf32>
    %470 = tpu.matmul %467, %468, %cst_236 {dimension_numbers = #tpu.dot_dimension_numbers<[2], [2], [1], [1], [0, 0, 0, 1, 1, 1], [0], [0]>} : vector<4x32x8xf32>, vector<4x32x8xf32>, vector<4x32x32xf32> -> vector<4x32x32xf32>
    "tpu.trace_stop"() : () -> ()
    %cst_237 = arith.constant 0.353553385 : f32
    %471 = vector.broadcast %cst_237 : f32 to vector<4x32x32xf32>
    %472 = arith.mulf %470, %471 : vector<4x32x32xf32>
    %473 = vector.shape_cast %61 : vector<32x32xf32> to vector<1x32x32xf32>
    %474 = vector.broadcast %473 : vector<1x32x32xf32> to vector<4x32x32xf32>
    %475 = arith.addf %472, %474 : vector<4x32x32xf32>
    %cst_238 = arith.constant dense<0xFF800000> : vector<4x32xf32>
    %476 = vector.multi_reduction <maximumf>, %475, %cst_238 [2] : vector<4x32x32xf32> to vector<4x32xf32>
    %477 = vector.shape_cast %476 : vector<4x32xf32> to vector<4x32x1xf32>
    %478 = vector.broadcast %477 : vector<4x32x1xf32> to vector<4x32x32xf32>
    %479 = arith.subf %475, %478 : vector<4x32x32xf32>
    %480 = math.exp %479 : vector<4x32x32xf32>
    %cst_239 = arith.constant dense<0.000000e+00> : vector<4x32xf32>
    %481 = vector.multi_reduction <add>, %480, %cst_239 [2] : vector<4x32x32xf32> to vector<4x32xf32>
    %482 = vector.shape_cast %481 : vector<4x32xf32> to vector<4x32x1xf32>
    %483 = tpu.reciprocal %482 {approx = true} : vector<4x32x1xf32> -> vector<4x32x1xf32>
    %484 = vector.broadcast %483 : vector<4x32x1xf32> to vector<4x32x32xf32>
    %485 = arith.mulf %480, %484 : vector<4x32x32xf32>
    "tpu.trace_start"() <{level = 10 : i32, message = "hqk,hkd->hqd"}> : () -> ()
    %cst_240 = arith.constant dense<0.000000e+00> : vector<4x32x8xf32>
    %486 = tpu.matmul %485, %469, %cst_240 {dimension_numbers = #tpu.dot_dimension_numbers<[2], [1], [1], [2], [0, 0, 0, 1, 1, 2], [0], [0]>} : vector<4x32x32xf32>, vector<4x32x8xf32>, vector<4x32x8xf32> -> vector<4x32x8xf32>
    "tpu.trace_stop"() : () -> ()
    "tpu.trace_start"() <{level = 10 : i32, message = "hqd,hdn->hqn"}> : () -> ()
    %cst_241 = arith.constant dense<0.000000e+00> : vector<4x32x32xf32>
    %487 = tpu.matmul %486, %439, %cst_241 {dimension_numbers = #tpu.dot_dimension_numbers<[2], [1], [1], [2], [0, 0, 0, 1, 1, 2], [0], [0]>} : vector<4x32x8xf32>, vector<4x8x32xf32>, vector<4x32x32xf32> -> vector<4x32x32xf32>
    "tpu.trace_stop"() : () -> ()
    %cst_242 = arith.constant dense<0.000000e+00> : vector<32x32xf32>
    %488 = vector.multi_reduction <add>, %487, %cst_242 [0] : vector<4x32x32xf32> to vector<32x32xf32>
    %489 = arith.addf %429, %488 : vector<32x32xf32>
    %c3_243 = arith.constant 3 : index
    %c0_244 = arith.constant 0 : index
    %c0_245 = arith.constant 0 : index
    %490 = vector.load %arg6[%c3_243, %c0_244, %c0_245] : memref<4x4x32xf32, #tpu.memory_space<vmem>>, vector<1x4x32xf32>
    %491 = vector.shape_cast %490 : vector<1x4x32xf32> to vector<4x32xf32>
    %c3_246 = arith.constant 3 : index
    %c0_247 = arith.constant 0 : index
    %c0_248 = arith.constant 0 : index
    %492 = vector.load %arg11[%c3_246, %c0_247, %c0_248] : memref<4x32x128xf32, #tpu.memory_space<vmem>>, vector<1x32x128xf32>
    %493 = vector.shape_cast %492 : vector<1x32x128xf32> to vector<32x128xf32>
    %c3_249 = arith.constant 3 : index
    %c0_250 = arith.constant 0 : index
    %c0_251 = arith.constant 0 : index
    %494 = vector.load %arg12[%c3_249, %c0_250, %c0_251] : memref<4x1x128xf32, #tpu.memory_space<vmem>>, vector<1x1x128xf32>
    %495 = vector.shape_cast %494 : vector<1x1x128xf32> to vector<1x128xf32>
    %c3_252 = arith.constant 3 : index
    %c0_253 = arith.constant 0 : index
    %c0_254 = arith.constant 0 : index
    %496 = vector.load %arg13[%c3_252, %c0_253, %c0_254] : memref<4x128x32xf32, #tpu.memory_space<vmem>>, vector<1x128x32xf32>
    %497 = vector.shape_cast %496 : vector<1x128x32xf32> to vector<128x32xf32>
    %c3_255 = arith.constant 3 : index
    %c0_256 = arith.constant 0 : index
    %c0_257 = arith.constant 0 : index
    %498 = vector.load %arg14[%c3_255, %c0_256, %c0_257] : memref<4x1x32xf32, #tpu.memory_space<vmem>>, vector<1x1x32xf32>
    %499 = vector.shape_cast %498 : vector<1x1x32xf32> to vector<1x32xf32>
    %500 = vector.extract_strided_slice %491 {offsets = [2, 0], sizes = [1, 32], strides = [1, 1]} : vector<4x32xf32> to vector<1x32xf32>
    %501 = vector.extract_strided_slice %491 {offsets = [3, 0], sizes = [1, 32], strides = [1, 1]} : vector<4x32xf32> to vector<1x32xf32>
    %cst_258 = arith.constant dense<0.000000e+00> : vector<32xf32>
    %502 = vector.multi_reduction <add>, %489, %cst_258 [1] : vector<32x32xf32> to vector<32xf32>
    %503 = vector.shape_cast %502 : vector<32xf32> to vector<32x1xf32>
    %cst_259 = arith.constant 3.200000e+01 : f32
    %504 = vector.broadcast %cst_259 : f32 to vector<32x1xf32>
    %505 = arith.divf %503, %504 : vector<32x1xf32>
    %506 = vector.broadcast %505 : vector<32x1xf32> to vector<32x32xf32>
    %507 = arith.subf %489, %506 : vector<32x32xf32>
    %508 = arith.mulf %507, %507 : vector<32x32xf32>
    %cst_260 = arith.constant dense<0.000000e+00> : vector<32xf32>
    %509 = vector.multi_reduction <add>, %508, %cst_260 [1] : vector<32x32xf32> to vector<32xf32>
    %510 = vector.shape_cast %509 : vector<32xf32> to vector<32x1xf32>
    %cst_261 = arith.constant 3.200000e+01 : f32
    %511 = vector.broadcast %cst_261 : f32 to vector<32x1xf32>
    %512 = arith.divf %510, %511 : vector<32x1xf32>
    %513 = vector.broadcast %505 : vector<32x1xf32> to vector<32x32xf32>
    %514 = arith.subf %489, %513 : vector<32x32xf32>
    %cst_262 = arith.constant 9.99999974E-6 : f32
    %515 = vector.broadcast %cst_262 : f32 to vector<32x1xf32>
    %516 = arith.addf %512, %515 : vector<32x1xf32>
    %517 = math.rsqrt %516 : vector<32x1xf32>
    %518 = vector.broadcast %517 : vector<32x1xf32> to vector<32x32xf32>
    %519 = arith.mulf %514, %518 : vector<32x32xf32>
    %520 = vector.broadcast %500 : vector<1x32xf32> to vector<32x32xf32>
    %521 = arith.mulf %519, %520 : vector<32x32xf32>
    %522 = vector.broadcast %501 : vector<1x32xf32> to vector<32x32xf32>
    %523 = arith.addf %521, %522 : vector<32x32xf32>
    %cst_263 = arith.constant dense<0.000000e+00> : vector<32x128xf32>
    %524 = tpu.matmul %523, %493, %cst_263 {dimension_numbers = #tpu.dot_dimension_numbers<[1], [0], [0], [1], [0, 0, 1, 1], [], []>} : vector<32x32xf32>, vector<32x128xf32>, vector<32x128xf32> -> vector<32x128xf32>
    %525 = vector.broadcast %495 : vector<1x128xf32> to vector<32x128xf32>
    %526 = arith.addf %524, %525 : vector<32x128xf32>
    %527 = arith.mulf %526, %526 : vector<32x128xf32>
    %528 = arith.mulf %526, %527 : vector<32x128xf32>
    %cst_264 = arith.constant 4.471500e-02 : f32
    %529 = vector.broadcast %cst_264 : f32 to vector<32x128xf32>
    %530 = arith.mulf %529, %528 : vector<32x128xf32>
    %531 = arith.addf %526, %530 : vector<32x128xf32>
    %cst_265 = arith.constant 0.797884583 : f32
    %532 = vector.broadcast %cst_265 : f32 to vector<32x128xf32>
    %533 = arith.mulf %532, %531 : vector<32x128xf32>
    %534 = math.tanh %533 : vector<32x128xf32>
    %cst_266 = arith.constant 1.000000e+00 : f32
    %535 = vector.broadcast %cst_266 : f32 to vector<32x128xf32>
    %536 = arith.addf %535, %534 : vector<32x128xf32>
    %cst_267 = arith.constant 5.000000e-01 : f32
    %537 = vector.broadcast %cst_267 : f32 to vector<32x128xf32>
    %538 = arith.mulf %537, %536 : vector<32x128xf32>
    %539 = arith.mulf %526, %538 : vector<32x128xf32>
    %cst_268 = arith.constant dense<0.000000e+00> : vector<32x32xf32>
    %540 = tpu.matmul %539, %497, %cst_268 {dimension_numbers = #tpu.dot_dimension_numbers<[1], [0], [0], [1], [0, 0, 1, 1], [], []>} : vector<32x128xf32>, vector<128x32xf32>, vector<32x32xf32> -> vector<32x32xf32>
    %541 = arith.addf %489, %540 : vector<32x32xf32>
    %542 = vector.broadcast %499 : vector<1x32xf32> to vector<32x32xf32>
    %543 = arith.addf %541, %542 : vector<32x32xf32>
    %544 = vector.extract_strided_slice %2 {offsets = [1, 0, 0], sizes = [1, 1, 32], strides = [1, 1, 1]} : vector<2x2x32xf32> to vector<1x1x32xf32>
    %545 = vector.shape_cast %544 : vector<1x1x32xf32> to vector<1x32xf32>
    %546 = vector.extract_strided_slice %2 {offsets = [1, 1, 0], sizes = [1, 1, 32], strides = [1, 1, 1]} : vector<2x2x32xf32> to vector<1x1x32xf32>
    %547 = vector.shape_cast %546 : vector<1x1x32xf32> to vector<1x32xf32>
    %cst_269 = arith.constant dense<0.000000e+00> : vector<32xf32>
    %548 = vector.multi_reduction <add>, %543, %cst_269 [1] : vector<32x32xf32> to vector<32xf32>
    %549 = vector.shape_cast %548 : vector<32xf32> to vector<32x1xf32>
    %cst_270 = arith.constant 3.200000e+01 : f32
    %550 = vector.broadcast %cst_270 : f32 to vector<32x1xf32>
    %551 = arith.divf %549, %550 : vector<32x1xf32>
    %552 = vector.broadcast %551 : vector<32x1xf32> to vector<32x32xf32>
    %553 = arith.subf %543, %552 : vector<32x32xf32>
    %554 = arith.mulf %553, %553 : vector<32x32xf32>
    %cst_271 = arith.constant dense<0.000000e+00> : vector<32xf32>
    %555 = vector.multi_reduction <add>, %554, %cst_271 [1] : vector<32x32xf32> to vector<32xf32>
    %556 = vector.shape_cast %555 : vector<32xf32> to vector<32x1xf32>
    %cst_272 = arith.constant 3.200000e+01 : f32
    %557 = vector.broadcast %cst_272 : f32 to vector<32x1xf32>
    %558 = arith.divf %556, %557 : vector<32x1xf32>
    %559 = vector.broadcast %551 : vector<32x1xf32> to vector<32x32xf32>
    %560 = arith.subf %543, %559 : vector<32x32xf32>
    %cst_273 = arith.constant 9.99999974E-6 : f32
    %561 = vector.broadcast %cst_273 : f32 to vector<32x1xf32>
    %562 = arith.addf %558, %561 : vector<32x1xf32>
    %563 = math.rsqrt %562 : vector<32x1xf32>
    %564 = vector.broadcast %563 : vector<32x1xf32> to vector<32x32xf32>
    %565 = arith.mulf %560, %564 : vector<32x32xf32>
    %566 = vector.broadcast %545 : vector<1x32xf32> to vector<32x32xf32>
    %567 = arith.mulf %565, %566 : vector<32x32xf32>
    %568 = vector.broadcast %547 : vector<1x32xf32> to vector<32x32xf32>
    %569 = arith.addf %567, %568 : vector<32x32xf32>
    %570 = vector.shape_cast %569 : vector<32x32xf32> to vector<2x16x32xf32>
    %cst_274 = arith.constant dense<0.000000e+00> : vector<16x32xf32>
    %571 = vector.multi_reduction <add>, %570, %cst_274 [0] : vector<2x16x32xf32> to vector<16x32xf32>
    %cst_275 = arith.constant 2.000000e+00 : f32
    %572 = vector.broadcast %cst_275 : f32 to vector<16x32xf32>
    %573 = arith.divf %571, %572 : vector<16x32xf32>
    %c0_276 = arith.constant 0 : index
    %c0_277 = arith.constant 0 : index
    %574 = vector.load %arg17[%c0_276, %c0_277] : memref<1x128xf32, #tpu.memory_space<vmem>>, vector<1x128xf32>
    %575 = vector.extract_strided_slice %573 {offsets = [0, 0], sizes = [1, 32], strides = [1, 1]} : vector<16x32xf32> to vector<1x32xf32>
    %c0_278 = arith.constant 0 : index
    %c0_279 = arith.constant 0 : index
    %c0_280 = arith.constant 0 : index
    %576 = vector.load %arg16[%c0_278, %c0_279, %c0_280] : memref<16x32x128xf32, #tpu.memory_space<vmem>>, vector<1x32x128xf32>
    %577 = vector.shape_cast %576 : vector<1x32x128xf32> to vector<32x128xf32>
    %cst_281 = arith.constant dense<0.000000e+00> : vector<1x128xf32>
    %578 = tpu.matmul %575, %577, %cst_281 {dimension_numbers = #tpu.dot_dimension_numbers<[1], [0], [0], [1], [0, 0, 1, 1], [], []>} : vector<1x32xf32>, vector<32x128xf32>, vector<1x128xf32> -> vector<1x128xf32>
    %579 = arith.addf %574, %578 : vector<1x128xf32>
    %580 = vector.extract_strided_slice %573 {offsets = [1, 0], sizes = [1, 32], strides = [1, 1]} : vector<16x32xf32> to vector<1x32xf32>
    %c1_282 = arith.constant 1 : index
    %c0_283 = arith.constant 0 : index
    %c0_284 = arith.constant 0 : index
    %581 = vector.load %arg16[%c1_282, %c0_283, %c0_284] : memref<16x32x128xf32, #tpu.memory_space<vmem>>, vector<1x32x128xf32>
    %582 = vector.shape_cast %581 : vector<1x32x128xf32> to vector<32x128xf32>
    %cst_285 = arith.constant dense<0.000000e+00> : vector<1x128xf32>
    %583 = tpu.matmul %580, %582, %cst_285 {dimension_numbers = #tpu.dot_dimension_numbers<[1], [0], [0], [1], [0, 0, 1, 1], [], []>} : vector<1x32xf32>, vector<32x128xf32>, vector<1x128xf32> -> vector<1x128xf32>
    %584 = arith.addf %579, %583 : vector<1x128xf32>
    %585 = vector.extract_strided_slice %573 {offsets = [2, 0], sizes = [1, 32], strides = [1, 1]} : vector<16x32xf32> to vector<1x32xf32>
    %c2_286 = arith.constant 2 : index
    %c0_287 = arith.constant 0 : index
    %c0_288 = arith.constant 0 : index
    %586 = vector.load %arg16[%c2_286, %c0_287, %c0_288] : memref<16x32x128xf32, #tpu.memory_space<vmem>>, vector<1x32x128xf32>
    %587 = vector.shape_cast %586 : vector<1x32x128xf32> to vector<32x128xf32>
    %cst_289 = arith.constant dense<0.000000e+00> : vector<1x128xf32>
    %588 = tpu.matmul %585, %587, %cst_289 {dimension_numbers = #tpu.dot_dimension_numbers<[1], [0], [0], [1], [0, 0, 1, 1], [], []>} : vector<1x32xf32>, vector<32x128xf32>, vector<1x128xf32> -> vector<1x128xf32>
    %589 = arith.addf %584, %588 : vector<1x128xf32>
    %590 = vector.extract_strided_slice %573 {offsets = [3, 0], sizes = [1, 32], strides = [1, 1]} : vector<16x32xf32> to vector<1x32xf32>
    %c3_290 = arith.constant 3 : index
    %c0_291 = arith.constant 0 : index
    %c0_292 = arith.constant 0 : index
    %591 = vector.load %arg16[%c3_290, %c0_291, %c0_292] : memref<16x32x128xf32, #tpu.memory_space<vmem>>, vector<1x32x128xf32>
    %592 = vector.shape_cast %591 : vector<1x32x128xf32> to vector<32x128xf32>
    %cst_293 = arith.constant dense<0.000000e+00> : vector<1x128xf32>
    %593 = tpu.matmul %590, %592, %cst_293 {dimension_numbers = #tpu.dot_dimension_numbers<[1], [0], [0], [1], [0, 0, 1, 1], [], []>} : vector<1x32xf32>, vector<32x128xf32>, vector<1x128xf32> -> vector<1x128xf32>
    %594 = arith.addf %589, %593 : vector<1x128xf32>
    %595 = vector.extract_strided_slice %573 {offsets = [4, 0], sizes = [1, 32], strides = [1, 1]} : vector<16x32xf32> to vector<1x32xf32>
    %c4 = arith.constant 4 : index
    %c0_294 = arith.constant 0 : index
    %c0_295 = arith.constant 0 : index
    %596 = vector.load %arg16[%c4, %c0_294, %c0_295] : memref<16x32x128xf32, #tpu.memory_space<vmem>>, vector<1x32x128xf32>
    %597 = vector.shape_cast %596 : vector<1x32x128xf32> to vector<32x128xf32>
    %cst_296 = arith.constant dense<0.000000e+00> : vector<1x128xf32>
    %598 = tpu.matmul %595, %597, %cst_296 {dimension_numbers = #tpu.dot_dimension_numbers<[1], [0], [0], [1], [0, 0, 1, 1], [], []>} : vector<1x32xf32>, vector<32x128xf32>, vector<1x128xf32> -> vector<1x128xf32>
    %599 = arith.addf %594, %598 : vector<1x128xf32>
    %600 = vector.extract_strided_slice %573 {offsets = [5, 0], sizes = [1, 32], strides = [1, 1]} : vector<16x32xf32> to vector<1x32xf32>
    %c5 = arith.constant 5 : index
    %c0_297 = arith.constant 0 : index
    %c0_298 = arith.constant 0 : index
    %601 = vector.load %arg16[%c5, %c0_297, %c0_298] : memref<16x32x128xf32, #tpu.memory_space<vmem>>, vector<1x32x128xf32>
    %602 = vector.shape_cast %601 : vector<1x32x128xf32> to vector<32x128xf32>
    %cst_299 = arith.constant dense<0.000000e+00> : vector<1x128xf32>
    %603 = tpu.matmul %600, %602, %cst_299 {dimension_numbers = #tpu.dot_dimension_numbers<[1], [0], [0], [1], [0, 0, 1, 1], [], []>} : vector<1x32xf32>, vector<32x128xf32>, vector<1x128xf32> -> vector<1x128xf32>
    %604 = arith.addf %599, %603 : vector<1x128xf32>
    %605 = vector.extract_strided_slice %573 {offsets = [6, 0], sizes = [1, 32], strides = [1, 1]} : vector<16x32xf32> to vector<1x32xf32>
    %c6 = arith.constant 6 : index
    %c0_300 = arith.constant 0 : index
    %c0_301 = arith.constant 0 : index
    %606 = vector.load %arg16[%c6, %c0_300, %c0_301] : memref<16x32x128xf32, #tpu.memory_space<vmem>>, vector<1x32x128xf32>
    %607 = vector.shape_cast %606 : vector<1x32x128xf32> to vector<32x128xf32>
    %cst_302 = arith.constant dense<0.000000e+00> : vector<1x128xf32>
    %608 = tpu.matmul %605, %607, %cst_302 {dimension_numbers = #tpu.dot_dimension_numbers<[1], [0], [0], [1], [0, 0, 1, 1], [], []>} : vector<1x32xf32>, vector<32x128xf32>, vector<1x128xf32> -> vector<1x128xf32>
    %609 = arith.addf %604, %608 : vector<1x128xf32>
    %610 = vector.extract_strided_slice %573 {offsets = [7, 0], sizes = [1, 32], strides = [1, 1]} : vector<16x32xf32> to vector<1x32xf32>
    %c7 = arith.constant 7 : index
    %c0_303 = arith.constant 0 : index
    %c0_304 = arith.constant 0 : index
    %611 = vector.load %arg16[%c7, %c0_303, %c0_304] : memref<16x32x128xf32, #tpu.memory_space<vmem>>, vector<1x32x128xf32>
    %612 = vector.shape_cast %611 : vector<1x32x128xf32> to vector<32x128xf32>
    %cst_305 = arith.constant dense<0.000000e+00> : vector<1x128xf32>
    %613 = tpu.matmul %610, %612, %cst_305 {dimension_numbers = #tpu.dot_dimension_numbers<[1], [0], [0], [1], [0, 0, 1, 1], [], []>} : vector<1x32xf32>, vector<32x128xf32>, vector<1x128xf32> -> vector<1x128xf32>
    %614 = arith.addf %609, %613 : vector<1x128xf32>
    %615 = vector.extract_strided_slice %573 {offsets = [8, 0], sizes = [1, 32], strides = [1, 1]} : vector<16x32xf32> to vector<1x32xf32>
    %c8 = arith.constant 8 : index
    %c0_306 = arith.constant 0 : index
    %c0_307 = arith.constant 0 : index
    %616 = vector.load %arg16[%c8, %c0_306, %c0_307] : memref<16x32x128xf32, #tpu.memory_space<vmem>>, vector<1x32x128xf32>
    %617 = vector.shape_cast %616 : vector<1x32x128xf32> to vector<32x128xf32>
    %cst_308 = arith.constant dense<0.000000e+00> : vector<1x128xf32>
    %618 = tpu.matmul %615, %617, %cst_308 {dimension_numbers = #tpu.dot_dimension_numbers<[1], [0], [0], [1], [0, 0, 1, 1], [], []>} : vector<1x32xf32>, vector<32x128xf32>, vector<1x128xf32> -> vector<1x128xf32>
    %619 = arith.addf %614, %618 : vector<1x128xf32>
    %620 = vector.extract_strided_slice %573 {offsets = [9, 0], sizes = [1, 32], strides = [1, 1]} : vector<16x32xf32> to vector<1x32xf32>
    %c9 = arith.constant 9 : index
    %c0_309 = arith.constant 0 : index
    %c0_310 = arith.constant 0 : index
    %621 = vector.load %arg16[%c9, %c0_309, %c0_310] : memref<16x32x128xf32, #tpu.memory_space<vmem>>, vector<1x32x128xf32>
    %622 = vector.shape_cast %621 : vector<1x32x128xf32> to vector<32x128xf32>
    %cst_311 = arith.constant dense<0.000000e+00> : vector<1x128xf32>
    %623 = tpu.matmul %620, %622, %cst_311 {dimension_numbers = #tpu.dot_dimension_numbers<[1], [0], [0], [1], [0, 0, 1, 1], [], []>} : vector<1x32xf32>, vector<32x128xf32>, vector<1x128xf32> -> vector<1x128xf32>
    %624 = arith.addf %619, %623 : vector<1x128xf32>
    %625 = vector.extract_strided_slice %573 {offsets = [10, 0], sizes = [1, 32], strides = [1, 1]} : vector<16x32xf32> to vector<1x32xf32>
    %c10 = arith.constant 10 : index
    %c0_312 = arith.constant 0 : index
    %c0_313 = arith.constant 0 : index
    %626 = vector.load %arg16[%c10, %c0_312, %c0_313] : memref<16x32x128xf32, #tpu.memory_space<vmem>>, vector<1x32x128xf32>
    %627 = vector.shape_cast %626 : vector<1x32x128xf32> to vector<32x128xf32>
    %cst_314 = arith.constant dense<0.000000e+00> : vector<1x128xf32>
    %628 = tpu.matmul %625, %627, %cst_314 {dimension_numbers = #tpu.dot_dimension_numbers<[1], [0], [0], [1], [0, 0, 1, 1], [], []>} : vector<1x32xf32>, vector<32x128xf32>, vector<1x128xf32> -> vector<1x128xf32>
    %629 = arith.addf %624, %628 : vector<1x128xf32>
    %630 = vector.extract_strided_slice %573 {offsets = [11, 0], sizes = [1, 32], strides = [1, 1]} : vector<16x32xf32> to vector<1x32xf32>
    %c11 = arith.constant 11 : index
    %c0_315 = arith.constant 0 : index
    %c0_316 = arith.constant 0 : index
    %631 = vector.load %arg16[%c11, %c0_315, %c0_316] : memref<16x32x128xf32, #tpu.memory_space<vmem>>, vector<1x32x128xf32>
    %632 = vector.shape_cast %631 : vector<1x32x128xf32> to vector<32x128xf32>
    %cst_317 = arith.constant dense<0.000000e+00> : vector<1x128xf32>
    %633 = tpu.matmul %630, %632, %cst_317 {dimension_numbers = #tpu.dot_dimension_numbers<[1], [0], [0], [1], [0, 0, 1, 1], [], []>} : vector<1x32xf32>, vector<32x128xf32>, vector<1x128xf32> -> vector<1x128xf32>
    %634 = arith.addf %629, %633 : vector<1x128xf32>
    %635 = vector.extract_strided_slice %573 {offsets = [12, 0], sizes = [1, 32], strides = [1, 1]} : vector<16x32xf32> to vector<1x32xf32>
    %c12 = arith.constant 12 : index
    %c0_318 = arith.constant 0 : index
    %c0_319 = arith.constant 0 : index
    %636 = vector.load %arg16[%c12, %c0_318, %c0_319] : memref<16x32x128xf32, #tpu.memory_space<vmem>>, vector<1x32x128xf32>
    %637 = vector.shape_cast %636 : vector<1x32x128xf32> to vector<32x128xf32>
    %cst_320 = arith.constant dense<0.000000e+00> : vector<1x128xf32>
    %638 = tpu.matmul %635, %637, %cst_320 {dimension_numbers = #tpu.dot_dimension_numbers<[1], [0], [0], [1], [0, 0, 1, 1], [], []>} : vector<1x32xf32>, vector<32x128xf32>, vector<1x128xf32> -> vector<1x128xf32>
    %639 = arith.addf %634, %638 : vector<1x128xf32>
    %640 = vector.extract_strided_slice %573 {offsets = [13, 0], sizes = [1, 32], strides = [1, 1]} : vector<16x32xf32> to vector<1x32xf32>
    %c13 = arith.constant 13 : index
    %c0_321 = arith.constant 0 : index
    %c0_322 = arith.constant 0 : index
    %641 = vector.load %arg16[%c13, %c0_321, %c0_322] : memref<16x32x128xf32, #tpu.memory_space<vmem>>, vector<1x32x128xf32>
    %642 = vector.shape_cast %641 : vector<1x32x128xf32> to vector<32x128xf32>
    %cst_323 = arith.constant dense<0.000000e+00> : vector<1x128xf32>
    %643 = tpu.matmul %640, %642, %cst_323 {dimension_numbers = #tpu.dot_dimension_numbers<[1], [0], [0], [1], [0, 0, 1, 1], [], []>} : vector<1x32xf32>, vector<32x128xf32>, vector<1x128xf32> -> vector<1x128xf32>
    %644 = arith.addf %639, %643 : vector<1x128xf32>
    %645 = vector.extract_strided_slice %573 {offsets = [14, 0], sizes = [1, 32], strides = [1, 1]} : vector<16x32xf32> to vector<1x32xf32>
    %c14 = arith.constant 14 : index
    %c0_324 = arith.constant 0 : index
    %c0_325 = arith.constant 0 : index
    %646 = vector.load %arg16[%c14, %c0_324, %c0_325] : memref<16x32x128xf32, #tpu.memory_space<vmem>>, vector<1x32x128xf32>
    %647 = vector.shape_cast %646 : vector<1x32x128xf32> to vector<32x128xf32>
    %cst_326 = arith.constant dense<0.000000e+00> : vector<1x128xf32>
    %648 = tpu.matmul %645, %647, %cst_326 {dimension_numbers = #tpu.dot_dimension_numbers<[1], [0], [0], [1], [0, 0, 1, 1], [], []>} : vector<1x32xf32>, vector<32x128xf32>, vector<1x128xf32> -> vector<1x128xf32>
    %649 = arith.addf %644, %648 : vector<1x128xf32>
    %650 = vector.extract_strided_slice %573 {offsets = [15, 0], sizes = [1, 32], strides = [1, 1]} : vector<16x32xf32> to vector<1x32xf32>
    %c15 = arith.constant 15 : index
    %c0_327 = arith.constant 0 : index
    %c0_328 = arith.constant 0 : index
    %651 = vector.load %arg16[%c15, %c0_327, %c0_328] : memref<16x32x128xf32, #tpu.memory_space<vmem>>, vector<1x32x128xf32>
    %652 = vector.shape_cast %651 : vector<1x32x128xf32> to vector<32x128xf32>
    %cst_329 = arith.constant dense<0.000000e+00> : vector<1x128xf32>
    %653 = tpu.matmul %650, %652, %cst_329 {dimension_numbers = #tpu.dot_dimension_numbers<[1], [0], [0], [1], [0, 0, 1, 1], [], []>} : vector<1x32xf32>, vector<32x128xf32>, vector<1x128xf32> -> vector<1x128xf32>
    %654 = arith.addf %649, %653 : vector<1x128xf32>
    %c0_330 = arith.constant 0 : index
    %c0_331 = arith.constant 0 : index
    %c0_332 = arith.constant 0 : index
    %655 = vector.load %arg18[%c0_330, %c0_331, %c0_332] : memref<1x1x128xf32, #tpu.memory_space<vmem>>, vector<1x1x128xf32>
    %656 = vector.shape_cast %655 : vector<1x1x128xf32> to vector<1x128xf32>
    %657 = vector.shape_cast %654 : vector<1x128xf32> to vector<1x1x128xf32>
    tpu.vector_store %arg18[%c0_330, %c0_331, %c0_332], %657 {strides = array<i32>} : memref<1x1x128xf32, #tpu.memory_space<vmem>>, vector<1x1x128xf32>,
    return
  }
  func.func @transform_0(%arg0: i32) -> (i32, i32, i32) {
    %c0_i32 = arith.constant 0 : i32
    %c0_i32_0 = arith.constant 0 : i32
    %c0_i32_1 = arith.constant 0 : i32
    return %arg0, %c0_i32, %c0_i32_0 : i32, i32, i32
  }
  func.func @transform_1(%arg0: i32) -> (i32, i32, i32) {
    %c0_i32 = arith.constant 0 : i32
    %c0_i32_0 = arith.constant 0 : i32
    %c0_i32_1 = arith.constant 0 : i32
    %c0_i32_2 = arith.constant 0 : i32
    return %c0_i32, %c0_i32_0, %c0_i32_1 : i32, i32, i32
  }
  func.func @transform_2(%arg0: i32) -> (i32, i32) {
    %c0_i32 = arith.constant 0 : i32
    %c0_i32_0 = arith.constant 0 : i32
    %c0_i32_1 = arith.constant 0 : i32
    return %c0_i32, %c0_i32_0 : i32, i32
  }
  func.func @transform_3(%arg0: i32) -> (i32, i32) {
    %c0_i32 = arith.constant 0 : i32
    %c0_i32_0 = arith.constant 0 : i32
    %c0_i32_1 = arith.constant 0 : i32
    return %c0_i32, %c0_i32_0 : i32, i32
  }
  func.func @transform_4(%arg0: i32) -> (i32, i32) {
    %c0_i32 = arith.constant 0 : i32
    %c0_i32_0 = arith.constant 0 : i32
    %c0_i32_1 = arith.constant 0 : i32
    return %c0_i32, %c0_i32_0 : i32, i32
  }
  func.func @transform_5(%arg0: i32) -> (i32, i32, i32) {
    %c0_i32 = arith.constant 0 : i32
    %c0_i32_0 = arith.constant 0 : i32
    %c0_i32_1 = arith.constant 0 : i32
    %c0_i32_2 = arith.constant 0 : i32
    return %c0_i32, %c0_i32_0, %c0_i32_1 : i32, i32, i32
  }
  func.func @transform_6(%arg0: i32) -> (i32, i32, i32, i32) {
    %c0_i32 = arith.constant 0 : i32
    %c0_i32_0 = arith.constant 0 : i32
    %c0_i32_1 = arith.constant 0 : i32
    %c0_i32_2 = arith.constant 0 : i32
    %c0_i32_3 = arith.constant 0 : i32
    return %c0_i32, %c0_i32_0, %c0_i32_1, %c0_i32_2 : i32, i32, i32, i32
  }
  func.func @transform_7(%arg0: i32) -> (i32, i32, i32, i32) {
    %c0_i32 = arith.constant 0 : i32
    %c0_i32_0 = arith.constant 0 : i32
    %c0_i32_1 = arith.constant 0 : i32
    %c0_i32_2 = arith.constant 0 : i32
    %c0_i32_3 = arith.constant 0 : i32
    return %c0_i32, %c0_i32_0, %c0_i32_1, %c0_i32_2 : i32, i32, i32, i32
  }
  func.func @transform_8(%arg0: i32) -> (i32, i32, i32, i32) {
    %c0_i32 = arith.constant 0 : i32
    %c0_i32_0 = arith.constant 0 : i32
    %c0_i32_1 = arith.constant 0 : i32
    %c0_i32_2 = arith.constant 0 : i32
    %c0_i32_3 = arith.constant 0 : i32
    return %c0_i32, %c0_i32_0, %c0_i32_1, %c0_i32_2 : i32, i32, i32, i32
  }
  func.func @transform_9(%arg0: i32) -> (i32, i32, i32, i32) {
    %c0_i32 = arith.constant 0 : i32
    %c0_i32_0 = arith.constant 0 : i32
    %c0_i32_1 = arith.constant 0 : i32
    %c0_i32_2 = arith.constant 0 : i32
    %c0_i32_3 = arith.constant 0 : i32
    return %c0_i32, %c0_i32_0, %c0_i32_1, %c0_i32_2 : i32, i32, i32, i32
  }
  func.func @transform_10(%arg0: i32) -> (i32, i32, i32) {
    %c0_i32 = arith.constant 0 : i32
    %c0_i32_0 = arith.constant 0 : i32
    %c0_i32_1 = arith.constant 0 : i32
    %c0_i32_2 = arith.constant 0 : i32
    return %c0_i32, %c0_i32_0, %c0_i32_1 : i32, i32, i32
  }
  func.func @transform_11(%arg0: i32) -> (i32, i32, i32) {
    %c0_i32 = arith.constant 0 : i32
    %c0_i32_0 = arith.constant 0 : i32
    %c0_i32_1 = arith.constant 0 : i32
    %c0_i32_2 = arith.constant 0 : i32
    return %c0_i32, %c0_i32_0, %c0_i32_1 : i32, i32, i32
  }
  func.func @transform_12(%arg0: i32) -> (i32, i32, i32) {
    %c0_i32 = arith.constant 0 : i32
    %c0_i32_0 = arith.constant 0 : i32
    %c0_i32_1 = arith.constant 0 : i32
    %c0_i32_2 = arith.constant 0 : i32
    return %c0_i32, %c0_i32_0, %c0_i32_1 : i32, i32, i32
  }
  func.func @transform_13(%arg0: i32) -> (i32, i32, i32) {
    %c0_i32 = arith.constant 0 : i32
    %c0_i32_0 = arith.constant 0 : i32
    %c0_i32_1 = arith.constant 0 : i32
    %c0_i32_2 = arith.constant 0 : i32
    return %c0_i32, %c0_i32_0, %c0_i32_1 : i32, i32, i32
  }
  func.func @transform_14(%arg0: i32) -> (i32, i32, i32) {
    %c0_i32 = arith.constant 0 : i32
    %c0_i32_0 = arith.constant 0 : i32
    %c0_i32_1 = arith.constant 0 : i32
    %c0_i32_2 = arith.constant 0 : i32
    return %c0_i32, %c0_i32_0, %c0_i32_1 : i32, i32, i32
  }
  func.func @transform_15(%arg0: i32) -> (i32, i32, i32) {
    %c0_i32 = arith.constant 0 : i32
    %c0_i32_0 = arith.constant 0 : i32
    %c0_i32_1 = arith.constant 0 : i32
    %c0_i32_2 = arith.constant 0 : i32
    return %c0_i32, %c0_i32_0, %c0_i32_1 : i32, i32, i32
  }
  func.func @transform_16(%arg0: i32) -> (i32, i32) {
    %c0_i32 = arith.constant 0 : i32
    %c0_i32_0 = arith.constant 0 : i32
    %c0_i32_1 = arith.constant 0 : i32
    return %c0_i32, %c0_i32_0 : i32, i32
  }
  func.func @transform_17(%arg0: i32) -> (i32, i32, i32) {
    %c0_i32 = arith.constant 0 : i32
    %c0_i32_0 = arith.constant 0 : i32
    %c0_i32_1 = arith.constant 0 : i32
    return %arg0, %c0_i32, %c0_i32_0 : i32, i32, i32
  }
}

</mosaic_0001>

<bundles_post_ra>
// kernel: evaluate_forward.1
= control target key start
LH: loop header
LB: loop body
LE: loop exit
PB: predicated region body
PF: predicated region fallthrough
CT: control target
= control target key end

     0   :  { %s12594_s0 = inlined_call_operand.vmem [shape: f32[2,32,96], index: 0, kind: input, shape index: {}]   ;;  %s12595_s1 = inlined_call_operand.vmem [shape: f32[2,32,32], index: 1, kind: input, shape index: {}]   ;;  %s12596_s2 = inlined_call_operand.vmem [shape: f32[2,96], index: 2, kind: input, shape index: {}]   ;;  %s12597_s3 = inlined_call_operand.vmem [shape: f32[96,32], index: 3, kind: input, shape index: {}]   ;;  %s12598_s4 = inlined_call_operand.vmem [shape: f32[3,32], index: 4, kind: input, shape index: {}]   ;;  %s12599_s5 = inlined_call_operand.vmem [shape: f32[4,4,32], index: 5, kind: input, shape index: {}]   ;;  %s12600_s6 = inlined_call_operand.vmem [shape: f32[4,4,32,8], index: 6, kind: input, shape index: {}]   ;;  %s12601_s7 = inlined_call_operand.vmem [shape: f32[4,4,32,8], index: 7, kind: input, shape index: {}]   ;;  %s12602_s8 = inlined_call_operand.vmem [shape: f32[4,4,32,8], index: 8, kind: input, shape index: {}]   ;;  %s12603_s9 = inlined_call_operand.vmem [shape: f32[4,4,8,32], index: 9, kind: input, shape index: {}]   ;;  %s12604_s10 = inlined_call_operand.vmem [shape: f32[4,32,128], index: 10, kind: input, shape index: {}]   ;;  %s12605_s11 = inlined_call_operand.vmem [shape: f32[4,1,128], index: 11, kind: input, shape index: {}]   ;;  %s12606_s12 = inlined_call_operand.vmem [shape: f32[4,128,32], index: 12, kind: input, shape index: {}]   ;;  %s12607_s13 = inlined_call_operand.vmem [shape: f32[4,1,32], index: 13, kind: input, shape index: {}]   ;;  %s12608_s14 = inlined_call_operand.vmem [shape: f32[2,2,32], index: 14, kind: input, shape index: {}]   ;;  %s12609_s15 = inlined_call_operand.vmem [shape: f32[16,32,128], index: 15, kind: input, shape index: {}]   ;;  %s12610_s16 = inlined_call_operand.vmem [shape: f32[1,128], index: 16, kind: input, shape index: {}]   ;;  %s12611_s17 = inlined_call_operand.hbm [shape: f32[2,1,128], index: 17, kind: output, shape index: {}]  }
   0x1   :  { %12618 = sst [smem:[#allocation9_spill]] %s12594_s0 }
   0x2   :  { %12619 = sst [smem:[#allocation10_spill]] %s12595_s1 }
   0x3   :  { %12620 = sst [smem:[#allocation11_spill]] %s12596_s2 }
   0x4   :  { %22 = vsyncpa [#allocation3], 0 }
   0x5   :  { %24 = vsyncpa [#allocation3 + $0x1], 0  ;;  %s9119_s24 = smov 0   ;;  %s9121_s25 = smov 0  }
   0x6   :  { %s9123_s26 = smov 0   ;;  %s9125_s27 = smov 0  }
   0x7 LB: > { %12621 = sst [smem:[#allocation5_spill]] %s9020_s26  ;;  %s9140_s28 = sadd.s32 4294967295, %s9024_s27   ;;  %s9024_s27 = sphi %s9125_s27, %s12633_s27   ;;  %s9020_s26 = sphi %s9123_s26, %s12635_s26   ;;  %s9016_s25 = sphi %s9121_s25, %s12637_s25   ;;  %s9012_s24 = sphi %s9119_s24, %s12636_s24  }
   0x8   : > { %s7729_s29 = sadd.s32 4294967294, %s9024_s27   ;;  %s9144_s0 = sadd.s32 1, %s9024_s27  }
   0x9   : > { %12622 = sst [smem:[#allocation6_spill]] %s9144_s0  ;;  %s399_s30 = sadd.s32 1, %s9020_s26 }
   0xa   : > { %s396_s18 = ssub.s32 %s9024_s27, %s9144_s0  ;;  %p409_p0 = scmp.ne.s32.totalorder %s9020_s26, %s9016_s25 }
   0xb   : > { %p397_p1 = scmp.eq.s32.totalorder %s396_s18, 0  ;;  %p410_p2 = scmp.eq.s32.totalorder %s9140_s28, 1 }
   0xc   : > { %p415_p3 = scmp.ne.s32.totalorder %s9016_s25, %s9012_s24  ;;  %p416_p4 = scmp.eq.s32.totalorder %s7729_s29, 1 }
   0xd   : > { %s9155_s19 = scalar_select %p397_p1, %s9020_s26, %s399_s30  }
   0xe   : > { %p9157_p5 = por %p410_p2, %p409_p0  ;;  %p9161_p6 = por %p416_p4, %p415_p3 }
   0xf   : > { %12623 = sst [smem:[#allocation7_spill]] %s9155_s19  ;;  %p7732_p7 = scmp.ge.s32.totalorder %s9024_s27, 1 }
  0x10   : > { %s12625_s20 = scalar_select %p9161_p6, 1, 0 }
  0x11   : > { %p490_p8 = scmp.lt.s32.totalorder %s9024_s27, 3 }
  0x12   : > { %12626 = sst [smem:[#allocation8_spill]] %s12625_s20 }
  0x13   : > { %p491_p9 = pnand %p7732_p7, %p490_p8 }
  0x14   : > { %p541_p10 = scmp.lt.s32.totalorder (!%p491_p9), %s9140_s28, 1  ;;  %s12627_s30 = sld [smem:[#allocation9_spill]] (!%p491_p9) }
  0x15   : > { %494 = sbr.rel (%p491_p9) target bundleno = 8210 (0x2012), region = 88  ;;  %s12628_s2 = sld [smem:[#allocation11_spill]] (!%p491_p9) }
  0x16   : > { %s12629_s0 = sld [smem:[#allocation10_spill]] (!%p491_p9)  ;;  %s539_s26 = sand.u32 (!%p491_p9), 1, %s9016_s25  }
  0x17   : > { %s7662_s29 = scalar_lea.sflag (!%p491_p9), [#allocation3], %s539_s26  ;;  %s8982_s20 = scalar_lea.hbm (!%p491_p9), %s12611_s17, 2 }
  0x1a   : > { %s542_s21 = scalar_select %p541_p10, %s9140_s28, 1  ;;  %vm554_vm0 = vcmask 785408   ;;  %v9026_v8 = vmov 96.0   ;;  %v671_v35 = vld [vmem:[%s12597_s3 + $0x58] sm:$0xff]  ;;  %v670_v36 = vld [vmem:[%s12597_s3 + $0x50] sm:$0xff]  ;;  %v669_v37 = vld [vmem:[%s12597_s3 + $0x48] sm:$0xff] }
  0x1b   : > { %8564 = vrcp.f32 %v9026_v8  ;;  %689 = vmatpush.msra.mxu0 %v671_v35  ;;  %v668_v38 = vld [vmem:[%s12597_s3 + $0x40] sm:$0xff]  ;;  %v667_v39 = vld [vmem:[%s12597_s3 + $0x38] sm:$0xff]  ;;  %v666_v40 = vld [vmem:[%s12597_s3 + $0x30] sm:$0xff]  ;;  %vm714_vm14 = vcmask 261120  }
  0x1c   : > { %s8513_s22 = sshll.u32 %s542_s21, 5  ;;  %v665_v41 = vld [vmem:[%s12597_s3 + $0x28] sm:$0xff]  ;;  %v664_v42 = vld [vmem:[%s12597_s3 + $0x20] sm:$0xff]  ;;  %v663_v43 = vld [vmem:[%s12597_s3 + $0x18] sm:$0xff]  ;;  %s7670_s21 = scalar_lea.hbm %s12611_s17, %s9140_s28 }
  0x1d   : > { %s545_s18 = scalar_lea.vmem %s12627_s30, %s8513_s22  ;;  %690 = vmatpush.msra.mxu0 %v670_v36  ;;  %v662_v44 = vld [vmem:[%s12597_s3 + $0x10] sm:$0xff]  ;;  %v661_v45 = vld [vmem:[%s12597_s3 + $0x8] sm:$0xff]  ;;  %v660_v46 = vld [vmem:[%s12597_s3] sm:$0xff]  ;;  %s7674_s23 = sshll.u32 %s7670_s21, 4  ;;  %s7675_s23 = int_to_ptr.hbm [resolvable:$true] %s7674_s23 }
  0x1e   : > { %v552_v0 = vld [vmem:[%s545_s18 + $0x10] sm:$0xff]  ;;  %v550_v1 = vld [vmem:[%s545_s18] sm:$0xff]  ;;  %v553_v4 = vld [vmem:[%s545_s18 + $0x18] sm:$0xff]  ;;  %s8976_s30 = sshra.s32 %s7675_s23, 4  ;;  %s8977_s30 = int_to_ptr.hbm [resolvable:$true] %s8976_s30 }
  0x1f   : > { %v561_v2 = vsel %vm554_vm0, %v552_v0, 0.0  ;;  %v555_v3 = vsel %vm554_vm0, %v550_v1, 0.0  ;;  %v551_v5 = vld [vmem:[%s545_s18 + $0x8] sm:$0xff]  ;;  %v564_v6 = vsel %vm554_vm0, %v553_v4, 0.0  ;;  %691 = vmatpush.msra.mxu0 %v669_v37  ;;  %s8978_s18 = scalar_lea.hbm %s8977_s30, 1  ;;  %p8983_p0 = scmp.lt.s32.totalorder %s8977_s30, %s12611_s17 }
  0x20   : > { %562 = vadd.xlane.f32.xlu1 %v561_v2  ;;  %556 = vadd.xlane.f32.xlu0 %v555_v3  ;;  %v558_v7 = vsel %vm554_vm0, %v551_v5, 0.0  ;;  %v546_v3 = vld [vmem:[%s12628_s2] sm:$0x3]  ;;  %s540_s2 = scalar_lea.vmem [#allocation2], %s539_s26  ;;  %p8979_p11 = scmp.ne.s32.totalorder %s8977_s30, %s8978_s18 }
  0x21   : > { %v8565_v9 = vpop.eup %8564  ;;  %692 = vmatpush.msra.mxu0 %v668_v38  ;;  %s7672_s22 = sshll.u32 %s540_s2, 4  ;;  %p8984_p1 = scmp.lt.s32.totalorder %s8982_s20, %s8978_s18  ;;  %s7673_s22 = int_to_ptr.vmem [resolvable:$true] %s7672_s22 }
  0x22   : > { %v568_v10 = vmul.f32 96.0, %v8565_v9  ;;  %vm572_vm1 = vweird.f32 %v8565_v9  ;;  %p8980_p12 = pnand %p8979_p11, %p9157_p5 }
  0x23   : > { %693 = vmatpush.msra.mxu0 %v667_v39  ;;  %p8985_p2 = por %p8984_p1, %p8983_p0 }
  0x24   : > { %v569_v11 = vsub.f32 1.0, %v568_v10  ;;  %v650_v10 = vperm.slane %v546_v3, 0  ;;  %p8981_p13 = pneg %p8980_p12 }
  0x25   : > { %694 = vmatpush.msra.mxu0 %v666_v40  ;;  %v9246_v40 = vld [vmem:[%s12598_s4] sm:$0x7] }
  0x26   : > { %v570_v12 = vmul.f32 %v8565_v9, %v569_v11  ;;  %p8986_p3 = pnand %p8985_p2, %p8981_p13 }
  0x27   : > { %695 = vmatpush.msra.mxu0 %v665_v41 }
  0x28   : > { %565 = vadd.xlane.f32.xlu1 %v564_v6  ;;  %559 = vadd.xlane.f32.xlu0 %v558_v7  ;;  %v571_v13 = vadd.f32 %v8565_v9, %v570_v12 }
  0x29   : > { %696 = vmatpush.msra.mxu0 %v664_v42 }
  0x2a   : > { %v573_v14 = vsel %vm572_vm1, %v8565_v9, %v571_v13 }
  0x2b   : > { %697 = vmatpush.msra.mxu0 %v663_v43 }
  0x2d   : > { %698 = vmatpush.msra.mxu0 %v662_v44 }
  0x2f   : > { %699 = vmatpush.msra.mxu0 %v661_v45 }
  0x31   : > { %700 = vmatpush.msra.mxu0 %v660_v46 }
  0x93   : > { %v563_v15 = vpop.xlane.xlu1 %562  ;;  %v557_v16 = vpop.xlane.xlu0 %556 }
  0x94   : > { %v576_v17 = vmul.f32 %v573_v14, %v563_v15  ;;  %v574_v18 = vmul.f32 %v573_v14, %v557_v16 }
  0x96   : > { %v9176_v19 = vsub.f32 %v552_v0, %v576_v17  ;;  %v9178_v20 = vsub.f32 %v550_v1, %v574_v18 }
  0x98   : > { %v584_v21 = vmul.f32 %v9176_v19, %v9176_v19  ;;  %v582_v22 = vmul.f32 %v9178_v20, %v9178_v20 }
  0x9a   : > { %v592_v23 = vsel %vm554_vm0, %v584_v21, 0.0  ;;  %v586_v24 = vsel %vm554_vm0, %v582_v22, 0.0 }
  0x9b   : > { %v566_v25 = vpop.xlane.xlu1 %565  ;;  %593 = vadd.xlane.f32.xlu0 %v592_v23  ;;  %587 = vadd.xlane.f32.xlu2 %v586_v24  ;;  %v560_v26 = vpop.xlane.xlu0 %559 }
  0x9c   : > { %v577_v27 = vmul.f32 %v573_v14, %v566_v25  ;;  %v575_v28 = vmul.f32 %v573_v14, %v560_v26 }
  0x9e   : > { %v9186_v29 = vsub.f32 %v553_v4, %v577_v27  ;;  %v9188_v30 = vsub.f32 %v551_v5, %v575_v28 }
  0xa0   : > { %v585_v31 = vmul.f32 %v9186_v29, %v9186_v29  ;;  %v583_v32 = vmul.f32 %v9188_v30, %v9188_v30 }
  0xa2   : > { %v595_v33 = vsel %vm554_vm0, %v585_v31, 0.0  ;;  %v589_v34 = vsel %vm554_vm0, %v583_v32, 0.0 }
  0xa3   : > { %596 = vadd.xlane.f32.xlu1 %v595_v33  ;;  %590 = vadd.xlane.f32.xlu2 %v589_v34 }
 0x10e   : > { %v588_v47 = vpop.xlane.xlu2 %587  ;;  %v594_v48 = vpop.xlane.xlu0 %593 }
 0x10f   : > { %v598_v49 = vmul.f32 %v588_v47, %v573_v14  ;;  %v600_v50 = vmul.f32 %v594_v48, %v573_v14 }
 0x111   : > { %v602_v51 = vadd.f32 1e-05, %v598_v49  ;;  %v604_v52 = vadd.f32 1e-05, %v600_v50 }
 0x113   : > { %8566 = vrsqrt.f32 %v602_v51  ;;  %vm612_vm3 = vweird.f32 %v602_v51  ;;  %vm632_vm5 = vweird.f32 %v604_v52 }
 0x114   : > { %8568 = vrsqrt.f32 %v604_v52 }
 0x116   : > { %v597_v53 = vpop.xlane.xlu1 %596  ;;  %v591_v54 = vpop.xlane.xlu2 %590 }
 0x117   : > { %v601_v55 = vmul.f32 %v597_v53, %v573_v14  ;;  %v599_v56 = vmul.f32 %v591_v54, %v573_v14  ;;  %v655_v14 = vperm.slane %v546_v3, 1 }
 0x119   : > { %v8567_v57 = vpop.eup %8566  ;;  %v605_v58 = vadd.f32 1e-05, %v601_v55  ;;  %v603_v59 = vadd.f32 1e-05, %v599_v56 }
 0x11a   : > { %v8569_v60 = vpop.eup %8568  ;;  %v607_v61 = vmul.f32 %v8567_v57, %v602_v51  ;;  %vm613_vm2 = vweird.f32 %v8567_v57 }
 0x11b   : > { %v627_v62 = vmul.f32 %v8569_v60, %v604_v52  ;;  %8570 = vrsqrt.f32 %v605_v58  ;;  %vm614_vm4 = vmor %vm612_vm3, %vm613_vm2  ;;  %vm633_vm6 = vweird.f32 %v8569_v60  ;;  %vm622_vm9 = vweird.f32 %v603_v59 }
 0x11c   : > { %v608_v63 = vmul.f32 %v8567_v57, %v607_v61  ;;  %8572 = vrsqrt.f32 %v603_v59  ;;  %vm634_vm8 = vmor %vm632_vm5, %vm633_vm6  ;;  %vm642_vm11 = vweird.f32 %v605_v58  ;;  %v9027_v52 = vmov 32.0  }
 0x11d   : > { %v628_v1 = vmul.f32 %v8569_v60, %v627_v62  ;;  %8574 = vrcp.f32 %v9027_v52 }
 0x11e   : > { %v609_v0 = vmul.f32 0.5, %v608_v63 }
 0x11f   : > { %v629_v7 = vmul.f32 0.5, %v628_v1 }
 0x120   : > { %v610_v2 = vsub.f32 1.5, %v609_v0 }
 0x121   : > { %v8571_v4 = vpop.eup %8570  ;;  %v630_v15 = vsub.f32 1.5, %v629_v7 }
 0x122   : > { %v8573_v5 = vpop.eup %8572  ;;  %v611_v6 = vmul.f32 %v8567_v57, %v610_v2  ;;  %v637_v8 = vmul.f32 %v8571_v4, %v605_v58  ;;  %vm643_vm12 = vweird.f32 %v8571_v4 }
 0x123   : > { %v617_v9 = vmul.f32 %v8573_v5, %v603_v59  ;;  %vm623_vm7 = vweird.f32 %v8573_v5  ;;  %v631_v23 = vmul.f32 %v8569_v60, %v630_v15  ;;  %vm644_vm13 = vmor %vm642_vm11, %vm643_vm12  ;;  %v8575_v53 = vpop.eup %8574 }
 0x124   : > { %v615_v11 = vsel %vm614_vm4, %v8567_v57, %v611_v6  ;;  %v638_v16 = vmul.f32 %v8571_v4, %v637_v8  ;;  %vm624_vm10 = vmor %vm622_vm9, %vm623_vm7  ;;  %v728_v54 = vmul.f32 32.0, %v8575_v53  ;;  %vm732_vm15 = vweird.f32 %v8575_v53 }
 0x125   : > { %v618_v12 = vmul.f32 %v8573_v5, %v617_v9  ;;  %v646_v13 = vmul.f32 %v615_v11, %v9178_v20  ;;  %v635_v28 = vsel %vm634_vm8, %v8569_v60, %v631_v23 }
 0x126   : > { %v639_v24 = vmul.f32 0.5, %v638_v16  ;;  %v648_v33 = vmul.f32 %v635_v28, %v9176_v19  ;;  %v672_v19 = vperm.slane %v9246_v40, 0  ;;  %v729_v55 = vsub.f32 1.0, %v728_v54 }
 0x127   : > { %v619_v17 = vmul.f32 0.5, %v618_v12  ;;  %v651_v18 = vmul.f32 %v650_v10, %v646_v13 }
 0x128   : > { %v640_v27 = vsub.f32 1.5, %v639_v24  ;;  %v653_v35 = vmul.f32 %v650_v10, %v648_v33  ;;  %v730_v56 = vmul.f32 %v8575_v53, %v729_v55 }
 0x129   : > { %v620_v21 = vsub.f32 1.5, %v619_v17  ;;  %v656_v22 = vadd.f32 %v655_v14, %v651_v18 }
 0x12a   : > { %v641_v34 = vmul.f32 %v8571_v4, %v640_v27  ;;  %v658_v37 = vadd.f32 %v655_v14, %v653_v35  ;;  %v731_v57 = vadd.f32 %v8575_v53, %v730_v56 }
 0x12b   : > { %v621_v25 = vmul.f32 %v8573_v5, %v620_v21  ;;  %7735 = vmatmul.msk.f32.vlgmr.msra.gmra.mxu0 %vm554_vm0, %v656_v22 }
 0x12c   : > { %v645_v36 = vsel %vm644_vm13, %v8571_v4, %v641_v34  ;;  %v9253_v58 = vsel %vm732_vm15, %v8575_v53, %v731_v57  ;;  %v810_v34 = vperm.slane %v9246_v40, 1 }
 0x12d   : > { %v625_v26 = vsel %vm624_vm10, %v8573_v5, %v621_v25  ;;  %v649_v38 = vmul.f32 %v645_v36, %v9186_v29 }
 0x12e   : > { %v647_v20 = vmul.f32 %v625_v26, %v9188_v30 }
 0x12f   : > { %v654_v30 = vmul.f32 %v650_v10, %v649_v38 }
 0x130   : > { %v652_v31 = vmul.f32 %v650_v10, %v647_v20 }
 0x131   : > { %v659_v39 = vadd.f32 %v655_v14, %v654_v30  ;;  %v815_v30 = vperm.slane %v9246_v40, 2 }
 0x132   : > { %v657_v32 = vadd.f32 %v655_v14, %v652_v31 }
 0x134   : > { %7736 = vmatmul.msk.f32.gmra.mxu0 %vm554_vm0, %v657_v32 }
 0x13c   : > { %7737 = vmatmul.msk.f32.gmra.mxu0 %vm554_vm0, %v658_v37 }
 0x144   : > { %7738 = vmatmul.msk.f32.gmra.mxu0 %vm554_vm0, %v659_v39 }
 0x1a8   : > { %v702_v41 = vpop.f32.mrf.mxu0 }
 0x1a9   : > { %v703_v42 = vadd.f32 %v702_v41, %v672_v19 }
 0x1ab   : > { %v715_v43 = vsel %vm714_vm14, %v703_v42, 0.0 }
 0x1ac   : > { %716 = vadd.xlane.f32.xlu2 %v715_v43 }
 0x1b1   : > { %v705_v29 = vpop.f32.mrf.mxu0 }
 0x1b2   : > { %v706_v44 = vadd.f32 %v705_v29, %v672_v19 }
 0x1b4   : > { %v718_v45 = vsel %vm714_vm14, %v706_v44, 0.0 }
 0x1b5   : > { %719 = vadd.xlane.f32.xlu0 %v718_v45 }
 0x1b9   : > { %v708_v46 = vpop.f32.mrf.mxu0 }
 0x1ba   : > { %v709_v47 = vadd.f32 %v708_v46, %v672_v19 }
 0x1bc   : > { %v721_v48 = vsel %vm714_vm14, %v709_v47, 0.0 }
 0x1bd   : > { %722 = vadd.xlane.f32.xlu1 %v721_v48 }
 0x1c1   : > { %v711_v49 = vpop.f32.mrf.mxu0 }
 0x1c2   : > { %v712_v50 = vadd.f32 %v711_v49, %v672_v19 }
 0x1c4   : > { %v724_v51 = vsel %vm714_vm14, %v712_v50, 0.0 }
 0x1c5   : > { %725 = vadd.xlane.f32.xlu2 %v724_v51 }
 0x21f   : > { %v717_v59 = vpop.xlane.xlu2 %716 }
 0x220   : > { %v734_v60 = vmul.f32 %v9253_v58, %v717_v59 }
 0x222   : > { %v738_v61 = vsub.f32 %v703_v42, %v734_v60 }
 0x224   : > { %v742_v62 = vmul.f32 %v738_v61, %v738_v61 }
 0x226   : > { %v746_v63 = vsel %vm714_vm14, %v742_v62, 0.0 }
 0x227   : > { %747 = vadd.xlane.f32.xlu0 %v746_v63 }
 0x228   : > { %v720_v0 = vpop.xlane.xlu0 %719 }
 0x229   : > { %v735_v1 = vmul.f32 %v9253_v58, %v720_v0 }
 0x22b   : > { %v9258_v2 = vsub.f32 %v706_v44, %v735_v1 }
 0x22d   : > { %v743_v3 = vmul.f32 %v9258_v2, %v9258_v2 }
 0x22f   : > { %v749_v4 = vsel %vm714_vm14, %v743_v3, 0.0 }
 0x230   : > { %v723_v5 = vpop.xlane.xlu1 %722  ;;  %750 = vadd.xlane.f32.xlu1 %v749_v4 }
 0x231   : > { %v736_v6 = vmul.f32 %v9253_v58, %v723_v5 }
 0x233   : > { %v9264_v7 = vsub.f32 %v709_v47, %v736_v6 }
 0x235   : > { %v744_v8 = vmul.f32 %v9264_v7, %v9264_v7 }
 0x237   : > { %v752_v9 = vsel %vm714_vm14, %v744_v8, 0.0 }
 0x238   : > { %v726_v10 = vpop.xlane.xlu2 %725  ;;  %753 = vadd.xlane.f32.xlu2 %v752_v9 }
 0x239   : > { %v737_v11 = vmul.f32 %v9253_v58, %v726_v10 }
 0x23b   : > { %v9270_v12 = vsub.f32 %v712_v50, %v737_v11 }
 0x23d   : > { %v745_v13 = vmul.f32 %v9270_v12, %v9270_v12 }
 0x23f   : > { %v755_v14 = vsel %vm714_vm14, %v745_v13, 0.0 }
 0x240   : > { %756 = vadd.xlane.f32.xlu0 %v755_v14 }
 0x29a   : > { %v748_v15 = vpop.xlane.xlu0 %747 }
 0x29b   : > { %v758_v16 = vmul.f32 %v748_v15, %v9253_v58 }
 0x29d   : > { %v762_v17 = vadd.f32 1e-05, %v758_v16 }
 0x29f   : > { %8576 = vrsqrt.f32 %v762_v17  ;;  %vm772_vm1 = vweird.f32 %v762_v17 }
 0x2a3   : > { %v751_v18 = vpop.xlane.xlu1 %750 }
 0x2a4   : > { %v759_v21 = vmul.f32 %v751_v18, %v9253_v58 }
 0x2a5   : > { %v8577_v22 = vpop.eup %8576 }
 0x2a6   : > { %v767_v23 = vmul.f32 %v8577_v22, %v762_v17  ;;  %v763_v24 = vadd.f32 1e-05, %v759_v21  ;;  %vm773_vm0 = vweird.f32 %v8577_v22 }
 0x2a7   : > { %vm774_vm2 = vmor %vm772_vm1, %vm773_vm0 }
 0x2a8   : > { %v768_v25 = vmul.f32 %v8577_v22, %v767_v23  ;;  %8578 = vrsqrt.f32 %v763_v24  ;;  %vm782_vm4 = vweird.f32 %v763_v24 }
 0x2aa   : > { %v769_v26 = vmul.f32 0.5, %v768_v25 }
 0x2ab   : > { %v754_v20 = vpop.xlane.xlu2 %753 }
 0x2ac   : > { %v770_v27 = vsub.f32 1.5, %v769_v26  ;;  %v760_v28 = vmul.f32 %v754_v20, %v9253_v58 }
 0x2ae   : > { %v8579_v31 = vpop.eup %8578  ;;  %v771_v32 = vmul.f32 %v8577_v22, %v770_v27  ;;  %v764_v33 = vadd.f32 1e-05, %v760_v28 }
 0x2af   : > { %v777_v35 = vmul.f32 %v8579_v31, %v763_v24  ;;  %vm783_vm3 = vweird.f32 %v8579_v31 }
 0x2b0   : > { %8580 = vrsqrt.f32 %v764_v33  ;;  %v775_v36 = vsel %vm774_vm2, %v8577_v22, %v771_v32  ;;  %vm784_vm5 = vmor %vm782_vm4, %vm783_vm3  ;;  %vm792_vm7 = vweird.f32 %v764_v33 }
 0x2b1   : > { %v778_v37 = vmul.f32 %v8579_v31, %v777_v35  ;;  %v806_v38 = vmul.f32 %v775_v36, %v738_v61  ;;  %v841_v35 = vld [vmem:[%s12600_s6 + $0x58] sm:$0xff] }
 0x2b2   : > { %v857_v36 = vld [vmem:[%s12601_s7 + $0x58] sm:$0xff]  ;;  %1062 = vmatpush.msra.mxu3 %v841_v35 }
 0x2b3   : > { %v779_v39 = vmul.f32 0.5, %v778_v37  ;;  %v757_v19 = vpop.xlane.xlu0 %756  ;;  %v811_v41 = vmul.f32 %v810_v34, %v806_v38  ;;  %1178 = vmatpush.msrb.mxu0 %v857_v36  ;;  %v832_v37 = vld [vmem:[%s12600_s6 + $0x10] sm:$0xff] }
 0x2b4   : > { %v761_v42 = vmul.f32 %v757_v19, %v9253_v58  ;;  %v836_v38 = vld [vmem:[%s12600_s6 + $0x30] sm:$0xff]  ;;  %v831_v19 = vld [vmem:[%s12600_s6 + $0x8] sm:$0xff] }
 0x2b5   : > { %v780_v43 = vsub.f32 1.5, %v779_v39  ;;  %v9281_v29 = vadd.f32 %v815_v30, %v811_v41  ;;  %v856_v39 = vld [vmem:[%s12601_s7 + $0x50] sm:$0xff]  ;;  %v835_v41 = vld [vmem:[%s12600_s6 + $0x28] sm:$0xff] }
 0x2b6   : > { %v8581_v44 = vpop.eup %8580  ;;  %v765_v45 = vadd.f32 1e-05, %v761_v42  ;;  %1179 = vmatpush.msrb.mxu0 %v856_v39  ;;  %v839_v42 = vld [vmem:[%s12600_s6 + $0x48] sm:$0xff] }
 0x2b7   : > { %v781_v46 = vmul.f32 %v8579_v31, %v780_v43  ;;  %v787_v47 = vmul.f32 %v8581_v44, %v764_v33  ;;  %v882_v48 = vsel %vm714_vm14, %v9281_v29, 0.0  ;;  %vm793_vm6 = vweird.f32 %v8581_v44  ;;  %v833_v33 = vld [vmem:[%s12600_s6 + $0x18] sm:$0xff]  ;;  %v855_v43 = vld [vmem:[%s12601_s7 + $0x48] sm:$0xff] }
 0x2b8   : > { %8582 = vrsqrt.f32 %v765_v45  ;;  %883 = vadd.xlane.f32.xlu1 %v882_v48  ;;  %vm794_vm8 = vmor %vm792_vm7, %vm793_vm6  ;;  %vm802_vm10 = vweird.f32 %v765_v45  ;;  %1004 = vmatpush.msra.mxu1 %v833_v33 }
 0x2b9   : > { %v788_v40 = vmul.f32 %v8581_v44, %v787_v47  ;;  %v785_v49 = vsel %vm784_vm5, %v8579_v31, %v781_v46  ;;  %1180 = vmatpush.msrb.mxu0 %v855_v43  ;;  %v838_v46 = vld [vmem:[%s12600_s6 + $0x40] sm:$0xff] }
 0x2ba   : > { %v807_v50 = vmul.f32 %v785_v49, %v9258_v2  ;;  %1005 = vmatpush.msra.mxu1 %v832_v37  ;;  %v854_v47 = vld [vmem:[%s12601_s7 + $0x40] sm:$0xff] }
 0x2bb   : > { %v789_v51 = vmul.f32 0.5, %v788_v40  ;;  %1181 = vmatpush.msrb.mxu0 %v854_v47  ;;  %v846_v37 = vld [vmem:[%s12601_s7] sm:$0xff] }
 0x2bc   : > { %v812_v52 = vmul.f32 %v810_v34, %v807_v50  ;;  %1006 = vmatpush.msra.mxu1 %v831_v19  ;;  %v870_v19 = vld [vmem:[%s12602_s8 + $0x40] sm:$0xff] }
 0x2bd   : > { %v790_v53 = vsub.f32 1.5, %v789_v51 }
 0x2be   : > { %v8583_v54 = vpop.eup %8582  ;;  %v9286_v55 = vadd.f32 %v815_v30, %v812_v52 }
 0x2bf   : > { %v791_v56 = vmul.f32 %v8581_v44, %v790_v53  ;;  %v797_v57 = vmul.f32 %v8583_v54, %v765_v45  ;;  %vm803_vm9 = vweird.f32 %v8583_v54  ;;  %v834_v45 = vld [vmem:[%s12600_s6 + $0x20] sm:$0xff] }
 0x2c0   : > { %v885_v59 = vsel %vm714_vm14, %v9286_v55, 0.0  ;;  %vm804_vm11 = vmor %vm802_vm10, %vm803_vm9  ;;  %vm1340_vm9 = vcmask 64512  }
 0x2c1   : > { %v798_v60 = vmul.f32 %v8583_v54, %v797_v57  ;;  %886 = vadd.xlane.f32.xlu2 %v885_v59  ;;  %v795_v61 = vsel %vm794_vm8, %v8581_v44, %v791_v56  ;;  %v830_v44 = vld [vmem:[%s12600_s6] sm:$0xff] }
 0x2c2   : > { %v808_v62 = vmul.f32 %v795_v61, %v9264_v7  ;;  %1007 = vmatpush.msra.mxu1 %v830_v44 }
 0x2c3   : > { %v799_v63 = vmul.f32 0.5, %v798_v60  ;;  %v829_v60 = vld [vmem:[%s12599_s5] sm:$0xf] }
 0x2c4   : > { %v813_v0 = vmul.f32 %v810_v34, %v808_v62 }
 0x2c5   : > { %v800_v1 = vsub.f32 1.5, %v799_v63 }
 0x2c6   : > { %v9291_v2 = vadd.f32 %v815_v30, %v813_v0 }
 0x2c7   : > { %v801_v3 = vmul.f32 %v8583_v54, %v800_v1 }
 0x2c8   : > { %v888_v4 = vsel %vm714_vm14, %v9291_v2, 0.0 }
 0x2c9   : > { %889 = vadd.xlane.f32.xlu0 %v888_v4  ;;  %v805_v5 = vsel %vm804_vm11, %v8583_v54, %v801_v3  ;;  %v845_v3 = vld [vmem:[%s12600_s6 + $0x78] sm:$0xff] }
 0x2ca   : > { %v809_v6 = vmul.f32 %v805_v5, %v9270_v12  ;;  %v849_v4 = vld [vmem:[%s12601_s7 + $0x18] sm:$0xff]  ;;  %1091 = vmatpush.msrb.mxu1 %v845_v3  ;;  %v868_v3 = vld [vmem:[%s12602_s8 + $0x30] sm:$0xff] }
 0x2cb   : > { %v853_v5 = vld [vmem:[%s12601_s7 + $0x38] sm:$0xff] }
 0x2cc   : > { %v814_v8 = vmul.f32 %v810_v34, %v809_v6  ;;  %v837_v34 = vld [vmem:[%s12600_s6 + $0x38] sm:$0xff]  ;;  %v9398_v6 = vperm.slane %v829_v60, 0 }
 0x2cd   : > { %1033 = vmatpush.msra.mxu2 %v837_v34 }
 0x2ce   : > { %v9296_v9 = vadd.f32 %v815_v30, %v814_v8  ;;  %v840_v30 = vld [vmem:[%s12600_s6 + $0x50] sm:$0xff] }
 0x2cf   : > { %1034 = vmatpush.msra.mxu2 %v836_v38  ;;  %1063 = vmatpush.msra.mxu3 %v840_v30  ;;  %v850_v38 = vld [vmem:[%s12601_s7 + $0x20] sm:$0xff] }
 0x2d0   : > { %v891_v7 = vsel %vm714_vm14, %v9296_v9, 0.0 }
 0x2d1   : > { %892 = vadd.xlane.f32.xlu1 %v891_v7  ;;  %1035 = vmatpush.msra.mxu2 %v835_v41 }
 0x2d2   : > { %1064 = vmatpush.msra.mxu3 %v839_v42 }
 0x2d3   : > { %1036 = vmatpush.msra.mxu2 %v834_v45 }
 0x2d4   : > { %1065 = vmatpush.msra.mxu3 %v838_v46 }
 0x2d5   : > { %1120 = vmatpush.msrb.mxu2 %v849_v4  ;;  %v859_v4 = vld [vmem:[%s12601_s7 + $0x68] sm:$0xff] }
 0x2d6   : > { %1149 = vmatpush.msrb.mxu3 %v853_v5  ;;  %v863_v5 = vld [vmem:[%s12602_s8 + $0x8] sm:$0xff] }
 0x32b   : > { %v884_v10 = vpop.xlane.xlu1 %883 }
 0x32c   : > { %v894_v11 = vmul.f32 %v884_v10, %v9253_v58  ;;  %v9403_v10 = vperm.slane %v829_v60, 1 }
 0x32e   : > { %v9302_v13 = vsub.f32 %v9281_v29, %v894_v11 }
 0x330   : > { %v902_v14 = vmul.f32 %v9302_v13, %v9302_v13 }
 0x332   : > { %v906_v15 = vsel %vm714_vm14, %v902_v14, 0.0 }
 0x333   : > { %907 = vadd.xlane.f32.xlu2 %v906_v15  ;;  %v844_v15 = vld [vmem:[%s12600_s6 + $0x70] sm:$0xff] }
 0x334   : > { %v887_v12 = vpop.xlane.xlu2 %886  ;;  %1092 = vmatpush.msrb.mxu1 %v844_v15  ;;  %v875_v15 = vld [vmem:[%s12602_s8 + $0x68] sm:$0xff] }
 0x335   : > { %v895_v16 = vmul.f32 %v887_v12, %v9253_v58  ;;  %v873_v12 = vld [vmem:[%s12602_s8 + $0x58] sm:$0xff] }
 0x336   : > { %1294 = vmatpush.msra.mxu0 %v873_v12  ;;  %v874_v12 = vld [vmem:[%s12602_s8 + $0x60] sm:$0xff] }
 0x337   : > { %v9309_v17 = vsub.f32 %v9286_v55, %v895_v16  ;;  %v848_v16 = vld [vmem:[%s12601_s7 + $0x10] sm:$0xff] }
 0x338   : > { %1121 = vmatpush.msrb.mxu2 %v848_v16 }
 0x339   : > { %v903_v18 = vmul.f32 %v9309_v17, %v9309_v17 }
 0x33b   : > { %v909_v21 = vsel %vm714_vm14, %v903_v18, 0.0  ;;  %v872_v18 = vld [vmem:[%s12602_s8 + $0x50] sm:$0xff] }
 0x33c   : > { %910 = vadd.xlane.f32.xlu0 %v909_v21  ;;  %v890_v22 = vpop.xlane.xlu0 %889  ;;  %v843_v21 = vld [vmem:[%s12600_s6 + $0x68] sm:$0xff]  ;;  %1295 = vmatpush.msra.mxu0 %v872_v18 }
 0x33d   : > { %v896_v23 = vmul.f32 %v890_v22, %v9253_v58  ;;  %1093 = vmatpush.msrb.mxu1 %v843_v21 }
 0x33f   : > { %v9316_v24 = vsub.f32 %v9291_v2, %v896_v23 }
 0x341   : > { %v904_v25 = vmul.f32 %v9316_v24, %v9316_v24 }
 0x343   : > { %v912_v26 = vsel %vm714_vm14, %v904_v25, 0.0 }
 0x344   : > { %v893_v20 = vpop.xlane.xlu1 %892  ;;  %913 = vadd.xlane.f32.xlu1 %v912_v26  ;;  %v847_v26 = vld [vmem:[%s12601_s7 + $0x8] sm:$0xff] }
 0x345   : > { %v897_v27 = vmul.f32 %v893_v20, %v9253_v58  ;;  %v851_v20 = vld [vmem:[%s12601_s7 + $0x28] sm:$0xff]  ;;  %1122 = vmatpush.msrb.mxu2 %v847_v26 }
 0x347   : > { %v9323_v28 = vsub.f32 %v9296_v9, %v897_v27  ;;  %v871_v27 = vld [vmem:[%s12602_s8 + $0x48] sm:$0xff]  ;;  %1123 = vmatpush.msrb.mxu2 %v846_v37 }
 0x348   : > { %1296 = vmatpush.msra.mxu0 %v871_v27 }
 0x349   : > { %v905_v31 = vmul.f32 %v9323_v28, %v9323_v28 }
 0x34a   : > { %1297 = vmatpush.msra.mxu0 %v870_v19 }
 0x34b   : > { %v915_v32 = vsel %vm714_vm14, %v905_v31, 0.0 }
 0x34c   : > { %916 = vadd.xlane.f32.xlu2 %v915_v32  ;;  %v842_v32 = vld [vmem:[%s12600_s6 + $0x60] sm:$0xff] }
 0x34d   : > { %1094 = vmatpush.msrb.mxu1 %v842_v32 }
 0x3a6   : > { %v908_v48 = vpop.xlane.xlu2 %907 }
 0x3a7   : > { %v918_v40 = vmul.f32 %v908_v48, %v9253_v58 }
 0x3a9   : > { %v922_v49 = vadd.f32 1e-05, %v918_v40 }
 0x3ab   : > { %8584 = vrsqrt.f32 %v922_v49  ;;  %vm932_vm13 = vweird.f32 %v922_v49 }
 0x3af   : > { %v911_v50 = vpop.xlane.xlu0 %910 }
 0x3b0   : > { %v919_v51 = vmul.f32 %v911_v50, %v9253_v58 }
 0x3b1   : > { %v8585_v52 = vpop.eup %8584 }
 0x3b2   : > { %v927_v53 = vmul.f32 %v8585_v52, %v922_v49  ;;  %v9378_v54 = vadd.f32 1e-05, %v919_v51  ;;  %vm933_vm12 = vweird.f32 %v8585_v52 }
 0x3b3   : > { %vm934_vm15 = vmor %vm932_vm13, %vm933_vm12 }
 0x3b4   : > { %v928_v56 = vmul.f32 %v8585_v52, %v927_v53  ;;  %8586 = vrsqrt.f32 %v9378_v54  ;;  %vm942_vm1 = vweird.f32 %v9378_v54 }
 0x3b6   : > { %v929_v57 = vmul.f32 0.5, %v928_v56 }
 0x3b7   : > { %v914_v59 = vpop.xlane.xlu1 %913 }
 0x3b8   : > { %v930_v61 = vsub.f32 1.5, %v929_v57  ;;  %v920_v62 = vmul.f32 %v914_v59, %v9253_v58 }
 0x3ba   : > { %v9385_v63 = vpop.eup %8586  ;;  %v931_v0 = vmul.f32 %v8585_v52, %v930_v61  ;;  %v9387_v1 = vadd.f32 1e-05, %v920_v62 }
 0x3bb   : > { %v937_v8 = vmul.f32 %v9385_v63, %v9378_v54  ;;  %vm943_vm0 = vweird.f32 %v9385_v63 }
 0x3bc   : > { %v935_v7 = vsel %vm934_vm15, %v8585_v52, %v931_v0  ;;  %8588 = vrsqrt.f32 %v9387_v1  ;;  %vm944_vm2 = vmor %vm942_vm1, %vm943_vm0  ;;  %vm952_vm4 = vweird.f32 %v9387_v1  ;;  %v869_v0 = vld [vmem:[%s12602_s8 + $0x38] sm:$0xff] }
 0x3bd   : > { %v966_v11 = vmul.f32 %v935_v7, %v9302_v13  ;;  %v938_v14 = vmul.f32 %v9385_v63, %v937_v8  ;;  %v852_v13 = vld [vmem:[%s12601_s7 + $0x30] sm:$0xff]  ;;  %v867_v8 = vld [vmem:[%s12602_s8 + $0x28] sm:$0xff]  ;;  %v862_v7 = vld [vmem:[%s12602_s8] sm:$0xff] }
 0x3be   : > { %1150 = vmatpush.msrb.mxu3 %v852_v13 }
 0x3bf   : > { %v971_v22 = vmul.f32 %v9398_v6, %v966_v11  ;;  %v939_v23 = vmul.f32 0.5, %v938_v14  ;;  %v917_v25 = vpop.xlane.xlu2 %916  ;;  %v877_v11 = vld [vmem:[%s12602_s8 + $0x78] sm:$0xff]  ;;  %v876_v14 = vld [vmem:[%s12602_s8 + $0x70] sm:$0xff] }
 0x3c0   : > { %v921_v31 = vmul.f32 %v917_v25, %v9253_v58  ;;  %1151 = vmatpush.msrb.mxu3 %v851_v20 }
 0x3c1   : > { %v9440_v33 = vadd.f32 %v9403_v10, %v971_v22  ;;  %v940_v34 = vsub.f32 1.5, %v939_v23 }
 0x3c2   : > { %v8589_v35 = vpop.eup %8588  ;;  %v925_v36 = vadd.f32 1e-05, %v921_v31  ;;  %1152 = vmatpush.msrb.mxu3 %v850_v38 }
 0x3c3   : > { %v941_v30 = vmul.f32 %v9385_v63, %v940_v34  ;;  %v947_v39 = vmul.f32 %v8589_v35, %v9387_v1  ;;  %7743 = vmatmul.msk.f32.vlgmr.msra.gmra.mxu1 %vm714_vm14, %v9440_v33  ;;  %7747 = vmatmul.msk.f32.vlgmr.msra.gmra.mxu2 %vm714_vm14, %v9440_v33  ;;  %vm953_vm3 = vweird.f32 %v8589_v35  ;;  %v864_v1 = vld [vmem:[%s12602_s8 + $0x10] sm:$0xff] }
 0x3c4   : > { %8590 = vrsqrt.f32 %v925_v36  ;;  %7751 = vmatmul.msk.f32.vlgmr.msra.gmra.mxu3 %vm714_vm14, %v9440_v33  ;;  %7767 = vmatmul.msk.f32.vlgmr.msrb.gmra.mxu0 %vm714_vm14, %v9440_v33  ;;  %vm954_vm5 = vmor %vm952_vm4, %vm953_vm3  ;;  %vm962_vm7 = vweird.f32 %v925_v36 }
 0x3c5   : > { %v945_v41 = vsel %vm944_vm2, %v9385_v63, %v941_v30  ;;  %v948_v42 = vmul.f32 %v8589_v35, %v947_v39  ;;  %v865_v63 = vld [vmem:[%s12602_s8 + $0x18] sm:$0xff]  ;;  %1265 = vmatpush.msra.mxu3 %v869_v0 }
 0x3c6   : > { %v967_v43 = vmul.f32 %v945_v41, %v9309_v17  ;;  %1236 = vmatpush.msra.mxu2 %v865_v63 }
 0x3c7   : > { %v949_v44 = vmul.f32 0.5, %v948_v42  ;;  %1266 = vmatpush.msra.mxu3 %v868_v3 }
 0x3c8   : > { %v972_v45 = vmul.f32 %v9398_v6, %v967_v43  ;;  %1237 = vmatpush.msra.mxu2 %v864_v1 }
 0x3c9   : > { %v950_v46 = vsub.f32 1.5, %v949_v44  ;;  %1267 = vmatpush.msra.mxu3 %v867_v8 }
 0x3ca   : > { %v8591_v47 = vpop.eup %8590  ;;  %v9469_v48 = vadd.f32 %v9403_v10, %v972_v45  ;;  %1238 = vmatpush.msra.mxu2 %v863_v5  ;;  %v821_v5 = vld [vmem:[%s12629_s0 + $0x8] sm:$0xff] }
 0x3cb   : > { %v951_v40 = vmul.f32 %v8589_v35, %v950_v46  ;;  %v957_v49 = vmul.f32 %v8591_v47, %v925_v36  ;;  %vm963_vm6 = vweird.f32 %v8591_v47 }
 0x3cc   : > { %7744 = vmatmul.msk.f32.gmra.mxu1 %vm714_vm14, %v9469_v48  ;;  %7748 = vmatmul.msk.f32.gmra.mxu2 %vm714_vm14, %v9469_v48  ;;  %vm964_vm8 = vmor %vm962_vm7, %vm963_vm6 }
 0x3cd   : > { %v955_v17 = vsel %vm954_vm5, %v8589_v35, %v951_v40  ;;  %v958_v50 = vmul.f32 %v8591_v47, %v957_v49  ;;  %7752 = vmatmul.msk.f32.gmra.mxu3 %vm714_vm14, %v9469_v48  ;;  %7768 = vmatmul.msk.f32.gmra.mxu0 %vm714_vm14, %v9469_v48 }
 0x3ce   : > { %v968_v51 = vmul.f32 %v955_v17, %v9316_v24  ;;  %v861_v24 = vld [vmem:[%s12601_s7 + $0x78] sm:$0xff]  ;;  %1239 = vmatpush.msra.mxu2 %v862_v7 }
 0x3cf   : > { %v959_v52 = vmul.f32 0.5, %v958_v50  ;;  %1207 = vmatpush.msra.mxu1 %v861_v24 }
 0x3d0   : > { %v973_v53 = vmul.f32 %v9398_v6, %v968_v51 }
 0x3d1   : > { %v960_v54 = vsub.f32 1.5, %v959_v52 }
 0x3d2   : > { %v9483_v56 = vadd.f32 %v9403_v10, %v973_v53 }
 0x3d3   : > { %v961_v57 = vmul.f32 %v8591_v47, %v960_v54 }
 0x3d4   : > { %7745 = vmatmul.msk.f32.gmra.mxu1 %vm714_vm14, %v9483_v56  ;;  %7749 = vmatmul.msk.f32.gmra.mxu2 %vm714_vm14, %v9483_v56 }
 0x3d5   : > { %v965_v59 = vsel %vm964_vm8, %v8591_v47, %v961_v57  ;;  %7753 = vmatmul.msk.f32.gmra.mxu3 %vm714_vm14, %v9483_v56  ;;  %7769 = vmatmul.msk.f32.gmra.mxu0 %vm714_vm14, %v9483_v56 }
 0x3d6   : > { %v969_v60 = vmul.f32 %v965_v59, %v9323_v28  ;;  %v860_v28 = vld [vmem:[%s12601_s7 + $0x70] sm:$0xff] }
 0x3d7   : > { %1208 = vmatpush.msra.mxu1 %v860_v28 }
 0x3d8   : > { %v974_v61 = vmul.f32 %v9398_v6, %v969_v60  ;;  %v858_v6 = vld [vmem:[%s12601_s7 + $0x60] sm:$0xff] }
 0x3d9   : > { %1209 = vmatpush.msra.mxu1 %v859_v4 }
 0x3da   : > { %v9499_v62 = vadd.f32 %v9403_v10, %v974_v61  ;;  %v866_v10 = vld [vmem:[%s12602_s8 + $0x20] sm:$0xff] }
 0x3db   : > { %1210 = vmatpush.msra.mxu1 %v858_v6  ;;  %1268 = vmatpush.msra.mxu3 %v866_v10 }
 0x3dc   : > { %7746 = vmatmul.msk.f32.gmra.mxu1 %vm714_vm14, %v9499_v62  ;;  %7750 = vmatmul.msk.f32.gmra.mxu2 %vm714_vm14, %v9499_v62 }
 0x3dd   : > { %7754 = vmatmul.msk.f32.gmra.mxu3 %vm714_vm14, %v9499_v62  ;;  %7770 = vmatmul.msk.f32.gmra.mxu0 %vm714_vm14, %v9499_v62 }
 0x3e4   : > { %7755 = vmatmul.msk.f32.vlgmr.msrb.gmra.mxu1 %vm714_vm14, %v9440_v33  ;;  %7759 = vmatmul.msk.f32.vlgmr.msrb.gmra.mxu2 %vm714_vm14, %v9440_v33 }
 0x3e5   : > { %7763 = vmatmul.msk.f32.vlgmr.msrb.gmra.mxu3 %vm714_vm14, %v9440_v33  ;;  %7783 = vmatmul.msk.f32.vlgmr.msra.gmra.mxu0 %vm714_vm14, %v9440_v33 }
 0x3e6   : > { %1323 = vmatpush.msrb.mxu1 %v877_v11 }
 0x3e8   : > { %1324 = vmatpush.msrb.mxu1 %v876_v14 }
 0x3ea   : > { %1325 = vmatpush.msrb.mxu1 %v875_v15 }
 0x3ec   : > { %7756 = vmatmul.msk.f32.gmra.mxu1 %vm714_vm14, %v9469_v48  ;;  %7760 = vmatmul.msk.f32.gmra.mxu2 %vm714_vm14, %v9469_v48 }
 0x3ed   : > { %7764 = vmatmul.msk.f32.gmra.mxu3 %vm714_vm14, %v9469_v48  ;;  %7784 = vmatmul.msk.f32.gmra.mxu0 %vm714_vm14, %v9469_v48 }
 0x3ee   : > { %1326 = vmatpush.msrb.mxu1 %v874_v12  ;;  %v820_v12 = vld [vmem:[%s12629_s0] sm:$0xff] }
 0x3f4   : > { %7757 = vmatmul.msk.f32.gmra.mxu1 %vm714_vm14, %v9483_v56  ;;  %7761 = vmatmul.msk.f32.gmra.mxu2 %vm714_vm14, %v9483_v56 }
 0x3f5   : > { %7765 = vmatmul.msk.f32.gmra.mxu3 %vm714_vm14, %v9483_v56  ;;  %7785 = vmatmul.msk.f32.gmra.mxu0 %vm714_vm14, %v9483_v56 }
 0x3fc   : > { %7758 = vmatmul.msk.f32.gmra.mxu1 %vm714_vm14, %v9499_v62  ;;  %7762 = vmatmul.msk.f32.gmra.mxu2 %vm714_vm14, %v9499_v62 }
 0x3fd   : > { %7766 = vmatmul.msk.f32.gmra.mxu3 %vm714_vm14, %v9499_v62  ;;  %7786 = vmatmul.msk.f32.gmra.mxu0 %vm714_vm14, %v9499_v62 }
 0x404   : > { %7771 = vmatmul.msk.f32.vlgmr.msra.gmra.mxu1 %vm714_vm14, %v9440_v33  ;;  %7775 = vmatmul.msk.f32.vlgmr.msra.gmra.mxu2 %vm714_vm14, %v9440_v33 }
 0x405   : > { %7779 = vmatmul.msk.f32.vlgmr.msra.gmra.mxu3 %vm714_vm14, %v9440_v33 }
 0x40c   : > { %7772 = vmatmul.msk.f32.gmra.mxu1 %vm714_vm14, %v9469_v48  ;;  %7776 = vmatmul.msk.f32.gmra.mxu2 %vm714_vm14, %v9469_v48 }
 0x40d   : > { %7780 = vmatmul.msk.f32.gmra.mxu3 %vm714_vm14, %v9469_v48 }
 0x414   : > { %7773 = vmatmul.msk.f32.gmra.mxu1 %vm714_vm14, %v9483_v56  ;;  %7777 = vmatmul.msk.f32.gmra.mxu2 %vm714_vm14, %v9483_v56 }
 0x415   : > { %7781 = vmatmul.msk.f32.gmra.mxu3 %vm714_vm14, %v9483_v56 }
 0x41c   : > { %7774 = vmatmul.msk.f32.gmra.mxu1 %vm714_vm14, %v9499_v62  ;;  %7778 = vmatmul.msk.f32.gmra.mxu2 %vm714_vm14, %v9499_v62 }
 0x41d   : > { %7782 = vmatmul.msk.f32.gmra.mxu3 %vm714_vm14, %v9499_v62 }
 0x424   : > { %7787 = vmatmul.msk.f32.vlgmr.msrb.gmra.mxu1 %vm714_vm14, %v9440_v33 }
 0x42c   : > { %7788 = vmatmul.msk.f32.gmra.mxu1 %vm714_vm14, %v9469_v48 }
 0x434   : > { %7789 = vmatmul.msk.f32.gmra.mxu1 %vm714_vm14, %v9483_v56 }
 0x43c   : > { %7790 = vmatmul.msk.f32.gmra.mxu1 %vm714_vm14, %v9499_v62 }
 0x440   : > { %v1009_v16 = vpop.f32.mrf.mxu1 }
 0x441   : > { %v1183_v13 = vpop.f32.mrf.mxu0 }
 0x446   : > { %v1038_v18 = vpop.f32.mrf.mxu2 }
 0x447   : > { %v1067_v21 = vpop.f32.mrf.mxu3 }
 0x449   : > { %v1012_v22 = vpop.f32.mrf.mxu1 }
 0x44a   : > { %v1186_v23 = vpop.f32.mrf.mxu0 }
 0x44f   : > { %v1041_v25 = vpop.f32.mrf.mxu2 }
 0x450   : > { %v1070_v26 = vpop.f32.mrf.mxu3 }
 0x451   : > { %v1015_v20 = vpop.f32.mrf.mxu1 }
 0x452   : > { %v1189_v27 = vpop.f32.mrf.mxu0 }
 0x457   : > { %v1044_v31 = vpop.f32.mrf.mxu2 }
 0x458   : > { %v1073_v32 = vpop.f32.mrf.mxu3 }
 0x459   : > { %v9618_v33 = vpop.f32.mrf.mxu1 }
 0x45a   : > { %v1192_v34 = vpop.f32.mrf.mxu0 }
 0x45b   : > { %7807 = vmatpush.xpose.msk.msrb.mxu0 %vm1340_vm9, %v1192_v34 }
 0x45f   : > { %7808 = vmatpush.xpose.msk.msrb.mxu0 %vm1340_vm9, %v1189_v27  ;;  %v9622_v35 = vpop.f32.mrf.mxu2 }
 0x460   : > { %v1076_v36 = vpop.f32.mrf.mxu3 }
 0x461   : > { %v9624_v37 = vpop.f32.mrf.mxu1 }
 0x462   : > { %v1299_v38 = vpop.f32.mrf.mxu0 }
 0x463   : > { %7809 = vmatpush.xpose.msk.msrb.mxu0 %vm1340_vm9, %v1186_v23 }
 0x467   : > { %7810 = vmatpush.xpose.msk.msrb.mxu0 %vm1340_vm9, %v1183_v13  ;;  %v1125_v30 = vpop.f32.mrf.mxu2 }
 0x468   : > { %v1154_v39 = vpop.f32.mrf.mxu3 }
 0x469   : > { %v9628_v19 = vpop.f32.mrf.mxu1 }
 0x46a   : > { %v1302_v41 = vpop.f32.mrf.mxu0  ;;  %7811 = vmatmul.msk.f32.vlgmr.msrb.gmra.mxu0 %vm1340_vm9, %v1067_v21 }
 0x46f   : > { %v1128_v42 = vpop.f32.mrf.mxu2 }
 0x470   : > { %v1157_v43 = vpop.f32.mrf.mxu3 }
 0x471   : > { %v1102_v44 = vpop.f32.mrf.mxu1 }
 0x472   : > { %v1305_v45 = vpop.f32.mrf.mxu0  ;;  %7812 = vmatmul.msk.f32.gmra.mxu0 %vm1340_vm9, %v1070_v26 }
 0x477   : > { %v1131_v46 = vpop.f32.mrf.mxu2 }
 0x478   : > { %v1160_v47 = vpop.f32.mrf.mxu3 }
 0x479   : > { %v1105_v48 = vpop.f32.mrf.mxu1 }
 0x47a   : > { %v1308_v40 = vpop.f32.mrf.mxu0  ;;  %7813 = vmatmul.msk.f32.gmra.mxu0 %vm1340_vm9, %v1073_v32 }
 0x47b   : > { %1867 = vmatpush.msra.mxu0 %v1308_v40 }
 0x47d   : > { %1868 = vmatpush.msra.mxu0 %v1305_v45 }
 0x47f   : > { %1869 = vmatpush.msra.mxu0 %v1302_v41  ;;  %v1134_v49 = vpop.f32.mrf.mxu2 }
 0x480   : > { %v1163_v17 = vpop.f32.mrf.mxu3  ;;  %7791 = vmatpush.xpose.msk.msrb.mxu2 %vm1340_vm9, %v1134_v49 }
 0x481   : > { %7799 = vmatpush.xpose.msk.msrb.mxu3 %vm1340_vm9, %v1163_v17  ;;  %1870 = vmatpush.msra.mxu0 %v1299_v38  ;;  %v1212_v50 = vpop.f32.mrf.mxu1 }
 0x482   : > { %7814 = vmatmul.msk.f32.gmra.mxu0 %vm1340_vm9, %v1076_v36 }
 0x484   : > { %7792 = vmatpush.xpose.msk.msrb.mxu2 %vm1340_vm9, %v1131_v46 }
 0x485   : > { %7800 = vmatpush.xpose.msk.msrb.mxu3 %vm1340_vm9, %v1160_v47 }
 0x487   : > { %v1241_v51 = vpop.f32.mrf.mxu2 }
 0x488   : > { %v1270_v52 = vpop.f32.mrf.mxu3  ;;  %7793 = vmatpush.xpose.msk.msrb.mxu2 %vm1340_vm9, %v1128_v42 }
 0x489   : > { %7801 = vmatpush.xpose.msk.msrb.mxu3 %vm1340_vm9, %v1157_v43  ;;  %v1215_v53 = vpop.f32.mrf.mxu1 }
 0x48c   : > { %7794 = vmatpush.xpose.msk.msrb.mxu2 %vm1340_vm9, %v1125_v30 }
 0x48d   : > { %7802 = vmatpush.xpose.msk.msrb.mxu3 %vm1340_vm9, %v1154_v39  ;;  %v822_v39 = vld [vmem:[%s12629_s0 + $0x10] sm:$0xff] }
 0x48f   : > { %v1244_v54 = vpop.f32.mrf.mxu2  ;;  %7795 = vmatmul.msk.f32.vlgmr.msrb.gmra.mxu2 %vm1340_vm9, %v1009_v16 }
 0x490   : > { %v1273_v56 = vpop.f32.mrf.mxu3  ;;  %7803 = vmatmul.msk.f32.vlgmr.msrb.gmra.mxu3 %vm1340_vm9, %v1038_v18 }
 0x491   : > { %v1218_v57 = vpop.f32.mrf.mxu1 }
 0x497   : > { %v1247_v59 = vpop.f32.mrf.mxu2  ;;  %7796 = vmatmul.msk.f32.gmra.mxu2 %vm1340_vm9, %v1012_v22 }
 0x498   : > { %v1276_v24 = vpop.f32.mrf.mxu3  ;;  %7804 = vmatmul.msk.f32.gmra.mxu3 %vm1340_vm9, %v1041_v25 }
 0x499   : > { %v1221_v60 = vpop.f32.mrf.mxu1 }
 0x49a   : > { %7815 = vmatpush.xpose.msk.msra.mxu1 %vm1340_vm9, %v1221_v60 }
 0x49e   : > { %7816 = vmatpush.xpose.msk.msra.mxu1 %vm1340_vm9, %v1218_v57 }
 0x49f   : > { %v1250_v61 = vpop.f32.mrf.mxu2  ;;  %7797 = vmatmul.msk.f32.gmra.mxu2 %vm1340_vm9, %v1015_v20 }
 0x4a0   : > { %v1279_v62 = vpop.f32.mrf.mxu3  ;;  %7805 = vmatmul.msk.f32.gmra.mxu3 %vm1340_vm9, %v1044_v31  ;;  %1785 = vmatpush.msra.mxu2 %v1250_v61 }
 0x4a1   : > { %1826 = vmatpush.msra.mxu3 %v1279_v62  ;;  %v1328_v28 = vpop.f32.mrf.mxu1 }
 0x4a2   : > { %7817 = vmatpush.xpose.msk.msra.mxu1 %vm1340_vm9, %v1215_v53  ;;  %1786 = vmatpush.msra.mxu2 %v1247_v59 }
 0x4a3   : > { %1827 = vmatpush.msra.mxu3 %v1276_v24 }
 0x4a4   : > { %1787 = vmatpush.msra.mxu2 %v1244_v54 }
 0x4a5   : > { %1828 = vmatpush.msra.mxu3 %v1273_v56 }
 0x4a6   : > { %7818 = vmatpush.xpose.msk.msra.mxu1 %vm1340_vm9, %v1212_v50  ;;  %1788 = vmatpush.msra.mxu2 %v1241_v51  ;;  %v823_v51 = vld [vmem:[%s12629_s0 + $0x18] sm:$0xff] }
 0x4a7   : > { %1829 = vmatpush.msra.mxu3 %v1270_v52  ;;  %7798 = vmatmul.msk.f32.gmra.mxu2 %vm1340_vm9, %v9618_v33 }
 0x4a8   : > { %7806 = vmatmul.msk.f32.gmra.mxu3 %vm1340_vm9, %v9622_v35 }
 0x4a9   : > { %v1331_v63 = vpop.f32.mrf.mxu1  ;;  %7819 = vmatmul.msk.f32.vlgmr.msra.gmra.mxu1 %vm1340_vm9, %v9624_v37 }
 0x4b1   : > { %v1334_v0 = vpop.f32.mrf.mxu1  ;;  %7820 = vmatmul.msk.f32.gmra.mxu1 %vm1340_vm9, %v9628_v19 }
 0x4b9   : > { %v1337_v1 = vpop.f32.mrf.mxu1  ;;  %7821 = vmatmul.msk.f32.gmra.mxu1 %vm1340_vm9, %v1102_v44 }
 0x4ba   : > { %1908 = vmatpush.msrb.mxu1 %v1337_v1 }
 0x4bc   : > { %1909 = vmatpush.msrb.mxu1 %v1334_v0 }
 0x4be   : > { %1910 = vmatpush.msrb.mxu1 %v1331_v63 }
 0x4c0   : > { %1911 = vmatpush.msrb.mxu1 %v1328_v28 }
 0x4c1   : > { %7822 = vmatmul.msk.f32.gmra.mxu1 %vm1340_vm9, %v1105_v48 }
 0x4e7   : > { %v1488_v3 = vpop.f32.mrf.mxu0 }
 0x4e8   : > { %v1561_v21 = vmul.f32 0.35355338, %v1488_v3 }
 0x4ea   : > { %v9680_v27 = vadd.f32 %v1561_v21, %v820_v12 }
 0x4ec   : > { %v1609_v34 = vsel %vm714_vm14, %v9680_v27, -inf }
 0x4ef   : > { %v1491_v4 = vpop.f32.mrf.mxu0 }
 0x4f0   : > { %v1562_v6 = vmul.f32 0.35355338, %v1491_v4 }
 0x4f2   : > { %v9665_v8 = vadd.f32 %v1562_v6, %v821_v5 }
 0x4f4   : > { %v1612_v7 = vsel %vm714_vm14, %v9665_v8, -inf }
 0x4f5   : > { %1613 = vmax.xlane.f32.xlu2 %v1612_v7 }
 0x4f7   : > { %v1494_v41 = vpop.f32.mrf.mxu0 }
 0x4f8   : > { %v1563_v59 = vmul.f32 0.35355338, %v1494_v41 }
 0x4fa   : > { %v9722_v63 = vadd.f32 %v1563_v59, %v822_v39 }
 0x4fc   : > { %v1615_v4 = vsel %vm714_vm14, %v9722_v63, -inf }
 0x4ff   : > { %v1497_v24 = vpop.f32.mrf.mxu0 }
 0x500   : > { %v1564_v61 = vmul.f32 0.35355338, %v1497_v24 }
 0x502   : > { %v9724_v3 = vadd.f32 %v1564_v61, %v823_v51 }
 0x504   : > { %v1618_v6 = vsel %vm714_vm14, %v9724_v3, -inf }
 0x512   : > { %v1382_v10 = vpop.f32.mrf.mxu2 }
 0x513   : > { %v1553_v11 = vmul.f32 0.35355338, %v1382_v10  ;;  %v1435_v14 = vpop.f32.mrf.mxu3 }
 0x514   : > { %v1557_v15 = vmul.f32 0.35355338, %v1435_v14 }
 0x515   : > { %v9672_v16 = vadd.f32 %v1553_v11, %v820_v12 }
 0x516   : > { %v9674_v13 = vadd.f32 %v1557_v15, %v820_v12 }
 0x517   : > { %v1585_v18 = vsel %vm714_vm14, %v9672_v16, -inf }
 0x518   : > { %v1597_v22 = vsel %vm714_vm14, %v9674_v13, -inf  ;;  %1586 = vmax.xlane.f32.xlu0 %v1585_v18 }
 0x519   : > { %1598 = vmax.xlane.f32.xlu1 %v1597_v22 }
 0x51a   : > { %v1385_v23 = vpop.f32.mrf.mxu2 }
 0x51b   : > { %v1554_v25 = vmul.f32 0.35355338, %v1385_v23  ;;  %v1438_v26 = vpop.f32.mrf.mxu3 }
 0x51c   : > { %v1558_v20 = vmul.f32 0.35355338, %v1438_v26 }
 0x51d   : > { %v9682_v31 = vadd.f32 %v1554_v25, %v821_v5 }
 0x51e   : > { %v9684_v32 = vadd.f32 %v1558_v20, %v821_v5 }
 0x51f   : > { %v1588_v33 = vsel %vm714_vm14, %v9682_v31, -inf }
 0x520   : > { %v1600_v35 = vsel %vm714_vm14, %v9684_v32, -inf  ;;  %1589 = vmax.xlane.f32.xlu2 %v1588_v33 }
 0x521   : > { %1610 = vmax.xlane.f32.xlu1 %v1609_v34  ;;  %1601 = vmax.xlane.f32.xlu0 %v1600_v35 }
 0x522   : > { %v1388_v36 = vpop.f32.mrf.mxu2 }
 0x523   : > { %v1555_v37 = vmul.f32 0.35355338, %v1388_v36  ;;  %v1441_v38 = vpop.f32.mrf.mxu3 }
 0x524   : > { %v1559_v30 = vmul.f32 0.35355338, %v1441_v38 }
 0x525   : > { %v9695_v19 = vadd.f32 %v1555_v37, %v822_v39 }
 0x526   : > { %v1541_v42 = vpop.f32.mrf.mxu1  ;;  %v9697_v43 = vadd.f32 %v1559_v30, %v822_v39 }
 0x527   : > { %v1565_v44 = vmul.f32 0.35355338, %v1541_v42  ;;  %v1591_v45 = vsel %vm714_vm14, %v9695_v19, -inf }
 0x528   : > { %v1603_v46 = vsel %vm714_vm14, %v9697_v43, -inf  ;;  %1592 = vmax.xlane.f32.xlu2 %v1591_v45 }
 0x529   : > { %1604 = vmax.xlane.f32.xlu0 %v1603_v46  ;;  %v9703_v47 = vadd.f32 %v1565_v44, %v820_v12 }
 0x52a   : > { %v1391_v48 = vpop.f32.mrf.mxu2 }
 0x52b   : > { %v1556_v40 = vmul.f32 0.35355338, %v1391_v48  ;;  %v1444_v49 = vpop.f32.mrf.mxu3  ;;  %v1621_v17 = vsel %vm714_vm14, %v9703_v47, -inf }
 0x52c   : > { %v1560_v50 = vmul.f32 0.35355338, %v1444_v49  ;;  %1622 = vmax.xlane.f32.xlu1 %v1621_v17 }
 0x52d   : > { %v9710_v52 = vadd.f32 %v1556_v40, %v823_v51 }
 0x52e   : > { %v1544_v53 = vpop.f32.mrf.mxu1  ;;  %v9714_v57 = vadd.f32 %v1560_v50, %v823_v51 }
 0x52f   : > { %v1566_v54 = vmul.f32 0.35355338, %v1544_v53  ;;  %v1594_v56 = vsel %vm714_vm14, %v9710_v52, -inf }
 0x530   : > { %v1606_v62 = vsel %vm714_vm14, %v9714_v57, -inf }
 0x531   : > { %1595 = vmax.xlane.f32.xlu0 %v1594_v56  ;;  %v9716_v60 = vadd.f32 %v1566_v54, %v821_v5 }
 0x533   : > { %v1624_v28 = vsel %vm714_vm14, %v9716_v60, -inf }
 0x534   : > { %1607 = vmax.xlane.f32.xlu1 %v1606_v62  ;;  %1625 = vmax.xlane.f32.xlu2 %v1624_v28 }
 0x536   : > { %v1547_v0 = vpop.f32.mrf.mxu1 }
 0x537   : > { %v1567_v1 = vmul.f32 0.35355338, %v1547_v0 }
 0x539   : > { %1616 = vmax.xlane.f32.xlu0 %v1615_v4  ;;  %v9728_v5 = vadd.f32 %v1567_v1, %v822_v39 }
 0x53b   : > { %v1627_v7 = vsel %vm714_vm14, %v9728_v5, -inf }
 0x53c   : > { %1619 = vmax.xlane.f32.xlu2 %v1618_v6  ;;  %1628 = vmax.xlane.f32.xlu1 %v1627_v7 }
 0x53e   : > { %v1550_v10 = vpop.f32.mrf.mxu1 }
 0x53f   : > { %v1568_v11 = vmul.f32 0.35355338, %v1550_v10 }
 0x541   : > { %v9734_v14 = vadd.f32 %v1568_v11, %v823_v51 }
 0x543   : > { %v1630_v15 = vsel %vm714_vm14, %v9734_v14, -inf }
 0x544   : > { %1631 = vmax.xlane.f32.xlu0 %v1630_v15 }
 0x568   : > { %v1614_v12 = vpop.xlane.xlu2 %1613 }
 0x569   : > { %v1642_v18 = vsub.f32 %v9665_v8, %v1614_v12 }
 0x56b   : > { %v1667_v21 = vmul.f32 1.442695, %v1642_v18 }
 0x56d   : > { %8592 = vpow2.f32 %v1667_v21 }
 0x573   : > { %v9739_v22 = vpop.eup %8592 }
 0x574   : > { %v1708_v23 = vsel %vm714_vm14, %v9739_v22, 0.0 }
 0x575   : > { %1709 = vadd.xlane.f32.xlu0 %v1708_v23 }
 0x58b   : > { %v1587_v25 = vpop.xlane.xlu0 %1586 }
 0x58c   : > { %v1599_v26 = vpop.xlane.xlu1 %1598  ;;  %v1633_v20 = vsub.f32 %v9672_v16, %v1587_v25 }
 0x58d   : > { %v1637_v33 = vsub.f32 %v9674_v13, %v1599_v26 }
 0x58e   : > { %v1649_v34 = vmul.f32 1.442695, %v1633_v20 }
 0x58f   : > { %v1657_v35 = vmul.f32 1.442695, %v1637_v33 }
 0x590   : > { %8594 = vpow2.f32 %v1649_v34 }
 0x591   : > { %8596 = vpow2.f32 %v1657_v35 }
 0x593   : > { %v1590_v36 = vpop.xlane.xlu2 %1589 }
 0x594   : > { %v1611_v8 = vpop.xlane.xlu1 %1610  ;;  %v1602_v37 = vpop.xlane.xlu0 %1601  ;;  %v1634_v38 = vsub.f32 %v9682_v31, %v1590_v36 }
 0x595   : > { %v1641_v30 = vsub.f32 %v9680_v27, %v1611_v8  ;;  %v1638_v39 = vsub.f32 %v9684_v32, %v1602_v37 }
 0x596   : > { %v9748_v41 = vpop.eup %8594  ;;  %v1651_v42 = vmul.f32 1.442695, %v1634_v38 }
 0x597   : > { %v9750_v44 = vpop.eup %8596  ;;  %v1665_v16 = vmul.f32 1.442695, %v1641_v30  ;;  %v1659_v13 = vmul.f32 1.442695, %v1638_v39  ;;  %v1681_v45 = vsel %vm714_vm14, %v9748_v41, 0.0 }
 0x598   : > { %8598 = vpow2.f32 %v1651_v42  ;;  %v1693_v46 = vsel %vm714_vm14, %v9750_v44, 0.0  ;;  %1682 = vadd.xlane.f32.xlu1 %v1681_v45 }
 0x599   : > { %8600 = vpow2.f32 %v1665_v16  ;;  %1694 = vadd.xlane.f32.xlu2 %v1693_v46 }
 0x59a   : > { %8602 = vpow2.f32 %v1659_v13 }
 0x59b   : > { %v1593_v27 = vpop.xlane.xlu2 %1592 }
 0x59c   : > { %v1605_v31 = vpop.xlane.xlu0 %1604  ;;  %v1635_v32 = vsub.f32 %v9695_v19, %v1593_v27 }
 0x59d   : > { %v1639_v48 = vsub.f32 %v9697_v43, %v1605_v31 }
 0x59e   : > { %v9758_v40 = vpop.eup %8598  ;;  %v1653_v49 = vmul.f32 1.442695, %v1635_v32 }
 0x59f   : > { %v9760_v17 = vpop.eup %8600  ;;  %v1661_v50 = vmul.f32 1.442695, %v1639_v48  ;;  %v1623_v51 = vpop.xlane.xlu1 %1622  ;;  %v1684_v53 = vsel %vm714_vm14, %v9758_v40, 0.0 }
 0x5a0   : > { %v9764_v54 = vpop.eup %8602  ;;  %8604 = vpow2.f32 %v1653_v49  ;;  %v1645_v56 = vsub.f32 %v9703_v47, %v1623_v51  ;;  %v1705_v19 = vsel %vm714_vm14, %v9760_v17, 0.0  ;;  %1685 = vadd.xlane.f32.xlu0 %v1684_v53 }
 0x5a1   : > { %8606 = vpow2.f32 %v1661_v50  ;;  %1706 = vadd.xlane.f32.xlu2 %v1705_v19  ;;  %v1696_v43 = vsel %vm714_vm14, %v9764_v54, 0.0 }
 0x5a2   : > { %v1673_v59 = vmul.f32 1.442695, %v1645_v56  ;;  %1697 = vadd.xlane.f32.xlu1 %v1696_v43 }
 0x5a4   : > { %8608 = vpow2.f32 %v1673_v59  ;;  %v1596_v24 = vpop.xlane.xlu0 %1595 }
 0x5a5   : > { %v1636_v61 = vsub.f32 %v9710_v52, %v1596_v24 }
 0x5a6   : > { %v9772_v62 = vpop.eup %8604 }
 0x5a7   : > { %v9774_v28 = vpop.eup %8606  ;;  %v1655_v47 = vmul.f32 1.442695, %v1636_v61  ;;  %v1608_v0 = vpop.xlane.xlu1 %1607  ;;  %v1687_v4 = vsel %vm714_vm14, %v9772_v62, 0.0 }
 0x5a8   : > { %v1626_v1 = vpop.xlane.xlu2 %1625  ;;  %v1640_v6 = vsub.f32 %v9714_v57, %v1608_v0  ;;  %v1699_v10 = vsel %vm714_vm14, %v9774_v28, 0.0  ;;  %1688 = vadd.xlane.f32.xlu0 %v1687_v4 }
 0x5a9   : > { %v1646_v7 = vsub.f32 %v9716_v60, %v1626_v1  ;;  %8610 = vpow2.f32 %v1655_v47 }
 0x5aa   : > { %v9782_v52 = vpop.eup %8608  ;;  %v1663_v11 = vmul.f32 1.442695, %v1640_v6  ;;  %1700 = vadd.xlane.f32.xlu1 %v1699_v10 }
 0x5ab   : > { %v1675_v15 = vmul.f32 1.442695, %v1646_v7  ;;  %v1717_v12 = vsel %vm714_vm14, %v9782_v52, 0.0 }
 0x5ac   : > { %8612 = vpow2.f32 %v1663_v11  ;;  %v1617_v18 = vpop.xlane.xlu0 %1616  ;;  %1718 = vadd.xlane.f32.xlu2 %v1717_v12 }
 0x5ad   : > { %8614 = vpow2.f32 %v1675_v15  ;;  %v1643_v57 = vsub.f32 %v9722_v63, %v1617_v18 }
 0x5af   : > { %v9787_v60 = vpop.eup %8610  ;;  %v1669_v21 = vmul.f32 1.442695, %v1643_v57  ;;  %v1629_v25 = vpop.xlane.xlu1 %1628 }
 0x5b0   : > { %v1620_v23 = vpop.xlane.xlu2 %1619  ;;  %v1647_v20 = vsub.f32 %v9728_v5, %v1629_v25  ;;  %v1690_v33 = vsel %vm714_vm14, %v9787_v60, 0.0 }
 0x5b1   : > { %v1644_v26 = vsub.f32 %v9724_v3, %v1620_v23  ;;  %8616 = vpow2.f32 %v1669_v21 }
 0x5b2   : > { %v9793_v34 = vpop.eup %8612  ;;  %v1677_v36 = vmul.f32 1.442695, %v1647_v20  ;;  %1691 = vadd.xlane.f32.xlu1 %v1690_v33 }
 0x5b3   : > { %v1671_v35 = vmul.f32 1.442695, %v1644_v26  ;;  %v9795_v8 = vpop.eup %8614  ;;  %v1702_v63 = vsel %vm714_vm14, %v9793_v34, 0.0 }
 0x5b4   : > { %1703 = vadd.xlane.f32.xlu2 %v1702_v63  ;;  %v1720_v3 = vsel %vm714_vm14, %v9795_v8, 0.0 }
 0x5b5   : > { %8618 = vpow2.f32 %v1671_v35  ;;  %1721 = vadd.xlane.f32.xlu0 %v1720_v3 }
 0x5b6   : > { %8620 = vpow2.f32 %v1677_v36 }
 0x5b7   : > { %v9801_v5 = vpop.eup %8616  ;;  %v1632_v37 = vpop.xlane.xlu0 %1631 }
 0x5b8   : > { %v1648_v38 = vsub.f32 %v9734_v14, %v1632_v37  ;;  %v1711_v30 = vsel %vm714_vm14, %v9801_v5, 0.0 }
 0x5ba   : > { %v1679_v42 = vmul.f32 1.442695, %v1648_v38  ;;  %1712 = vadd.xlane.f32.xlu1 %v1711_v30 }
 0x5bb   : > { %v9806_v39 = vpop.eup %8618 }
 0x5bc   : > { %v9808_v16 = vpop.eup %8620  ;;  %v1714_v13 = vsel %vm714_vm14, %v9806_v39, 0.0  ;;  %8622 = vpow2.f32 %v1679_v42 }
 0x5bd   : > { %v1723_v45 = vsel %vm714_vm14, %v9808_v16, 0.0  ;;  %1715 = vadd.xlane.f32.xlu0 %v1714_v13 }
 0x5be   : > { %1724 = vadd.xlane.f32.xlu2 %v1723_v45 }
 0x5c2   : > { %v9814_v46 = vpop.eup %8622 }
 0x5c3   : > { %v1726_v14 = vsel %vm714_vm14, %v9814_v46, 0.0 }
 0x5c4   : > { %1727 = vadd.xlane.f32.xlu1 %v1726_v14 }
 0x5e8   : > { %v1710_v27 = vpop.xlane.xlu0 %1709 }
 0x60b   : > { %v1683_v31 = vpop.xlane.xlu1 %1682 }
 0x60c   : > { %v1695_v32 = vpop.xlane.xlu2 %1694  ;;  %8624 = vrcp.f32 %v1683_v31 }
 0x60d   : > { %8626 = vrcp.f32 %v1695_v32 }
 0x612   : > { %v8625_v48 = vpop.eup %8624 }
 0x613   : > { %v8627_v49 = vpop.eup %8626  ;;  %v1745_v50 = vmul.f32 %v8625_v48, %v9748_v41  ;;  %v1686_v51 = vpop.xlane.xlu0 %1685 }
 0x614   : > { %v1749_v53 = vmul.f32 %v8627_v49, %v9750_v44  ;;  %v1707_v56 = vpop.xlane.xlu2 %1706  ;;  %8628 = vrcp.f32 %v1686_v51 }
 0x615   : > { %8630 = vrcp.f32 %v1707_v56  ;;  %v1698_v19 = vpop.xlane.xlu1 %1697  ;;  %7823 = vmatmul.msk.f32.vlgmr.msra.gmra.mxu2 %vm714_vm14, %v1745_v50 }
 0x616   : > { %8632 = vrcp.f32 %v1698_v19  ;;  %7827 = vmatmul.msk.f32.vlgmr.msra.gmra.mxu3 %vm714_vm14, %v1749_v53 }
 0x617   : > { %8634 = vrcp.f32 %v1710_v27 }
 0x61a   : > { %v8629_v43 = vpop.eup %8628 }
 0x61b   : > { %v8631_v59 = vpop.eup %8630  ;;  %v1689_v24 = vpop.xlane.xlu0 %1688  ;;  %v1746_v61 = vmul.f32 %v8629_v43, %v9758_v40  ;;  %v878_v40 = vld [vmem:[%s12603_s9] sm:$0xff] }
 0x61c   : > { %v8633_v47 = vpop.eup %8632  ;;  %v1753_v41 = vmul.f32 %v8631_v59, %v9760_v17  ;;  %8636 = vrcp.f32 %v1689_v24  ;;  %v879_v17 = vld [vmem:[%s12603_s9 + $0x8] sm:$0xff]  ;;  %1952 = vmatpush.msrb.mxu2 %v878_v40 }
 0x61d   : > { %v1701_v44 = vpop.xlane.xlu1 %1700  ;;  %7824 = vmatmul.msk.f32.gmra.mxu2 %vm714_vm14, %v1746_v61  ;;  %v1750_v0 = vmul.f32 %v8633_v47, %v9764_v54  ;;  %v8635_v4 = vpop.eup %8634  ;;  %v880_v54 = vld [vmem:[%s12603_s9 + $0x10] sm:$0xff]  ;;  %1993 = vmatpush.msrb.mxu3 %v879_v17 }
 0x61e   : > { %8638 = vrcp.f32 %v1701_v44  ;;  %7831 = vmatmul.msk.f32.vlgmr.msra.gmra.mxu0 %vm714_vm14, %v1753_v41  ;;  %v1754_v11 = vmul.f32 %v8635_v4, %v9739_v22 }
 0x61f   : > { %7828 = vmatmul.msk.f32.gmra.mxu3 %vm714_vm14, %v1750_v0  ;;  %v1719_v1 = vpop.xlane.xlu2 %1718  ;;  %2034 = vmatpush.msrb.mxu0 %v880_v54 }
 0x620   : > { %8640 = vrcp.f32 %v1719_v1 }
 0x622   : > { %v8637_v6 = vpop.eup %8636 }
 0x623   : > { %v1747_v7 = vmul.f32 %v8637_v6, %v9772_v62 }
 0x624   : > { %v8639_v10 = vpop.eup %8638 }
 0x625   : > { %v1692_v15 = vpop.xlane.xlu1 %1691  ;;  %7825 = vmatmul.msk.f32.gmra.mxu2 %vm714_vm14, %v1747_v7  ;;  %v1751_v12 = vmul.f32 %v8639_v10, %v9774_v28 }
 0x626   : > { %v8641_v18 = vpop.eup %8640  ;;  %8642 = vrcp.f32 %v1692_v15  ;;  %7832 = vmatmul.msk.f32.gmra.mxu0 %vm714_vm14, %v1754_v11 }
 0x627   : > { %v1757_v57 = vmul.f32 %v8641_v18, %v9782_v52  ;;  %7829 = vmatmul.msk.f32.gmra.mxu3 %vm714_vm14, %v1751_v12  ;;  %v1704_v62 = vpop.xlane.xlu2 %1703 }
 0x628   : > { %8644 = vrcp.f32 %v1704_v62  ;;  %v1722_v21 = vpop.xlane.xlu0 %1721 }
 0x629   : > { %8646 = vrcp.f32 %v1722_v21  ;;  %7835 = vmatmul.msk.f32.vlgmr.msrb.gmra.mxu1 %vm714_vm14, %v1757_v57 }
 0x62c   : > { %v8643_v22 = vpop.eup %8642 }
 0x62d   : > { %v1713_v23 = vpop.xlane.xlu1 %1712  ;;  %v1748_v25 = vmul.f32 %v8643_v22, %v9787_v60 }
 0x62e   : > { %v8645_v26 = vpop.eup %8644  ;;  %8648 = vrcp.f32 %v1713_v23 }
 0x62f   : > { %v8647_v28 = vpop.eup %8646  ;;  %7826 = vmatmul.msk.f32.gmra.mxu2 %vm714_vm14, %v1748_v25  ;;  %v1752_v20 = vmul.f32 %v8645_v26, %v9793_v34 }
 0x630   : > { %v1758_v33 = vmul.f32 %v8647_v28, %v9795_v8  ;;  %v1716_v35 = vpop.xlane.xlu0 %1715 }
 0x631   : > { %v1725_v52 = vpop.xlane.xlu2 %1724  ;;  %7830 = vmatmul.msk.f32.gmra.mxu3 %vm714_vm14, %v1752_v20 }
 0x632   : > { %8650 = vrcp.f32 %v1725_v52  ;;  %7836 = vmatmul.msk.f32.gmra.mxu1 %vm714_vm14, %v1758_v33 }
 0x633   : > { %8652 = vrcp.f32 %v1716_v35 }
 0x634   : > { %v8649_v36 = vpop.eup %8648 }
 0x635   : > { %v1755_v60 = vmul.f32 %v8649_v36, %v9801_v5  ;;  %v881_v5 = vld [vmem:[%s12603_s9 + $0x18] sm:$0xff] }
 0x636   : > { %2075 = vmatpush.msra.mxu1 %v881_v5 }
 0x637   : > { %7833 = vmatmul.msk.f32.gmra.mxu0 %vm714_vm14, %v1755_v60  ;;  %v1728_v3 = vpop.xlane.xlu1 %1727 }
 0x638   : > { %v8651_v63 = vpop.eup %8650  ;;  %8654 = vrcp.f32 %v1728_v3 }
 0x639   : > { %v1759_v34 = vmul.f32 %v8651_v63, %v9808_v16  ;;  %v8653_v37 = vpop.eup %8652 }
 0x63a   : > { %v1756_v8 = vmul.f32 %v8653_v37, %v9806_v39 }
 0x63b   : > { %7837 = vmatmul.msk.f32.gmra.mxu1 %vm714_vm14, %v1759_v34 }
 0x63e   : > { %v8655_v38 = vpop.eup %8654 }
 0x63f   : > { %7834 = vmatmul.msk.f32.gmra.mxu0 %vm714_vm14, %v1756_v8  ;;  %v1760_v30 = vmul.f32 %v8655_v38, %v9814_v46 }
 0x643   : > { %7838 = vmatmul.msk.f32.gmra.mxu1 %vm714_vm14, %v1760_v30 }
 0x698   : > { %v1790_v42 = vpop.f32.mrf.mxu2 }
 0x699   : > { %v1831_v13 = vpop.f32.mrf.mxu3  ;;  %7839 = vmatmul.msk.f32.vlgmr.msrb.gmra.mxu2 %vm1340_vm9, %v1790_v42 }
 0x69a   : > { %7843 = vmatmul.msk.f32.vlgmr.msrb.gmra.mxu3 %vm1340_vm9, %v1831_v13 }
 0x69b   : > { %v1872_v16 = vpop.f32.mrf.mxu0 }
 0x69c   : > { %7847 = vmatmul.msk.f32.vlgmr.msrb.gmra.mxu0 %vm1340_vm9, %v1872_v16 }
 0x6a0   : > { %v1793_v39 = vpop.f32.mrf.mxu2 }
 0x6a1   : > { %7840 = vmatmul.msk.f32.gmra.mxu2 %vm1340_vm9, %v1793_v39 }
 0x6a2   : > { %v1834_v45 = vpop.f32.mrf.mxu3 }
 0x6a3   : > { %7844 = vmatmul.msk.f32.gmra.mxu3 %vm1340_vm9, %v1834_v45  ;;  %v1875_v46 = vpop.f32.mrf.mxu0 }
 0x6a4   : > { %7848 = vmatmul.msk.f32.gmra.mxu0 %vm1340_vm9, %v1875_v46 }
 0x6a6   : > { %v1913_v14 = vpop.f32.mrf.mxu1 }
 0x6a7   : > { %7851 = vmatmul.msk.f32.vlgmr.msra.gmra.mxu1 %vm1340_vm9, %v1913_v14 }
 0x6a8   : > { %v1796_v27 = vpop.f32.mrf.mxu2 }
 0x6a9   : > { %7841 = vmatmul.msk.f32.gmra.mxu2 %vm1340_vm9, %v1796_v27 }
 0x6aa   : > { %v1837_v31 = vpop.f32.mrf.mxu3 }
 0x6ab   : > { %7845 = vmatmul.msk.f32.gmra.mxu3 %vm1340_vm9, %v1837_v31 }
 0x6af   : > { %v1916_v32 = vpop.f32.mrf.mxu1 }
 0x6b0   : > { %7852 = vmatmul.msk.f32.gmra.mxu1 %vm1340_vm9, %v1916_v32 }
 0x6b2   : > { %v1799_v48 = vpop.f32.mrf.mxu2 }
 0x6b3   : > { %7842 = vmatmul.msk.f32.gmra.mxu2 %vm1340_vm9, %v1799_v48 }
 0x6b4   : > { %v1878_v49 = vpop.f32.mrf.mxu0  ;;  %v1840_v50 = vpop.f32.mrf.mxu3 }
 0x6b5   : > { %7849 = vmatmul.msk.f32.gmra.mxu0 %vm1340_vm9, %v1878_v49  ;;  %7846 = vmatmul.msk.f32.gmra.mxu3 %vm1340_vm9, %v1840_v50 }
 0x6b8   : > { %v1919_v51 = vpop.f32.mrf.mxu1 }
 0x6b9   : > { %7853 = vmatmul.msk.f32.gmra.mxu1 %vm1340_vm9, %v1919_v51 }
 0x6bc   : > { %v1881_v53 = vpop.f32.mrf.mxu0 }
 0x6bd   : > { %7850 = vmatmul.msk.f32.gmra.mxu0 %vm1340_vm9, %v1881_v53 }
 0x6c0   : > { %v1922_v56 = vpop.f32.mrf.mxu1 }
 0x6c1   : > { %7854 = vmatmul.msk.f32.gmra.mxu1 %vm1340_vm9, %v1922_v56 }
 0x719   : > { %v2036_v61 = vpop.f32.mrf.mxu0 }
 0x71a   : > { %v2092_v41 = vsel %vm714_vm14, %v2036_v61, 0.0 }
 0x71c   : > { %v1954_v19 = vpop.f32.mrf.mxu2 }
 0x71d   : > { %v2089_v43 = vsel %vm714_vm14, %v1954_v19, 0.0  ;;  %v1995_v59 = vpop.f32.mrf.mxu3 }
 0x71e   : > { %v2090_v24 = vsel %vm714_vm14, %v1995_v59, 0.0 }
 0x71f   : > { %v2091_v47 = vadd.f32 %v2090_v24, %v2089_v43 }
 0x721   : > { %v2093_v1 = vadd.f32 %v2092_v41, %v2091_v47  ;;  %v2039_v10 = vpop.f32.mrf.mxu0 }
 0x722   : > { %v2099_v12 = vsel %vm714_vm14, %v2039_v10, 0.0 }
 0x724   : > { %v1957_v44 = vpop.f32.mrf.mxu2  ;;  %v2077_v0 = vpop.f32.mrf.mxu1 }
 0x725   : > { %v2094_v4 = vsel %vm714_vm14, %v2077_v0, 0.0  ;;  %v2096_v6 = vsel %vm714_vm14, %v1957_v44, 0.0 }
 0x726   : > { %v1998_v40 = vpop.f32.mrf.mxu3  ;;  %v2095_v17 = vadd.f32 %v2094_v4, %v2093_v1  ;;  %v2125_v1 = vld [vmem:[%s12604_s10 + $0x18] sm:$0xff]  ;;  %v2124_v4 = vld [vmem:[%s12604_s10 + $0x10] sm:$0xff] }
 0x727   : > { %v2097_v54 = vsel %vm714_vm14, %v1998_v40, 0.0  ;;  %2269 = vmatpush.msra.mxu2 %v2125_v1  ;;  %v2122_v40 = vld [vmem:[%s12604_s10] sm:$0xff] }
 0x728   : > { %v9885_v7 = vadd.f32 %v2095_v17, %v9281_v29  ;;  %v2098_v11 = vadd.f32 %v2097_v54, %v2096_v6  ;;  %v2123_v6 = vld [vmem:[%s12604_s10 + $0x8] sm:$0xff] }
 0x729   : > { %2270 = vmatpush.msra.mxu2 %v2124_v4 }
 0x72a   : > { %v2144_v15 = vsel %vm714_vm14, %v9885_v7, 0.0  ;;  %v2100_v62 = vadd.f32 %v2099_v12, %v2098_v11 }
 0x72b   : > { %2145 = vadd.xlane.f32.xlu2 %v2144_v15  ;;  %2271 = vmatpush.msra.mxu2 %v2123_v6 }
 0x72c   : > { %v1960_v18 = vpop.f32.mrf.mxu2 }
 0x72d   : > { %v2080_v57 = vpop.f32.mrf.mxu1  ;;  %v2103_v25 = vsel %vm714_vm14, %v1960_v18, 0.0  ;;  %2272 = vmatpush.msra.mxu2 %v2122_v40 }
 0x72e   : > { %v2001_v21 = vpop.f32.mrf.mxu3  ;;  %v2101_v22 = vsel %vm714_vm14, %v2080_v57, 0.0 }
 0x72f   : > { %v2102_v23 = vadd.f32 %v2101_v22, %v2100_v62  ;;  %v2104_v29 = vsel %vm714_vm14, %v2001_v21, 0.0 }
 0x730   : > { %v2105_v20 = vadd.f32 %v2104_v29, %v2103_v25 }
 0x731   : > { %v9894_v26 = vadd.f32 %v2102_v23, %v9286_v55  ;;  %v2121_v23 = vld [vmem:[%s12599_s5] sm:$0xf] }
 0x732   : > { %v2042_v28 = vpop.f32.mrf.mxu0 }
 0x733   : > { %v2106_v52 = vsel %vm714_vm14, %v2042_v28, 0.0  ;;  %v2147_v33 = vsel %vm714_vm14, %v9894_v26, 0.0 }
 0x734   : > { %2148 = vadd.xlane.f32.xlu0 %v2147_v33  ;;  %v2107_v35 = vadd.f32 %v2106_v52, %v2105_v20  ;;  %v2232_v33 = vperm.slane %v2121_v23, 2 }
 0x736   : > { %v2083_v36 = vpop.f32.mrf.mxu1  ;;  %v1963_v60 = vpop.f32.mrf.mxu2 }
 0x737   : > { %v2108_v63 = vsel %vm714_vm14, %v2083_v36, 0.0  ;;  %v2110_v37 = vsel %vm714_vm14, %v1963_v60, 0.0  ;;  %v2142_v60 = vld [vmem:[%s12606_s12 + $0x78] sm:$0xff] }
 0x738   : > { %v2109_v3 = vadd.f32 %v2108_v63, %v2107_v35  ;;  %v2004_v34 = vpop.f32.mrf.mxu3  ;;  %v2141_v63 = vld [vmem:[%s12606_s12 + $0x70] sm:$0xff]  ;;  %2322 = vmatpush.msra.mxu3 %v2142_v60 }
 0x739   : > { %v2111_v8 = vsel %vm714_vm14, %v2004_v34, 0.0 }
 0x73a   : > { %v9902_v55 = vadd.f32 %v2109_v3, %v9291_v2  ;;  %v2112_v38 = vadd.f32 %v2111_v8, %v2110_v37  ;;  %v2045_v30 = vpop.f32.mrf.mxu0  ;;  %v2237_v3 = vperm.slane %v2121_v23, 3  ;;  %v2140_v8 = vld [vmem:[%s12606_s12 + $0x68] sm:$0xff]  ;;  %2323 = vmatpush.msra.mxu3 %v2141_v63  ;;  %v2127_v23 = vld [vmem:[%s12606_s12] sm:$0xff] }
 0x73b   : > { %v2113_v5 = vsel %vm714_vm14, %v2045_v30, 0.0 }
 0x73c   : > { %v2150_v42 = vsel %vm714_vm14, %v9902_v55, 0.0  ;;  %v2114_v13 = vadd.f32 %v2113_v5, %v2112_v38  ;;  %2324 = vmatpush.msra.mxu3 %v2140_v8 }
 0x73d   : > { %2151 = vadd.xlane.f32.xlu1 %v2150_v42 }
 0x73e   : > { %v2086_v16 = vpop.f32.mrf.mxu1 }
 0x73f   : > { %v2115_v39 = vsel %vm714_vm14, %v2086_v16, 0.0 }
 0x740   : > { %v2116_v45 = vadd.f32 %v2115_v39, %v2114_v13 }
 0x742   : > { %v9910_v46 = vadd.f32 %v2116_v45, %v9296_v9 }
 0x744   : > { %v2153_v2 = vsel %vm714_vm14, %v9910_v46, 0.0 }
 0x745   : > { %2154 = vadd.xlane.f32.xlu2 %v2153_v2 }
 0x79e   : > { %v2146_v14 = vpop.xlane.xlu2 %2145 }
 0x79f   : > { %v2156_v27 = vmul.f32 %v2146_v14, %v9253_v58 }
 0x7a1   : > { %v2160_v31 = vsub.f32 %v9885_v7, %v2156_v27 }
 0x7a3   : > { %v2164_v32 = vmul.f32 %v2160_v31, %v2160_v31 }
 0x7a5   : > { %v2168_v48 = vsel %vm714_vm14, %v2164_v32, 0.0 }
 0x7a6   : > { %2169 = vadd.xlane.f32.xlu0 %v2168_v48 }
 0x7a7   : > { %v2149_v49 = vpop.xlane.xlu0 %2148 }
 0x7a8   : > { %v2157_v50 = vmul.f32 %v2149_v49, %v9253_v58 }
 0x7aa   : > { %v9919_v51 = vsub.f32 %v9894_v26, %v2157_v50 }
 0x7ac   : > { %v2165_v9 = vmul.f32 %v9919_v51, %v9919_v51 }
 0x7ae   : > { %v2171_v53 = vsel %vm714_vm14, %v2165_v9, 0.0 }
 0x7af   : > { %2172 = vadd.xlane.f32.xlu1 %v2171_v53 }
 0x7b0   : > { %v2152_v56 = vpop.xlane.xlu1 %2151 }
 0x7b1   : > { %v2158_v19 = vmul.f32 %v2152_v56, %v9253_v58 }
 0x7b3   : > { %v9926_v43 = vsub.f32 %v9902_v55, %v2158_v19 }
 0x7b5   : > { %v2166_v59 = vmul.f32 %v9926_v43, %v9926_v43 }
 0x7b7   : > { %v2174_v24 = vsel %vm714_vm14, %v2166_v59, 0.0 }
 0x7b8   : > { %2175 = vadd.xlane.f32.xlu2 %v2174_v24  ;;  %v2155_v61 = vpop.xlane.xlu2 %2154 }
 0x7b9   : > { %v2159_v47 = vmul.f32 %v2155_v61, %v9253_v58 }
 0x7bb   : > { %v9933_v41 = vsub.f32 %v9910_v46, %v2159_v47 }
 0x7bd   : > { %v2167_v44 = vmul.f32 %v9933_v41, %v9933_v41 }
 0x7bf   : > { %v2177_v0 = vsel %vm714_vm14, %v2167_v44, 0.0 }
 0x7c0   : > { %2178 = vadd.xlane.f32.xlu0 %v2177_v0 }
 0x819   : > { %v2170_v17 = vpop.xlane.xlu0 %2169 }
 0x81a   : > { %v2180_v54 = vmul.f32 %v2170_v17, %v9253_v58 }
 0x81c   : > { %v2184_v10 = vadd.f32 1e-05, %v2180_v54  ;;  %v2138_v54 = vld [vmem:[%s12606_s12 + $0x58] sm:$0xff] }
 0x81e   : > { %8656 = vrsqrt.f32 %v2184_v10  ;;  %vm2194_vm11 = vweird.f32 %v2184_v10 }
 0x822   : > { %v2173_v11 = vpop.xlane.xlu1 %2172 }
 0x823   : > { %v2181_v15 = vmul.f32 %v2173_v11, %v9253_v58  ;;  %v2135_v11 = vld [vmem:[%s12606_s12 + $0x40] sm:$0xff] }
 0x824   : > { %v8657_v12 = vpop.eup %8656 }
 0x825   : > { %v2189_v18 = vmul.f32 %v8657_v12, %v2184_v10  ;;  %v2185_v57 = vadd.f32 1e-05, %v2181_v15  ;;  %vm2195_vm10 = vweird.f32 %v8657_v12  ;;  %v2137_v10 = vld [vmem:[%s12606_s12 + $0x50] sm:$0xff]  ;;  %v2134_v15 = vld [vmem:[%s12606_s12 + $0x38] sm:$0xff] }
 0x826   : > { %vm2196_vm12 = vmor %vm2194_vm11, %vm2195_vm10 }
 0x827   : > { %v2190_v62 = vmul.f32 %v8657_v12, %v2189_v18  ;;  %8658 = vrsqrt.f32 %v2185_v57  ;;  %vm2204_vm15 = vweird.f32 %v2185_v57  ;;  %v2132_v18 = vld [vmem:[%s12606_s12 + $0x28] sm:$0xff] }
 0x829   : > { %v2191_v21 = vmul.f32 0.5, %v2190_v62  ;;  %v2130_v62 = vld [vmem:[%s12606_s12 + $0x18] sm:$0xff] }
 0x82b   : > { %v2176_v22 = vpop.xlane.xlu2 %2175  ;;  %v2192_v25 = vsub.f32 1.5, %v2191_v21  ;;  %v2129_v21 = vld [vmem:[%s12606_s12 + $0x10] sm:$0xff] }
 0x82c   : > { %v2182_v29 = vmul.f32 %v2176_v22, %v9253_v58  ;;  %v2128_v22 = vld [vmem:[%s12606_s12 + $0x8] sm:$0xff] }
 0x82d   : > { %v8659_v28 = vpop.eup %8658  ;;  %v2193_v20 = vmul.f32 %v8657_v12, %v2192_v25  ;;  %v8556_v25 = vld [vmem:[%s12605_s11] ss:$0 sm:$0xff] }
 0x82e   : > { %v2186_v52 = vadd.f32 1e-05, %v2182_v29  ;;  %v2199_v35 = vmul.f32 %v8659_v28, %v2185_v57  ;;  %vm2205_vm13 = vweird.f32 %v8659_v28  ;;  %v2131_v57 = vld [vmem:[%s12606_s12 + $0x20] sm:$0xff] }
 0x82f   : > { %v2197_v36 = vsel %vm2196_vm12, %v8657_v12, %v2193_v20  ;;  %vm2206_vm0 = vmor %vm2204_vm15, %vm2205_vm13  ;;  %v2133_v12 = vld [vmem:[%s12606_s12 + $0x30] sm:$0xff] }
 0x830   : > { %8660 = vrsqrt.f32 %v2186_v52  ;;  %v2228_v34 = vmul.f32 %v2197_v36, %v2160_v31  ;;  %v2200_v37 = vmul.f32 %v8659_v28, %v2199_v35  ;;  %vm2214_vm2 = vweird.f32 %v2186_v52 }
 0x832   : > { %v2233_v38 = vmul.f32 %v2232_v33, %v2228_v34  ;;  %v2201_v30 = vmul.f32 0.5, %v2200_v37 }
 0x833   : > { %v2179_v5 = vpop.xlane.xlu0 %2178 }
 0x834   : > { %v2183_v42 = vmul.f32 %v2179_v5, %v9253_v58  ;;  %v2238_v13 = vadd.f32 %v2237_v3, %v2233_v38  ;;  %v2202_v16 = vsub.f32 1.5, %v2201_v30 }
 0x836   : > { %v8661_v39 = vpop.eup %8660  ;;  %v2187_v45 = vadd.f32 1e-05, %v2183_v42  ;;  %v2203_v2 = vmul.f32 %v8659_v28, %v2202_v16  ;;  %7855 = vmatmul.msk.f32.vlgmr.msra.gmra.mxu2 %vm714_vm14, %v2238_v13 }
 0x837   : > { %v2209_v14 = vmul.f32 %v8661_v39, %v2186_v52  ;;  %vm2215_vm1 = vweird.f32 %v8661_v39 }
 0x838   : > { %8662 = vrsqrt.f32 %v2187_v45  ;;  %v2207_v27 = vsel %vm2206_vm0, %v8659_v28, %v2203_v2  ;;  %vm2216_vm3 = vmor %vm2214_vm2, %vm2215_vm1  ;;  %vm2224_vm5 = vweird.f32 %v2187_v45 }
 0x839   : > { %v2210_v31 = vmul.f32 %v8661_v39, %v2209_v14  ;;  %v2229_v32 = vmul.f32 %v2207_v27, %v9919_v51 }
 0x83b   : > { %v2211_v48 = vmul.f32 0.5, %v2210_v31  ;;  %v2234_v49 = vmul.f32 %v2232_v33, %v2229_v32 }
 0x83d   : > { %v2212_v50 = vsub.f32 1.5, %v2211_v48  ;;  %v2239_v53 = vadd.f32 %v2237_v3, %v2234_v49 }
 0x83e   : > { %v8663_v9 = vpop.eup %8662 }
 0x83f   : > { %v2213_v56 = vmul.f32 %v8661_v39, %v2212_v50  ;;  %v2219_v19 = vmul.f32 %v8663_v9, %v2187_v45  ;;  %7856 = vmatmul.msk.f32.gmra.mxu2 %vm714_vm14, %v2239_v53  ;;  %vm2225_vm4 = vweird.f32 %v8663_v9 }
 0x840   : > { %vm2226_vm6 = vmor %vm2224_vm5, %vm2225_vm4 }
 0x841   : > { %v2217_v59 = vsel %vm2216_vm3, %v8661_v39, %v2213_v56  ;;  %v2220_v24 = vmul.f32 %v8663_v9, %v2219_v19 }
 0x842   : > { %v2230_v61 = vmul.f32 %v2217_v59, %v9926_v43  ;;  %v2139_v43 = vld [vmem:[%s12606_s12 + $0x60] sm:$0xff] }
 0x843   : > { %v2221_v47 = vmul.f32 0.5, %v2220_v24  ;;  %2325 = vmatpush.msra.mxu3 %v2139_v43 }
 0x844   : > { %v2235_v44 = vmul.f32 %v2232_v33, %v2230_v61 }
 0x845   : > { %v2222_v0 = vsub.f32 1.5, %v2221_v47  ;;  %2326 = vmatpush.msra.mxu3 %v2138_v54 }
 0x846   : > { %v2240_v51 = vadd.f32 %v2237_v3, %v2235_v44 }
 0x847   : > { %v2223_v1 = vmul.f32 %v8663_v9, %v2222_v0  ;;  %2327 = vmatpush.msra.mxu3 %v2137_v10 }
 0x848   : > { %7857 = vmatmul.msk.f32.gmra.mxu2 %vm714_vm14, %v2240_v51 }
 0x849   : > { %v2227_v4 = vsel %vm2226_vm6, %v8663_v9, %v2223_v1 }
 0x84a   : > { %v2231_v6 = vmul.f32 %v2227_v4, %v9933_v41  ;;  %v2136_v41 = vld [vmem:[%s12606_s12 + $0x48] sm:$0xff] }
 0x84b   : > { %2328 = vmatpush.msra.mxu3 %v2136_v41 }
 0x84c   : > { %v2236_v40 = vmul.f32 %v2232_v33, %v2231_v6 }
 0x84d   : > { %2329 = vmatpush.msra.mxu3 %v2135_v11 }
 0x84e   : > { %v2241_v17 = vadd.f32 %v2237_v3, %v2236_v40 }
 0x84f   : > { %2330 = vmatpush.msra.mxu3 %v2134_v15 }
 0x850   : > { %7858 = vmatmul.msk.f32.gmra.mxu2 %vm714_vm14, %v2241_v17  ;;  %v8557_v17 = vld [vmem:[%s12607_s13] ss:$0 sm:$0xff] }
 0x851   : > { %2331 = vmatpush.msra.mxu3 %v2133_v12 }
 0x853   : > { %2332 = vmatpush.msra.mxu3 %v2132_v18 }
 0x855   : > { %2333 = vmatpush.msra.mxu3 %v2131_v57 }
 0x857   : > { %2334 = vmatpush.msra.mxu3 %v2130_v62 }
 0x859   : > { %2335 = vmatpush.msra.mxu3 %v2129_v21 }
 0x85b   : > { %2336 = vmatpush.msra.mxu3 %v2128_v22 }
 0x85d   : > { %2337 = vmatpush.msra.mxu3 %v2127_v23 }
 0x8b9   : > { %v2274_v29 = vpop.f32.mrf.mxu2 }
 0x8ba   : > { %v2275_v28 = vadd.f32 %v8556_v25, %v2274_v29 }
 0x8bc   : > { %v2286_v20 = vmul.f32 %v2275_v28, %v2275_v28 }
 0x8be   : > { %v2290_v52 = vmul.f32 %v2286_v20, %v2275_v28 }
 0x8c0   : > { %v2294_v33 = vmul.f32 0.044715, %v2290_v52 }
 0x8c2   : > { %v2298_v35 = vadd.f32 %v2294_v33, %v2275_v28  ;;  %v2277_v36 = vpop.f32.mrf.mxu2 }
 0x8c3   : > { %v2278_v60 = vadd.f32 %v8556_v25, %v2277_v36 }
 0x8c4   : > { %v2302_v63 = vmul.f32 0.7978846, %v2298_v35 }
 0x8c5   : > { %v2287_v3 = vmul.f32 %v2278_v60, %v2278_v60 }
 0x8c6   : > { %8664 = vtanh.f32 %v2302_v63 }
 0x8c7   : > { %v2291_v34 = vmul.f32 %v2287_v3, %v2278_v60 }
 0x8c9   : > { %v2295_v37 = vmul.f32 0.044715, %v2291_v34 }
 0x8cb   : > { %v2280_v8 = vpop.f32.mrf.mxu2  ;;  %v2299_v30 = vadd.f32 %v2295_v37, %v2278_v60 }
 0x8cc   : > { %v2281_v38 = vadd.f32 %v8556_v25, %v2280_v8  ;;  %v8665_v5 = vpop.eup %8664 }
 0x8cd   : > { %v2310_v42 = vadd.f32 1.0, %v8665_v5  ;;  %v2303_v16 = vmul.f32 0.7978846, %v2299_v30 }
 0x8ce   : > { %v2288_v13 = vmul.f32 %v2281_v38, %v2281_v38 }
 0x8cf   : > { %v2314_v39 = vmul.f32 0.5, %v2310_v42  ;;  %8666 = vtanh.f32 %v2303_v16  ;;  %v7871_v16 = vld [vmem:[%s12600_s6 + $0xd8] sm:$0xff] }
 0x8d0   : > { %v2292_v45 = vmul.f32 %v2288_v13, %v2281_v38  ;;  %2600 = vmatpush.msrb.mxu2 %v7871_v16 }
 0x8d1   : > { %v2318_v2 = vmul.f32 %v2314_v39, %v2275_v28  ;;  %v7863_v39 = vld [vmem:[%s12600_s6 + $0x98] sm:$0xff] }
 0x8d2   : > { %v2296_v14 = vmul.f32 0.044715, %v2292_v45  ;;  %v7867_v45 = vld [vmem:[%s12600_s6 + $0xb8] sm:$0xff]  ;;  %2542 = vmatpush.msra.mxu0 %v7863_v39 }
 0x8d3   : > { %v2283_v27 = vpop.f32.mrf.mxu2  ;;  %2338 = vmatmul.f32.vlgmr.msra.gmra.mxu3 %v2318_v2  ;;  %v7875_v2 = vld [vmem:[%s12600_s6 + $0xf8] sm:$0xff]  ;;  %2571 = vmatpush.msrb.mxu1 %v7867_v45  ;;  %v7889_v45 = vld [vmem:[%s12601_s7 + $0xe8] sm:$0xff] }
 0x8d4   : > { %v2284_v31 = vadd.f32 %v8556_v25, %v2283_v27  ;;  %v2300_v32 = vadd.f32 %v2296_v14, %v2281_v38  ;;  %v7870_v14 = vld [vmem:[%s12600_s6 + $0xd0] sm:$0xff]  ;;  %2629 = vmatpush.msrb.mxu3 %v7875_v2  ;;  %v7876_v2 = vld [vmem:[%s12601_s7 + $0x80] sm:$0xff] }
 0x8d5   : > { %v8667_v48 = vpop.eup %8666  ;;  %v7862_v27 = vld [vmem:[%s12600_s6 + $0x90] sm:$0xff]  ;;  %2601 = vmatpush.msrb.mxu2 %v7870_v14 }
 0x8d6   : > { %v2289_v49 = vmul.f32 %v2284_v31, %v2284_v31  ;;  %v2304_v50 = vmul.f32 0.7978846, %v2300_v32  ;;  %v2311_v9 = vadd.f32 1.0, %v8667_v48  ;;  %2543 = vmatpush.msra.mxu0 %v7862_v27  ;;  %v7874_v32 = vld [vmem:[%s12600_s6 + $0xf0] sm:$0xff]  ;;  %v7861_v48 = vld [vmem:[%s12600_s6 + $0x88] sm:$0xff] }
 0x8d7   : > { %2630 = vmatpush.msrb.mxu3 %v7874_v32  ;;  %v7884_v32 = vld [vmem:[%s12601_s7 + $0xc0] sm:$0xff] }
 0x8d8   : > { %v2293_v53 = vmul.f32 %v2289_v49, %v2284_v31  ;;  %8668 = vtanh.f32 %v2304_v50  ;;  %v2315_v56 = vmul.f32 0.5, %v2311_v9  ;;  %v7865_v49 = vld [vmem:[%s12600_s6 + $0xa8] sm:$0xff]  ;;  %2544 = vmatpush.msra.mxu0 %v7861_v48  ;;  %v7888_v48 = vld [vmem:[%s12601_s7 + $0xe0] sm:$0xff] }
 0x8d9   : > { %v7869_v50 = vld [vmem:[%s12600_s6 + $0xc8] sm:$0xff] }
 0x8da   : > { %v2297_v19 = vmul.f32 0.044715, %v2293_v53  ;;  %v2319_v59 = vmul.f32 %v2315_v56, %v2278_v60  ;;  %2602 = vmatpush.msrb.mxu2 %v7869_v50  ;;  %v7873_v9 = vld [vmem:[%s12600_s6 + $0xe8] sm:$0xff]  ;;  %v7860_v53 = vld [vmem:[%s12600_s6 + $0x80] sm:$0xff] }
 0x8db   : > { %2631 = vmatpush.msrb.mxu3 %v7873_v9  ;;  %v7864_v56 = vld [vmem:[%s12600_s6 + $0xa0] sm:$0xff]  ;;  %2545 = vmatpush.msra.mxu0 %v7860_v53 }
 0x8dc   : > { %v2301_v24 = vadd.f32 %v2297_v19, %v2284_v31  ;;  %2341 = vmatmul.f32.gmra.mxu3 %v2319_v59  ;;  %v7868_v19 = vld [vmem:[%s12600_s6 + $0xc0] sm:$0xff] }
 0x8dd   : > { %2603 = vmatpush.msrb.mxu2 %v7868_v19  ;;  %v7872_v59 = vld [vmem:[%s12600_s6 + $0xe0] sm:$0xff] }
 0x8de   : > { %v8669_v61 = vpop.eup %8668  ;;  %v2305_v47 = vmul.f32 0.7978846, %v2301_v24  ;;  %2632 = vmatpush.msrb.mxu3 %v7872_v59 }
 0x8df   : > { %v2312_v44 = vadd.f32 1.0, %v8669_v61 }
 0x8e0   : > { %8670 = vtanh.f32 %v2305_v47 }
 0x8e1   : > { %v2316_v0 = vmul.f32 0.5, %v2312_v44 }
 0x8e3   : > { %v2320_v51 = vmul.f32 %v2316_v0, %v2281_v38 }
 0x8e5   : > { %2344 = vmatmul.f32.gmra.mxu3 %v2320_v51 }
 0x8e6   : > { %v8671_v1 = vpop.eup %8670 }
 0x8e7   : > { %v2313_v4 = vadd.f32 1.0, %v8671_v1 }
 0x8e9   : > { %v2317_v6 = vmul.f32 0.5, %v2313_v4 }
 0x8eb   : > { %v2321_v40 = vmul.f32 %v2317_v6, %v2284_v31  ;;  %v7866_v31 = vld [vmem:[%s12600_s6 + $0xb0] sm:$0xff] }
 0x8ec   : > { %2572 = vmatpush.msrb.mxu1 %v7866_v31  ;;  %v7880_v31 = vld [vmem:[%s12601_s7 + $0xa0] sm:$0xff] }
 0x8ed   : > { %2347 = vmatmul.f32.gmra.mxu3 %v2321_v40 }
 0x8ee   : > { %2573 = vmatpush.msrb.mxu1 %v7865_v49 }
 0x8f0   : > { %2574 = vmatpush.msrb.mxu1 %v7864_v56 }
 0x956   : > { %v2339_v43 = vpop.f32.mrf.mxu3 }
 0x957   : > { %v2351_v54 = vadd.f32 %v2339_v43, %v9885_v7  ;;  %v7859_v43 = vld [vmem:[%s12599_s5 + $0x4] sm:$0xf] }
 0x959   : > { %v10019_v10 = vadd.f32 %v8557_v17, %v2351_v54 }
 0x95b   : > { %v2420_v41 = vsel %vm714_vm14, %v10019_v10, 0.0 }
 0x95c   : > { %2421 = vadd.xlane.f32.xlu1 %v2420_v41 }
 0x95f   : > { %v2342_v11 = vpop.f32.mrf.mxu3 }
 0x960   : > { %v2352_v15 = vadd.f32 %v2342_v11, %v9894_v26 }
 0x962   : > { %v10024_v12 = vadd.f32 %v8557_v17, %v2352_v15 }
 0x964   : > { %v2423_v18 = vsel %vm714_vm14, %v10024_v12, 0.0 }
 0x965   : > { %2424 = vadd.xlane.f32.xlu2 %v2423_v18 }
 0x968   : > { %v2345_v57 = vpop.f32.mrf.mxu3 }
 0x969   : > { %v2353_v62 = vadd.f32 %v2345_v57, %v9902_v55  ;;  %v7887_v57 = vld [vmem:[%s12601_s7 + $0xd8] sm:$0xff] }
 0x96a   : > { %2716 = vmatpush.msra.mxu2 %v7887_v57  ;;  %v7898_v57 = vld [vmem:[%s12602_s8 + $0xb0] sm:$0xff] }
 0x96b   : > { %v10029_v21 = vadd.f32 %v8557_v17, %v2353_v62  ;;  %v10125_v62 = vperm.slane %v7859_v43, 0 }
 0x96d   : > { %v2426_v7 = vsel %vm714_vm14, %v10029_v21, 0.0 }
 0x96e   : > { %2427 = vadd.xlane.f32.xlu0 %v2426_v7 }
 0x970   : > { %v2348_v22 = vpop.f32.mrf.mxu3 }
 0x971   : > { %v2354_v23 = vadd.f32 %v2348_v22, %v9910_v46 }
 0x973   : > { %v10034_v25 = vadd.f32 %v8557_v17, %v2354_v23  ;;  %v10128_v23 = vperm.slane %v7859_v43, 1 }
 0x975   : > { %v2429_v26 = vsel %vm714_vm14, %v10034_v25, 0.0 }
 0x976   : > { %2430 = vadd.xlane.f32.xlu1 %v2429_v26 }
 0x9cf   : > { %v2422_v29 = vpop.xlane.xlu1 %2421 }
 0x9d0   : > { %v2432_v28 = vmul.f32 %v2422_v29, %v9253_v58 }
 0x9d2   : > { %v10040_v55 = vsub.f32 %v10019_v10, %v2432_v28  ;;  %v7879_v28 = vld [vmem:[%s12601_s7 + $0x98] sm:$0xff] }
 0x9d3   : > { %2658 = vmatpush.msrb.mxu0 %v7879_v28  ;;  %v7892_v28 = vld [vmem:[%s12602_s8 + $0x80] sm:$0xff] }
 0x9d4   : > { %v2440_v20 = vmul.f32 %v10040_v55, %v10040_v55 }
 0x9d6   : > { %v2444_v52 = vsel %vm714_vm14, %v2440_v20, 0.0  ;;  %v7883_v20 = vld [vmem:[%s12601_s7 + $0xb8] sm:$0xff] }
 0x9d7   : > { %2445 = vadd.xlane.f32.xlu2 %v2444_v52  ;;  %v7886_v52 = vld [vmem:[%s12601_s7 + $0xd0] sm:$0xff]  ;;  %2687 = vmatpush.msra.mxu1 %v7883_v20  ;;  %v7896_v20 = vld [vmem:[%s12602_s8 + $0xa0] sm:$0xff] }
 0x9d8   : > { %v2425_v33 = vpop.xlane.xlu2 %2424  ;;  %2717 = vmatpush.msra.mxu2 %v7886_v52  ;;  %v7900_v52 = vld [vmem:[%s12602_s8 + $0xc0] sm:$0xff] }
 0x9d9   : > { %v2433_v46 = vmul.f32 %v2425_v33, %v9253_v58  ;;  %v7891_v33 = vld [vmem:[%s12601_s7 + $0xf8] sm:$0xff] }
 0x9da   : > { %2745 = vmatpush.msra.mxu3 %v7891_v33  ;;  %v7904_v33 = vld [vmem:[%s12602_s8 + $0xe0] sm:$0xff] }
 0x9db   : > { %v10047_v35 = vsub.f32 %v10024_v12, %v2433_v46  ;;  %v7882_v46 = vld [vmem:[%s12601_s7 + $0xb0] sm:$0xff] }
 0x9dc   : > { %2688 = vmatpush.msra.mxu1 %v7882_v46 }
 0x9dd   : > { %v2441_v36 = vmul.f32 %v10047_v35, %v10047_v35 }
 0x9df   : > { %v2447_v60 = vsel %vm714_vm14, %v2441_v36, 0.0 }
 0x9e0   : > { %2448 = vadd.xlane.f32.xlu0 %v2447_v60 }
 0x9e1   : > { %v2428_v63 = vpop.xlane.xlu0 %2427 }
 0x9e2   : > { %v2434_v3 = vmul.f32 %v2428_v63, %v9253_v58 }
 0x9e4   : > { %v10054_v34 = vsub.f32 %v10029_v21, %v2434_v3  ;;  %v7890_v3 = vld [vmem:[%s12601_s7 + $0xf0] sm:$0xff] }
 0x9e5   : > { %2746 = vmatpush.msra.mxu3 %v7890_v3 }
 0x9e6   : > { %v2442_v37 = vmul.f32 %v10054_v34, %v10054_v34 }
 0x9e7   : > { %2747 = vmatpush.msra.mxu3 %v7889_v45 }
 0x9e8   : > { %v2450_v8 = vsel %vm714_vm14, %v2442_v37, 0.0  ;;  %v7877_v37 = vld [vmem:[%s12601_s7 + $0x88] sm:$0xff] }
 0x9e9   : > { %2451 = vadd.xlane.f32.xlu1 %v2450_v8  ;;  %v2431_v38 = vpop.xlane.xlu1 %2430  ;;  %v7881_v8 = vld [vmem:[%s12601_s7 + $0xa8] sm:$0xff]  ;;  %2748 = vmatpush.msra.mxu3 %v7888_v48 }
 0x9ea   : > { %v2435_v30 = vmul.f32 %v2431_v38, %v9253_v58  ;;  %2689 = vmatpush.msra.mxu1 %v7881_v8 }
 0x9ec   : > { %v10061_v5 = vsub.f32 %v10034_v25, %v2435_v30  ;;  %v7885_v30 = vld [vmem:[%s12601_s7 + $0xc8] sm:$0xff]  ;;  %2690 = vmatpush.msra.mxu1 %v7880_v31 }
 0x9ed   : > { %2718 = vmatpush.msra.mxu2 %v7885_v30 }
 0x9ee   : > { %v2443_v42 = vmul.f32 %v10061_v5, %v10061_v5 }
 0x9ef   : > { %2719 = vmatpush.msra.mxu2 %v7884_v32 }
 0x9f0   : > { %v2453_v13 = vsel %vm714_vm14, %v2443_v42, 0.0 }
 0x9f1   : > { %2454 = vadd.xlane.f32.xlu2 %v2453_v13 }
 0xa4a   : > { %v2446_v24 = vpop.xlane.xlu2 %2445 }
 0xa4b   : > { %v2456_v61 = vmul.f32 %v2446_v24, %v9253_v58 }
 0xa4d   : > { %v2460_v47 = vadd.f32 1e-05, %v2456_v61 }
 0xa4f   : > { %8672 = vrsqrt.f32 %v2460_v47  ;;  %vm2470_vm8 = vweird.f32 %v2460_v47 }
 0xa53   : > { %v2449_v44 = vpop.xlane.xlu0 %2448 }
 0xa54   : > { %v2457_v0 = vmul.f32 %v2449_v44, %v9253_v58 }
 0xa55   : > { %v8673_v51 = vpop.eup %8672 }
 0xa56   : > { %v2465_v1 = vmul.f32 %v8673_v51, %v2460_v47  ;;  %v2461_v4 = vadd.f32 1e-05, %v2457_v0  ;;  %vm2471_vm7 = vweird.f32 %v8673_v51 }
 0xa57   : > { %vm2472_vm10 = vmor %vm2470_vm8, %vm2471_vm7 }
 0xa58   : > { %v2466_v6 = vmul.f32 %v8673_v51, %v2465_v1  ;;  %8674 = vrsqrt.f32 %v2461_v4  ;;  %vm2480_vm12 = vweird.f32 %v2461_v4 }
 0xa5a   : > { %v2467_v40 = vmul.f32 0.5, %v2466_v6 }
 0xa5c   : > { %v2452_v17 = vpop.xlane.xlu1 %2451  ;;  %v2468_v54 = vsub.f32 1.5, %v2467_v40 }
 0xa5d   : > { %v2458_v41 = vmul.f32 %v2452_v17, %v9253_v58 }
 0xa5e   : > { %v8675_v11 = vpop.eup %8674  ;;  %v2469_v15 = vmul.f32 %v8673_v51, %v2468_v54 }
 0xa5f   : > { %v10120_v18 = vadd.f32 1e-05, %v2458_v41  ;;  %v2475_v7 = vmul.f32 %v8675_v11, %v2461_v4  ;;  %vm2481_vm11 = vweird.f32 %v8675_v11  ;;  %v7899_v41 = vld [vmem:[%s12602_s8 + $0xb8] sm:$0xff] }
 0xa60   : > { %v2473_v22 = vsel %vm2472_vm10, %v8673_v51, %v2469_v15  ;;  %vm2482_vm13 = vmor %vm2480_vm12, %vm2481_vm11  ;;  %v7907_v15 = vld [vmem:[%s12602_s8 + $0xf8] sm:$0xff] }
 0xa61   : > { %8676 = vrsqrt.f32 %v10120_v18  ;;  %v2504_v26 = vmul.f32 %v2473_v22, %v10040_v55  ;;  %v2476_v29 = vmul.f32 %v8675_v11, %v2475_v7  ;;  %v7878_v55 = vld [vmem:[%s12601_s7 + $0x90] sm:$0xff]  ;;  %vm2490_vm0 = vweird.f32 %v10120_v18  ;;  %v7893_v22 = vld [vmem:[%s12602_s8 + $0x88] sm:$0xff] }
 0xa62   : > { %2659 = vmatpush.msrb.mxu0 %v7878_v55  ;;  %v7906_v7 = vld [vmem:[%s12602_s8 + $0xf0] sm:$0xff] }
 0xa63   : > { %v2509_v36 = vmul.f32 %v10125_v62, %v2504_v26  ;;  %v2477_v60 = vmul.f32 0.5, %v2476_v29  ;;  %v7901_v26 = vld [vmem:[%s12602_s8 + $0xc8] sm:$0xff] }
 0xa64   : > { %v2455_v63 = vpop.xlane.xlu2 %2454  ;;  %2660 = vmatpush.msrb.mxu0 %v7877_v37  ;;  %v7905_v29 = vld [vmem:[%s12602_s8 + $0xe8] sm:$0xff] }
 0xa65   : > { %v2459_v38 = vmul.f32 %v2455_v63, %v9253_v58  ;;  %v10164_v42 = vadd.f32 %v10128_v23, %v2509_v36  ;;  %v2478_v13 = vsub.f32 1.5, %v2477_v60 }
 0xa66   : > { %2661 = vmatpush.msrb.mxu0 %v7876_v2 }
 0xa67   : > { %v8677_v16 = vpop.eup %8676  ;;  %v2463_v39 = vadd.f32 1e-05, %v2459_v38  ;;  %v2479_v14 = vmul.f32 %v8675_v11, %v2478_v13  ;;  %7912 = vmatmul.msk.f32.vlgmr.msra.gmra.mxu0 %vm714_vm14, %v10164_v42  ;;  %7916 = vmatmul.msk.f32.vlgmr.msrb.gmra.mxu1 %vm714_vm14, %v10164_v42 }
 0xa68   : > { %v2485_v27 = vmul.f32 %v8677_v16, %v10120_v18  ;;  %7920 = vmatmul.msk.f32.vlgmr.msrb.gmra.mxu2 %vm714_vm14, %v10164_v42  ;;  %7924 = vmatmul.msk.f32.vlgmr.msrb.gmra.mxu3 %vm714_vm14, %v10164_v42  ;;  %vm2491_vm15 = vweird.f32 %v8677_v16  ;;  %v7894_v18 = vld [vmem:[%s12602_s8 + $0x90] sm:$0xff] }
 0xa69   : > { %8678 = vrsqrt.f32 %v2463_v39  ;;  %v2483_v49 = vsel %vm2482_vm13, %v8675_v11, %v2479_v14  ;;  %vm2492_vm1 = vmor %vm2490_vm0, %vm2491_vm15  ;;  %vm2500_vm3 = vweird.f32 %v2463_v39  ;;  %v7903_v11 = vld [vmem:[%s12602_s8 + $0xd8] sm:$0xff]  ;;  %2803 = vmatpush.msrb.mxu1 %v7899_v41  ;;  %2861 = vmatpush.msrb.mxu3 %v7907_v15 }
 0xa6a   : > { %v2486_v50 = vmul.f32 %v8677_v16, %v2485_v27  ;;  %v2505_v9 = vmul.f32 %v2483_v49, %v10047_v35  ;;  %2832 = vmatpush.msrb.mxu2 %v7903_v11 }
 0xa6b   : > { %2804 = vmatpush.msrb.mxu1 %v7898_v57  ;;  %2862 = vmatpush.msrb.mxu3 %v7906_v7  ;;  %v8954_v7 = vld [vmem:[%s12629_s0] sm:$0xff] }
 0xa6c   : > { %v2487_v53 = vmul.f32 0.5, %v2486_v50  ;;  %v2510_v56 = vmul.f32 %v10125_v62, %v2505_v9 }
 0xa6d   : > { %2863 = vmatpush.msrb.mxu3 %v7905_v29 }
 0xa6e   : > { %v2488_v19 = vsub.f32 1.5, %v2487_v53  ;;  %v10194_v24 = vadd.f32 %v10128_v23, %v2510_v56 }
 0xa6f   : > { %v8679_v59 = vpop.eup %8678  ;;  %2864 = vmatpush.msrb.mxu3 %v7904_v33 }
 0xa70   : > { %v2489_v61 = vmul.f32 %v8677_v16, %v2488_v19  ;;  %v2495_v47 = vmul.f32 %v8679_v59, %v2463_v39  ;;  %7913 = vmatmul.msk.f32.gmra.mxu0 %vm714_vm14, %v10194_v24  ;;  %7917 = vmatmul.msk.f32.gmra.mxu1 %vm714_vm14, %v10194_v24  ;;  %vm2501_vm2 = vweird.f32 %v8679_v59 }
 0xa71   : > { %7921 = vmatmul.msk.f32.gmra.mxu2 %vm714_vm14, %v10194_v24  ;;  %7925 = vmatmul.msk.f32.gmra.mxu3 %vm714_vm14, %v10194_v24  ;;  %vm2502_vm4 = vmor %vm2500_vm3, %vm2501_vm2 }
 0xa72   : > { %v2493_v35 = vsel %vm2492_vm1, %v8677_v16, %v2489_v61  ;;  %v2496_v44 = vmul.f32 %v8679_v59, %v2495_v47 }
 0xa73   : > { %v2506_v0 = vmul.f32 %v2493_v35, %v10054_v34 }
 0xa74   : > { %v2497_v51 = vmul.f32 0.5, %v2496_v44 }
 0xa75   : > { %v2511_v1 = vmul.f32 %v10125_v62, %v2506_v0 }
 0xa76   : > { %v2498_v4 = vsub.f32 1.5, %v2497_v51 }
 0xa77   : > { %v10208_v6 = vadd.f32 %v10128_v23, %v2511_v1 }
 0xa78   : > { %v2499_v40 = vmul.f32 %v8679_v59, %v2498_v4 }
 0xa79   : > { %7914 = vmatmul.msk.f32.gmra.mxu0 %vm714_vm14, %v10208_v6  ;;  %7918 = vmatmul.msk.f32.gmra.mxu1 %vm714_vm14, %v10208_v6 }
 0xa7a   : > { %v2503_v17 = vsel %vm2502_vm4, %v8679_v59, %v2499_v40  ;;  %7922 = vmatmul.msk.f32.gmra.mxu2 %vm714_vm14, %v10208_v6  ;;  %7926 = vmatmul.msk.f32.gmra.mxu3 %vm714_vm14, %v10208_v6 }
 0xa7b   : > { %v2507_v34 = vmul.f32 %v2503_v17, %v10061_v5  ;;  %v7895_v5 = vld [vmem:[%s12602_s8 + $0x98] sm:$0xff] }
 0xa7c   : > { %2774 = vmatpush.msra.mxu0 %v7895_v5 }
 0xa7d   : > { %v2512_v43 = vmul.f32 %v10125_v62, %v2507_v34  ;;  %v7902_v62 = vld [vmem:[%s12602_s8 + $0xd0] sm:$0xff] }
 0xa7e   : > { %2775 = vmatpush.msra.mxu0 %v7894_v18  ;;  %2833 = vmatpush.msrb.mxu2 %v7902_v62 }
 0xa7f   : > { %v10221_v54 = vadd.f32 %v10128_v23, %v2512_v43  ;;  %v7897_v23 = vld [vmem:[%s12602_s8 + $0xa8] sm:$0xff] }
 0xa80   : > { %2776 = vmatpush.msra.mxu0 %v7893_v22  ;;  %2805 = vmatpush.msrb.mxu1 %v7897_v23 }
 0xa81   : > { %7915 = vmatmul.msk.f32.gmra.mxu0 %vm714_vm14, %v10221_v54  ;;  %7919 = vmatmul.msk.f32.gmra.mxu1 %vm714_vm14, %v10221_v54 }
 0xa82   : > { %7923 = vmatmul.msk.f32.gmra.mxu2 %vm714_vm14, %v10221_v54  ;;  %7927 = vmatmul.msk.f32.gmra.mxu3 %vm714_vm14, %v10221_v54 }
 0xa83   : > { %2834 = vmatpush.msrb.mxu2 %v7901_v26  ;;  %2777 = vmatpush.msra.mxu0 %v7892_v28 }
 0xa84   : > { %2806 = vmatpush.msrb.mxu1 %v7896_v20 }
 0xa85   : > { %2835 = vmatpush.msrb.mxu2 %v7900_v52 }
 0xa89   : > { %7928 = vmatmul.msk.f32.vlgmr.msrb.gmra.mxu0 %vm714_vm14, %v10164_v42  ;;  %7932 = vmatmul.msk.f32.vlgmr.msra.gmra.mxu1 %vm714_vm14, %v10164_v42 }
 0xa8a   : > { %7936 = vmatmul.msk.f32.vlgmr.msra.gmra.mxu2 %vm714_vm14, %v10164_v42  ;;  %7940 = vmatmul.msk.f32.vlgmr.msra.gmra.mxu3 %vm714_vm14, %v10164_v42 }
 0xa91   : > { %7929 = vmatmul.msk.f32.gmra.mxu0 %vm714_vm14, %v10194_v24  ;;  %7933 = vmatmul.msk.f32.gmra.mxu1 %vm714_vm14, %v10194_v24 }
 0xa92   : > { %7937 = vmatmul.msk.f32.gmra.mxu2 %vm714_vm14, %v10194_v24  ;;  %7941 = vmatmul.msk.f32.gmra.mxu3 %vm714_vm14, %v10194_v24 }
 0xa99   : > { %7930 = vmatmul.msk.f32.gmra.mxu0 %vm714_vm14, %v10208_v6  ;;  %7934 = vmatmul.msk.f32.gmra.mxu1 %vm714_vm14, %v10208_v6 }
 0xa9a   : > { %7938 = vmatmul.msk.f32.gmra.mxu2 %vm714_vm14, %v10208_v6  ;;  %7942 = vmatmul.msk.f32.gmra.mxu3 %vm714_vm14, %v10208_v6 }
 0xaa1   : > { %7931 = vmatmul.msk.f32.gmra.mxu0 %vm714_vm14, %v10221_v54  ;;  %7935 = vmatmul.msk.f32.gmra.mxu1 %vm714_vm14, %v10221_v54 }
 0xaa2   : > { %7939 = vmatmul.msk.f32.gmra.mxu2 %vm714_vm14, %v10221_v54  ;;  %7943 = vmatmul.msk.f32.gmra.mxu3 %vm714_vm14, %v10221_v54 }
 0xaa9   : > { %7944 = vmatmul.msk.f32.vlgmr.msra.gmra.mxu0 %vm714_vm14, %v10164_v42  ;;  %7948 = vmatmul.msk.f32.vlgmr.msrb.gmra.mxu1 %vm714_vm14, %v10164_v42 }
 0xaaa   : > { %7952 = vmatmul.msk.f32.vlgmr.msrb.gmra.mxu2 %vm714_vm14, %v10164_v42  ;;  %7956 = vmatmul.msk.f32.vlgmr.msrb.gmra.mxu3 %vm714_vm14, %v10164_v42 }
 0xab1   : > { %7945 = vmatmul.msk.f32.gmra.mxu0 %vm714_vm14, %v10194_v24  ;;  %7949 = vmatmul.msk.f32.gmra.mxu1 %vm714_vm14, %v10194_v24 }
 0xab2   : > { %7953 = vmatmul.msk.f32.gmra.mxu2 %vm714_vm14, %v10194_v24  ;;  %7957 = vmatmul.msk.f32.gmra.mxu3 %vm714_vm14, %v10194_v24 }
 0xab9   : > { %7946 = vmatmul.msk.f32.gmra.mxu0 %vm714_vm14, %v10208_v6  ;;  %7950 = vmatmul.msk.f32.gmra.mxu1 %vm714_vm14, %v10208_v6 }
 0xaba   : > { %7954 = vmatmul.msk.f32.gmra.mxu2 %vm714_vm14, %v10208_v6  ;;  %7958 = vmatmul.msk.f32.gmra.mxu3 %vm714_vm14, %v10208_v6 }
 0xac1   : > { %7947 = vmatmul.msk.f32.gmra.mxu0 %vm714_vm14, %v10221_v54  ;;  %7951 = vmatmul.msk.f32.gmra.mxu1 %vm714_vm14, %v10221_v54 }
 0xac2   : > { %7955 = vmatmul.msk.f32.gmra.mxu2 %vm714_vm14, %v10221_v54  ;;  %7959 = vmatmul.msk.f32.gmra.mxu3 %vm714_vm14, %v10221_v54 }
 0xae4   : > { %v2547_v55 = vpop.f32.mrf.mxu0  ;;  %v2576_v46 = vpop.f32.mrf.mxu1 }
 0xaeb   : > { %v2605_v36 = vpop.f32.mrf.mxu2  ;;  %v2634_v60 = vpop.f32.mrf.mxu3 }
 0xaed   : > { %v2550_v63 = vpop.f32.mrf.mxu0  ;;  %v2579_v3 = vpop.f32.mrf.mxu1 }
 0xaf4   : > { %v2608_v37 = vpop.f32.mrf.mxu2  ;;  %v2637_v8 = vpop.f32.mrf.mxu3 }
 0xaf6   : > { %v2553_v38 = vpop.f32.mrf.mxu0  ;;  %v2582_v30 = vpop.f32.mrf.mxu1 }
 0xafd   : > { %v10343_v42 = vpop.f32.mrf.mxu2  ;;  %v10345_v13 = vpop.f32.mrf.mxu3 }
 0xafe   : > { %v10347_v16 = vpop.f32.mrf.mxu0  ;;  %v10349_v39 = vpop.f32.mrf.mxu1 }
 0xb05   : > { %v10351_v45 = vpop.f32.mrf.mxu2  ;;  %v10353_v2 = vpop.f32.mrf.mxu3 }
 0xb06   : > { %v2663_v14 = vpop.f32.mrf.mxu0  ;;  %v2692_v27 = vpop.f32.mrf.mxu1 }
 0xb0d   : > { %v2721_v31 = vpop.f32.mrf.mxu2  ;;  %v2750_v32 = vpop.f32.mrf.mxu3 }
 0xb0e   : > { %v2666_v48 = vpop.f32.mrf.mxu0  ;;  %v2695_v49 = vpop.f32.mrf.mxu1 }
 0xb15   : > { %v2724_v50 = vpop.f32.mrf.mxu2  ;;  %v2753_v9 = vpop.f32.mrf.mxu3 }
 0xb16   : > { %v2669_v53 = vpop.f32.mrf.mxu0  ;;  %v2698_v56 = vpop.f32.mrf.mxu1 }
 0xb1d   : > { %v2727_v19 = vpop.f32.mrf.mxu2  ;;  %v2756_v59 = vpop.f32.mrf.mxu3 }
 0xb1e   : > { %v2672_v24 = vpop.f32.mrf.mxu0  ;;  %v2701_v61 = vpop.f32.mrf.mxu1 }
 0xb1f   : > { %7960 = vmatpush.xpose.msk.msrb.mxu0 %vm1340_vm9, %v2672_v24  ;;  %7968 = vmatpush.xpose.msk.msra.mxu1 %vm1340_vm9, %v2701_v61 }
 0xb23   : > { %7961 = vmatpush.xpose.msk.msrb.mxu0 %vm1340_vm9, %v2669_v53  ;;  %7969 = vmatpush.xpose.msk.msra.mxu1 %vm1340_vm9, %v2698_v56 }
 0xb25   : > { %v2730_v47 = vpop.f32.mrf.mxu2  ;;  %v2759_v35 = vpop.f32.mrf.mxu3 }
 0xb26   : > { %7976 = vmatpush.xpose.msk.msra.mxu2 %vm1340_vm9, %v2730_v47  ;;  %7984 = vmatpush.xpose.msk.msra.mxu3 %vm1340_vm9, %v2759_v35  ;;  %v2779_v44 = vpop.f32.mrf.mxu0  ;;  %v2808_v0 = vpop.f32.mrf.mxu1 }
 0xb27   : > { %7962 = vmatpush.xpose.msk.msrb.mxu0 %vm1340_vm9, %v2666_v48  ;;  %7970 = vmatpush.xpose.msk.msra.mxu1 %vm1340_vm9, %v2695_v49 }
 0xb2a   : > { %7977 = vmatpush.xpose.msk.msra.mxu2 %vm1340_vm9, %v2727_v19  ;;  %7985 = vmatpush.xpose.msk.msra.mxu3 %vm1340_vm9, %v2756_v59 }
 0xb2b   : > { %7963 = vmatpush.xpose.msk.msrb.mxu0 %vm1340_vm9, %v2663_v14  ;;  %7971 = vmatpush.xpose.msk.msra.mxu1 %vm1340_vm9, %v2692_v27 }
 0xb2d   : > { %v2837_v51 = vpop.f32.mrf.mxu2  ;;  %v2866_v1 = vpop.f32.mrf.mxu3 }
 0xb2e   : > { %7978 = vmatpush.xpose.msk.msra.mxu2 %vm1340_vm9, %v2724_v50  ;;  %7986 = vmatpush.xpose.msk.msra.mxu3 %vm1340_vm9, %v2753_v9  ;;  %v2782_v4 = vpop.f32.mrf.mxu0  ;;  %v2811_v6 = vpop.f32.mrf.mxu1  ;;  %v8956_v50 = vld [vmem:[%s12629_s0 + $0x10] sm:$0xff] }
 0xb2f   : > { %7964 = vmatmul.msk.f32.vlgmr.msrb.gmra.mxu0 %vm1340_vm9, %v2547_v55  ;;  %7972 = vmatmul.msk.f32.vlgmr.msra.gmra.mxu1 %vm1340_vm9, %v2576_v46 }
 0xb32   : > { %7979 = vmatpush.xpose.msk.msra.mxu2 %vm1340_vm9, %v2721_v31  ;;  %7987 = vmatpush.xpose.msk.msra.mxu3 %vm1340_vm9, %v2750_v32 }
 0xb35   : > { %v2840_v40 = vpop.f32.mrf.mxu2  ;;  %v2869_v17 = vpop.f32.mrf.mxu3  ;;  %7980 = vmatmul.msk.f32.vlgmr.msra.gmra.mxu2 %vm1340_vm9, %v2605_v36  ;;  %7988 = vmatmul.msk.f32.vlgmr.msra.gmra.mxu3 %vm1340_vm9, %v2634_v60 }
 0xb36   : > { %v2785_v34 = vpop.f32.mrf.mxu0  ;;  %v2814_v43 = vpop.f32.mrf.mxu1 }
 0xb37   : > { %7965 = vmatmul.msk.f32.gmra.mxu0 %vm1340_vm9, %v2550_v63  ;;  %7973 = vmatmul.msk.f32.gmra.mxu1 %vm1340_vm9, %v2579_v3 }
 0xb3d   : > { %v2843_v54 = vpop.f32.mrf.mxu2  ;;  %v2872_v5 = vpop.f32.mrf.mxu3  ;;  %7981 = vmatmul.msk.f32.gmra.mxu2 %vm1340_vm9, %v2608_v37  ;;  %7989 = vmatmul.msk.f32.gmra.mxu3 %vm1340_vm9, %v2637_v8 }
 0xb3e   : > { %v2788_v41 = vpop.f32.mrf.mxu0  ;;  %v2817_v11 = vpop.f32.mrf.mxu1 }
 0xb3f   : > { %7966 = vmatmul.msk.f32.gmra.mxu0 %vm1340_vm9, %v2553_v38  ;;  %7974 = vmatmul.msk.f32.gmra.mxu1 %vm1340_vm9, %v2582_v30 }
 0xb40   : > { %3322 = vmatpush.msra.mxu0 %v2788_v41  ;;  %3363 = vmatpush.msrb.mxu1 %v2817_v11 }
 0xb42   : > { %3323 = vmatpush.msra.mxu0 %v2785_v34  ;;  %3364 = vmatpush.msrb.mxu1 %v2814_v43 }
 0xb44   : > { %3324 = vmatpush.msra.mxu0 %v2782_v4  ;;  %3365 = vmatpush.msrb.mxu1 %v2811_v6 }
 0xb45   : > { %v2846_v15 = vpop.f32.mrf.mxu2  ;;  %v2875_v18 = vpop.f32.mrf.mxu3  ;;  %7982 = vmatmul.msk.f32.gmra.mxu2 %vm1340_vm9, %v10343_v42  ;;  %7990 = vmatmul.msk.f32.gmra.mxu3 %vm1340_vm9, %v10345_v13  ;;  %v8955_v42 = vld [vmem:[%s12629_s0 + $0x8] sm:$0xff] }
 0xb46   : > { %3325 = vmatpush.msra.mxu0 %v2779_v44  ;;  %3366 = vmatpush.msrb.mxu1 %v2808_v0 }
 0xb47   : > { %3404 = vmatpush.msrb.mxu2 %v2846_v15  ;;  %3445 = vmatpush.msrb.mxu3 %v2875_v18 }
 0xb48   : > { %7967 = vmatmul.msk.f32.gmra.mxu0 %vm1340_vm9, %v10347_v16  ;;  %7975 = vmatmul.msk.f32.gmra.mxu1 %vm1340_vm9, %v10349_v39 }
 0xb49   : > { %3405 = vmatpush.msrb.mxu2 %v2843_v54  ;;  %3446 = vmatpush.msrb.mxu3 %v2872_v5 }
 0xb4b   : > { %3406 = vmatpush.msrb.mxu2 %v2840_v40  ;;  %3447 = vmatpush.msrb.mxu3 %v2869_v17 }
 0xb4d   : > { %3407 = vmatpush.msrb.mxu2 %v2837_v51  ;;  %3448 = vmatpush.msrb.mxu3 %v2866_v1  ;;  %v8957_v1 = vld [vmem:[%s12629_s0 + $0x18] sm:$0xff] }
 0xb4e   : > { %7983 = vmatmul.msk.f32.gmra.mxu2 %vm1340_vm9, %v10351_v45  ;;  %7991 = vmatmul.msk.f32.gmra.mxu3 %vm1340_vm9, %v10353_v2 }
 0xbac   : > { %v2972_v57 = vpop.f32.mrf.mxu1  ;;  %v2919_v23 = vpop.f32.mrf.mxu0 }
 0xbad   : > { %v3094_v62 = vmul.f32 0.35355338, %v2972_v57  ;;  %v3090_v36 = vmul.f32 0.35355338, %v2919_v23 }
 0xbaf   : > { %v10396_v22 = vadd.f32 %v8954_v7, %v3094_v62  ;;  %v10408_v30 = vadd.f32 %v8954_v7, %v3090_v36 }
 0xbb1   : > { %v3134_v26 = vsel %vm714_vm14, %v10396_v22, -inf  ;;  %v3122_v2 = vsel %vm714_vm14, %v10408_v30, -inf }
 0xbb2   : > { %3135 = vmax.xlane.f32.xlu1 %v3134_v26 }
 0xbb4   : > { %v2922_v33 = vpop.f32.mrf.mxu0  ;;  %v2975_v14 = vpop.f32.mrf.mxu1 }
 0xbb5   : > { %v3091_v3 = vmul.f32 0.35355338, %v2922_v33  ;;  %v3095_v53 = vmul.f32 0.35355338, %v2975_v14 }
 0xbb7   : > { %v10413_v13 = vadd.f32 %v8955_v42, %v3091_v3  ;;  %v10434_v35 = vadd.f32 %v8955_v42, %v3095_v53 }
 0xbb8   : > { %v3025_v29 = vpop.f32.mrf.mxu2  ;;  %v3078_v28 = vpop.f32.mrf.mxu3 }
 0xbb9   : > { %v3098_v20 = vmul.f32 0.35355338, %v3025_v29  ;;  %v3102_v52 = vmul.f32 0.35355338, %v3078_v28  ;;  %v3125_v27 = vsel %vm714_vm14, %v10413_v13, -inf  ;;  %v3137_v17 = vsel %vm714_vm14, %v10434_v35, -inf }
 0xbbb   : > { %v10400_v55 = vadd.f32 %v8954_v7, %v3098_v20  ;;  %v10402_v46 = vadd.f32 %v8954_v7, %v3102_v52 }
 0xbbc   : > { %v2925_v24 = vpop.f32.mrf.mxu0  ;;  %v2978_v61 = vpop.f32.mrf.mxu1 }
 0xbbd   : > { %v3146_v60 = vsel %vm714_vm14, %v10400_v55, -inf  ;;  %v3158_v63 = vsel %vm714_vm14, %v10402_v46, -inf  ;;  %v3092_v6 = vmul.f32 0.35355338, %v2925_v24  ;;  %v3096_v40 = vmul.f32 0.35355338, %v2978_v61 }
 0xbbe   : > { %3147 = vmax.xlane.f32.xlu0 %v3146_v60  ;;  %3159 = vmax.xlane.f32.xlu1 %v3158_v63 }
 0xbbf   : > { %v10449_v5 = vadd.f32 %v8956_v50, %v3096_v40  ;;  %v10451_v41 = vadd.f32 %v8956_v50, %v3092_v6 }
 0xbc0   : > { %v3028_v37 = vpop.f32.mrf.mxu2  ;;  %v3081_v8 = vpop.f32.mrf.mxu3 }
 0xbc1   : > { %v3099_v38 = vmul.f32 0.35355338, %v3028_v37  ;;  %v3103_v39 = vmul.f32 0.35355338, %v3081_v8  ;;  %v3140_v7 = vsel %vm714_vm14, %v10449_v5, -inf  ;;  %v3128_v23 = vsel %vm714_vm14, %v10451_v41, -inf }
 0xbc3   : > { %v10415_v16 = vadd.f32 %v8955_v42, %v3099_v38  ;;  %v10423_v49 = vadd.f32 %v8955_v42, %v3103_v39 }
 0xbc5   : > { %v3149_v45 = vsel %vm714_vm14, %v10415_v16, -inf  ;;  %v3161_v19 = vsel %vm714_vm14, %v10423_v49, -inf  ;;  %v2928_v11 = vpop.f32.mrf.mxu0  ;;  %v2981_v15 = vpop.f32.mrf.mxu1 }
 0xbc6   : > { %3150 = vmax.xlane.f32.xlu2 %v3149_v45  ;;  %3123 = vmax.xlane.f32.xlu0 %v3122_v2  ;;  %v3093_v57 = vmul.f32 0.35355338, %v2928_v11  ;;  %v3097_v62 = vmul.f32 0.35355338, %v2981_v15 }
 0xbc7   : > { %3126 = vmax.xlane.f32.xlu1 %v3125_v27 }
 0xbc8   : > { %v3031_v31 = vpop.f32.mrf.mxu2  ;;  %v3084_v48 = vpop.f32.mrf.mxu3  ;;  %v10461_v29 = vadd.f32 %v8957_v1, %v3097_v62  ;;  %v10463_v28 = vadd.f32 %v8957_v1, %v3093_v57 }
 0xbc9   : > { %v3100_v32 = vmul.f32 0.35355338, %v3031_v31  ;;  %v3104_v56 = vmul.f32 0.35355338, %v3084_v48 }
 0xbca   : > { %v3143_v20 = vsel %vm714_vm14, %v10461_v29, -inf  ;;  %v3131_v52 = vsel %vm714_vm14, %v10463_v28, -inf }
 0xbcb   : > { %v10428_v9 = vadd.f32 %v8956_v50, %v3100_v32  ;;  %v10436_v44 = vadd.f32 %v8956_v50, %v3104_v56 }
 0xbcd   : > { %v3152_v59 = vsel %vm714_vm14, %v10428_v9, -inf  ;;  %v3164_v34 = vsel %vm714_vm14, %v10436_v44, -inf }
 0xbce   : > { %3162 = vmax.xlane.f32.xlu2 %v3161_v19  ;;  %3153 = vmax.xlane.f32.xlu0 %v3152_v59 }
 0xbd1   : > { %v3034_v47 = vpop.f32.mrf.mxu2  ;;  %v3087_v51 = vpop.f32.mrf.mxu3 }
 0xbd2   : > { %v3101_v0 = vmul.f32 0.35355338, %v3034_v47  ;;  %v3105_v43 = vmul.f32 0.35355338, %v3087_v51 }
 0xbd4   : > { %v10441_v4 = vadd.f32 %v8957_v1, %v3101_v0  ;;  %v10453_v18 = vadd.f32 %v8957_v1, %v3105_v43 }
 0xbd6   : > { %3138 = vmax.xlane.f32.xlu2 %v3137_v17  ;;  %3165 = vmax.xlane.f32.xlu0 %v3164_v34  ;;  %v3155_v54 = vsel %vm714_vm14, %v10441_v4, -inf  ;;  %v3167_v26 = vsel %vm714_vm14, %v10453_v18, -inf }
 0xbd7   : > { %3156 = vmax.xlane.f32.xlu1 %v3155_v54 }
 0xbde   : > { %3141 = vmax.xlane.f32.xlu0 %v3140_v7  ;;  %3129 = vmax.xlane.f32.xlu2 %v3128_v23 }
 0xbdf   : > { %3168 = vmax.xlane.f32.xlu1 %v3167_v26 }
 0xbe6   : > { %3144 = vmax.xlane.f32.xlu0 %v3143_v20  ;;  %3132 = vmax.xlane.f32.xlu2 %v3131_v52 }
 0xc25   : > { %v3136_v33 = vpop.xlane.xlu1 %3135 }
 0xc26   : > { %v3174_v36 = vsub.f32 %v10396_v22, %v3136_v33 }
 0xc28   : > { %v3194_v60 = vmul.f32 1.442695, %v3174_v36 }
 0xc2a   : > { %8680 = vpow2.f32 %v3194_v60 }
 0xc30   : > { %v10470_v63 = vpop.eup %8680 }
 0xc31   : > { %v3148_v3 = vpop.xlane.xlu0 %3147  ;;  %v3160_v37 = vpop.xlane.xlu1 %3159  ;;  %v3230_v8 = vsel %vm714_vm14, %v10470_v63, 0.0 }
 0xc32   : > { %v3178_v38 = vsub.f32 %v10400_v55, %v3148_v3  ;;  %v3182_v42 = vsub.f32 %v10402_v46, %v3160_v37  ;;  %3231 = vadd.xlane.f32.xlu2 %v3230_v8 }
 0xc34   : > { %v3202_v39 = vmul.f32 1.442695, %v3178_v38  ;;  %v3210_v45 = vmul.f32 1.442695, %v3182_v42 }
 0xc36   : > { %8682 = vpow2.f32 %v3202_v39 }
 0xc37   : > { %8684 = vpow2.f32 %v3210_v45 }
 0xc39   : > { %v3151_v2 = vpop.xlane.xlu2 %3150  ;;  %v3124_v22 = vpop.xlane.xlu0 %3123 }
 0xc3a   : > { %v3179_v14 = vsub.f32 %v10415_v16, %v3151_v2  ;;  %v3170_v27 = vsub.f32 %v10408_v30, %v3124_v22  ;;  %v3127_v31 = vpop.xlane.xlu1 %3126 }
 0xc3b   : > { %v3171_v32 = vsub.f32 %v10413_v13, %v3127_v31 }
 0xc3c   : > { %v10479_v48 = vpop.eup %8682  ;;  %v3204_v50 = vmul.f32 1.442695, %v3179_v14  ;;  %v3186_v55 = vmul.f32 1.442695, %v3170_v27 }
 0xc3d   : > { %v10481_v53 = vpop.eup %8684  ;;  %v3188_v46 = vmul.f32 1.442695, %v3171_v32  ;;  %v3242_v56 = vsel %vm714_vm14, %v10479_v48, 0.0 }
 0xc3e   : > { %8686 = vpow2.f32 %v3204_v50  ;;  %3243 = vadd.xlane.f32.xlu1 %v3242_v56  ;;  %v3254_v16 = vsel %vm714_vm14, %v10481_v53, 0.0 }
 0xc3f   : > { %8688 = vpow2.f32 %v3186_v55  ;;  %3255 = vadd.xlane.f32.xlu2 %v3254_v16 }
 0xc40   : > { %8690 = vpow2.f32 %v3188_v46 }
 0xc41   : > { %v3163_v30 = vpop.xlane.xlu2 %3162  ;;  %v3154_v13 = vpop.xlane.xlu0 %3153 }
 0xc42   : > { %v3183_v19 = vsub.f32 %v10423_v49, %v3163_v30  ;;  %v3180_v59 = vsub.f32 %v10428_v9, %v3154_v13 }
 0xc44   : > { %v10489_v24 = vpop.eup %8686  ;;  %v3212_v61 = vmul.f32 1.442695, %v3183_v19  ;;  %v3206_v47 = vmul.f32 1.442695, %v3180_v59 }
 0xc45   : > { %v10491_v0 = vpop.eup %8688  ;;  %v3245_v51 = vsel %vm714_vm14, %v10489_v24, 0.0 }
 0xc46   : > { %v10495_v1 = vpop.eup %8690  ;;  %8692 = vpow2.f32 %v3212_v61  ;;  %3246 = vadd.xlane.f32.xlu0 %v3245_v51  ;;  %v3218_v6 = vsel %vm714_vm14, %v10491_v0, 0.0 }
 0xc47   : > { %8694 = vpow2.f32 %v3206_v47  ;;  %3219 = vadd.xlane.f32.xlu1 %v3218_v6  ;;  %v3221_v49 = vsel %vm714_vm14, %v10495_v1, 0.0 }
 0xc48   : > { %3222 = vadd.xlane.f32.xlu2 %v3221_v49 }
 0xc49   : > { %v3139_v9 = vpop.xlane.xlu2 %3138  ;;  %v3166_v40 = vpop.xlane.xlu0 %3165 }
 0xc4a   : > { %v3175_v17 = vsub.f32 %v10434_v35, %v3139_v9  ;;  %v3184_v34 = vsub.f32 %v10436_v44, %v3166_v40  ;;  %v3157_v43 = vpop.xlane.xlu1 %3156 }
 0xc4b   : > { %v3181_v54 = vsub.f32 %v10441_v4, %v3157_v43 }
 0xc4c   : > { %v10504_v11 = vpop.eup %8692  ;;  %v3196_v15 = vmul.f32 1.442695, %v3175_v17  ;;  %v3214_v57 = vmul.f32 1.442695, %v3184_v34 }
 0xc4d   : > { %v10506_v62 = vpop.eup %8694  ;;  %v3208_v7 = vmul.f32 1.442695, %v3181_v54  ;;  %v3257_v23 = vsel %vm714_vm14, %v10504_v11, 0.0 }
 0xc4e   : > { %8696 = vpow2.f32 %v3196_v15  ;;  %3258 = vadd.xlane.f32.xlu0 %v3257_v23  ;;  %v3248_v35 = vsel %vm714_vm14, %v10506_v62, 0.0 }
 0xc4f   : > { %8698 = vpow2.f32 %v3214_v57  ;;  %3249 = vadd.xlane.f32.xlu1 %v3248_v35 }
 0xc50   : > { %8700 = vpow2.f32 %v3208_v7 }
 0xc51   : > { %v3142_v44 = vpop.xlane.xlu0 %3141  ;;  %v3130_v4 = vpop.xlane.xlu2 %3129 }
 0xc52   : > { %v3176_v26 = vsub.f32 %v10449_v5, %v3142_v44  ;;  %v3169_v20 = vpop.xlane.xlu1 %3168  ;;  %v3172_v52 = vsub.f32 %v10451_v41, %v3130_v4 }
 0xc53   : > { %v3185_v33 = vsub.f32 %v10453_v18, %v3169_v20 }
 0xc54   : > { %v10515_v36 = vpop.eup %8696  ;;  %v3198_v60 = vmul.f32 1.442695, %v3176_v26  ;;  %v3190_v3 = vmul.f32 1.442695, %v3172_v52 }
 0xc55   : > { %v10517_v37 = vpop.eup %8698  ;;  %v3216_v8 = vmul.f32 1.442695, %v3185_v33  ;;  %v3233_v38 = vsel %vm714_vm14, %v10515_v36, 0.0 }
 0xc56   : > { %v10521_v42 = vpop.eup %8700  ;;  %8702 = vpow2.f32 %v3198_v60  ;;  %3234 = vadd.xlane.f32.xlu0 %v3233_v38  ;;  %v3260_v5 = vsel %vm714_vm14, %v10517_v37, 0.0 }
 0xc57   : > { %8704 = vpow2.f32 %v3216_v8  ;;  %3261 = vadd.xlane.f32.xlu1 %v3260_v5  ;;  %v3251_v41 = vsel %vm714_vm14, %v10521_v42, 0.0 }
 0xc58   : > { %8706 = vpow2.f32 %v3190_v3  ;;  %3252 = vadd.xlane.f32.xlu2 %v3251_v41 }
 0xc59   : > { %v3145_v18 = vpop.xlane.xlu0 %3144  ;;  %v3133_v39 = vpop.xlane.xlu2 %3132 }
 0xc5a   : > { %v3177_v45 = vsub.f32 %v10461_v29, %v3145_v18  ;;  %v3173_v2 = vsub.f32 %v10463_v28, %v3133_v39 }
 0xc5c   : > { %v10529_v22 = vpop.eup %8702  ;;  %v3200_v14 = vmul.f32 1.442695, %v3177_v45  ;;  %v3192_v27 = vmul.f32 1.442695, %v3173_v2 }
 0xc5d   : > { %v10531_v31 = vpop.eup %8704  ;;  %v3236_v32 = vsel %vm714_vm14, %v10529_v22, 0.0 }
 0xc5e   : > { %v10535_v50 = vpop.eup %8706  ;;  %8708 = vpow2.f32 %v3200_v14  ;;  %v3263_v55 = vsel %vm714_vm14, %v10531_v31, 0.0  ;;  %v7909_v14 = vld [vmem:[%s12603_s9 + $0x28] sm:$0xff] }
 0xc5f   : > { %8710 = vpow2.f32 %v3192_v27  ;;  %3237 = vadd.xlane.f32.xlu1 %v3236_v32  ;;  %v3224_v29 = vsel %vm714_vm14, %v10535_v50, 0.0  ;;  %3530 = vmatpush.msra.mxu1 %v7909_v14  ;;  %v7910_v27 = vld [vmem:[%s12603_s9 + $0x30] sm:$0xff]  ;;  %v7908_v32 = vld [vmem:[%s12603_s9 + $0x20] sm:$0xff] }
 0xc60   : > { %3225 = vadd.xlane.f32.xlu0 %v3224_v29  ;;  %3264 = vadd.xlane.f32.xlu2 %v3263_v55 }
 0xc61   : > { %3571 = vmatpush.msra.mxu2 %v7910_v27  ;;  %3489 = vmatpush.msrb.mxu0 %v7908_v32 }
 0xc64   : > { %v10541_v28 = vpop.eup %8708 }
 0xc65   : > { %v10543_v46 = vpop.eup %8710  ;;  %v3239_v56 = vsel %vm714_vm14, %v10541_v28, 0.0 }
 0xc66   : > { %v3227_v16 = vsel %vm714_vm14, %v10543_v46, 0.0 }
 0xc67   : > { %3240 = vadd.xlane.f32.xlu1 %v3239_v56 }
 0xc68   : > { %3228 = vadd.xlane.f32.xlu0 %v3227_v16 }
 0xca5   : > { %v3232_v30 = vpop.xlane.xlu2 %3231 }
 0xca6   : > { %8712 = vrcp.f32 %v3232_v30 }
 0xcac   : > { %v8713_v13 = vpop.eup %8712 }
 0xcad   : > { %v3286_v19 = vmul.f32 %v8713_v13, %v10470_v63 }
 0xcaf   : > { %7996 = vmatmul.msk.f32.vlgmr.msrb.gmra.mxu1 %vm714_vm14, %v3286_v19 }
 0xcb1   : > { %v3244_v59 = vpop.xlane.xlu1 %3243 }
 0xcb2   : > { %8714 = vrcp.f32 %v3244_v59  ;;  %v3256_v61 = vpop.xlane.xlu2 %3255 }
 0xcb3   : > { %8716 = vrcp.f32 %v3256_v61 }
 0xcb8   : > { %v8715_v47 = vpop.eup %8714 }
 0xcb9   : > { %v8717_v51 = vpop.eup %8716  ;;  %v3290_v6 = vmul.f32 %v8715_v47, %v10479_v48  ;;  %v3247_v49 = vpop.xlane.xlu0 %3246 }
 0xcba   : > { %v3294_v9 = vmul.f32 %v8717_v51, %v10481_v53  ;;  %8718 = vrcp.f32 %v3247_v49  ;;  %v3220_v40 = vpop.xlane.xlu1 %3219 }
 0xcbb   : > { %8720 = vrcp.f32 %v3220_v40  ;;  %8000 = vmatmul.msk.f32.vlgmr.msrb.gmra.mxu2 %vm714_vm14, %v3290_v6  ;;  %v3223_v63 = vpop.xlane.xlu2 %3222 }
 0xcbc   : > { %8004 = vmatmul.msk.f32.vlgmr.msrb.gmra.mxu3 %vm714_vm14, %v3294_v9  ;;  %8722 = vrcp.f32 %v3223_v63 }
 0xcc0   : > { %v8719_v17 = vpop.eup %8718 }
 0xcc1   : > { %v8721_v34 = vpop.eup %8720  ;;  %v3259_v43 = vpop.xlane.xlu0 %3258  ;;  %v3291_v54 = vmul.f32 %v8719_v17, %v10489_v24 }
 0xcc2   : > { %v3282_v15 = vmul.f32 %v8721_v34, %v10491_v0  ;;  %8724 = vrcp.f32 %v3259_v43  ;;  %v3250_v48 = vpop.xlane.xlu1 %3249  ;;  %v8723_v53 = vpop.eup %8722 }
 0xcc3   : > { %8726 = vrcp.f32 %v3250_v48  ;;  %8001 = vmatmul.msk.f32.gmra.mxu2 %vm714_vm14, %v3291_v54  ;;  %v3283_v4 = vmul.f32 %v8723_v53, %v10495_v1 }
 0xcc4   : > { %7992 = vmatmul.msk.f32.vlgmr.msra.gmra.mxu0 %vm714_vm14, %v3282_v15 }
 0xcc8   : > { %v8725_v57 = vpop.eup %8724 }
 0xcc9   : > { %v8727_v7 = vpop.eup %8726  ;;  %v3235_v23 = vpop.xlane.xlu0 %3234  ;;  %v3295_v35 = vmul.f32 %v8725_v57, %v10504_v11 }
 0xcca   : > { %8728 = vrcp.f32 %v3235_v23  ;;  %v3262_v44 = vpop.xlane.xlu1 %3261  ;;  %v3292_v24 = vmul.f32 %v8727_v7, %v10506_v62 }
 0xccb   : > { %8730 = vrcp.f32 %v3262_v44  ;;  %v3253_v0 = vpop.xlane.xlu2 %3252  ;;  %8005 = vmatmul.msk.f32.gmra.mxu3 %vm714_vm14, %v3295_v35 }
 0xccc   : > { %8732 = vrcp.f32 %v3253_v0  ;;  %7993 = vmatmul.msk.f32.gmra.mxu0 %vm714_vm14, %v3283_v4  ;;  %8002 = vmatmul.msk.f32.gmra.mxu2 %vm714_vm14, %v3292_v24 }
 0xcd0   : > { %v8729_v26 = vpop.eup %8728 }
 0xcd1   : > { %v8731_v20 = vpop.eup %8730  ;;  %v3287_v52 = vmul.f32 %v8729_v26, %v10515_v36 }
 0xcd2   : > { %v8733_v11 = vpop.eup %8732  ;;  %v3238_v33 = vpop.xlane.xlu1 %3237  ;;  %v3296_v60 = vmul.f32 %v8731_v20, %v10517_v37 }
 0xcd3   : > { %8734 = vrcp.f32 %v3238_v33  ;;  %v3226_v1 = vpop.xlane.xlu0 %3225  ;;  %v3265_v62 = vpop.xlane.xlu2 %3264  ;;  %7997 = vmatmul.msk.f32.gmra.mxu1 %vm714_vm14, %v3287_v52  ;;  %v3293_v3 = vmul.f32 %v8733_v11, %v10521_v42 }
 0xcd4   : > { %8736 = vrcp.f32 %v3226_v1  ;;  %8006 = vmatmul.msk.f32.gmra.mxu3 %vm714_vm14, %v3296_v60 }
 0xcd5   : > { %8738 = vrcp.f32 %v3265_v62  ;;  %8003 = vmatmul.msk.f32.gmra.mxu2 %vm714_vm14, %v3293_v3 }
 0xcd9   : > { %v8735_v8 = vpop.eup %8734 }
 0xcda   : > { %v8737_v38 = vpop.eup %8736  ;;  %v3241_v36 = vpop.xlane.xlu1 %3240  ;;  %v3288_v5 = vmul.f32 %v8735_v8, %v10529_v22 }
 0xcdb   : > { %v8739_v41 = vpop.eup %8738  ;;  %8740 = vrcp.f32 %v3241_v36  ;;  %v3229_v37 = vpop.xlane.xlu0 %3228  ;;  %v3284_v18 = vmul.f32 %v8737_v38, %v10535_v50 }
 0xcdc   : > { %8742 = vrcp.f32 %v3229_v37  ;;  %7998 = vmatmul.msk.f32.gmra.mxu1 %vm714_vm14, %v3288_v5  ;;  %v3297_v42 = vmul.f32 %v8739_v41, %v10531_v31  ;;  %v7911_v31 = vld [vmem:[%s12603_s9 + $0x38] sm:$0xff] }
 0xcdd   : > { %7994 = vmatmul.msk.f32.gmra.mxu0 %vm714_vm14, %v3284_v18  ;;  %3612 = vmatpush.msra.mxu3 %v7911_v31 }
 0xcde   : > { %8007 = vmatmul.msk.f32.gmra.mxu3 %vm714_vm14, %v3297_v42 }
 0xce1   : > { %v8741_v39 = vpop.eup %8740 }
 0xce2   : > { %v8743_v45 = vpop.eup %8742  ;;  %v3289_v2 = vmul.f32 %v8741_v39, %v10541_v28 }
 0xce3   : > { %v3285_v22 = vmul.f32 %v8743_v45, %v10543_v46 }
 0xce4   : > { %7999 = vmatmul.msk.f32.gmra.mxu1 %vm714_vm14, %v3289_v2 }
 0xce5   : > { %7995 = vmatmul.msk.f32.gmra.mxu0 %vm714_vm14, %v3285_v22 }
 0xd2c   : > { %v3368_v50 = vpop.f32.mrf.mxu1 }
 0xd2d   : > { %8012 = vmatmul.msk.f32.vlgmr.msra.gmra.mxu1 %vm1340_vm9, %v3368_v50 }
 0xd3e   : > { %v3409_v55 = vpop.f32.mrf.mxu2 }
 0xd3f   : > { %v3450_v29 = vpop.f32.mrf.mxu3  ;;  %8016 = vmatmul.msk.f32.vlgmr.msra.gmra.mxu2 %vm1340_vm9, %v3409_v55 }
 0xd40   : > { %8020 = vmatmul.msk.f32.vlgmr.msra.gmra.mxu3 %vm1340_vm9, %v3450_v29 }
 0xd41   : > { %v3327_v28 = vpop.f32.mrf.mxu0 }
 0xd42   : > { %8008 = vmatmul.msk.f32.vlgmr.msrb.gmra.mxu0 %vm1340_vm9, %v3327_v28 }
 0xd46   : > { %v3412_v46 = vpop.f32.mrf.mxu2 }
 0xd47   : > { %8017 = vmatmul.msk.f32.gmra.mxu2 %vm1340_vm9, %v3412_v46 }
 0xd49   : > { %v3330_v56 = vpop.f32.mrf.mxu0 }
 0xd4a   : > { %8009 = vmatmul.msk.f32.gmra.mxu0 %vm1340_vm9, %v3330_v56 }
 0xd4e   : > { %v3453_v16 = vpop.f32.mrf.mxu3 }
 0xd4f   : > { %v3415_v30 = vpop.f32.mrf.mxu2  ;;  %8021 = vmatmul.msk.f32.gmra.mxu3 %vm1340_vm9, %v3453_v16 }
 0xd50   : > { %8018 = vmatmul.msk.f32.gmra.mxu2 %vm1340_vm9, %v3415_v30  ;;  %v3371_v13 = vpop.f32.mrf.mxu1 }
 0xd51   : > { %8013 = vmatmul.msk.f32.gmra.mxu1 %vm1340_vm9, %v3371_v13 }
 0xd57   : > { %v3456_v19 = vpop.f32.mrf.mxu3 }
 0xd58   : > { %v3418_v59 = vpop.f32.mrf.mxu2  ;;  %8022 = vmatmul.msk.f32.gmra.mxu3 %vm1340_vm9, %v3456_v19 }
 0xd59   : > { %8019 = vmatmul.msk.f32.gmra.mxu2 %vm1340_vm9, %v3418_v59  ;;  %v3374_v61 = vpop.f32.mrf.mxu1 }
 0xd5a   : > { %v3333_v47 = vpop.f32.mrf.mxu0  ;;  %8014 = vmatmul.msk.f32.gmra.mxu1 %vm1340_vm9, %v3374_v61 }
 0xd5b   : > { %8010 = vmatmul.msk.f32.gmra.mxu0 %vm1340_vm9, %v3333_v47 }
 0xd61   : > { %v3459_v51 = vpop.f32.mrf.mxu3  ;;  %v3377_v6 = vpop.f32.mrf.mxu1 }
 0xd62   : > { %8023 = vmatmul.msk.f32.gmra.mxu3 %vm1340_vm9, %v3459_v51  ;;  %v3336_v49 = vpop.f32.mrf.mxu0  ;;  %8015 = vmatmul.msk.f32.gmra.mxu1 %vm1340_vm9, %v3377_v6 }
 0xd63   : > { %8011 = vmatmul.msk.f32.gmra.mxu0 %vm1340_vm9, %v3336_v49 }
 0xdaa   : > { %v3532_v9 = vpop.f32.mrf.mxu1 }
 0xdab   : > { %v3627_v17 = vsel %vm714_vm14, %v3532_v9, 0.0 }
 0xdbf   : > { %v3491_v40 = vpop.f32.mrf.mxu0 }
 0xdc0   : > { %v3626_v63 = vsel %vm714_vm14, %v3491_v40, 0.0 }
 0xdc1   : > { %v3628_v34 = vadd.f32 %v3627_v17, %v3626_v63 }
 0xdc2   : > { %v3573_v43 = vpop.f32.mrf.mxu2 }
 0xdc3   : > { %v3629_v54 = vsel %vm714_vm14, %v3573_v43, 0.0  ;;  %v3614_v15 = vpop.f32.mrf.mxu3 }
 0xdc4   : > { %v3630_v48 = vadd.f32 %v3629_v54, %v3628_v34  ;;  %v3631_v53 = vsel %vm714_vm14, %v3614_v15, 0.0 }
 0xdc6   : > { %v3632_v57 = vadd.f32 %v3631_v53, %v3630_v48  ;;  %v8028_v53 = vld [vmem:[%s12604_s10 + $0x38] sm:$0xff] }
 0xdc7   : > { %v3494_v35 = vpop.f32.mrf.mxu0  ;;  %3810 = vmatpush.msra.mxu0 %v8028_v53 }
 0xdc8   : > { %v10614_v7 = vadd.f32 %v3632_v57, %v10019_v10  ;;  %v3633_v24 = vsel %vm714_vm14, %v3494_v35, 0.0  ;;  %v8027_v57 = vld [vmem:[%s12604_s10 + $0x30] sm:$0xff]  ;;  %v8025_v35 = vld [vmem:[%s12604_s10 + $0x20] sm:$0xff] }
 0xdc9   : > { %3811 = vmatpush.msra.mxu0 %v8027_v57 }
 0xdca   : > { %v3685_v23 = vsel %vm714_vm14, %v10614_v7, 0.0  ;;  %v3576_v44 = vpop.f32.mrf.mxu2 }
 0xdcb   : > { %3686 = vadd.xlane.f32.xlu2 %v3685_v23  ;;  %v3636_v20 = vsel %vm714_vm14, %v3576_v44, 0.0  ;;  %v8026_v23 = vld [vmem:[%s12604_s10 + $0x28] sm:$0xff] }
 0xdcc   : > { %3812 = vmatpush.msra.mxu0 %v8026_v23 }
 0xdce   : > { %v3535_v4 = vpop.f32.mrf.mxu1  ;;  %3813 = vmatpush.msra.mxu0 %v8025_v35 }
 0xdcf   : > { %v3634_v0 = vsel %vm714_vm14, %v3535_v4, 0.0 }
 0xdd0   : > { %v3635_v26 = vadd.f32 %v3634_v0, %v3633_v24 }
 0xdd2   : > { %v3617_v52 = vpop.f32.mrf.mxu3  ;;  %v3637_v11 = vadd.f32 %v3636_v20, %v3635_v26 }
 0xdd3   : > { %v3638_v33 = vsel %vm714_vm14, %v3617_v52, 0.0  ;;  %v3579_v60 = vpop.f32.mrf.mxu2 }
 0xdd4   : > { %v3639_v10 = vadd.f32 %v3638_v33, %v3637_v11  ;;  %v3643_v41 = vsel %vm714_vm14, %v3579_v60, 0.0  ;;  %v8024_v60 = vld [vmem:[%s12599_s5 + $0x4] sm:$0xf] }
 0xdd6   : > { %v10623_v1 = vadd.f32 %v3639_v10, %v10024_v12 }
 0xdd7   : > { %v3538_v62 = vpop.f32.mrf.mxu1 }
 0xdd8   : > { %v3497_v3 = vpop.f32.mrf.mxu0  ;;  %v3641_v8 = vsel %vm714_vm14, %v3538_v62, 0.0  ;;  %v3688_v38 = vsel %vm714_vm14, %v10623_v1, 0.0 }
 0xdd9   : > { %v3640_v36 = vsel %vm714_vm14, %v3497_v3, 0.0  ;;  %3689 = vadd.xlane.f32.xlu0 %v3688_v38 }
 0xdda   : > { %v3642_v5 = vadd.f32 %v3641_v8, %v3640_v36  ;;  %v3773_v8 = vperm.slane %v8024_v60, 2  ;;  %v3778_v36 = vperm.slane %v8024_v60, 3  ;;  %v8031_v60 = vld [vmem:[%s12606_s12 + $0x88] sm:$0xff] }
 0xddb   : > { %v3620_v37 = vpop.f32.mrf.mxu3 }
 0xddc   : > { %v3644_v18 = vadd.f32 %v3643_v41, %v3642_v5  ;;  %v3645_v42 = vsel %vm714_vm14, %v3620_v37, 0.0  ;;  %v3582_v45 = vpop.f32.mrf.mxu2 }
 0xddd   : > { %v3650_v50 = vsel %vm714_vm14, %v3582_v45, 0.0 }
 0xdde   : > { %v3646_v39 = vadd.f32 %v3645_v42, %v3644_v18 }
 0xddf   : > { %v3541_v12 = vpop.f32.mrf.mxu1 }
 0xde0   : > { %v10632_v2 = vadd.f32 %v3646_v39, %v10029_v21  ;;  %v3500_v22 = vpop.f32.mrf.mxu0  ;;  %v3648_v14 = vsel %vm714_vm14, %v3541_v12, 0.0 }
 0xde1   : > { %v3647_v27 = vsel %vm714_vm14, %v3500_v22, 0.0 }
 0xde2   : > { %v3649_v31 = vadd.f32 %v3648_v14, %v3647_v27  ;;  %v3691_v32 = vsel %vm714_vm14, %v10632_v2, 0.0  ;;  %v8045_v27 = vld [vmem:[%s12606_s12 + $0xf8] sm:$0xff] }
 0xde3   : > { %3692 = vadd.xlane.f32.xlu1 %v3691_v32  ;;  %3863 = vmatpush.msrb.mxu1 %v8045_v27 }
 0xde4   : > { %v3651_v55 = vadd.f32 %v3650_v50, %v3649_v31  ;;  %v8044_v31 = vld [vmem:[%s12606_s12 + $0xf0] sm:$0xff]  ;;  %v8043_v50 = vld [vmem:[%s12606_s12 + $0xe8] sm:$0xff] }
 0xde5   : > { %v3623_v29 = vpop.f32.mrf.mxu3  ;;  %3864 = vmatpush.msrb.mxu1 %v8044_v31 }
 0xde6   : > { %v3652_v28 = vsel %vm714_vm14, %v3623_v29, 0.0 }
 0xde7   : > { %v3653_v46 = vadd.f32 %v3652_v28, %v3651_v55  ;;  %3865 = vmatpush.msrb.mxu1 %v8043_v50 }
 0xde9   : > { %v10641_v21 = vadd.f32 %v3653_v46, %v10034_v25 }
 0xdeb   : > { %v3694_v56 = vsel %vm714_vm14, %v10641_v21, 0.0 }
 0xdec   : > { %3695 = vadd.xlane.f32.xlu2 %v3694_v56 }
 0xe3e   : > { %v3687_v16 = vpop.xlane.xlu2 %3686 }
 0xe3f   : > { %v3697_v30 = vmul.f32 %v3687_v16, %v9253_v58 }
 0xe41   : > { %v3701_v13 = vsub.f32 %v10614_v7, %v3697_v30 }
 0xe43   : > { %v3705_v19 = vmul.f32 %v3701_v13, %v3701_v13 }
 0xe45   : > { %v3709_v59 = vsel %vm714_vm14, %v3705_v19, 0.0 }
 0xe46   : > { %3710 = vadd.xlane.f32.xlu0 %v3709_v59 }
 0xe4c   : > { %v3690_v61 = vpop.xlane.xlu0 %3689 }
 0xe4d   : > { %v3698_v47 = vmul.f32 %v3690_v61, %v9253_v58 }
 0xe4f   : > { %v10650_v51 = vsub.f32 %v10623_v1, %v3698_v47 }
 0xe51   : > { %v3706_v25 = vmul.f32 %v10650_v51, %v10650_v51 }
 0xe53   : > { %v3712_v6 = vsel %vm714_vm14, %v3706_v25, 0.0 }
 0xe54   : > { %3713 = vadd.xlane.f32.xlu1 %v3712_v6 }
 0xe56   : > { %v3693_v49 = vpop.xlane.xlu1 %3692 }
 0xe57   : > { %v3699_v9 = vmul.f32 %v3693_v49, %v9253_v58 }
 0xe59   : > { %v10657_v40 = vsub.f32 %v10632_v2, %v3699_v9 }
 0xe5b   : > { %v3707_v63 = vmul.f32 %v10657_v40, %v10657_v40 }
 0xe5d   : > { %v3715_v17 = vsel %vm714_vm14, %v3707_v63, 0.0 }
 0xe5e   : > { %3716 = vadd.xlane.f32.xlu2 %v3715_v17 }
 0xe5f   : > { %v3696_v34 = vpop.xlane.xlu2 %3695 }
 0xe60   : > { %v3700_v43 = vmul.f32 %v3696_v34, %v9253_v58 }
 0xe62   : > { %v10664_v54 = vsub.f32 %v10641_v21, %v3700_v43 }
 0xe64   : > { %v3708_v15 = vmul.f32 %v10664_v54, %v10664_v54 }
 0xe66   : > { %v3718_v48 = vsel %vm714_vm14, %v3708_v15, 0.0 }
 0xe67   : > { %3719 = vadd.xlane.f32.xlu0 %v3718_v48 }
 0xeb9   : > { %v3711_v44 = vpop.xlane.xlu0 %3710 }
 0xeba   : > { %v3721_v4 = vmul.f32 %v3711_v44, %v9253_v58 }
 0xebc   : > { %v3725_v24 = vadd.f32 1e-05, %v3721_v4  ;;  %v8041_v4 = vld [vmem:[%s12606_s12 + $0xd8] sm:$0xff] }
 0xebe   : > { %8744 = vrsqrt.f32 %v3725_v24  ;;  %vm3735_vm6 = vweird.f32 %v3725_v24 }
 0xec4   : > { %v8745_v0 = vpop.eup %8744 }
 0xec5   : > { %v3730_v26 = vmul.f32 %v8745_v0, %v3725_v24  ;;  %vm3736_vm5 = vweird.f32 %v8745_v0  ;;  %v8040_v24 = vld [vmem:[%s12606_s12 + $0xd0] sm:$0xff] }
 0xec6   : > { %vm3737_vm7 = vmor %vm3735_vm6, %vm3736_vm5 }
 0xec7   : > { %v3731_v20 = vmul.f32 %v8745_v0, %v3730_v26  ;;  %v3714_v52 = vpop.xlane.xlu1 %3713  ;;  %v8037_v26 = vld [vmem:[%s12606_s12 + $0xb8] sm:$0xff] }
 0xec8   : > { %v3722_v11 = vmul.f32 %v3714_v52, %v9253_v58  ;;  %v8035_v52 = vld [vmem:[%s12606_s12 + $0xa8] sm:$0xff] }
 0xec9   : > { %v3732_v33 = vmul.f32 0.5, %v3731_v20  ;;  %v8036_v20 = vld [vmem:[%s12606_s12 + $0xb0] sm:$0xff] }
 0xeca   : > { %v3726_v10 = vadd.f32 1e-05, %v3722_v11  ;;  %v8034_v11 = vld [vmem:[%s12606_s12 + $0xa0] sm:$0xff] }
 0xecb   : > { %v3733_v62 = vsub.f32 1.5, %v3732_v33  ;;  %v8033_v33 = vld [vmem:[%s12606_s12 + $0x98] sm:$0xff] }
 0xecc   : > { %8746 = vrsqrt.f32 %v3726_v10  ;;  %vm3745_vm10 = vweird.f32 %v3726_v10 }
 0xecd   : > { %v3734_v3 = vmul.f32 %v8745_v0, %v3733_v62  ;;  %v8030_v62 = vld [vmem:[%s12606_s12 + $0x80] sm:$0xff] }
 0xecf   : > { %v3738_v38 = vsel %vm3737_vm7, %v8745_v0, %v3734_v3  ;;  %v8038_v0 = vld [vmem:[%s12606_s12 + $0xc0] sm:$0xff] }
 0xed0   : > { %v3769_v5 = vmul.f32 %v3738_v38, %v3701_v13  ;;  %v8558_v3 = vld [vmem:[%s12605_s11 + $0x1] ss:$0 sm:$0xff] }
 0xed1   : > { %v3717_v41 = vpop.xlane.xlu2 %3716 }
 0xed2   : > { %v8747_v37 = vpop.eup %8746  ;;  %v3774_v18 = vmul.f32 %v3773_v8, %v3769_v5  ;;  %v3723_v42 = vmul.f32 %v3717_v41, %v9253_v58 }
 0xed3   : > { %v3740_v39 = vmul.f32 %v8747_v37, %v3726_v10  ;;  %vm3746_vm8 = vweird.f32 %v8747_v37  ;;  %v8032_v10 = vld [vmem:[%s12606_s12 + $0x90] sm:$0xff] }
 0xed4   : > { %v3779_v12 = vadd.f32 %v3778_v36, %v3774_v18  ;;  %v3727_v45 = vadd.f32 1e-05, %v3723_v42  ;;  %vm3747_vm11 = vmor %vm3745_vm10, %vm3746_vm8 }
 0xed5   : > { %v3741_v22 = vmul.f32 %v8747_v37, %v3740_v39 }
 0xed6   : > { %8748 = vrsqrt.f32 %v3727_v45  ;;  %8047 = vmatmul.msk.f32.vlgmr.msra.gmra.mxu0 %vm714_vm14, %v3779_v12  ;;  %vm3755_vm13 = vweird.f32 %v3727_v45 }
 0xed7   : > { %v3742_v14 = vmul.f32 0.5, %v3741_v22 }
 0xed9   : > { %v3743_v32 = vsub.f32 1.5, %v3742_v14 }
 0xeda   : > { %v3720_v55 = vpop.xlane.xlu0 %3719 }
 0xedb   : > { %v3744_v29 = vmul.f32 %v8747_v37, %v3743_v32  ;;  %v3724_v28 = vmul.f32 %v3720_v55, %v9253_v58 }
 0xedc   : > { %v8749_v46 = vpop.eup %8748 }
 0xedd   : > { %v3748_v56 = vsel %vm3747_vm11, %v8747_v37, %v3744_v29  ;;  %v3750_v16 = vmul.f32 %v8749_v46, %v3727_v45  ;;  %v3728_v30 = vadd.f32 1e-05, %v3724_v28  ;;  %vm3756_vm12 = vweird.f32 %v8749_v46 }
 0xede   : > { %v3770_v13 = vmul.f32 %v3748_v56, %v10650_v51  ;;  %vm3757_vm15 = vmor %vm3755_vm13, %vm3756_vm12 }
 0xedf   : > { %v3751_v19 = vmul.f32 %v8749_v46, %v3750_v16  ;;  %8750 = vrsqrt.f32 %v3728_v30  ;;  %vm3765_vm1 = vweird.f32 %v3728_v30 }
 0xee0   : > { %v3775_v59 = vmul.f32 %v3773_v8, %v3770_v13 }
 0xee1   : > { %v3752_v61 = vmul.f32 0.5, %v3751_v19 }
 0xee2   : > { %v3780_v47 = vadd.f32 %v3778_v36, %v3775_v59 }
 0xee3   : > { %v3753_v25 = vsub.f32 1.5, %v3752_v61 }
 0xee4   : > { %8048 = vmatmul.msk.f32.gmra.mxu0 %vm714_vm14, %v3780_v47 }
 0xee5   : > { %v8751_v6 = vpop.eup %8750  ;;  %v3754_v49 = vmul.f32 %v8749_v46, %v3753_v25 }
 0xee6   : > { %v3760_v9 = vmul.f32 %v8751_v6, %v3728_v30  ;;  %vm3766_vm0 = vweird.f32 %v8751_v6 }
 0xee7   : > { %v3758_v63 = vsel %vm3757_vm15, %v8749_v46, %v3754_v49  ;;  %vm3767_vm2 = vmor %vm3765_vm1, %vm3766_vm0 }
 0xee8   : > { %v3771_v17 = vmul.f32 %v3758_v63, %v10657_v40  ;;  %v3761_v34 = vmul.f32 %v8751_v6, %v3760_v9  ;;  %v8042_v40 = vld [vmem:[%s12606_s12 + $0xe0] sm:$0xff] }
 0xee9   : > { %3866 = vmatpush.msrb.mxu1 %v8042_v40 }
 0xeea   : > { %v3762_v43 = vmul.f32 0.5, %v3761_v34  ;;  %v3776_v51 = vmul.f32 %v3773_v8, %v3771_v17 }
 0xeeb   : > { %3867 = vmatpush.msrb.mxu1 %v8041_v4 }
 0xeec   : > { %v3763_v15 = vsub.f32 1.5, %v3762_v43  ;;  %v3781_v48 = vadd.f32 %v3778_v36, %v3776_v51 }
 0xeed   : > { %3868 = vmatpush.msrb.mxu1 %v8040_v24 }
 0xeee   : > { %v3764_v53 = vmul.f32 %v8751_v6, %v3763_v15  ;;  %8049 = vmatmul.msk.f32.gmra.mxu0 %vm714_vm14, %v3781_v48 }
 0xef0   : > { %v3768_v57 = vsel %vm3767_vm2, %v8751_v6, %v3764_v53 }
 0xef1   : > { %v3772_v23 = vmul.f32 %v3768_v57, %v10664_v54  ;;  %v8039_v54 = vld [vmem:[%s12606_s12 + $0xc8] sm:$0xff] }
 0xef2   : > { %3869 = vmatpush.msrb.mxu1 %v8039_v54 }
 0xef3   : > { %v3777_v35 = vmul.f32 %v3773_v8, %v3772_v23 }
 0xef4   : > { %3870 = vmatpush.msrb.mxu1 %v8038_v0 }
 0xef5   : > { %v3782_v44 = vadd.f32 %v3778_v36, %v3777_v35 }
 0xef6   : > { %3871 = vmatpush.msrb.mxu1 %v8037_v26 }
 0xef7   : > { %8050 = vmatmul.msk.f32.gmra.mxu0 %vm714_vm14, %v3782_v44  ;;  %v8559_v44 = vld [vmem:[%s12607_s13 + $0x1] ss:$0 sm:$0xff] }
 0xef8   : > { %3872 = vmatpush.msrb.mxu1 %v8036_v20 }
 0xefa   : > { %3873 = vmatpush.msrb.mxu1 %v8035_v52 }
 0xefc   : > { %3874 = vmatpush.msrb.mxu1 %v8034_v11 }
 0xefe   : > { %3875 = vmatpush.msrb.mxu1 %v8033_v33 }
 0xf00   : > { %3876 = vmatpush.msrb.mxu1 %v8032_v10 }
 0xf02   : > { %3877 = vmatpush.msrb.mxu1 %v8031_v60 }
 0xf04   : > { %3878 = vmatpush.msrb.mxu1 %v8030_v62 }
 0xf53   : > { %v3815_v8 = vpop.f32.mrf.mxu0 }
 0xf54   : > { %v3816_v38 = vadd.f32 %v8558_v3, %v3815_v8 }
 0xf56   : > { %v3827_v36 = vmul.f32 %v3816_v38, %v3816_v38 }
 0xf58   : > { %v3831_v5 = vmul.f32 %v3827_v36, %v3816_v38 }
 0xf5a   : > { %v3835_v41 = vmul.f32 0.044715, %v3831_v5 }
 0xf5c   : > { %v3839_v37 = vadd.f32 %v3835_v41, %v3816_v38 }
 0xf5e   : > { %v3843_v18 = vmul.f32 0.7978846, %v3839_v37 }
 0xf60   : > { %8752 = vtanh.f32 %v3843_v18 }
 0xf61   : > { %v3818_v42 = vpop.f32.mrf.mxu0 }
 0xf62   : > { %v3819_v39 = vadd.f32 %v8558_v3, %v3818_v42 }
 0xf64   : > { %v3828_v12 = vmul.f32 %v3819_v39, %v3819_v39 }
 0xf66   : > { %v8753_v45 = vpop.eup %8752  ;;  %v3832_v22 = vmul.f32 %v3828_v12, %v3819_v39 }
 0xf67   : > { %v3851_v14 = vadd.f32 1.0, %v8753_v45 }
 0xf68   : > { %v3836_v27 = vmul.f32 0.044715, %v3832_v22 }
 0xf69   : > { %v3855_v31 = vmul.f32 0.5, %v3851_v14 }
 0xf6a   : > { %v3840_v32 = vadd.f32 %v3836_v27, %v3819_v39 }
 0xf6b   : > { %v3859_v50 = vmul.f32 %v3855_v31, %v3816_v38  ;;  %v3821_v55 = vpop.f32.mrf.mxu0 }
 0xf6c   : > { %v3822_v29 = vadd.f32 %v8558_v3, %v3821_v55  ;;  %v3844_v28 = vmul.f32 0.7978846, %v3840_v32 }
 0xf6d   : > { %3879 = vmatmul.f32.vlgmr.msrb.gmra.mxu1 %v3859_v50 }
 0xf6e   : > { %v3829_v46 = vmul.f32 %v3822_v29, %v3822_v29  ;;  %8754 = vtanh.f32 %v3844_v28 }
 0xf70   : > { %v3833_v56 = vmul.f32 %v3829_v46, %v3822_v29 }
 0xf72   : > { %v3837_v16 = vmul.f32 0.044715, %v3833_v56 }
 0xf74   : > { %v8755_v30 = vpop.eup %8754  ;;  %v3824_v13 = vpop.f32.mrf.mxu0  ;;  %v3841_v19 = vadd.f32 %v3837_v16, %v3822_v29 }
 0xf75   : > { %v3825_v59 = vadd.f32 %v8558_v3, %v3824_v13  ;;  %v3852_v61 = vadd.f32 1.0, %v8755_v30 }
 0xf76   : > { %v3845_v47 = vmul.f32 0.7978846, %v3841_v19 }
 0xf77   : > { %v3830_v25 = vmul.f32 %v3825_v59, %v3825_v59  ;;  %v3856_v6 = vmul.f32 0.5, %v3852_v61 }
 0xf78   : > { %8756 = vtanh.f32 %v3845_v47 }
 0xf79   : > { %v3834_v49 = vmul.f32 %v3830_v25, %v3825_v59  ;;  %v3860_v9 = vmul.f32 %v3856_v6, %v3819_v39  ;;  %v548_v25 = vld [vmem:[%s12608_s14] sm:$0x3] }
 0xf7b   : > { %v3838_v63 = vmul.f32 0.044715, %v3834_v49  ;;  %3882 = vmatmul.f32.gmra.mxu1 %v3860_v9  ;;  %v3991_v49 = vperm.slane %v548_v25, 0 }
 0xf7d   : > { %v3842_v17 = vadd.f32 %v3838_v63, %v3825_v59 }
 0xf7e   : > { %v8757_v34 = vpop.eup %8756 }
 0xf7f   : > { %v3853_v43 = vadd.f32 1.0, %v8757_v34  ;;  %v3846_v51 = vmul.f32 0.7978846, %v3842_v17  ;;  %v3996_v17 = vperm.slane %v548_v25, 1 }
 0xf81   : > { %v3857_v15 = vmul.f32 0.5, %v3853_v43  ;;  %8758 = vtanh.f32 %v3846_v51 }
 0xf83   : > { %v3861_v48 = vmul.f32 %v3857_v15, %v3822_v29 }
 0xf85   : > { %3885 = vmatmul.f32.gmra.mxu1 %v3861_v48 }
 0xf87   : > { %v8759_v53 = vpop.eup %8758 }
 0xf88   : > { %v3854_v57 = vadd.f32 1.0, %v8759_v53 }
 0xf8a   : > { %v3858_v23 = vmul.f32 0.5, %v3854_v57 }
 0xf8c   : > { %v3862_v35 = vmul.f32 %v3858_v23, %v3825_v59 }
 0xf8e   : > { %3888 = vmatmul.f32.gmra.mxu1 %v3862_v35 }
 0xfea   : > { %v3880_v40 = vpop.f32.mrf.mxu1 }
 0xfeb   : > { %v3892_v4 = vadd.f32 %v3880_v40, %v10614_v7 }
 0xfed   : > { %v3899_v24 = vadd.f32 %v8559_v44, %v3892_v4 }
 0xfef   : > { %v3903_v54 = vsel %vm714_vm14, %v3899_v24, 0.0 }
 0xff0   : > { %3904 = vadd.xlane.f32.xlu1 %v3903_v54 }
 0xff8   : > { %v3883_v0 = vpop.f32.mrf.mxu1 }
 0xff9   : > { %v3893_v26 = vadd.f32 %v3883_v0, %v10623_v1 }
 0xffb   : > { %v3900_v20 = vadd.f32 %v8559_v44, %v3893_v26 }
 0xffd   : > { %v3906_v52 = vsel %vm714_vm14, %v3900_v20, 0.0 }
 0xffe   : > { %3907 = vadd.xlane.f32.xlu2 %v3906_v52 }
0x1002   : > { %v3886_v11 = vpop.f32.mrf.mxu1 }
0x1003   : > { %v3894_v33 = vadd.f32 %v3886_v11, %v10632_v2 }
0x1005   : > { %v3901_v10 = vadd.f32 %v8559_v44, %v3894_v33 }
0x1007   : > { %v3909_v60 = vsel %vm714_vm14, %v3901_v10, 0.0 }
0x1008   : > { %3910 = vadd.xlane.f32.xlu0 %v3909_v60 }
0x100b   : > { %v3889_v62 = vpop.f32.mrf.mxu1 }
0x100c   : > { %v3895_v7 = vadd.f32 %v3889_v62, %v10641_v21 }
0x100e   : > { %v3902_v3 = vadd.f32 %v8559_v44, %v3895_v7 }
0x1010   : > { %v3912_v8 = vsel %vm714_vm14, %v3902_v3, 0.0 }
0x1011   : > { %3913 = vadd.xlane.f32.xlu1 %v3912_v8 }
0x1063   : > { %v3905_v38 = vpop.xlane.xlu1 %3904 }
0x1064   : > { %v3915_v1 = vmul.f32 %v3905_v38, %v9253_v58 }
0x1066   : > { %v3919_v36 = vsub.f32 %v3899_v24, %v3915_v1 }
0x1068   : > { %v3923_v5 = vmul.f32 %v3919_v36, %v3919_v36 }
0x106a   : > { %v3927_v41 = vsel %vm714_vm14, %v3923_v5, 0.0 }
0x106b   : > { %3928 = vadd.xlane.f32.xlu2 %v3927_v41 }
0x1071   : > { %v3908_v2 = vpop.xlane.xlu2 %3907 }
0x1072   : > { %v3916_v37 = vmul.f32 %v3908_v2, %v9253_v58 }
0x1074   : > { %v3920_v18 = vsub.f32 %v3900_v20, %v3916_v37 }
0x1076   : > { %v3924_v42 = vmul.f32 %v3920_v18, %v3920_v18 }
0x1078   : > { %v3930_v39 = vsel %vm714_vm14, %v3924_v42, 0.0 }
0x1079   : > { %3931 = vadd.xlane.f32.xlu0 %v3930_v39 }
0x107b   : > { %v3911_v21 = vpop.xlane.xlu0 %3910 }
0x107c   : > { %v3917_v12 = vmul.f32 %v3911_v21, %v9253_v58 }
0x107e   : > { %v10762_v45 = vsub.f32 %v3901_v10, %v3917_v12 }
0x1080   : > { %v3925_v22 = vmul.f32 %v10762_v45, %v10762_v45 }
0x1082   : > { %v3933_v14 = vsel %vm714_vm14, %v3925_v22, 0.0 }
0x1083   : > { %3934 = vadd.xlane.f32.xlu1 %v3933_v14 }
0x1084   : > { %v3914_v27 = vpop.xlane.xlu1 %3913 }
0x1085   : > { %v3918_v31 = vmul.f32 %v3914_v27, %v9253_v58 }
0x1087   : > { %v10768_v32 = vsub.f32 %v3902_v3, %v3918_v31 }
0x1089   : > { %v3926_v50 = vmul.f32 %v10768_v32, %v10768_v32 }
0x108b   : > { %v3936_v55 = vsel %vm714_vm14, %v3926_v50, 0.0 }
0x108c   : > { %3937 = vadd.xlane.f32.xlu2 %v3936_v55 }
0x10de   : > { %v3929_v29 = vpop.xlane.xlu2 %3928 }
0x10df   : > { %v3939_v28 = vmul.f32 %v3929_v29, %v9253_v58 }
0x10e1   : > { %v3943_v46 = vadd.f32 1e-05, %v3939_v28 }
0x10e3   : > { %8760 = vrsqrt.f32 %v3943_v46  ;;  %vm3953_vm4 = vweird.f32 %v3943_v46 }
0x10e9   : > { %v8761_v56 = vpop.eup %8760 }
0x10ea   : > { %v3948_v16 = vmul.f32 %v8761_v56, %v3943_v46  ;;  %vm3954_vm3 = vweird.f32 %v8761_v56 }
0x10eb   : > { %vm3955_vm5 = vmor %vm3953_vm4, %vm3954_vm3 }
0x10ec   : > { %v3949_v30 = vmul.f32 %v8761_v56, %v3948_v16  ;;  %v3932_v13 = vpop.xlane.xlu0 %3931 }
0x10ed   : > { %v3940_v19 = vmul.f32 %v3932_v13, %v9253_v58 }
0x10ee   : > { %v3950_v59 = vmul.f32 0.5, %v3949_v30 }
0x10ef   : > { %v3944_v61 = vadd.f32 1e-05, %v3940_v19 }
0x10f0   : > { %v3951_v47 = vsub.f32 1.5, %v3950_v59 }
0x10f1   : > { %8762 = vrsqrt.f32 %v3944_v61  ;;  %vm3963_vm7 = vweird.f32 %v3944_v61 }
0x10f2   : > { %v3952_v6 = vmul.f32 %v8761_v56, %v3951_v47 }
0x10f4   : > { %v3956_v9 = vsel %vm3955_vm5, %v8761_v56, %v3952_v6 }
0x10f5   : > { %v3987_v63 = vmul.f32 %v3956_v9, %v3919_v36 }
0x10f6   : > { %v3935_v34 = vpop.xlane.xlu1 %3934 }
0x10f7   : > { %v8763_v43 = vpop.eup %8762  ;;  %v3941_v51 = vmul.f32 %v3935_v34, %v9253_v58  ;;  %v3992_v15 = vmul.f32 %v3991_v49, %v3987_v63  ;;  %v8059_v34 = vld [vmem:[%s12600_s6 + $0x138] sm:$0xff] }
0x10f8   : > { %v3958_v48 = vmul.f32 %v8763_v43, %v3944_v61  ;;  %vm3964_vm6 = vweird.f32 %v8763_v43  ;;  %4210 = vmatpush.msrb.mxu3 %v8059_v34 }
0x10f9   : > { %v3945_v53 = vadd.f32 1e-05, %v3941_v51  ;;  %v10779_v57 = vadd.f32 %v3996_v17, %v3992_v15  ;;  %vm3965_vm8 = vmor %vm3963_vm7, %vm3964_vm6  ;;  %v8067_v51 = vld [vmem:[%s12600_s6 + $0x178] sm:$0xff]  ;;  %v8054_v15 = vld [vmem:[%s12600_s6 + $0x110] sm:$0xff] }
0x10fa   : > { %v3959_v23 = vmul.f32 %v8763_v43, %v3958_v48  ;;  %4268 = vmatpush.msra.mxu1 %v8067_v51  ;;  %v8058_v48 = vld [vmem:[%s12600_s6 + $0x130] sm:$0xff]  ;;  %v8072_v51 = vld [vmem:[%s12601_s7 + $0x120] sm:$0xff] }
0x10fb   : > { %8764 = vrsqrt.f32 %v3945_v53  ;;  %v4059_v35 = vsel %vm714_vm14, %v10779_v57, 0.0  ;;  %vm3973_vm11 = vweird.f32 %v3945_v53  ;;  %4211 = vmatpush.msrb.mxu3 %v8058_v48  ;;  %v8076_v48 = vld [vmem:[%s12601_s7 + $0x140] sm:$0xff] }
0x10fc   : > { %v3960_v44 = vmul.f32 0.5, %v3959_v23  ;;  %4060 = vadd.xlane.f32.xlu0 %v4059_v35  ;;  %v8066_v23 = vld [vmem:[%s12600_s6 + $0x170] sm:$0xff]  ;;  %v8053_v35 = vld [vmem:[%s12600_s6 + $0x108] sm:$0xff] }
0x10fd   : > { %4269 = vmatpush.msra.mxu1 %v8066_v23 }
0x10fe   : > { %v3961_v40 = vsub.f32 1.5, %v3960_v44  ;;  %v8057_v44 = vld [vmem:[%s12600_s6 + $0x128] sm:$0xff] }
0x10ff   : > { %v3938_v4 = vpop.xlane.xlu2 %3937  ;;  %4212 = vmatpush.msrb.mxu3 %v8057_v44 }
0x1100   : > { %v3962_v24 = vmul.f32 %v8763_v43, %v3961_v40  ;;  %v3942_v54 = vmul.f32 %v3938_v4, %v9253_v58  ;;  %v8061_v40 = vld [vmem:[%s12600_s6 + $0x148] sm:$0xff] }
0x1101   : > { %v8765_v0 = vpop.eup %8764  ;;  %v8065_v4 = vld [vmem:[%s12600_s6 + $0x168] sm:$0xff] }
0x1102   : > { %v3966_v26 = vsel %vm3965_vm8, %v8763_v43, %v3962_v24  ;;  %v3968_v20 = vmul.f32 %v8765_v0, %v3945_v53  ;;  %v3946_v52 = vadd.f32 1e-05, %v3942_v54  ;;  %vm3974_vm10 = vweird.f32 %v8765_v0  ;;  %v8063_v43 = vld [vmem:[%s12600_s6 + $0x158] sm:$0xff]  ;;  %v8062_v53 = vld [vmem:[%s12600_s6 + $0x150] sm:$0xff]  ;;  %4270 = vmatpush.msra.mxu1 %v8065_v4  ;;  %v8052_v24 = vld [vmem:[%s12600_s6 + $0x100] sm:$0xff] }
0x1103   : > { %v3988_v11 = vmul.f32 %v3966_v26, %v3920_v18  ;;  %vm3975_vm12 = vmor %vm3973_vm11, %vm3974_vm10  ;;  %4239 = vmatpush.msrb.mxu0 %v8063_v43  ;;  %v8056_v54 = vld [vmem:[%s12600_s6 + $0x120] sm:$0xff] }
0x1104   : > { %v3969_v33 = vmul.f32 %v8765_v0, %v3968_v20  ;;  %8766 = vrsqrt.f32 %v3946_v52  ;;  %vm3983_vm15 = vweird.f32 %v3946_v52  ;;  %4213 = vmatpush.msrb.mxu3 %v8056_v54  ;;  %v8064_v26 = vld [vmem:[%s12600_s6 + $0x160] sm:$0xff] }
0x1105   : > { %v3993_v10 = vmul.f32 %v3991_v49, %v3988_v11  ;;  %4240 = vmatpush.msrb.mxu0 %v8062_v53  ;;  %4271 = vmatpush.msra.mxu1 %v8064_v26  ;;  %v8068_v43 = vld [vmem:[%s12601_s7 + $0x100] sm:$0xff] }
0x1106   : > { %v3970_v60 = vmul.f32 0.5, %v3969_v33  ;;  %v8080_v53 = vld [vmem:[%s12601_s7 + $0x160] sm:$0xff] }
0x1107   : > { %v10784_v62 = vadd.f32 %v3996_v17, %v3993_v10  ;;  %4241 = vmatpush.msrb.mxu0 %v8061_v40 }
0x1108   : > { %v3971_v7 = vsub.f32 1.5, %v3970_v60 }
0x1109   : > { %v4062_v3 = vsel %vm714_vm14, %v10784_v62, 0.0 }
0x110a   : > { %v8767_v8 = vpop.eup %8766  ;;  %v3972_v38 = vmul.f32 %v8765_v0, %v3971_v7  ;;  %4063 = vadd.xlane.f32.xlu1 %v4062_v3 }
0x110b   : > { %v3978_v1 = vmul.f32 %v8767_v8, %v3946_v52  ;;  %vm3984_vm13 = vweird.f32 %v8767_v8 }
0x110c   : > { %v3976_v36 = vsel %vm3975_vm12, %v8765_v0, %v3972_v38  ;;  %vm3985_vm0 = vmor %vm3983_vm15, %vm3984_vm13  ;;  %v8060_v0 = vld [vmem:[%s12600_s6 + $0x140] sm:$0xff] }
0x110d   : > { %v3979_v5 = vmul.f32 %v8767_v8, %v3978_v1  ;;  %v3989_v41 = vmul.f32 %v3976_v36, %v10762_v45  ;;  %4242 = vmatpush.msrb.mxu0 %v8060_v0  ;;  %v8051_v1 = vld [vmem:[%s12599_s5 + $0x8] sm:$0xf] }
0x110f   : > { %v3980_v2 = vmul.f32 0.5, %v3979_v5  ;;  %v3994_v37 = vmul.f32 %v3991_v49, %v3989_v41  ;;  %v10879_v41 = vperm.slane %v8051_v1, 0 }
0x1111   : > { %v3981_v18 = vsub.f32 1.5, %v3980_v2  ;;  %v10789_v42 = vadd.f32 %v3996_v17, %v3994_v37  ;;  %v10881_v37 = vperm.slane %v8051_v1, 1 }
0x1113   : > { %v3982_v39 = vmul.f32 %v8767_v8, %v3981_v18  ;;  %v4065_v21 = vsel %vm714_vm14, %v10789_v42, 0.0 }
0x1114   : > { %4066 = vadd.xlane.f32.xlu2 %v4065_v21 }
0x1115   : > { %v3986_v12 = vsel %vm3985_vm0, %v8767_v8, %v3982_v39 }
0x1116   : > { %v3990_v22 = vmul.f32 %v3986_v12, %v10768_v32 }
0x1118   : > { %v3995_v14 = vmul.f32 %v3991_v49, %v3990_v22 }
0x111a   : > { %v10794_v27 = vadd.f32 %v3996_v17, %v3995_v14  ;;  %v8055_v17 = vld [vmem:[%s12600_s6 + $0x118] sm:$0xff] }
0x111b   : > { %4181 = vmatpush.msrb.mxu2 %v8055_v17 }
0x111c   : > { %v4068_v45 = vsel %vm714_vm14, %v10794_v27, 0.0 }
0x111d   : > { %4069 = vadd.xlane.f32.xlu0 %v4068_v45  ;;  %4182 = vmatpush.msrb.mxu2 %v8054_v15 }
0x111f   : > { %4183 = vmatpush.msrb.mxu2 %v8053_v35 }
0x1121   : > { %4184 = vmatpush.msrb.mxu2 %v8052_v24 }
0x116f   : > { %v4061_v31 = vpop.xlane.xlu0 %4060 }
0x1170   : > { %v4071_v50 = vmul.f32 %v4061_v31, %v9253_v58 }
0x1172   : > { %v10800_v55 = vsub.f32 %v10779_v57, %v4071_v50 }
0x1174   : > { %v4079_v29 = vmul.f32 %v10800_v55, %v10800_v55 }
0x1176   : > { %v4083_v28 = vsel %vm714_vm14, %v4079_v29, 0.0  ;;  %v8071_v29 = vld [vmem:[%s12601_s7 + $0x118] sm:$0xff] }
0x1177   : > { %4084 = vadd.xlane.f32.xlu1 %v4083_v28  ;;  %v8079_v28 = vld [vmem:[%s12601_s7 + $0x158] sm:$0xff]  ;;  %4297 = vmatpush.msra.mxu2 %v8071_v29  ;;  %v8084_v29 = vld [vmem:[%s12602_s8 + $0x100] sm:$0xff] }
0x1178   : > { %4355 = vmatpush.msra.mxu0 %v8079_v28  ;;  %v8092_v28 = vld [vmem:[%s12602_s8 + $0x140] sm:$0xff] }
0x117d   : > { %v4064_v32 = vpop.xlane.xlu1 %4063 }
0x117e   : > { %v4072_v46 = vmul.f32 %v4064_v32, %v9253_v58 }
0x1180   : > { %v10807_v56 = vsub.f32 %v10784_v62, %v4072_v46  ;;  %v8070_v46 = vld [vmem:[%s12601_s7 + $0x110] sm:$0xff] }
0x1181   : > { %4298 = vmatpush.msra.mxu2 %v8070_v46 }
0x1182   : > { %v4080_v16 = vmul.f32 %v10807_v56, %v10807_v56 }
0x1184   : > { %v4086_v30 = vsel %vm714_vm14, %v4080_v16, 0.0  ;;  %v8074_v16 = vld [vmem:[%s12601_s7 + $0x130] sm:$0xff] }
0x1185   : > { %4087 = vadd.xlane.f32.xlu2 %v4086_v30  ;;  %v8083_v30 = vld [vmem:[%s12601_s7 + $0x178] sm:$0xff] }
0x1186   : > { %4384 = vmatpush.msrb.mxu1 %v8083_v30 }
0x1187   : > { %v4067_v13 = vpop.xlane.xlu2 %4066 }
0x1188   : > { %v4073_v19 = vmul.f32 %v4067_v13, %v9253_v58 }
0x118a   : > { %v10814_v59 = vsub.f32 %v10789_v42, %v4073_v19  ;;  %v8078_v19 = vld [vmem:[%s12601_s7 + $0x150] sm:$0xff] }
0x118b   : > { %4356 = vmatpush.msra.mxu0 %v8078_v19 }
0x118c   : > { %v4081_v61 = vmul.f32 %v10814_v59, %v10814_v59 }
0x118e   : > { %v4089_v47 = vsel %vm714_vm14, %v4081_v61, 0.0  ;;  %v8082_v61 = vld [vmem:[%s12601_s7 + $0x170] sm:$0xff] }
0x118f   : > { %4090 = vadd.xlane.f32.xlu0 %v4089_v47  ;;  %v8069_v47 = vld [vmem:[%s12601_s7 + $0x108] sm:$0xff]  ;;  %4385 = vmatpush.msrb.mxu1 %v8082_v61 }
0x1190   : > { %v4070_v25 = vpop.xlane.xlu0 %4069  ;;  %4299 = vmatpush.msra.mxu2 %v8069_v47 }
0x1191   : > { %v4074_v6 = vmul.f32 %v4070_v25, %v9253_v58 }
0x1192   : > { %4300 = vmatpush.msra.mxu2 %v8068_v43 }
0x1193   : > { %v10821_v49 = vsub.f32 %v10794_v27, %v4074_v6  ;;  %v8073_v6 = vld [vmem:[%s12601_s7 + $0x128] sm:$0xff] }
0x1195   : > { %v4082_v9 = vmul.f32 %v10821_v49, %v10821_v49 }
0x1197   : > { %v4092_v63 = vsel %vm714_vm14, %v4082_v9, 0.0  ;;  %v8077_v9 = vld [vmem:[%s12601_s7 + $0x148] sm:$0xff] }
0x1198   : > { %4093 = vadd.xlane.f32.xlu1 %v4092_v63  ;;  %v8081_v63 = vld [vmem:[%s12601_s7 + $0x168] sm:$0xff]  ;;  %4357 = vmatpush.msra.mxu0 %v8077_v9 }
0x1199   : > { %4386 = vmatpush.msrb.mxu1 %v8081_v63 }
0x119a   : > { %4358 = vmatpush.msra.mxu0 %v8076_v48 }
0x119b   : > { %4387 = vmatpush.msrb.mxu1 %v8080_v53 }
0x11ea   : > { %v4085_v20 = vpop.xlane.xlu1 %4084 }
0x11eb   : > { %v4095_v52 = vmul.f32 %v4085_v20, %v9253_v58 }
0x11ed   : > { %v4099_v11 = vadd.f32 1e-05, %v4095_v52 }
0x11ef   : > { %8768 = vrsqrt.f32 %v4099_v11  ;;  %vm4109_vm2 = vweird.f32 %v4099_v11 }
0x11f5   : > { %v8769_v33 = vpop.eup %8768 }
0x11f6   : > { %v4104_v10 = vmul.f32 %v8769_v33, %v4099_v11  ;;  %vm4110_vm1 = vweird.f32 %v8769_v33 }
0x11f7   : > { %vm4111_vm3 = vmor %vm4109_vm2, %vm4110_vm1 }
0x11f8   : > { %v4105_v60 = vmul.f32 %v8769_v33, %v4104_v10  ;;  %v4088_v7 = vpop.xlane.xlu2 %4087 }
0x11f9   : > { %v4096_v3 = vmul.f32 %v4088_v7, %v9253_v58 }
0x11fa   : > { %v4106_v8 = vmul.f32 0.5, %v4105_v60 }
0x11fb   : > { %v4100_v38 = vadd.f32 1e-05, %v4096_v3 }
0x11fc   : > { %v4107_v36 = vsub.f32 1.5, %v4106_v8 }
0x11fd   : > { %8770 = vrsqrt.f32 %v4100_v38  ;;  %vm4119_vm5 = vweird.f32 %v4100_v38 }
0x11fe   : > { %v4108_v5 = vmul.f32 %v8769_v33, %v4107_v36 }
0x1200   : > { %v4112_v2 = vsel %vm4111_vm3, %v8769_v33, %v4108_v5 }
0x1201   : > { %v4143_v18 = vmul.f32 %v4112_v2, %v10800_v55  ;;  %v8075_v55 = vld [vmem:[%s12601_s7 + $0x138] sm:$0xff] }
0x1202   : > { %v4091_v39 = vpop.xlane.xlu0 %4090  ;;  %4326 = vmatpush.msra.mxu3 %v8075_v55  ;;  %v8095_v2 = vld [vmem:[%s12602_s8 + $0x158] sm:$0xff]  ;;  %v8088_v55 = vld [vmem:[%s12602_s8 + $0x120] sm:$0xff] }
0x1203   : > { %v8771_v21 = vpop.eup %8770  ;;  %v4148_v12 = vmul.f32 %v10879_v41, %v4143_v18  ;;  %v4097_v22 = vmul.f32 %v4091_v39, %v9253_v58  ;;  %v8086_v18 = vld [vmem:[%s12602_s8 + $0x110] sm:$0xff] }
0x1204   : > { %v4114_v14 = vmul.f32 %v8771_v21, %v4100_v38  ;;  %vm4120_vm4 = vweird.f32 %v8771_v21  ;;  %4327 = vmatpush.msra.mxu3 %v8074_v16  ;;  %v8090_v39 = vld [vmem:[%s12602_s8 + $0x130] sm:$0xff] }
0x1205   : > { %v10887_v45 = vadd.f32 %v10881_v37, %v4148_v12  ;;  %v10889_v31 = vadd.f32 1e-05, %v4097_v22  ;;  %vm4121_vm6 = vmor %vm4119_vm5, %vm4120_vm4  ;;  %v8098_v12 = vld [vmem:[%s12602_s8 + $0x170] sm:$0xff]  ;;  %v8085_v22 = vld [vmem:[%s12602_s8 + $0x108] sm:$0xff] }
0x1206   : > { %v4115_v50 = vmul.f32 %v8771_v21, %v4114_v14  ;;  %4328 = vmatpush.msra.mxu3 %v8073_v6  ;;  %v8089_v14 = vld [vmem:[%s12602_s8 + $0x128] sm:$0xff] }
0x1207   : > { %8772 = vrsqrt.f32 %v10889_v31  ;;  %8104 = vmatmul.msk.f32.vlgmr.msrb.gmra.mxu2 %vm714_vm14, %v10887_v45  ;;  %8108 = vmatmul.msk.f32.vlgmr.msrb.gmra.mxu3 %vm714_vm14, %v10887_v45  ;;  %vm4129_vm8 = vweird.f32 %v10889_v31 }
0x1208   : > { %v4116_v32 = vmul.f32 0.5, %v4115_v50  ;;  %8112 = vmatmul.msk.f32.vlgmr.msrb.gmra.mxu0 %vm714_vm14, %v10887_v45  ;;  %8116 = vmatmul.msk.f32.vlgmr.msra.gmra.mxu1 %vm714_vm14, %v10887_v45  ;;  %v8097_v50 = vld [vmem:[%s12602_s8 + $0x168] sm:$0xff] }
0x1209   : > { %4329 = vmatpush.msra.mxu3 %v8072_v51  ;;  %4471 = vmatpush.msrb.mxu0 %v8095_v2 }
0x120a   : > { %v4117_v13 = vsub.f32 1.5, %v4116_v32  ;;  %v8096_v32 = vld [vmem:[%s12602_s8 + $0x160] sm:$0xff] }
0x120b   : > { %v4094_v25 = vpop.xlane.xlu1 %4093 }
0x120c   : > { %v4118_v17 = vmul.f32 %v8771_v21, %v4117_v13  ;;  %v4098_v34 = vmul.f32 %v4094_v25, %v9253_v58 }
0x120d   : > { %v8773_v15 = vpop.eup %8772 }
0x120e   : > { %v4122_v23 = vsel %vm4121_vm6, %v8771_v21, %v4118_v17  ;;  %v4124_v35 = vmul.f32 %v8773_v15, %v10889_v31  ;;  %v4102_v44 = vadd.f32 1e-05, %v4098_v34  ;;  %vm4130_vm7 = vweird.f32 %v8773_v15  ;;  %v8094_v21 = vld [vmem:[%s12602_s8 + $0x150] sm:$0xff]  ;;  %v8093_v31 = vld [vmem:[%s12602_s8 + $0x148] sm:$0xff] }
0x120f   : > { %v4144_v40 = vmul.f32 %v4122_v23, %v10807_v56  ;;  %vm4131_vm10 = vmor %vm4129_vm8, %vm4130_vm7  ;;  %4472 = vmatpush.msrb.mxu0 %v8094_v21 }
0x1210   : > { %v4125_v4 = vmul.f32 %v8773_v15, %v4124_v35  ;;  %8774 = vrsqrt.f32 %v4102_v44  ;;  %vm4139_vm12 = vweird.f32 %v4102_v44 }
0x1211   : > { %v4149_v24 = vmul.f32 %v10879_v41, %v4144_v40  ;;  %4473 = vmatpush.msrb.mxu0 %v8093_v31 }
0x1212   : > { %v4126_v54 = vmul.f32 0.5, %v4125_v4 }
0x1213   : > { %v10954_v0 = vadd.f32 %v10881_v37, %v4149_v24  ;;  %4474 = vmatpush.msrb.mxu0 %v8092_v28 }
0x1214   : > { %v4127_v26 = vsub.f32 1.5, %v4126_v54 }
0x1215   : > { %8105 = vmatmul.msk.f32.gmra.mxu2 %vm714_vm14, %v10954_v0  ;;  %8109 = vmatmul.msk.f32.gmra.mxu3 %vm714_vm14, %v10954_v0 }
0x1216   : > { %v8775_v56 = vpop.eup %8774  ;;  %v4128_v20 = vmul.f32 %v8773_v15, %v4127_v26  ;;  %8113 = vmatmul.msk.f32.gmra.mxu0 %vm714_vm14, %v10954_v0  ;;  %8117 = vmatmul.msk.f32.gmra.mxu1 %vm714_vm14, %v10954_v0 }
0x1217   : > { %v4134_v52 = vmul.f32 %v8775_v56, %v4102_v44  ;;  %vm4140_vm11 = vweird.f32 %v8775_v56 }
0x1218   : > { %v4132_v11 = vsel %vm4131_vm10, %v8773_v15, %v4128_v20  ;;  %vm4141_vm13 = vmor %vm4139_vm12, %vm4140_vm11 }
0x1219   : > { %v4145_v33 = vmul.f32 %v4132_v11, %v10814_v59  ;;  %v4135_v10 = vmul.f32 %v8775_v56, %v4134_v52 }
0x121b   : > { %v4150_v60 = vmul.f32 %v10879_v41, %v4145_v33  ;;  %v4136_v7 = vmul.f32 0.5, %v4135_v10 }
0x121d   : > { %v10968_v3 = vadd.f32 %v10881_v37, %v4150_v60  ;;  %v4137_v8 = vsub.f32 1.5, %v4136_v7 }
0x121f   : > { %v4138_v38 = vmul.f32 %v8775_v56, %v4137_v8  ;;  %8106 = vmatmul.msk.f32.gmra.mxu2 %vm714_vm14, %v10968_v3  ;;  %8110 = vmatmul.msk.f32.gmra.mxu3 %vm714_vm14, %v10968_v3 }
0x1220   : > { %8114 = vmatmul.msk.f32.gmra.mxu0 %vm714_vm14, %v10968_v3  ;;  %8118 = vmatmul.msk.f32.gmra.mxu1 %vm714_vm14, %v10968_v3 }
0x1221   : > { %v4142_v59 = vsel %vm4141_vm13, %v8775_v56, %v4138_v38 }
0x1222   : > { %v4146_v1 = vmul.f32 %v4142_v59, %v10821_v49  ;;  %v8087_v49 = vld [vmem:[%s12602_s8 + $0x118] sm:$0xff] }
0x1223   : > { %4413 = vmatpush.msrb.mxu2 %v8087_v49 }
0x1224   : > { %v4151_v36 = vmul.f32 %v10879_v41, %v4146_v1  ;;  %v8091_v41 = vld [vmem:[%s12602_s8 + $0x138] sm:$0xff] }
0x1225   : > { %4442 = vmatpush.msrb.mxu3 %v8091_v41  ;;  %4414 = vmatpush.msrb.mxu2 %v8086_v18 }
0x1226   : > { %v10981_v5 = vadd.f32 %v10881_v37, %v4151_v36  ;;  %v8099_v37 = vld [vmem:[%s12602_s8 + $0x178] sm:$0xff] }
0x1227   : > { %4500 = vmatpush.msra.mxu1 %v8099_v37  ;;  %4443 = vmatpush.msrb.mxu3 %v8090_v39 }
0x1228   : > { %8107 = vmatmul.msk.f32.gmra.mxu2 %vm714_vm14, %v10981_v5  ;;  %8111 = vmatmul.msk.f32.gmra.mxu3 %vm714_vm14, %v10981_v5 }
0x1229   : > { %8115 = vmatmul.msk.f32.gmra.mxu0 %vm714_vm14, %v10981_v5  ;;  %8119 = vmatmul.msk.f32.gmra.mxu1 %vm714_vm14, %v10981_v5 }
0x122a   : > { %4501 = vmatpush.msra.mxu1 %v8098_v12  ;;  %4415 = vmatpush.msrb.mxu2 %v8085_v22  ;;  %v7740_v12 = vld [vmem:[%s12629_s0 + $0x28] sm:$0xff] }
0x122b   : > { %4444 = vmatpush.msrb.mxu3 %v8089_v14 }
0x122c   : > { %4502 = vmatpush.msra.mxu1 %v8097_v50  ;;  %4416 = vmatpush.msrb.mxu2 %v8084_v29 }
0x122d   : > { %4445 = vmatpush.msrb.mxu3 %v8088_v55 }
0x122e   : > { %4503 = vmatpush.msra.mxu1 %v8096_v32  ;;  %v7739_v32 = vld [vmem:[%s12629_s0 + $0x20] sm:$0xff] }
0x1230   : > { %8120 = vmatmul.msk.f32.vlgmr.msra.gmra.mxu2 %vm714_vm14, %v10887_v45  ;;  %8124 = vmatmul.msk.f32.vlgmr.msra.gmra.mxu3 %vm714_vm14, %v10887_v45 }
0x1231   : > { %8128 = vmatmul.msk.f32.vlgmr.msra.gmra.mxu0 %vm714_vm14, %v10887_v45  ;;  %8132 = vmatmul.msk.f32.vlgmr.msrb.gmra.mxu1 %vm714_vm14, %v10887_v45 }
0x1238   : > { %8121 = vmatmul.msk.f32.gmra.mxu2 %vm714_vm14, %v10954_v0  ;;  %8125 = vmatmul.msk.f32.gmra.mxu3 %vm714_vm14, %v10954_v0 }
0x1239   : > { %8129 = vmatmul.msk.f32.gmra.mxu0 %vm714_vm14, %v10954_v0  ;;  %8133 = vmatmul.msk.f32.gmra.mxu1 %vm714_vm14, %v10954_v0 }
0x1240   : > { %8122 = vmatmul.msk.f32.gmra.mxu2 %vm714_vm14, %v10968_v3  ;;  %8126 = vmatmul.msk.f32.gmra.mxu3 %vm714_vm14, %v10968_v3 }
0x1241   : > { %8130 = vmatmul.msk.f32.gmra.mxu0 %vm714_vm14, %v10968_v3  ;;  %8134 = vmatmul.msk.f32.gmra.mxu1 %vm714_vm14, %v10968_v3 }
0x1248   : > { %8123 = vmatmul.msk.f32.gmra.mxu2 %vm714_vm14, %v10981_v5  ;;  %8127 = vmatmul.msk.f32.gmra.mxu3 %vm714_vm14, %v10981_v5 }
0x1249   : > { %8131 = vmatmul.msk.f32.gmra.mxu0 %vm714_vm14, %v10981_v5  ;;  %8135 = vmatmul.msk.f32.gmra.mxu1 %vm714_vm14, %v10981_v5 }
0x1250   : > { %8136 = vmatmul.msk.f32.vlgmr.msrb.gmra.mxu2 %vm714_vm14, %v10887_v45  ;;  %8140 = vmatmul.msk.f32.vlgmr.msrb.gmra.mxu3 %vm714_vm14, %v10887_v45 }
0x1251   : > { %8144 = vmatmul.msk.f32.vlgmr.msrb.gmra.mxu0 %vm714_vm14, %v10887_v45  ;;  %8148 = vmatmul.msk.f32.vlgmr.msra.gmra.mxu1 %vm714_vm14, %v10887_v45 }
0x1258   : > { %8137 = vmatmul.msk.f32.gmra.mxu2 %vm714_vm14, %v10954_v0  ;;  %8141 = vmatmul.msk.f32.gmra.mxu3 %vm714_vm14, %v10954_v0 }
0x1259   : > { %8145 = vmatmul.msk.f32.gmra.mxu0 %vm714_vm14, %v10954_v0  ;;  %8149 = vmatmul.msk.f32.gmra.mxu1 %vm714_vm14, %v10954_v0 }
0x1260   : > { %8138 = vmatmul.msk.f32.gmra.mxu2 %vm714_vm14, %v10968_v3  ;;  %8142 = vmatmul.msk.f32.gmra.mxu3 %vm714_vm14, %v10968_v3 }
0x1261   : > { %8146 = vmatmul.msk.f32.gmra.mxu0 %vm714_vm14, %v10968_v3  ;;  %8150 = vmatmul.msk.f32.gmra.mxu1 %vm714_vm14, %v10968_v3 }
0x1268   : > { %8139 = vmatmul.msk.f32.gmra.mxu2 %vm714_vm14, %v10981_v5  ;;  %8143 = vmatmul.msk.f32.gmra.mxu3 %vm714_vm14, %v10981_v5 }
0x1269   : > { %8147 = vmatmul.msk.f32.gmra.mxu0 %vm714_vm14, %v10981_v5  ;;  %8151 = vmatmul.msk.f32.gmra.mxu1 %vm714_vm14, %v10981_v5 }
0x1285   : > { %v4244_v45 = vpop.f32.mrf.mxu0  ;;  %v4273_v46 = vpop.f32.mrf.mxu1 }
0x128a   : > { %v4186_v16 = vpop.f32.mrf.mxu2  ;;  %v4215_v30 = vpop.f32.mrf.mxu3 }
0x1293   : > { %v4247_v13 = vpop.f32.mrf.mxu0  ;;  %v4276_v19 = vpop.f32.mrf.mxu1 }
0x1298   : > { %v4189_v61 = vpop.f32.mrf.mxu2  ;;  %v4218_v47 = vpop.f32.mrf.mxu3 }
0x129d   : > { %v4250_v25 = vpop.f32.mrf.mxu0  ;;  %v4279_v6 = vpop.f32.mrf.mxu1 }
0x12a2   : > { %v11103_v9 = vpop.f32.mrf.mxu2  ;;  %v11105_v63 = vpop.f32.mrf.mxu3 }
0x12a6   : > { %v11107_v17 = vpop.f32.mrf.mxu0  ;;  %v11109_v34 = vpop.f32.mrf.mxu1 }
0x12ab   : > { %v11111_v43 = vpop.f32.mrf.mxu2  ;;  %v11113_v51 = vpop.f32.mrf.mxu3 }
0x12ae   : > { %v4360_v15 = vpop.f32.mrf.mxu0  ;;  %v4389_v48 = vpop.f32.mrf.mxu1 }
0x12b3   : > { %v4302_v53 = vpop.f32.mrf.mxu2  ;;  %v4331_v23 = vpop.f32.mrf.mxu3 }
0x12b6   : > { %v4363_v35 = vpop.f32.mrf.mxu0  ;;  %v4392_v44 = vpop.f32.mrf.mxu1 }
0x12bb   : > { %v4305_v40 = vpop.f32.mrf.mxu2  ;;  %v4334_v4 = vpop.f32.mrf.mxu3 }
0x12be   : > { %v4366_v24 = vpop.f32.mrf.mxu0  ;;  %v4395_v54 = vpop.f32.mrf.mxu1 }
0x12c3   : > { %v4308_v0 = vpop.f32.mrf.mxu2  ;;  %v4337_v26 = vpop.f32.mrf.mxu3 }
0x12c6   : > { %v4369_v56 = vpop.f32.mrf.mxu0  ;;  %v4398_v20 = vpop.f32.mrf.mxu1 }
0x12c7   : > { %8168 = vmatpush.xpose.msk.msra.mxu0 %vm1340_vm9, %v4369_v56  ;;  %8176 = vmatpush.xpose.msk.msrb.mxu1 %vm1340_vm9, %v4398_v20 }
0x12cb   : > { %8169 = vmatpush.xpose.msk.msra.mxu0 %vm1340_vm9, %v4366_v24  ;;  %8177 = vmatpush.xpose.msk.msrb.mxu1 %vm1340_vm9, %v4395_v54  ;;  %v4311_v52 = vpop.f32.mrf.mxu2  ;;  %v4340_v11 = vpop.f32.mrf.mxu3  ;;  %v7741_v24 = vld [vmem:[%s12629_s0 + $0x30] sm:$0xff] }
0x12cc   : > { %8152 = vmatpush.xpose.msk.msra.mxu2 %vm1340_vm9, %v4311_v52  ;;  %8160 = vmatpush.xpose.msk.msra.mxu3 %vm1340_vm9, %v4340_v11 }
0x12ce   : > { %v4476_v33 = vpop.f32.mrf.mxu0  ;;  %v4505_v10 = vpop.f32.mrf.mxu1 }
0x12cf   : > { %8170 = vmatpush.xpose.msk.msra.mxu0 %vm1340_vm9, %v4363_v35  ;;  %8178 = vmatpush.xpose.msk.msrb.mxu1 %vm1340_vm9, %v4392_v44 }
0x12d0   : > { %8153 = vmatpush.xpose.msk.msra.mxu2 %vm1340_vm9, %v4308_v0  ;;  %8161 = vmatpush.xpose.msk.msra.mxu3 %vm1340_vm9, %v4337_v26 }
0x12d3   : > { %8171 = vmatpush.xpose.msk.msra.mxu0 %vm1340_vm9, %v4360_v15  ;;  %8179 = vmatpush.xpose.msk.msrb.mxu1 %vm1340_vm9, %v4389_v48  ;;  %v4418_v60 = vpop.f32.mrf.mxu2  ;;  %v4447_v7 = vpop.f32.mrf.mxu3 }
0x12d4   : > { %8154 = vmatpush.xpose.msk.msra.mxu2 %vm1340_vm9, %v4305_v40  ;;  %8162 = vmatpush.xpose.msk.msra.mxu3 %vm1340_vm9, %v4334_v4 }
0x12d6   : > { %v4479_v3 = vpop.f32.mrf.mxu0  ;;  %v4508_v8 = vpop.f32.mrf.mxu1  ;;  %8172 = vmatmul.msk.f32.vlgmr.msra.gmra.mxu0 %vm1340_vm9, %v4244_v45  ;;  %8180 = vmatmul.msk.f32.vlgmr.msrb.gmra.mxu1 %vm1340_vm9, %v4273_v46 }
0x12d8   : > { %8155 = vmatpush.xpose.msk.msra.mxu2 %vm1340_vm9, %v4302_v53  ;;  %8163 = vmatpush.xpose.msk.msra.mxu3 %vm1340_vm9, %v4331_v23 }
0x12db   : > { %v4421_v38 = vpop.f32.mrf.mxu2  ;;  %v4450_v59 = vpop.f32.mrf.mxu3  ;;  %8156 = vmatmul.msk.f32.vlgmr.msra.gmra.mxu2 %vm1340_vm9, %v4186_v16  ;;  %8164 = vmatmul.msk.f32.vlgmr.msra.gmra.mxu3 %vm1340_vm9, %v4215_v30 }
0x12de   : > { %v4482_v1 = vpop.f32.mrf.mxu0  ;;  %v4511_v36 = vpop.f32.mrf.mxu1  ;;  %8173 = vmatmul.msk.f32.gmra.mxu0 %vm1340_vm9, %v4247_v13  ;;  %8181 = vmatmul.msk.f32.gmra.mxu1 %vm1340_vm9, %v4276_v19 }
0x12e3   : > { %v4424_v5 = vpop.f32.mrf.mxu2  ;;  %v4453_v49 = vpop.f32.mrf.mxu3  ;;  %8157 = vmatmul.msk.f32.gmra.mxu2 %vm1340_vm9, %v4189_v61  ;;  %8165 = vmatmul.msk.f32.gmra.mxu3 %vm1340_vm9, %v4218_v47 }
0x12e6   : > { %v4485_v41 = vpop.f32.mrf.mxu0  ;;  %v4514_v2 = vpop.f32.mrf.mxu1  ;;  %8174 = vmatmul.msk.f32.gmra.mxu0 %vm1340_vm9, %v4250_v25  ;;  %8182 = vmatmul.msk.f32.gmra.mxu1 %vm1340_vm9, %v4279_v6 }
0x12e7   : > { %5043 = vmatpush.msrb.mxu0 %v4485_v41  ;;  %5084 = vmatpush.msra.mxu1 %v4514_v2 }
0x12e9   : > { %5044 = vmatpush.msrb.mxu0 %v4482_v1  ;;  %5085 = vmatpush.msra.mxu1 %v4511_v36 }
0x12eb   : > { %5045 = vmatpush.msrb.mxu0 %v4479_v3  ;;  %5086 = vmatpush.msra.mxu1 %v4508_v8  ;;  %v4427_v37 = vpop.f32.mrf.mxu2  ;;  %v4456_v18 = vpop.f32.mrf.mxu3 }
0x12ec   : > { %8158 = vmatmul.msk.f32.gmra.mxu2 %vm1340_vm9, %v11103_v9  ;;  %8166 = vmatmul.msk.f32.gmra.mxu3 %vm1340_vm9, %v11105_v63 }
0x12ed   : > { %4961 = vmatpush.msrb.mxu2 %v4427_v37  ;;  %5002 = vmatpush.msrb.mxu3 %v4456_v18 }
0x12ee   : > { %5046 = vmatpush.msrb.mxu0 %v4476_v33  ;;  %5087 = vmatpush.msra.mxu1 %v4505_v10 }
0x12ef   : > { %8175 = vmatmul.msk.f32.gmra.mxu0 %vm1340_vm9, %v11107_v17  ;;  %8183 = vmatmul.msk.f32.gmra.mxu1 %vm1340_vm9, %v11109_v34 }
0x12f0   : > { %4962 = vmatpush.msrb.mxu2 %v4424_v5  ;;  %5003 = vmatpush.msrb.mxu3 %v4453_v49 }
0x12f2   : > { %4963 = vmatpush.msrb.mxu2 %v4421_v38  ;;  %5004 = vmatpush.msrb.mxu3 %v4450_v59  ;;  %v7742_v38 = vld [vmem:[%s12629_s0 + $0x38] sm:$0xff] }
0x12f4   : > { %4964 = vmatpush.msrb.mxu2 %v4418_v60  ;;  %5005 = vmatpush.msrb.mxu3 %v4447_v7 }
0x12f5   : > { %8159 = vmatmul.msk.f32.gmra.mxu2 %vm1340_vm9, %v11111_v43  ;;  %8167 = vmatmul.msk.f32.gmra.mxu3 %vm1340_vm9, %v11113_v51 }
0x1353   : > { %v4664_v39 = vpop.f32.mrf.mxu0  ;;  %v4717_v30 = vpop.f32.mrf.mxu1 }
0x1354   : > { %v4737_v16 = vmul.f32 0.35355338, %v4664_v39  ;;  %v4741_v34 = vmul.f32 0.35355338, %v4717_v30 }
0x1356   : > { %v11171_v9 = vadd.f32 %v7739_v32, %v4737_v16  ;;  %v11183_v44 = vadd.f32 %v7739_v32, %v4741_v34 }
0x1358   : > { %v4785_v43 = vsel %vm714_vm14, %v11171_v9, -inf  ;;  %v4797_v26 = vsel %vm714_vm14, %v11183_v44, -inf }
0x135b   : > { %v4667_v21 = vpop.f32.mrf.mxu0  ;;  %v4720_v48 = vpop.f32.mrf.mxu1 }
0x135c   : > { %v4738_v22 = vmul.f32 0.35355338, %v4667_v21  ;;  %v4742_v56 = vmul.f32 0.35355338, %v4720_v48 }
0x135e   : > { %v4558_v14 = vpop.f32.mrf.mxu2  ;;  %v4611_v31 = vpop.f32.mrf.mxu3  ;;  %v11156_v50 = vadd.f32 %v7740_v12, %v4738_v22  ;;  %v11198_v60 = vadd.f32 %v7740_v12, %v4742_v56 }
0x135f   : > { %v4729_v29 = vmul.f32 0.35355338, %v4558_v14  ;;  %v4733_v55 = vmul.f32 0.35355338, %v4611_v31 }
0x1360   : > { %v4788_v28 = vsel %vm714_vm14, %v11156_v50, -inf  ;;  %v4800_v5 = vsel %vm714_vm14, %v11198_v60, -inf }
0x1361   : > { %4789 = vmax.xlane.f32.xlu1 %v4788_v28  ;;  %v11163_v45 = vadd.f32 %v7739_v32, %v4733_v55  ;;  %v11165_v46 = vadd.f32 %v7739_v32, %v4729_v29 }
0x1363   : > { %v4773_v13 = vsel %vm714_vm14, %v11163_v45, -inf  ;;  %v4761_v19 = vsel %vm714_vm14, %v11165_v46, -inf  ;;  %v4670_v53 = vpop.f32.mrf.mxu0  ;;  %v4723_v11 = vpop.f32.mrf.mxu1 }
0x1364   : > { %4774 = vmax.xlane.f32.xlu0 %v4773_v13  ;;  %4762 = vmax.xlane.f32.xlu2 %v4761_v19  ;;  %v4739_v49 = vmul.f32 0.35355338, %v4670_v53  ;;  %v4743_v41 = vmul.f32 0.35355338, %v4723_v11 }
0x1366   : > { %v4561_v61 = vpop.f32.mrf.mxu2  ;;  %v4614_v47 = vpop.f32.mrf.mxu3  ;;  %v11215_v39 = vadd.f32 %v7741_v24, %v4743_v41  ;;  %v11217_v21 = vadd.f32 %v7741_v24, %v4739_v49 }
0x1367   : > { %v4730_v25 = vmul.f32 0.35355338, %v4561_v61  ;;  %v4734_v6 = vmul.f32 0.35355338, %v4614_v47 }
0x1368   : > { %v4803_v31 = vsel %vm714_vm14, %v11215_v39, -inf  ;;  %v4791_v29 = vsel %vm714_vm14, %v11217_v21, -inf }
0x1369   : > { %v11173_v63 = vadd.f32 %v7740_v12, %v4734_v6  ;;  %v11175_v17 = vadd.f32 %v7740_v12, %v4730_v25 }
0x136b   : > { %v4776_v51 = vsel %vm714_vm14, %v11173_v63, -inf  ;;  %v4764_v15 = vsel %vm714_vm14, %v11175_v17, -inf }
0x136c   : > { %4786 = vmax.xlane.f32.xlu0 %v4785_v43  ;;  %4777 = vmax.xlane.f32.xlu2 %v4776_v51  ;;  %v4673_v7 = vpop.f32.mrf.mxu0  ;;  %v4726_v12 = vpop.f32.mrf.mxu1 }
0x136d   : > { %4765 = vmax.xlane.f32.xlu1 %v4764_v15  ;;  %v4740_v36 = vmul.f32 0.35355338, %v4673_v7  ;;  %v4744_v14 = vmul.f32 0.35355338, %v4726_v12 }
0x136f   : > { %v4564_v23 = vpop.f32.mrf.mxu2  ;;  %v4617_v35 = vpop.f32.mrf.mxu3  ;;  %v11213_v18 = vadd.f32 %v7742_v38, %v4740_v36  ;;  %v11225_v55 = vadd.f32 %v7742_v38, %v4744_v14 }
0x1370   : > { %v4731_v40 = vmul.f32 0.35355338, %v4564_v23  ;;  %v4735_v4 = vmul.f32 0.35355338, %v4617_v35 }
0x1371   : > { %v4794_v22 = vsel %vm714_vm14, %v11213_v18, -inf  ;;  %v4806_v28 = vsel %vm714_vm14, %v11225_v55, -inf }
0x1372   : > { %v11188_v54 = vadd.f32 %v7741_v24, %v4735_v4  ;;  %v11190_v0 = vadd.f32 %v7741_v24, %v4731_v40 }
0x1374   : > { %4798 = vmax.xlane.f32.xlu0 %v4797_v26  ;;  %v4779_v20 = vsel %vm714_vm14, %v11188_v54, -inf  ;;  %v4767_v52 = vsel %vm714_vm14, %v11190_v0, -inf }
0x1375   : > { %4780 = vmax.xlane.f32.xlu2 %v4779_v20  ;;  %4768 = vmax.xlane.f32.xlu1 %v4767_v52 }
0x1378   : > { %v4567_v33 = vpop.f32.mrf.mxu2  ;;  %v4620_v10 = vpop.f32.mrf.mxu3 }
0x1379   : > { %v4732_v3 = vmul.f32 0.35355338, %v4567_v33  ;;  %v4736_v8 = vmul.f32 0.35355338, %v4620_v10 }
0x137b   : > { %v11203_v59 = vadd.f32 %v7742_v38, %v4736_v8  ;;  %v11205_v1 = vadd.f32 %v7742_v38, %v4732_v3 }
0x137d   : > { %v4782_v2 = vsel %vm714_vm14, %v11203_v59, -inf  ;;  %4801 = vmax.xlane.f32.xlu1 %v4800_v5  ;;  %v4770_v37 = vsel %vm714_vm14, %v11205_v1, -inf }
0x137e   : > { %4783 = vmax.xlane.f32.xlu0 %v4782_v2  ;;  %4771 = vmax.xlane.f32.xlu2 %v4770_v37 }
0x1385   : > { %4795 = vmax.xlane.f32.xlu1 %v4794_v22 }
0x1386   : > { %4804 = vmax.xlane.f32.xlu0 %v4803_v31  ;;  %4792 = vmax.xlane.f32.xlu2 %v4791_v29 }
0x138e   : > { %4807 = vmax.xlane.f32.xlu2 %v4806_v28 }
0x13d4   : > { %v4790_v32 = vpop.xlane.xlu1 %4789 }
0x13d5   : > { %v4818_v16 = vsub.f32 %v11156_v50, %v4790_v32 }
0x13d7   : > { %v4843_v30 = vmul.f32 1.442695, %v4818_v16  ;;  %v4775_v13 = vpop.xlane.xlu0 %4774  ;;  %v4763_v19 = vpop.xlane.xlu2 %4762 }
0x13d8   : > { %v4813_v61 = vsub.f32 %v11163_v45, %v4775_v13  ;;  %v4809_v47 = vsub.f32 %v11165_v46, %v4763_v19 }
0x13d9   : > { %8776 = vpow2.f32 %v4843_v30 }
0x13da   : > { %v4833_v25 = vmul.f32 1.442695, %v4813_v61  ;;  %v4825_v6 = vmul.f32 1.442695, %v4809_v47 }
0x13dc   : > { %8778 = vpow2.f32 %v4833_v25 }
0x13dd   : > { %8780 = vpow2.f32 %v4825_v6 }
0x13df   : > { %v11232_v34 = vpop.eup %8776  ;;  %v4787_v43 = vpop.xlane.xlu0 %4786 }
0x13e0   : > { %v4778_v51 = vpop.xlane.xlu2 %4777  ;;  %v4817_v15 = vsub.f32 %v11171_v9, %v4787_v43  ;;  %v4766_v48 = vpop.xlane.xlu1 %4765  ;;  %v4884_v53 = vsel %vm714_vm14, %v11232_v34, 0.0 }
0x13e1   : > { %v4814_v50 = vsub.f32 %v11173_v63, %v4778_v51  ;;  %v4810_v45 = vsub.f32 %v11175_v17, %v4766_v48  ;;  %4885 = vadd.xlane.f32.xlu2 %v4884_v53 }
0x13e2   : > { %v11239_v46 = vpop.eup %8778  ;;  %v4841_v23 = vmul.f32 1.442695, %v4817_v15 }
0x13e3   : > { %v4835_v35 = vmul.f32 1.442695, %v4814_v50  ;;  %v11241_v40 = vpop.eup %8780  ;;  %v4827_v4 = vmul.f32 1.442695, %v4810_v45  ;;  %v4869_v24 = vsel %vm714_vm14, %v11239_v46, 0.0 }
0x13e4   : > { %8782 = vpow2.f32 %v4841_v23  ;;  %v4857_v9 = vsel %vm714_vm14, %v11241_v40, 0.0  ;;  %4870 = vadd.xlane.f32.xlu1 %v4869_v24 }
0x13e5   : > { %8784 = vpow2.f32 %v4835_v35  ;;  %4858 = vadd.xlane.f32.xlu0 %v4857_v9 }
0x13e6   : > { %8786 = vpow2.f32 %v4827_v4 }
0x13e7   : > { %v4799_v63 = vpop.xlane.xlu0 %4798 }
0x13e8   : > { %v4821_v17 = vsub.f32 %v11183_v44, %v4799_v63  ;;  %v4781_v26 = vpop.xlane.xlu2 %4780  ;;  %v4769_v56 = vpop.xlane.xlu1 %4768 }
0x13e9   : > { %v4815_v20 = vsub.f32 %v11188_v54, %v4781_v26  ;;  %v4811_v52 = vsub.f32 %v11190_v0, %v4769_v56 }
0x13ea   : > { %v11250_v11 = vpop.eup %8782  ;;  %v4849_v33 = vmul.f32 1.442695, %v4821_v17 }
0x13eb   : > { %v11252_v10 = vpop.eup %8784  ;;  %v4837_v7 = vmul.f32 1.442695, %v4815_v20  ;;  %v4829_v3 = vmul.f32 1.442695, %v4811_v52  ;;  %v4881_v8 = vsel %vm714_vm14, %v11250_v11, 0.0 }
0x13ec   : > { %v11256_v38 = vpop.eup %8786  ;;  %8788 = vpow2.f32 %v4849_v33  ;;  %v4872_v44 = vsel %vm714_vm14, %v11252_v10, 0.0  ;;  %4882 = vadd.xlane.f32.xlu1 %v4881_v8 }
0x13ed   : > { %8790 = vpow2.f32 %v4837_v7  ;;  %4873 = vadd.xlane.f32.xlu0 %v4872_v44  ;;  %v4860_v54 = vsel %vm714_vm14, %v11256_v38, 0.0 }
0x13ee   : > { %8792 = vpow2.f32 %v4829_v3  ;;  %4861 = vadd.xlane.f32.xlu2 %v4860_v54 }
0x13f0   : > { %v4802_v0 = vpop.xlane.xlu1 %4801 }
0x13f1   : > { %v4784_v36 = vpop.xlane.xlu0 %4783  ;;  %v4822_v5 = vsub.f32 %v11198_v60, %v4802_v0  ;;  %v4772_v49 = vpop.xlane.xlu2 %4771 }
0x13f2   : > { %v11263_v41 = vpop.eup %8788  ;;  %v4816_v2 = vsub.f32 %v11203_v59, %v4784_v36  ;;  %v4812_v37 = vsub.f32 %v11205_v1, %v4772_v49 }
0x13f3   : > { %v11267_v12 = vpop.eup %8790  ;;  %v4851_v22 = vmul.f32 1.442695, %v4822_v5  ;;  %v4893_v14 = vsel %vm714_vm14, %v11263_v41, 0.0 }
0x13f4   : > { %v11271_v31 = vpop.eup %8792  ;;  %v4839_v29 = vmul.f32 1.442695, %v4816_v2  ;;  %v4831_v28 = vmul.f32 1.442695, %v4812_v37  ;;  %v4875_v60 = vsel %vm714_vm14, %v11267_v12, 0.0  ;;  %4894 = vadd.xlane.f32.xlu1 %v4893_v14  ;;  %v8103_v14 = vld [vmem:[%s12603_s9 + $0x58] sm:$0xff] }
0x13f5   : > { %8794 = vpow2.f32 %v4851_v22  ;;  %4876 = vadd.xlane.f32.xlu0 %v4875_v60  ;;  %v4863_v59 = vsel %vm714_vm14, %v11271_v31, 0.0  ;;  %5251 = vmatpush.msrb.mxu1 %v8103_v14 }
0x13f6   : > { %8796 = vpow2.f32 %v4839_v29  ;;  %4864 = vadd.xlane.f32.xlu2 %v4863_v59 }
0x13f7   : > { %8798 = vpow2.f32 %v4831_v28 }
0x13f8   : > { %v4796_v1 = vpop.xlane.xlu1 %4795 }
0x13f9   : > { %v4805_v32 = vpop.xlane.xlu0 %4804  ;;  %v4820_v16 = vsub.f32 %v11213_v18, %v4796_v1  ;;  %v4793_v30 = vpop.xlane.xlu2 %4792 }
0x13fa   : > { %v4823_v13 = vsub.f32 %v11215_v39, %v4805_v32  ;;  %v4819_v19 = vsub.f32 %v11217_v21, %v4793_v30 }
0x13fb   : > { %v11280_v61 = vpop.eup %8794  ;;  %v4847_v47 = vmul.f32 1.442695, %v4820_v16 }
0x13fc   : > { %v11282_v25 = vpop.eup %8796  ;;  %v4853_v6 = vmul.f32 1.442695, %v4823_v13  ;;  %v4845_v43 = vmul.f32 1.442695, %v4819_v19  ;;  %v4896_v51 = vsel %vm714_vm14, %v11280_v61, 0.0 }
0x13fd   : > { %v11286_v15 = vpop.eup %8798  ;;  %8800 = vpow2.f32 %v4847_v47  ;;  %v4878_v18 = vsel %vm714_vm14, %v11282_v25, 0.0 }
0x13fe   : > { %8802 = vpow2.f32 %v4853_v6  ;;  %4879 = vadd.xlane.f32.xlu1 %v4878_v18  ;;  %4897 = vadd.xlane.f32.xlu2 %v4896_v51  ;;  %v4866_v39 = vsel %vm714_vm14, %v11286_v15, 0.0 }
0x13ff   : > { %8804 = vpow2.f32 %v4845_v43  ;;  %4867 = vadd.xlane.f32.xlu0 %v4866_v39 }
0x1401   : > { %v4808_v21 = vpop.xlane.xlu2 %4807 }
0x1402   : > { %v4824_v50 = vsub.f32 %v11225_v55, %v4808_v21 }
0x1403   : > { %v11293_v48 = vpop.eup %8800 }
0x1404   : > { %v11295_v53 = vpop.eup %8802  ;;  %v4855_v45 = vmul.f32 1.442695, %v4824_v50  ;;  %v4890_v23 = vsel %vm714_vm14, %v11293_v48, 0.0 }
0x1405   : > { %v11299_v35 = vpop.eup %8804  ;;  %v4899_v4 = vsel %vm714_vm14, %v11295_v53, 0.0 }
0x1406   : > { %8806 = vpow2.f32 %v4855_v45  ;;  %4900 = vadd.xlane.f32.xlu1 %v4899_v4  ;;  %4891 = vadd.xlane.f32.xlu2 %v4890_v23  ;;  %v4887_v24 = vsel %vm714_vm14, %v11299_v35, 0.0 }
0x1407   : > { %4888 = vadd.xlane.f32.xlu0 %v4887_v24 }
0x140c   : > { %v11305_v55 = vpop.eup %8806 }
0x140d   : > { %v4902_v9 = vsel %vm714_vm14, %v11305_v55, 0.0 }
0x140f   : > { %4903 = vadd.xlane.f32.xlu0 %v4902_v9 }
0x1454   : > { %v4886_v26 = vpop.xlane.xlu2 %4885 }
0x1457   : > { %v4871_v63 = vpop.xlane.xlu1 %4870 }
0x1458   : > { %v4859_v17 = vpop.xlane.xlu0 %4858  ;;  %8808 = vrcp.f32 %v4871_v63 }
0x1459   : > { %8810 = vrcp.f32 %v4859_v17 }
0x145e   : > { %v8809_v56 = vpop.eup %8808 }
0x145f   : > { %v8811_v20 = vpop.eup %8810  ;;  %v4925_v52 = vmul.f32 %v8809_v56, %v11239_v46  ;;  %v4883_v33 = vpop.xlane.xlu1 %4882 }
0x1460   : > { %v4921_v7 = vmul.f32 %v8811_v20, %v11241_v40  ;;  %v4874_v3 = vpop.xlane.xlu0 %4873  ;;  %8812 = vrcp.f32 %v4883_v33 }
0x1461   : > { %8814 = vrcp.f32 %v4874_v3  ;;  %v4862_v8 = vpop.xlane.xlu2 %4861  ;;  %8188 = vmatmul.msk.f32.vlgmr.msrb.gmra.mxu3 %vm714_vm14, %v4925_v52 }
0x1462   : > { %8816 = vrcp.f32 %v4862_v8  ;;  %8184 = vmatmul.msk.f32.vlgmr.msrb.gmra.mxu2 %vm714_vm14, %v4921_v7 }
0x1463   : > { %8818 = vrcp.f32 %v4886_v26 }
0x1466   : > { %v8813_v44 = vpop.eup %8812 }
0x1467   : > { %v8815_v54 = vpop.eup %8814  ;;  %v4929_v0 = vmul.f32 %v8813_v44, %v11250_v11  ;;  %v4895_v36 = vpop.xlane.xlu1 %4894  ;;  %v8100_v11 = vld [vmem:[%s12603_s9 + $0x40] sm:$0xff] }
0x1468   : > { %v8817_v5 = vpop.eup %8816  ;;  %v4877_v46 = vpop.xlane.xlu0 %4876  ;;  %8820 = vrcp.f32 %v4895_v36  ;;  %v4926_v40 = vmul.f32 %v8815_v54, %v11252_v10  ;;  %v8101_v10 = vld [vmem:[%s12603_s9 + $0x48] sm:$0xff]  ;;  %5128 = vmatpush.msra.mxu2 %v8100_v11 }
0x1469   : > { %8822 = vrcp.f32 %v4877_v46  ;;  %v4865_v49 = vpop.xlane.xlu2 %4864  ;;  %v4922_v2 = vmul.f32 %v8817_v5, %v11256_v38  ;;  %8192 = vmatmul.msk.f32.vlgmr.msrb.gmra.mxu0 %vm714_vm14, %v4929_v0  ;;  %v8819_v37 = vpop.eup %8818  ;;  %v8102_v38 = vld [vmem:[%s12603_s9 + $0x50] sm:$0xff]  ;;  %5169 = vmatpush.msra.mxu3 %v8101_v10 }
0x146a   : > { %8824 = vrcp.f32 %v4865_v49  ;;  %8189 = vmatmul.msk.f32.gmra.mxu3 %vm714_vm14, %v4926_v40  ;;  %v4930_v60 = vmul.f32 %v8819_v37, %v11232_v34  ;;  %5210 = vmatpush.msra.mxu0 %v8102_v38 }
0x146b   : > { %8185 = vmatmul.msk.f32.gmra.mxu2 %vm714_vm14, %v4922_v2 }
0x146e   : > { %v8821_v22 = vpop.eup %8820 }
0x146f   : > { %v8823_v29 = vpop.eup %8822  ;;  %v4933_v28 = vmul.f32 %v8821_v22, %v11263_v41 }
0x1470   : > { %v8825_v59 = vpop.eup %8824  ;;  %v4927_v1 = vmul.f32 %v8823_v29, %v11267_v12 }
0x1471   : > { %v4880_v32 = vpop.xlane.xlu1 %4879  ;;  %v4898_v16 = vpop.xlane.xlu2 %4897  ;;  %v4923_v30 = vmul.f32 %v8825_v59, %v11271_v31  ;;  %8193 = vmatmul.msk.f32.gmra.mxu0 %vm714_vm14, %v4930_v60  ;;  %8196 = vmatmul.msk.f32.vlgmr.msra.gmra.mxu1 %vm714_vm14, %v4933_v28 }
0x1472   : > { %8826 = vrcp.f32 %v4880_v32  ;;  %v4868_v13 = vpop.xlane.xlu0 %4867  ;;  %8190 = vmatmul.msk.f32.gmra.mxu3 %vm714_vm14, %v4927_v1 }
0x1473   : > { %8828 = vrcp.f32 %v4868_v13  ;;  %8186 = vmatmul.msk.f32.gmra.mxu2 %vm714_vm14, %v4923_v30 }
0x1474   : > { %8830 = vrcp.f32 %v4898_v16 }
0x1478   : > { %v8827_v34 = vpop.eup %8826 }
0x1479   : > { %v8829_v41 = vpop.eup %8828  ;;  %v4901_v19 = vpop.xlane.xlu1 %4900  ;;  %v4928_v12 = vmul.f32 %v8827_v34, %v11282_v25 }
0x147a   : > { %v8831_v47 = vpop.eup %8830  ;;  %8832 = vrcp.f32 %v4901_v19  ;;  %v4889_v31 = vpop.xlane.xlu0 %4888  ;;  %v4924_v6 = vmul.f32 %v8829_v41, %v11286_v15 }
0x147b   : > { %8834 = vrcp.f32 %v4889_v31  ;;  %8191 = vmatmul.msk.f32.gmra.mxu3 %vm714_vm14, %v4928_v12  ;;  %v4934_v43 = vmul.f32 %v8831_v47, %v11280_v61  ;;  %v4892_v51 = vpop.xlane.xlu2 %4891 }
0x147c   : > { %8187 = vmatmul.msk.f32.gmra.mxu2 %vm714_vm14, %v4924_v6  ;;  %8836 = vrcp.f32 %v4892_v51 }
0x147d   : > { %8197 = vmatmul.msk.f32.gmra.mxu1 %vm714_vm14, %v4934_v43 }
0x1480   : > { %v8833_v18 = vpop.eup %8832 }
0x1481   : > { %v8835_v39 = vpop.eup %8834  ;;  %v4935_v25 = vmul.f32 %v8833_v18, %v11295_v53 }
0x1482   : > { %v4904_v21 = vpop.xlane.xlu0 %4903  ;;  %v4931_v50 = vmul.f32 %v8835_v39, %v11299_v35  ;;  %v8837_v15 = vpop.eup %8836 }
0x1483   : > { %8838 = vrcp.f32 %v4904_v21  ;;  %v4932_v45 = vmul.f32 %v8837_v15, %v11293_v48 }
0x1484   : > { %8194 = vmatmul.msk.f32.gmra.mxu0 %vm714_vm14, %v4931_v50 }
0x1485   : > { %8198 = vmatmul.msk.f32.gmra.mxu1 %vm714_vm14, %v4935_v25 }
0x1489   : > { %v8839_v61 = vpop.eup %8838 }
0x148a   : > { %v4936_v23 = vmul.f32 %v8839_v61, %v11305_v55 }
0x148c   : > { %8195 = vmatmul.msk.f32.gmra.mxu0 %vm714_vm14, %v4932_v45 }
0x148d   : > { %8199 = vmatmul.msk.f32.gmra.mxu1 %vm714_vm14, %v4936_v23 }
0x14e4   : > { %v5007_v4 = vpop.f32.mrf.mxu3 }
0x14e5   : > { %v4966_v53 = vpop.f32.mrf.mxu2  ;;  %8204 = vmatmul.msk.f32.vlgmr.msra.gmra.mxu3 %vm1340_vm9, %v5007_v4 }
0x14e6   : > { %8200 = vmatmul.msk.f32.vlgmr.msra.gmra.mxu2 %vm1340_vm9, %v4966_v53  ;;  %v5048_v35 = vpop.f32.mrf.mxu0 }
0x14e7   : > { %8208 = vmatmul.msk.f32.vlgmr.msra.gmra.mxu0 %vm1340_vm9, %v5048_v35 }
0x14ed   : > { %v5010_v24 = vpop.f32.mrf.mxu3 }
0x14ee   : > { %v4969_v9 = vpop.f32.mrf.mxu2  ;;  %8205 = vmatmul.msk.f32.gmra.mxu3 %vm1340_vm9, %v5010_v24  ;;  %v5051_v48 = vpop.f32.mrf.mxu0 }
0x14ef   : > { %8201 = vmatmul.msk.f32.gmra.mxu2 %vm1340_vm9, %v4969_v9  ;;  %v5089_v55 = vpop.f32.mrf.mxu1  ;;  %8209 = vmatmul.msk.f32.gmra.mxu0 %vm1340_vm9, %v5051_v48 }
0x14f0   : > { %8212 = vmatmul.msk.f32.vlgmr.msrb.gmra.mxu1 %vm1340_vm9, %v5089_v55 }
0x14f5   : > { %v5013_v63 = vpop.f32.mrf.mxu3 }
0x14f6   : > { %v4972_v17 = vpop.f32.mrf.mxu2  ;;  %8206 = vmatmul.msk.f32.gmra.mxu3 %vm1340_vm9, %v5013_v63 }
0x14f7   : > { %8202 = vmatmul.msk.f32.gmra.mxu2 %vm1340_vm9, %v4972_v17 }
0x14fa   : > { %v5092_v26 = vpop.f32.mrf.mxu1 }
0x14fb   : > { %8213 = vmatmul.msk.f32.gmra.mxu1 %vm1340_vm9, %v5092_v26 }
0x14fe   : > { %v5016_v56 = vpop.f32.mrf.mxu3 }
0x14ff   : > { %v4975_v20 = vpop.f32.mrf.mxu2  ;;  %8207 = vmatmul.msk.f32.gmra.mxu3 %vm1340_vm9, %v5016_v56 }
0x1500   : > { %8203 = vmatmul.msk.f32.gmra.mxu2 %vm1340_vm9, %v4975_v20 }
0x1501   : > { %v5054_v52 = vpop.f32.mrf.mxu0 }
0x1502   : > { %v5095_v33 = vpop.f32.mrf.mxu1  ;;  %8210 = vmatmul.msk.f32.gmra.mxu0 %vm1340_vm9, %v5054_v52 }
0x1503   : > { %8214 = vmatmul.msk.f32.gmra.mxu1 %vm1340_vm9, %v5095_v33 }
0x1509   : > { %v5057_v7 = vpop.f32.mrf.mxu0 }
0x150a   : > { %v5098_v3 = vpop.f32.mrf.mxu1  ;;  %8211 = vmatmul.msk.f32.gmra.mxu0 %vm1340_vm9, %v5057_v7 }
0x150b   : > { %8215 = vmatmul.msk.f32.gmra.mxu1 %vm1340_vm9, %v5098_v3 }
0x1564   : > { %v5212_v8 = vpop.f32.mrf.mxu0 }
0x1565   : > { %v5268_v46 = vsel %vm714_vm14, %v5212_v8, 0.0 }
0x1568   : > { %v5171_v44 = vpop.f32.mrf.mxu3 }
0x1569   : > { %v5130_v54 = vpop.f32.mrf.mxu2  ;;  %v5266_v0 = vsel %vm714_vm14, %v5171_v44, 0.0 }
0x156a   : > { %v5265_v36 = vsel %vm714_vm14, %v5130_v54, 0.0 }
0x156b   : > { %v5267_v5 = vadd.f32 %v5266_v0, %v5265_v36 }
0x156c   : > { %v5215_v38 = vpop.f32.mrf.mxu0 }
0x156d   : > { %v5253_v40 = vpop.f32.mrf.mxu1  ;;  %v5269_v49 = vadd.f32 %v5268_v46, %v5267_v5  ;;  %v5275_v59 = vsel %vm714_vm14, %v5215_v38, 0.0  ;;  %v8217_v38 = vld [vmem:[%s12604_s10 + $0x40] sm:$0xff] }
0x156e   : > { %v5270_v2 = vsel %vm714_vm14, %v5253_v40, 0.0 }
0x156f   : > { %v5271_v37 = vadd.f32 %v5270_v2, %v5269_v49  ;;  %v8220_v2 = vld [vmem:[%s12604_s10 + $0x58] sm:$0xff] }
0x1570   : > { %5449 = vmatpush.msrb.mxu2 %v8220_v2 }
0x1571   : > { %v11374_v11 = vadd.f32 %v5271_v37, %v10779_v57  ;;  %v5174_v10 = vpop.f32.mrf.mxu3  ;;  %v8219_v37 = vld [vmem:[%s12604_s10 + $0x50] sm:$0xff] }
0x1572   : > { %v5133_v22 = vpop.f32.mrf.mxu2  ;;  %v5273_v14 = vsel %vm714_vm14, %v5174_v10, 0.0  ;;  %5450 = vmatpush.msrb.mxu2 %v8219_v37  ;;  %v8218_v10 = vld [vmem:[%s12604_s10 + $0x48] sm:$0xff] }
0x1573   : > { %v5272_v29 = vsel %vm714_vm14, %v5133_v22, 0.0  ;;  %v5324_v28 = vsel %vm714_vm14, %v11374_v11, 0.0 }
0x1574   : > { %v5274_v60 = vadd.f32 %v5273_v14, %v5272_v29  ;;  %5325 = vadd.xlane.f32.xlu1 %v5324_v28  ;;  %5451 = vmatpush.msrb.mxu2 %v8218_v10 }
0x1576   : > { %v5276_v1 = vadd.f32 %v5275_v59, %v5274_v60  ;;  %5452 = vmatpush.msrb.mxu2 %v8217_v38 }
0x1578   : > { %v5256_v32 = vpop.f32.mrf.mxu1 }
0x1579   : > { %v5277_v16 = vsel %vm714_vm14, %v5256_v32, 0.0  ;;  %v5177_v57 = vpop.f32.mrf.mxu3 }
0x157a   : > { %v5278_v30 = vadd.f32 %v5277_v16, %v5276_v1  ;;  %v5136_v13 = vpop.f32.mrf.mxu2  ;;  %v5280_v19 = vsel %vm714_vm14, %v5177_v57, 0.0 }
0x157b   : > { %v5279_v41 = vsel %vm714_vm14, %v5136_v13, 0.0 }
0x157c   : > { %v11383_v34 = vadd.f32 %v5278_v30, %v10784_v62  ;;  %v5281_v47 = vadd.f32 %v5280_v19, %v5279_v41  ;;  %v8216_v30 = vld [vmem:[%s12599_s5 + $0x8] sm:$0xf] }
0x157e   : > { %v5327_v12 = vsel %vm714_vm14, %v11383_v34, 0.0 }
0x157f   : > { %5328 = vadd.xlane.f32.xlu2 %v5327_v12  ;;  %v5218_v31 = vpop.f32.mrf.mxu0  ;;  %v5412_v12 = vperm.slane %v8216_v30, 2 }
0x1580   : > { %v5282_v6 = vsel %vm714_vm14, %v5218_v31, 0.0  ;;  %v5259_v43 = vpop.f32.mrf.mxu1 }
0x1581   : > { %v5283_v51 = vadd.f32 %v5282_v6, %v5281_v47  ;;  %v5284_v18 = vsel %vm714_vm14, %v5259_v43, 0.0  ;;  %v5417_v43 = vperm.slane %v8216_v30, 3  ;;  %v8223_v30 = vld [vmem:[%s12606_s12 + $0x108] sm:$0xff] }
0x1582   : > { %v5180_v39 = vpop.f32.mrf.mxu3 }
0x1583   : > { %v5285_v25 = vadd.f32 %v5284_v18, %v5283_v51  ;;  %v5139_v62 = vpop.f32.mrf.mxu2  ;;  %v5287_v50 = vsel %vm714_vm14, %v5180_v39, 0.0 }
0x1584   : > { %v5286_v21 = vsel %vm714_vm14, %v5139_v62, 0.0 }
0x1585   : > { %v11394_v15 = vadd.f32 %v5285_v25, %v10789_v42  ;;  %v5288_v61 = vadd.f32 %v5287_v50, %v5286_v21  ;;  %v8237_v21 = vld [vmem:[%s12606_s12 + $0x178] sm:$0xff]  ;;  %v8236_v50 = vld [vmem:[%s12606_s12 + $0x170] sm:$0xff] }
0x1586   : > { %5502 = vmatpush.msrb.mxu3 %v8237_v21 }
0x1587   : > { %v5221_v45 = vpop.f32.mrf.mxu0  ;;  %v5330_v23 = vsel %vm714_vm14, %v11394_v15, 0.0 }
0x1588   : > { %v5289_v4 = vsel %vm714_vm14, %v5221_v45, 0.0  ;;  %v5262_v53 = vpop.f32.mrf.mxu1  ;;  %5331 = vadd.xlane.f32.xlu0 %v5330_v23  ;;  %v8235_v23 = vld [vmem:[%s12606_s12 + $0x168] sm:$0xff]  ;;  %5503 = vmatpush.msrb.mxu3 %v8236_v50 }
0x1589   : > { %v5290_v35 = vadd.f32 %v5289_v4, %v5288_v61  ;;  %v5291_v24 = vsel %vm714_vm14, %v5262_v53, 0.0 }
0x158a   : > { %5504 = vmatpush.msrb.mxu3 %v8235_v23 }
0x158b   : > { %v5292_v9 = vadd.f32 %v5291_v24, %v5290_v35 }
0x158d   : > { %v11401_v48 = vadd.f32 %v5292_v9, %v10794_v27 }
0x158f   : > { %v5333_v42 = vsel %vm714_vm14, %v11401_v48, 0.0 }
0x1590   : > { %5334 = vadd.xlane.f32.xlu1 %v5333_v42 }
0x15e7   : > { %v5326_v55 = vpop.xlane.xlu1 %5325 }
0x15e8   : > { %v5336_v63 = vmul.f32 %v5326_v55, %v9253_v58 }
0x15ea   : > { %v5340_v17 = vsub.f32 %v11374_v11, %v5336_v63 }
0x15ec   : > { %v5344_v26 = vmul.f32 %v5340_v17, %v5340_v17 }
0x15ee   : > { %v5348_v56 = vsel %vm714_vm14, %v5344_v26, 0.0 }
0x15ef   : > { %5349 = vadd.xlane.f32.xlu2 %v5348_v56 }
0x15f2   : > { %v5329_v20 = vpop.xlane.xlu2 %5328 }
0x15f3   : > { %v5337_v52 = vmul.f32 %v5329_v20, %v9253_v58 }
0x15f5   : > { %v11410_v33 = vsub.f32 %v11383_v34, %v5337_v52 }
0x15f7   : > { %v5345_v27 = vmul.f32 %v11410_v33, %v11410_v33 }
0x15f9   : > { %v5351_v7 = vsel %vm714_vm14, %v5345_v27, 0.0 }
0x15fa   : > { %5352 = vadd.xlane.f32.xlu0 %v5351_v7 }
0x15fb   : > { %v5332_v3 = vpop.xlane.xlu0 %5331 }
0x15fc   : > { %v5338_v8 = vmul.f32 %v5332_v3, %v9253_v58 }
0x15fe   : > { %v11417_v44 = vsub.f32 %v11394_v15, %v5338_v8 }
0x1600   : > { %v5346_v54 = vmul.f32 %v11417_v44, %v11417_v44 }
0x1602   : > { %v5354_v0 = vsel %vm714_vm14, %v5346_v54, 0.0 }
0x1603   : > { %5355 = vadd.xlane.f32.xlu1 %v5354_v0  ;;  %v5335_v36 = vpop.xlane.xlu1 %5334 }
0x1604   : > { %v5339_v5 = vmul.f32 %v5335_v36, %v9253_v58 }
0x1606   : > { %v11424_v46 = vsub.f32 %v11401_v48, %v5339_v5 }
0x1608   : > { %v5347_v40 = vmul.f32 %v11424_v46, %v11424_v46 }
0x160a   : > { %v5357_v49 = vsel %vm714_vm14, %v5347_v40, 0.0 }
0x160b   : > { %5358 = vadd.xlane.f32.xlu2 %v5357_v49 }
0x1662   : > { %v5350_v22 = vpop.xlane.xlu2 %5349 }
0x1663   : > { %v5360_v14 = vmul.f32 %v5350_v22, %v9253_v58 }
0x1665   : > { %v5364_v29 = vadd.f32 1e-05, %v5360_v14  ;;  %v8233_v14 = vld [vmem:[%s12606_s12 + $0x158] sm:$0xff] }
0x1667   : > { %8840 = vrsqrt.f32 %v5364_v29  ;;  %vm5374_vm0 = vweird.f32 %v5364_v29 }
0x166d   : > { %v8841_v28 = vpop.eup %8840  ;;  %v5353_v60 = vpop.xlane.xlu0 %5352 }
0x166e   : > { %v5369_v59 = vmul.f32 %v8841_v28, %v5364_v29  ;;  %v5361_v1 = vmul.f32 %v5353_v60, %v9253_v58  ;;  %vm5375_vm15 = vweird.f32 %v8841_v28  ;;  %v8232_v29 = vld [vmem:[%s12606_s12 + $0x150] sm:$0xff]  ;;  %v8229_v60 = vld [vmem:[%s12606_s12 + $0x138] sm:$0xff] }
0x166f   : > { %vm5376_vm1 = vmor %vm5374_vm0, %vm5375_vm15 }
0x1670   : > { %v5370_v32 = vmul.f32 %v8841_v28, %v5369_v59  ;;  %v5365_v16 = vadd.f32 1e-05, %v5361_v1  ;;  %v8228_v59 = vld [vmem:[%s12606_s12 + $0x130] sm:$0xff]  ;;  %v8227_v1 = vld [vmem:[%s12606_s12 + $0x128] sm:$0xff] }
0x1672   : > { %v5371_v57 = vmul.f32 0.5, %v5370_v32  ;;  %8842 = vrsqrt.f32 %v5365_v16  ;;  %vm5384_vm3 = vweird.f32 %v5365_v16  ;;  %v8226_v32 = vld [vmem:[%s12606_s12 + $0x120] sm:$0xff] }
0x1674   : > { %v5372_v13 = vsub.f32 1.5, %v5371_v57  ;;  %v8224_v57 = vld [vmem:[%s12606_s12 + $0x110] sm:$0xff] }
0x1676   : > { %v5373_v41 = vmul.f32 %v8841_v28, %v5372_v13  ;;  %v5356_v19 = vpop.xlane.xlu1 %5355  ;;  %v8222_v13 = vld [vmem:[%s12606_s12 + $0x100] sm:$0xff] }
0x1677   : > { %v5362_v47 = vmul.f32 %v5356_v19, %v9253_v58 }
0x1678   : > { %v8843_v31 = vpop.eup %8842  ;;  %v5377_v6 = vsel %vm5376_vm1, %v8841_v28, %v5373_v41  ;;  %v8230_v28 = vld [vmem:[%s12606_s12 + $0x140] sm:$0xff] }
0x1679   : > { %v5408_v51 = vmul.f32 %v5377_v6, %v5340_v17  ;;  %v5379_v18 = vmul.f32 %v8843_v31, %v5365_v16  ;;  %v5366_v39 = vadd.f32 1e-05, %v5362_v47  ;;  %vm5385_vm2 = vweird.f32 %v8843_v31  ;;  %v8225_v16 = vld [vmem:[%s12606_s12 + $0x118] sm:$0xff]  ;;  %v8560_v41 = vld [vmem:[%s12605_s11 + $0x2] ss:$0 sm:$0xff] }
0x167a   : > { %vm5386_vm4 = vmor %vm5384_vm3, %vm5385_vm2 }
0x167b   : > { %v5413_v25 = vmul.f32 %v5412_v12, %v5408_v51  ;;  %v5380_v62 = vmul.f32 %v8843_v31, %v5379_v18  ;;  %8844 = vrsqrt.f32 %v5366_v39  ;;  %vm5394_vm6 = vweird.f32 %v5366_v39 }
0x167d   : > { %v5418_v61 = vadd.f32 %v5417_v43, %v5413_v25  ;;  %v5381_v45 = vmul.f32 0.5, %v5380_v62 }
0x167e   : > { %v5359_v4 = vpop.xlane.xlu2 %5358 }
0x167f   : > { %v5382_v53 = vsub.f32 1.5, %v5381_v45  ;;  %v5363_v35 = vmul.f32 %v5359_v4, %v9253_v58  ;;  %8239 = vmatmul.msk.f32.vlgmr.msrb.gmra.mxu2 %vm714_vm14, %v5418_v61 }
0x1681   : > { %v8845_v24 = vpop.eup %8844  ;;  %v5383_v9 = vmul.f32 %v8843_v31, %v5382_v53  ;;  %v5367_v42 = vadd.f32 1e-05, %v5363_v35 }
0x1682   : > { %v5389_v55 = vmul.f32 %v8845_v24, %v5366_v39  ;;  %vm5395_vm5 = vweird.f32 %v8845_v24 }
0x1683   : > { %v5387_v63 = vsel %vm5386_vm4, %v8843_v31, %v5383_v9  ;;  %8846 = vrsqrt.f32 %v5367_v42  ;;  %vm5396_vm7 = vmor %vm5394_vm6, %vm5395_vm5  ;;  %vm5404_vm10 = vweird.f32 %v5367_v42 }
0x1684   : > { %v5409_v17 = vmul.f32 %v5387_v63, %v11410_v33  ;;  %v5390_v26 = vmul.f32 %v8845_v24, %v5389_v55 }
0x1686   : > { %v5391_v56 = vmul.f32 0.5, %v5390_v26  ;;  %v5414_v20 = vmul.f32 %v5412_v12, %v5409_v17 }
0x1688   : > { %v5392_v52 = vsub.f32 1.5, %v5391_v56  ;;  %v5419_v27 = vadd.f32 %v5417_v43, %v5414_v20 }
0x1689   : > { %v8847_v7 = vpop.eup %8846 }
0x168a   : > { %v5393_v3 = vmul.f32 %v8845_v24, %v5392_v52  ;;  %v5399_v8 = vmul.f32 %v8847_v7, %v5367_v42  ;;  %8240 = vmatmul.msk.f32.gmra.mxu2 %vm714_vm14, %v5419_v27  ;;  %vm5405_vm8 = vweird.f32 %v8847_v7 }
0x168b   : > { %vm5406_vm11 = vmor %vm5404_vm10, %vm5405_vm8 }
0x168c   : > { %v5397_v54 = vsel %vm5396_vm7, %v8845_v24, %v5393_v3  ;;  %v5400_v0 = vmul.f32 %v8847_v7, %v5399_v8 }
0x168d   : > { %v5410_v36 = vmul.f32 %v5397_v54, %v11417_v44  ;;  %v8234_v44 = vld [vmem:[%s12606_s12 + $0x160] sm:$0xff] }
0x168e   : > { %v5401_v5 = vmul.f32 0.5, %v5400_v0  ;;  %5505 = vmatpush.msrb.mxu3 %v8234_v44 }
0x168f   : > { %v5415_v40 = vmul.f32 %v5412_v12, %v5410_v36 }
0x1690   : > { %v5402_v33 = vsub.f32 1.5, %v5401_v5  ;;  %5506 = vmatpush.msrb.mxu3 %v8233_v14 }
0x1691   : > { %v5420_v49 = vadd.f32 %v5417_v43, %v5415_v40 }
0x1692   : > { %v5403_v2 = vmul.f32 %v8847_v7, %v5402_v33  ;;  %5507 = vmatpush.msrb.mxu3 %v8232_v29 }
0x1693   : > { %8241 = vmatmul.msk.f32.gmra.mxu2 %vm714_vm14, %v5420_v49 }
0x1694   : > { %v5407_v37 = vsel %vm5406_vm11, %v8847_v7, %v5403_v2 }
0x1695   : > { %v5411_v10 = vmul.f32 %v5407_v37, %v11424_v46  ;;  %v8231_v46 = vld [vmem:[%s12606_s12 + $0x148] sm:$0xff] }
0x1696   : > { %5508 = vmatpush.msrb.mxu3 %v8231_v46 }
0x1697   : > { %v5416_v38 = vmul.f32 %v5412_v12, %v5411_v10 }
0x1698   : > { %5509 = vmatpush.msrb.mxu3 %v8230_v28 }
0x1699   : > { %v5421_v22 = vadd.f32 %v5417_v43, %v5416_v38 }
0x169a   : > { %5510 = vmatpush.msrb.mxu3 %v8229_v60 }
0x169b   : > { %8242 = vmatmul.msk.f32.gmra.mxu2 %vm714_vm14, %v5421_v22  ;;  %v8561_v22 = vld [vmem:[%s12607_s13 + $0x2] ss:$0 sm:$0xff] }
0x169c   : > { %5511 = vmatpush.msrb.mxu3 %v8228_v59 }
0x169e   : > { %5512 = vmatpush.msrb.mxu3 %v8227_v1 }
0x16a0   : > { %5513 = vmatpush.msrb.mxu3 %v8226_v32 }
0x16a2   : > { %5514 = vmatpush.msrb.mxu3 %v8225_v16 }
0x16a4   : > { %5515 = vmatpush.msrb.mxu3 %v8224_v57 }
0x16a6   : > { %5516 = vmatpush.msrb.mxu3 %v8223_v30 }
0x16a8   : > { %5517 = vmatpush.msrb.mxu3 %v8222_v13 }
0x1702   : > { %v5454_v19 = vpop.f32.mrf.mxu2 }
0x1703   : > { %v5455_v12 = vadd.f32 %v8560_v41, %v5454_v19 }
0x1705   : > { %v5466_v47 = vmul.f32 %v5455_v12, %v5455_v12 }
0x1707   : > { %v5470_v31 = vmul.f32 %v5466_v47, %v5455_v12 }
0x1709   : > { %v5474_v6 = vmul.f32 0.044715, %v5470_v31 }
0x170b   : > { %v5478_v43 = vadd.f32 %v5474_v6, %v5455_v12 }
0x170d   : > { %v5482_v51 = vmul.f32 0.7978846, %v5478_v43  ;;  %v5457_v18 = vpop.f32.mrf.mxu2 }
0x170e   : > { %v5458_v39 = vadd.f32 %v8560_v41, %v5457_v18 }
0x170f   : > { %8848 = vtanh.f32 %v5482_v51 }
0x1710   : > { %v5467_v25 = vmul.f32 %v5458_v39, %v5458_v39 }
0x1712   : > { %v5471_v62 = vmul.f32 %v5467_v25, %v5458_v39 }
0x1714   : > { %v5475_v21 = vmul.f32 0.044715, %v5471_v62 }
0x1715   : > { %v8849_v50 = vpop.eup %8848 }
0x1716   : > { %v5490_v61 = vadd.f32 1.0, %v8849_v50  ;;  %v5460_v45 = vpop.f32.mrf.mxu2  ;;  %v5479_v23 = vadd.f32 %v5475_v21, %v5458_v39 }
0x1717   : > { %v5461_v4 = vadd.f32 %v8560_v41, %v5460_v45 }
0x1718   : > { %v5494_v53 = vmul.f32 0.5, %v5490_v61  ;;  %v5483_v35 = vmul.f32 0.7978846, %v5479_v23 }
0x1719   : > { %v5468_v24 = vmul.f32 %v5461_v4, %v5461_v4 }
0x171a   : > { %v5498_v9 = vmul.f32 %v5494_v53, %v5455_v12  ;;  %8850 = vtanh.f32 %v5483_v35  ;;  %v8255_v35 = vld [vmem:[%s12600_s6 + $0x1d8] sm:$0xff] }
0x171b   : > { %v5472_v42 = vmul.f32 %v5468_v24, %v5461_v4  ;;  %v8247_v24 = vld [vmem:[%s12600_s6 + $0x198] sm:$0xff]  ;;  %5780 = vmatpush.msra.mxu2 %v8255_v35 }
0x171c   : > { %5518 = vmatmul.f32.vlgmr.msrb.gmra.mxu3 %v5498_v9  ;;  %v8251_v9 = vld [vmem:[%s12600_s6 + $0x1b8] sm:$0xff]  ;;  %5722 = vmatpush.msrb.mxu0 %v8247_v24 }
0x171d   : > { %v5476_v55 = vmul.f32 0.044715, %v5472_v42  ;;  %v8259_v42 = vld [vmem:[%s12600_s6 + $0x1f8] sm:$0xff]  ;;  %5751 = vmatpush.msra.mxu1 %v8251_v9 }
0x171e   : > { %v5463_v63 = vpop.f32.mrf.mxu2  ;;  %5809 = vmatpush.msra.mxu3 %v8259_v42  ;;  %v8273_v42 = vld [vmem:[%s12601_s7 + $0x1e8] sm:$0xff] }
0x171f   : > { %v5464_v17 = vadd.f32 %v8560_v41, %v5463_v63  ;;  %v5480_v26 = vadd.f32 %v5476_v55, %v5461_v4  ;;  %v8246_v55 = vld [vmem:[%s12600_s6 + $0x190] sm:$0xff] }
0x1720   : > { %v8851_v56 = vpop.eup %8850  ;;  %v8250_v63 = vld [vmem:[%s12600_s6 + $0x1b0] sm:$0xff]  ;;  %5723 = vmatpush.msrb.mxu0 %v8246_v55  ;;  %v8268_v55 = vld [vmem:[%s12601_s7 + $0x1c0] sm:$0xff] }
0x1721   : > { %v5469_v20 = vmul.f32 %v5464_v17, %v5464_v17  ;;  %v5491_v52 = vadd.f32 1.0, %v8851_v56  ;;  %v5484_v27 = vmul.f32 0.7978846, %v5480_v26  ;;  %v8258_v26 = vld [vmem:[%s12600_s6 + $0x1f0] sm:$0xff]  ;;  %5752 = vmatpush.msra.mxu1 %v8250_v63  ;;  %v8245_v56 = vld [vmem:[%s12600_s6 + $0x188] sm:$0xff] }
0x1722   : > { %5810 = vmatpush.msra.mxu3 %v8258_v26  ;;  %5724 = vmatpush.msrb.mxu0 %v8245_v56  ;;  %v8264_v26 = vld [vmem:[%s12601_s7 + $0x1a0] sm:$0xff] }
0x1723   : > { %v5473_v7 = vmul.f32 %v5469_v20, %v5464_v17  ;;  %v5495_v3 = vmul.f32 0.5, %v5491_v52  ;;  %8852 = vtanh.f32 %v5484_v27  ;;  %v8249_v20 = vld [vmem:[%s12600_s6 + $0x1a8] sm:$0xff] }
0x1724   : > { %v8253_v52 = vld [vmem:[%s12600_s6 + $0x1c8] sm:$0xff]  ;;  %5753 = vmatpush.msra.mxu1 %v8249_v20  ;;  %v8272_v20 = vld [vmem:[%s12601_s7 + $0x1e0] sm:$0xff] }
0x1725   : > { %v5477_v8 = vmul.f32 0.044715, %v5473_v7  ;;  %v5499_v54 = vmul.f32 %v5495_v3, %v5458_v39  ;;  %v8257_v27 = vld [vmem:[%s12600_s6 + $0x1e8] sm:$0xff]  ;;  %v8244_v7 = vld [vmem:[%s12600_s6 + $0x180] sm:$0xff] }
0x1726   : > { %5811 = vmatpush.msra.mxu3 %v8257_v27  ;;  %v8248_v3 = vld [vmem:[%s12600_s6 + $0x1a0] sm:$0xff]  ;;  %5725 = vmatpush.msrb.mxu0 %v8244_v7 }
0x1727   : > { %5521 = vmatmul.f32.gmra.mxu3 %v5499_v54  ;;  %v5481_v0 = vadd.f32 %v5477_v8, %v5464_v17  ;;  %v8252_v8 = vld [vmem:[%s12600_s6 + $0x1c0] sm:$0xff]  ;;  %5754 = vmatpush.msra.mxu1 %v8248_v3 }
0x1728   : > { %v8256_v54 = vld [vmem:[%s12600_s6 + $0x1e0] sm:$0xff] }
0x1729   : > { %v8853_v36 = vpop.eup %8852  ;;  %v5485_v5 = vmul.f32 0.7978846, %v5481_v0  ;;  %5812 = vmatpush.msra.mxu3 %v8256_v54 }
0x172a   : > { %v5492_v40 = vadd.f32 1.0, %v8853_v36 }
0x172b   : > { %8854 = vtanh.f32 %v5485_v5 }
0x172c   : > { %v5496_v33 = vmul.f32 0.5, %v5492_v40 }
0x172e   : > { %v5500_v49 = vmul.f32 %v5496_v33, %v5461_v4 }
0x1730   : > { %5524 = vmatmul.f32.gmra.mxu3 %v5500_v49 }
0x1731   : > { %v8855_v2 = vpop.eup %8854 }
0x1732   : > { %v5493_v37 = vadd.f32 1.0, %v8855_v2 }
0x1734   : > { %v5497_v10 = vmul.f32 0.5, %v5493_v37 }
0x1736   : > { %v5501_v38 = vmul.f32 %v5497_v10, %v5464_v17  ;;  %v8254_v17 = vld [vmem:[%s12600_s6 + $0x1d0] sm:$0xff] }
0x1737   : > { %5781 = vmatpush.msra.mxu2 %v8254_v17  ;;  %v8260_v17 = vld [vmem:[%s12601_s7 + $0x180] sm:$0xff] }
0x1738   : > { %5527 = vmatmul.f32.gmra.mxu3 %v5501_v38 }
0x1739   : > { %5782 = vmatpush.msra.mxu2 %v8253_v52 }
0x173b   : > { %5783 = vmatpush.msra.mxu2 %v8252_v8 }
0x179f   : > { %v5519_v44 = vpop.f32.mrf.mxu3 }
0x17a0   : > { %v5531_v14 = vadd.f32 %v5519_v44, %v11374_v11 }
0x17a2   : > { %v11510_v29 = vadd.f32 %v8561_v22, %v5531_v14 }
0x17a4   : > { %v5600_v46 = vsel %vm714_vm14, %v11510_v29, 0.0 }
0x17a5   : > { %5601 = vadd.xlane.f32.xlu0 %v5600_v46 }
0x17aa   : > { %v5522_v28 = vpop.f32.mrf.mxu3 }
0x17ab   : > { %v5532_v60 = vadd.f32 %v5522_v28, %v11383_v34 }
0x17ad   : > { %v11515_v59 = vadd.f32 %v8561_v22, %v5532_v60 }
0x17af   : > { %v5603_v1 = vsel %vm714_vm14, %v11515_v59, 0.0 }
0x17b0   : > { %5604 = vadd.xlane.f32.xlu1 %v5603_v1 }
0x17b3   : > { %v5525_v32 = vpop.f32.mrf.mxu3 }
0x17b4   : > { %v5533_v16 = vadd.f32 %v5525_v32, %v11394_v15 }
0x17b6   : > { %v11520_v57 = vadd.f32 %v8561_v22, %v5533_v16 }
0x17b8   : > { %v5606_v11 = vsel %vm714_vm14, %v11520_v57, 0.0 }
0x17b9   : > { %5607 = vadd.xlane.f32.xlu2 %v5606_v11 }
0x17bb   : > { %v5528_v30 = vpop.f32.mrf.mxu3 }
0x17bc   : > { %v5534_v13 = vadd.f32 %v5528_v30, %v11401_v48 }
0x17be   : > { %v11525_v41 = vadd.f32 %v8561_v22, %v5534_v13  ;;  %v8243_v22 = vld [vmem:[%s12599_s5 + $0xc] sm:$0xf] }
0x17bf   : > { %v11610_v28 = vperm.slane %v8243_v22, 0  ;;  %v11613_v16 = vperm.slane %v8243_v22, 1 }
0x17c0   : > { %v5609_v34 = vsel %vm714_vm14, %v11525_v41, 0.0 }
0x17c1   : > { %5610 = vadd.xlane.f32.xlu0 %v5609_v34  ;;  %v8271_v34 = vld [vmem:[%s12601_s7 + $0x1d8] sm:$0xff] }
0x17c2   : > { %5896 = vmatpush.msrb.mxu2 %v8271_v34  ;;  %v8285_v34 = vld [vmem:[%s12602_s8 + $0x1c8] sm:$0xff] }
0x1818   : > { %v5602_v19 = vpop.xlane.xlu0 %5601 }
0x1819   : > { %v5612_v12 = vmul.f32 %v5602_v19, %v9253_v58 }
0x181b   : > { %v11531_v15 = vsub.f32 %v11510_v29, %v5612_v12 }
0x181d   : > { %v5620_v47 = vmul.f32 %v11531_v15, %v11531_v15 }
0x181f   : > { %v5624_v31 = vsel %vm714_vm14, %v5620_v47, 0.0  ;;  %v8263_v47 = vld [vmem:[%s12601_s7 + $0x198] sm:$0xff] }
0x1820   : > { %5625 = vadd.xlane.f32.xlu1 %v5624_v31  ;;  %v8270_v31 = vld [vmem:[%s12601_s7 + $0x1d0] sm:$0xff]  ;;  %5838 = vmatpush.msra.mxu0 %v8263_v47  ;;  %v8280_v47 = vld [vmem:[%s12602_s8 + $0x1a0] sm:$0xff] }
0x1821   : > { %5897 = vmatpush.msrb.mxu2 %v8270_v31  ;;  %v8288_v31 = vld [vmem:[%s12602_s8 + $0x1e0] sm:$0xff] }
0x1823   : > { %v5605_v6 = vpop.xlane.xlu1 %5604 }
0x1824   : > { %v5613_v48 = vmul.f32 %v5605_v6, %v9253_v58 }
0x1826   : > { %v11538_v43 = vsub.f32 %v11515_v59, %v5613_v48 }
0x1828   : > { %v5621_v51 = vmul.f32 %v11538_v43, %v11538_v43 }
0x182a   : > { %v5627_v18 = vsel %vm714_vm14, %v5621_v51, 0.0  ;;  %v8275_v51 = vld [vmem:[%s12601_s7 + $0x1f8] sm:$0xff] }
0x182b   : > { %5628 = vadd.xlane.f32.xlu2 %v5627_v18  ;;  %5925 = vmatpush.msrb.mxu3 %v8275_v51 }
0x182c   : > { %v5608_v39 = vpop.xlane.xlu2 %5607 }
0x182d   : > { %v5614_v25 = vmul.f32 %v5608_v39, %v9253_v58  ;;  %v8262_v39 = vld [vmem:[%s12601_s7 + $0x190] sm:$0xff] }
0x182e   : > { %5839 = vmatpush.msra.mxu0 %v8262_v39 }
0x182f   : > { %v11545_v62 = vsub.f32 %v11520_v57, %v5614_v25  ;;  %v8266_v25 = vld [vmem:[%s12601_s7 + $0x1b0] sm:$0xff] }
0x1831   : > { %v5622_v21 = vmul.f32 %v11545_v62, %v11545_v62 }
0x1833   : > { %v5630_v50 = vsel %vm714_vm14, %v5622_v21, 0.0 }
0x1834   : > { %5631 = vadd.xlane.f32.xlu0 %v5630_v50  ;;  %v5611_v61 = vpop.xlane.xlu0 %5610 }
0x1835   : > { %v5615_v45 = vmul.f32 %v5611_v61, %v9253_v58  ;;  %v8274_v61 = vld [vmem:[%s12601_s7 + $0x1f0] sm:$0xff] }
0x1836   : > { %5926 = vmatpush.msrb.mxu3 %v8274_v61 }
0x1837   : > { %v11552_v23 = vsub.f32 %v11525_v41, %v5615_v45  ;;  %v8269_v45 = vld [vmem:[%s12601_s7 + $0x1c8] sm:$0xff] }
0x1838   : > { %5898 = vmatpush.msrb.mxu2 %v8269_v45  ;;  %5927 = vmatpush.msrb.mxu3 %v8273_v42 }
0x1839   : > { %v5623_v4 = vmul.f32 %v11552_v23, %v11552_v23 }
0x183a   : > { %5899 = vmatpush.msrb.mxu2 %v8268_v55  ;;  %5928 = vmatpush.msrb.mxu3 %v8272_v20 }
0x183b   : > { %v5633_v53 = vsel %vm714_vm14, %v5623_v4, 0.0  ;;  %v8261_v4 = vld [vmem:[%s12601_s7 + $0x188] sm:$0xff] }
0x183c   : > { %5634 = vadd.xlane.f32.xlu1 %v5633_v53  ;;  %v8265_v53 = vld [vmem:[%s12601_s7 + $0x1a8] sm:$0xff]  ;;  %5840 = vmatpush.msra.mxu0 %v8261_v4 }
0x183e   : > { %5841 = vmatpush.msra.mxu0 %v8260_v17 }
0x1893   : > { %v5626_v0 = vpop.xlane.xlu1 %5625 }
0x1894   : > { %v5636_v36 = vmul.f32 %v5626_v0, %v9253_v58 }
0x1896   : > { %v5640_v5 = vadd.f32 1e-05, %v5636_v36 }
0x1898   : > { %8856 = vrsqrt.f32 %v5640_v5  ;;  %vm5650_vm13 = vweird.f32 %v5640_v5 }
0x189e   : > { %v8857_v40 = vpop.eup %8856  ;;  %v5629_v33 = vpop.xlane.xlu2 %5628 }
0x189f   : > { %v5645_v49 = vmul.f32 %v8857_v40, %v5640_v5  ;;  %v5637_v2 = vmul.f32 %v5629_v33, %v9253_v58  ;;  %vm5651_vm12 = vweird.f32 %v8857_v40 }
0x18a0   : > { %vm5652_vm15 = vmor %vm5650_vm13, %vm5651_vm12 }
0x18a1   : > { %v5646_v37 = vmul.f32 %v8857_v40, %v5645_v49  ;;  %v5641_v10 = vadd.f32 1e-05, %v5637_v2 }
0x18a3   : > { %v5647_v38 = vmul.f32 0.5, %v5646_v37  ;;  %8858 = vrsqrt.f32 %v5641_v10  ;;  %vm5660_vm1 = vweird.f32 %v5641_v10 }
0x18a5   : > { %v5648_v44 = vsub.f32 1.5, %v5647_v38 }
0x18a7   : > { %v5649_v14 = vmul.f32 %v8857_v40, %v5648_v44  ;;  %v5632_v46 = vpop.xlane.xlu0 %5631 }
0x18a8   : > { %v5638_v60 = vmul.f32 %v5632_v46, %v9253_v58  ;;  %v8283_v46 = vld [vmem:[%s12602_s8 + $0x1b8] sm:$0xff] }
0x18a9   : > { %v8859_v1 = vpop.eup %8858  ;;  %v5653_v32 = vsel %vm5652_vm15, %v8857_v40, %v5649_v14 }
0x18aa   : > { %v5684_v11 = vmul.f32 %v5653_v32, %v11531_v15  ;;  %v5655_v30 = vmul.f32 %v8859_v1, %v5641_v10  ;;  %v11616_v13 = vadd.f32 1e-05, %v5638_v60  ;;  %v8267_v15 = vld [vmem:[%s12601_s7 + $0x1b8] sm:$0xff]  ;;  %vm5661_vm0 = vweird.f32 %v8859_v1  ;;  %v8282_v32 = vld [vmem:[%s12602_s8 + $0x1b0] sm:$0xff] }
0x18ab   : > { %5867 = vmatpush.msrb.mxu1 %v8267_v15  ;;  %vm5662_vm2 = vmor %vm5660_vm1, %vm5661_vm0  ;;  %v8291_v60 = vld [vmem:[%s12602_s8 + $0x1f8] sm:$0xff]  ;;  %v8284_v15 = vld [vmem:[%s12602_s8 + $0x1c0] sm:$0xff] }
0x18ac   : > { %v5689_v19 = vmul.f32 %v11610_v28, %v5684_v11  ;;  %v5656_v12 = vmul.f32 %v8859_v1, %v5655_v30  ;;  %8860 = vrsqrt.f32 %v11616_v13  ;;  %vm5670_vm4 = vweird.f32 %v11616_v13  ;;  %v8290_v11 = vld [vmem:[%s12602_s8 + $0x1f0] sm:$0xff]  ;;  %v8277_v30 = vld [vmem:[%s12602_s8 + $0x188] sm:$0xff] }
0x18ad   : > { %5868 = vmatpush.msrb.mxu1 %v8266_v25 }
0x18ae   : > { %v11633_v6 = vadd.f32 %v11613_v16, %v5689_v19  ;;  %v5657_v48 = vmul.f32 0.5, %v5656_v12  ;;  %v8289_v19 = vld [vmem:[%s12602_s8 + $0x1e8] sm:$0xff]  ;;  %v8276_v12 = vld [vmem:[%s12602_s8 + $0x180] sm:$0xff] }
0x18af   : > { %v5635_v18 = vpop.xlane.xlu1 %5634  ;;  %5869 = vmatpush.msrb.mxu1 %v8265_v53 }
0x18b0   : > { %v5658_v21 = vsub.f32 1.5, %v5657_v48  ;;  %v5639_v50 = vmul.f32 %v5635_v18, %v9253_v58  ;;  %8296 = vmatmul.msk.f32.vlgmr.msrb.gmra.mxu0 %vm714_vm14, %v11633_v6  ;;  %8300 = vmatmul.msk.f32.vlgmr.msra.gmra.mxu1 %vm714_vm14, %v11633_v6 }
0x18b1   : > { %8304 = vmatmul.msk.f32.vlgmr.msra.gmra.mxu2 %vm714_vm14, %v11633_v6  ;;  %8308 = vmatmul.msk.f32.vlgmr.msra.gmra.mxu3 %vm714_vm14, %v11633_v6 }
0x18b2   : > { %v8861_v35 = vpop.eup %8860  ;;  %v5659_v24 = vmul.f32 %v8859_v1, %v5658_v21  ;;  %v5643_v9 = vadd.f32 1e-05, %v5639_v50  ;;  %5870 = vmatpush.msrb.mxu1 %v8264_v26  ;;  %6041 = vmatpush.msra.mxu3 %v8291_v60 }
0x18b3   : > { %v5665_v63 = vmul.f32 %v8861_v35, %v11616_v13  ;;  %vm5671_vm3 = vweird.f32 %v8861_v35  ;;  %v8281_v13 = vld [vmem:[%s12602_s8 + $0x1a8] sm:$0xff] }
0x18b4   : > { %v5663_v56 = vsel %vm5662_vm2, %v8859_v1, %v5659_v24  ;;  %8862 = vrsqrt.f32 %v5643_v9  ;;  %vm5672_vm5 = vmor %vm5670_vm4, %vm5671_vm3  ;;  %vm5680_vm7 = vweird.f32 %v5643_v9  ;;  %5983 = vmatpush.msra.mxu1 %v8283_v46  ;;  %v8278_v1 = vld [vmem:[%s12602_s8 + $0x190] sm:$0xff]  ;;  %6042 = vmatpush.msra.mxu3 %v8290_v11 }
0x18b5   : > { %v5685_v52 = vmul.f32 %v5663_v56, %v11538_v43  ;;  %v5666_v27 = vmul.f32 %v8861_v35, %v5665_v63 }
0x18b6   : > { %5984 = vmatpush.msra.mxu1 %v8282_v32  ;;  %6043 = vmatpush.msra.mxu3 %v8289_v19  ;;  %v8958_v19 = vld [vmem:[%s12629_s0 + $0x20] sm:$0xff] }
0x18b7   : > { %v5690_v7 = vmul.f32 %v11610_v28, %v5685_v52  ;;  %v5667_v3 = vmul.f32 0.5, %v5666_v27 }
0x18b8   : > { %5985 = vmatpush.msra.mxu1 %v8281_v13  ;;  %6044 = vmatpush.msra.mxu3 %v8288_v31 }
0x18b9   : > { %v11685_v8 = vadd.f32 %v11613_v16, %v5690_v7  ;;  %v5668_v54 = vsub.f32 1.5, %v5667_v3 }
0x18ba   : > { %v8863_v0 = vpop.eup %8862  ;;  %5986 = vmatpush.msra.mxu1 %v8280_v47 }
0x18bb   : > { %v5669_v36 = vmul.f32 %v8861_v35, %v5668_v54  ;;  %v5675_v5 = vmul.f32 %v8863_v0, %v5643_v9  ;;  %8297 = vmatmul.msk.f32.gmra.mxu0 %vm714_vm14, %v11685_v8  ;;  %8301 = vmatmul.msk.f32.gmra.mxu1 %vm714_vm14, %v11685_v8  ;;  %vm5681_vm6 = vweird.f32 %v8863_v0 }
0x18bc   : > { %8305 = vmatmul.msk.f32.gmra.mxu2 %vm714_vm14, %v11685_v8  ;;  %8309 = vmatmul.msk.f32.gmra.mxu3 %vm714_vm14, %v11685_v8  ;;  %vm5682_vm8 = vmor %vm5680_vm7, %vm5681_vm6 }
0x18bd   : > { %v5673_v43 = vsel %vm5672_vm5, %v8861_v35, %v5669_v36  ;;  %v5676_v40 = vmul.f32 %v8863_v0, %v5675_v5 }
0x18be   : > { %v5686_v33 = vmul.f32 %v5673_v43, %v11545_v62 }
0x18bf   : > { %v5677_v49 = vmul.f32 0.5, %v5676_v40 }
0x18c0   : > { %v5691_v2 = vmul.f32 %v11610_v28, %v5686_v33 }
0x18c1   : > { %v5678_v37 = vsub.f32 1.5, %v5677_v49 }
0x18c2   : > { %v11699_v10 = vadd.f32 %v11613_v16, %v5691_v2 }
0x18c3   : > { %v5679_v38 = vmul.f32 %v8863_v0, %v5678_v37 }
0x18c4   : > { %8298 = vmatmul.msk.f32.gmra.mxu0 %vm714_vm14, %v11699_v10  ;;  %8302 = vmatmul.msk.f32.gmra.mxu1 %vm714_vm14, %v11699_v10 }
0x18c5   : > { %v5683_v22 = vsel %vm5682_vm8, %v8863_v0, %v5679_v38  ;;  %8306 = vmatmul.msk.f32.gmra.mxu2 %vm714_vm14, %v11699_v10  ;;  %8310 = vmatmul.msk.f32.gmra.mxu3 %vm714_vm14, %v11699_v10 }
0x18c6   : > { %v5687_v62 = vmul.f32 %v5683_v22, %v11552_v23  ;;  %v8279_v23 = vld [vmem:[%s12602_s8 + $0x198] sm:$0xff] }
0x18c7   : > { %5954 = vmatpush.msrb.mxu0 %v8279_v23 }
0x18c8   : > { %v5692_v44 = vmul.f32 %v11610_v28, %v5687_v62  ;;  %v8287_v28 = vld [vmem:[%s12602_s8 + $0x1d8] sm:$0xff] }
0x18c9   : > { %6012 = vmatpush.msra.mxu2 %v8287_v28  ;;  %5955 = vmatpush.msrb.mxu0 %v8278_v1 }
0x18ca   : > { %v11712_v14 = vadd.f32 %v11613_v16, %v5692_v44  ;;  %v8286_v16 = vld [vmem:[%s12602_s8 + $0x1d0] sm:$0xff] }
0x18cb   : > { %6013 = vmatpush.msra.mxu2 %v8286_v16  ;;  %5956 = vmatpush.msrb.mxu0 %v8277_v30 }
0x18cc   : > { %8299 = vmatmul.msk.f32.gmra.mxu0 %vm714_vm14, %v11712_v14  ;;  %8303 = vmatmul.msk.f32.gmra.mxu1 %vm714_vm14, %v11712_v14 }
0x18cd   : > { %8307 = vmatmul.msk.f32.gmra.mxu2 %vm714_vm14, %v11712_v14  ;;  %8311 = vmatmul.msk.f32.gmra.mxu3 %vm714_vm14, %v11712_v14 }
0x18ce   : > { %6014 = vmatpush.msra.mxu2 %v8285_v34  ;;  %5957 = vmatpush.msrb.mxu0 %v8276_v12 }
0x18d0   : > { %6015 = vmatpush.msra.mxu2 %v8284_v15 }
0x18d4   : > { %8312 = vmatmul.msk.f32.vlgmr.msra.gmra.mxu0 %vm714_vm14, %v11633_v6  ;;  %8316 = vmatmul.msk.f32.vlgmr.msrb.gmra.mxu1 %vm714_vm14, %v11633_v6 }
0x18d5   : > { %8320 = vmatmul.msk.f32.vlgmr.msrb.gmra.mxu2 %vm714_vm14, %v11633_v6  ;;  %8324 = vmatmul.msk.f32.vlgmr.msrb.gmra.mxu3 %vm714_vm14, %v11633_v6 }
0x18dc   : > { %8313 = vmatmul.msk.f32.gmra.mxu0 %vm714_vm14, %v11685_v8  ;;  %8317 = vmatmul.msk.f32.gmra.mxu1 %vm714_vm14, %v11685_v8 }
0x18dd   : > { %8321 = vmatmul.msk.f32.gmra.mxu2 %vm714_vm14, %v11685_v8  ;;  %8325 = vmatmul.msk.f32.gmra.mxu3 %vm714_vm14, %v11685_v8 }
0x18e4   : > { %8314 = vmatmul.msk.f32.gmra.mxu0 %vm714_vm14, %v11699_v10  ;;  %8318 = vmatmul.msk.f32.gmra.mxu1 %vm714_vm14, %v11699_v10 }
0x18e5   : > { %8322 = vmatmul.msk.f32.gmra.mxu2 %vm714_vm14, %v11699_v10  ;;  %8326 = vmatmul.msk.f32.gmra.mxu3 %vm714_vm14, %v11699_v10 }
0x18ec   : > { %8315 = vmatmul.msk.f32.gmra.mxu0 %vm714_vm14, %v11712_v14  ;;  %8319 = vmatmul.msk.f32.gmra.mxu1 %vm714_vm14, %v11712_v14 }
0x18ed   : > { %8323 = vmatmul.msk.f32.gmra.mxu2 %vm714_vm14, %v11712_v14  ;;  %8327 = vmatmul.msk.f32.gmra.mxu3 %vm714_vm14, %v11712_v14 }
0x18f4   : > { %8328 = vmatmul.msk.f32.vlgmr.msrb.gmra.mxu0 %vm714_vm14, %v11633_v6  ;;  %8332 = vmatmul.msk.f32.vlgmr.msra.gmra.mxu1 %vm714_vm14, %v11633_v6 }
0x18f5   : > { %8336 = vmatmul.msk.f32.vlgmr.msra.gmra.mxu2 %vm714_vm14, %v11633_v6  ;;  %8340 = vmatmul.msk.f32.vlgmr.msra.gmra.mxu3 %vm714_vm14, %v11633_v6 }
0x18fc   : > { %8329 = vmatmul.msk.f32.gmra.mxu0 %vm714_vm14, %v11685_v8  ;;  %8333 = vmatmul.msk.f32.gmra.mxu1 %vm714_vm14, %v11685_v8 }
0x18fd   : > { %8337 = vmatmul.msk.f32.gmra.mxu2 %vm714_vm14, %v11685_v8  ;;  %8341 = vmatmul.msk.f32.gmra.mxu3 %vm714_vm14, %v11685_v8 }
0x1904   : > { %8330 = vmatmul.msk.f32.gmra.mxu0 %vm714_vm14, %v11699_v10  ;;  %8334 = vmatmul.msk.f32.gmra.mxu1 %vm714_vm14, %v11699_v10 }
0x1905   : > { %8338 = vmatmul.msk.f32.gmra.mxu2 %vm714_vm14, %v11699_v10  ;;  %8342 = vmatmul.msk.f32.gmra.mxu3 %vm714_vm14, %v11699_v10 }
0x190c   : > { %8331 = vmatmul.msk.f32.gmra.mxu0 %vm714_vm14, %v11712_v14  ;;  %8335 = vmatmul.msk.f32.gmra.mxu1 %vm714_vm14, %v11712_v14 }
0x190d   : > { %8339 = vmatmul.msk.f32.gmra.mxu2 %vm714_vm14, %v11712_v14  ;;  %8343 = vmatmul.msk.f32.gmra.mxu3 %vm714_vm14, %v11712_v14 }
0x192d   : > { %v5727_v6 = vpop.f32.mrf.mxu0  ;;  %v5756_v48 = vpop.f32.mrf.mxu1 }
0x1934   : > { %v5785_v51 = vpop.f32.mrf.mxu2  ;;  %v5814_v18 = vpop.f32.mrf.mxu3 }
0x1938   : > { %v5730_v39 = vpop.f32.mrf.mxu0  ;;  %v5759_v25 = vpop.f32.mrf.mxu1 }
0x193f   : > { %v5788_v21 = vpop.f32.mrf.mxu2  ;;  %v5817_v50 = vpop.f32.mrf.mxu3 }
0x1941   : > { %v5733_v61 = vpop.f32.mrf.mxu0  ;;  %v5762_v45 = vpop.f32.mrf.mxu1 }
0x1948   : > { %v11834_v4 = vpop.f32.mrf.mxu2  ;;  %v11836_v53 = vpop.f32.mrf.mxu3 }
0x1949   : > { %v11838_v35 = vpop.f32.mrf.mxu0  ;;  %v11840_v24 = vpop.f32.mrf.mxu1 }
0x1950   : > { %v11842_v9 = vpop.f32.mrf.mxu2  ;;  %v11844_v42 = vpop.f32.mrf.mxu3 }
0x1951   : > { %v5843_v55 = vpop.f32.mrf.mxu0  ;;  %v5872_v63 = vpop.f32.mrf.mxu1 }
0x1958   : > { %v5901_v17 = vpop.f32.mrf.mxu2  ;;  %v5930_v26 = vpop.f32.mrf.mxu3 }
0x1959   : > { %v5846_v56 = vpop.f32.mrf.mxu0  ;;  %v5875_v20 = vpop.f32.mrf.mxu1 }
0x1960   : > { %v5904_v52 = vpop.f32.mrf.mxu2  ;;  %v5933_v27 = vpop.f32.mrf.mxu3 }
0x1961   : > { %v5849_v7 = vpop.f32.mrf.mxu0  ;;  %v5878_v3 = vpop.f32.mrf.mxu1 }
0x1968   : > { %v5907_v8 = vpop.f32.mrf.mxu2  ;;  %v5936_v54 = vpop.f32.mrf.mxu3 }
0x1969   : > { %v5852_v0 = vpop.f32.mrf.mxu0  ;;  %v5881_v36 = vpop.f32.mrf.mxu1 }
0x196a   : > { %8344 = vmatpush.xpose.msk.msra.mxu0 %vm1340_vm9, %v5852_v0  ;;  %8352 = vmatpush.xpose.msk.msrb.mxu1 %vm1340_vm9, %v5881_v36 }
0x196e   : > { %8345 = vmatpush.xpose.msk.msra.mxu0 %vm1340_vm9, %v5849_v7  ;;  %8353 = vmatpush.xpose.msk.msrb.mxu1 %vm1340_vm9, %v5878_v3 }
0x1970   : > { %v5910_v5 = vpop.f32.mrf.mxu2  ;;  %v5939_v43 = vpop.f32.mrf.mxu3 }
0x1971   : > { %8360 = vmatpush.xpose.msk.msrb.mxu2 %vm1340_vm9, %v5910_v5  ;;  %8368 = vmatpush.xpose.msk.msrb.mxu3 %vm1340_vm9, %v5939_v43  ;;  %v5959_v40 = vpop.f32.mrf.mxu0  ;;  %v5988_v33 = vpop.f32.mrf.mxu1 }
0x1972   : > { %8346 = vmatpush.xpose.msk.msra.mxu0 %vm1340_vm9, %v5846_v56  ;;  %8354 = vmatpush.xpose.msk.msrb.mxu1 %vm1340_vm9, %v5875_v20 }
0x1975   : > { %8361 = vmatpush.xpose.msk.msrb.mxu2 %vm1340_vm9, %v5907_v8  ;;  %8369 = vmatpush.xpose.msk.msrb.mxu3 %vm1340_vm9, %v5936_v54 }
0x1976   : > { %8347 = vmatpush.xpose.msk.msra.mxu0 %vm1340_vm9, %v5843_v55  ;;  %8355 = vmatpush.xpose.msk.msrb.mxu1 %vm1340_vm9, %v5872_v63 }
0x1978   : > { %v6017_v49 = vpop.f32.mrf.mxu2  ;;  %v6046_v2 = vpop.f32.mrf.mxu3 }
0x1979   : > { %8362 = vmatpush.xpose.msk.msrb.mxu2 %vm1340_vm9, %v5904_v52  ;;  %8370 = vmatpush.xpose.msk.msrb.mxu3 %vm1340_vm9, %v5933_v27  ;;  %v5962_v37 = vpop.f32.mrf.mxu0  ;;  %v5991_v10 = vpop.f32.mrf.mxu1  ;;  %v8960_v52 = vld [vmem:[%s12629_s0 + $0x30] sm:$0xff] }
0x197a   : > { %8348 = vmatmul.msk.f32.vlgmr.msra.gmra.mxu0 %vm1340_vm9, %v5727_v6  ;;  %8356 = vmatmul.msk.f32.vlgmr.msrb.gmra.mxu1 %vm1340_vm9, %v5756_v48 }
0x197d   : > { %8363 = vmatpush.xpose.msk.msrb.mxu2 %vm1340_vm9, %v5901_v17  ;;  %8371 = vmatpush.xpose.msk.msrb.mxu3 %vm1340_vm9, %v5930_v26 }
0x1980   : > { %v6020_v38 = vpop.f32.mrf.mxu2  ;;  %v6049_v22 = vpop.f32.mrf.mxu3  ;;  %8364 = vmatmul.msk.f32.vlgmr.msrb.gmra.mxu2 %vm1340_vm9, %v5785_v51  ;;  %8372 = vmatmul.msk.f32.vlgmr.msrb.gmra.mxu3 %vm1340_vm9, %v5814_v18 }
0x1981   : > { %v5965_v62 = vpop.f32.mrf.mxu0  ;;  %v5994_v44 = vpop.f32.mrf.mxu1 }
0x1982   : > { %8349 = vmatmul.msk.f32.gmra.mxu0 %vm1340_vm9, %v5730_v39  ;;  %8357 = vmatmul.msk.f32.gmra.mxu1 %vm1340_vm9, %v5759_v25 }
0x1988   : > { %v6023_v14 = vpop.f32.mrf.mxu2  ;;  %v6052_v23 = vpop.f32.mrf.mxu3  ;;  %8365 = vmatmul.msk.f32.gmra.mxu2 %vm1340_vm9, %v5788_v21  ;;  %8373 = vmatmul.msk.f32.gmra.mxu3 %vm1340_vm9, %v5817_v50 }
0x1989   : > { %v5968_v46 = vpop.f32.mrf.mxu0  ;;  %v5997_v28 = vpop.f32.mrf.mxu1 }
0x198a   : > { %8350 = vmatmul.msk.f32.gmra.mxu0 %vm1340_vm9, %v5733_v61  ;;  %8358 = vmatmul.msk.f32.gmra.mxu1 %vm1340_vm9, %v5762_v45  ;;  %v8959_v61 = vld [vmem:[%s12629_s0 + $0x28] sm:$0xff] }
0x198b   : > { %6502 = vmatpush.msrb.mxu0 %v5968_v46  ;;  %6543 = vmatpush.msra.mxu1 %v5997_v28 }
0x198d   : > { %6503 = vmatpush.msrb.mxu0 %v5965_v62  ;;  %6544 = vmatpush.msra.mxu1 %v5994_v44 }
0x198f   : > { %6504 = vmatpush.msrb.mxu0 %v5962_v37  ;;  %6545 = vmatpush.msra.mxu1 %v5991_v10 }
0x1990   : > { %v6026_v60 = vpop.f32.mrf.mxu2  ;;  %v6055_v1 = vpop.f32.mrf.mxu3  ;;  %8366 = vmatmul.msk.f32.gmra.mxu2 %vm1340_vm9, %v11834_v4  ;;  %8374 = vmatmul.msk.f32.gmra.mxu3 %vm1340_vm9, %v11836_v53 }
0x1991   : > { %6505 = vmatpush.msrb.mxu0 %v5959_v40  ;;  %6546 = vmatpush.msra.mxu1 %v5988_v33 }
0x1992   : > { %6584 = vmatpush.msra.mxu2 %v6026_v60  ;;  %6625 = vmatpush.msra.mxu3 %v6055_v1 }
0x1993   : > { %8351 = vmatmul.msk.f32.gmra.mxu0 %vm1340_vm9, %v11838_v35  ;;  %8359 = vmatmul.msk.f32.gmra.mxu1 %vm1340_vm9, %v11840_v24 }
0x1994   : > { %6585 = vmatpush.msra.mxu2 %v6023_v14  ;;  %6626 = vmatpush.msra.mxu3 %v6052_v23  ;;  %v8961_v23 = vld [vmem:[%s12629_s0 + $0x38] sm:$0xff] }
0x1996   : > { %6586 = vmatpush.msra.mxu2 %v6020_v38  ;;  %6627 = vmatpush.msra.mxu3 %v6049_v22 }
0x1998   : > { %6587 = vmatpush.msra.mxu2 %v6017_v49  ;;  %6628 = vmatpush.msra.mxu3 %v6046_v2 }
0x1999   : > { %8367 = vmatmul.msk.f32.gmra.mxu2 %vm1340_vm9, %v11842_v9  ;;  %8375 = vmatmul.msk.f32.gmra.mxu3 %vm1340_vm9, %v11844_v42 }
0x19f7   : > { %v6099_v32 = vpop.f32.mrf.mxu0  ;;  %v6152_v34 = vpop.f32.mrf.mxu1 }
0x19f8   : > { %v6274_v15 = vmul.f32 0.35355338, %v6152_v34  ;;  %v6270_v48 = vmul.f32 0.35355338, %v6099_v32 }
0x19fa   : > { %v11895_v25 = vadd.f32 %v8958_v19, %v6274_v15  ;;  %v11897_v50 = vadd.f32 %v8958_v19, %v6270_v48 }
0x19fc   : > { %v6314_v24 = vsel %vm714_vm14, %v11895_v25, -inf  ;;  %v6302_v9 = vsel %vm714_vm14, %v11897_v50, -inf }
0x19ff   : > { %v6102_v51 = vpop.f32.mrf.mxu0  ;;  %v6155_v42 = vpop.f32.mrf.mxu1 }
0x1a00   : > { %v6271_v4 = vmul.f32 0.35355338, %v6102_v51  ;;  %v6275_v7 = vmul.f32 0.35355338, %v6155_v42 }
0x1a02   : > { %v11910_v17 = vadd.f32 %v8959_v61, %v6271_v4  ;;  %v11925_v5 = vadd.f32 %v8959_v61, %v6275_v7 }
0x1a03   : > { %v6205_v16 = vpop.f32.mrf.mxu2  ;;  %v6258_v11 = vpop.f32.mrf.mxu3 }
0x1a04   : > { %v6278_v30 = vmul.f32 0.35355338, %v6205_v16  ;;  %v6282_v13 = vmul.f32 0.35355338, %v6258_v11  ;;  %v6305_v0 = vsel %vm714_vm14, %v11910_v17, -inf  ;;  %v6317_v38 = vsel %vm714_vm14, %v11925_v5, -inf }
0x1a06   : > { %v11887_v12 = vadd.f32 %v8958_v19, %v6278_v30  ;;  %v11889_v47 = vadd.f32 %v8958_v19, %v6282_v13 }
0x1a07   : > { %v6105_v20 = vpop.f32.mrf.mxu0  ;;  %v6158_v40 = vpop.f32.mrf.mxu1 }
0x1a08   : > { %v6338_v31 = vsel %vm714_vm14, %v11889_v47, -inf  ;;  %v6326_v6 = vsel %vm714_vm14, %v11887_v12, -inf  ;;  %v6272_v3 = vmul.f32 0.35355338, %v6105_v20  ;;  %v6276_v37 = vmul.f32 0.35355338, %v6158_v40 }
0x1a09   : > { %6339 = vmax.xlane.f32.xlu0 %v6338_v31  ;;  %6327 = vmax.xlane.f32.xlu2 %v6326_v6 }
0x1a0a   : > { %v11927_v43 = vadd.f32 %v8960_v52, %v6272_v3  ;;  %v11937_v14 = vadd.f32 %v8960_v52, %v6276_v37 }
0x1a0b   : > { %v6208_v18 = vpop.f32.mrf.mxu2  ;;  %v6261_v39 = vpop.f32.mrf.mxu3 }
0x1a0c   : > { %v6279_v21 = vmul.f32 0.35355338, %v6208_v18  ;;  %v6283_v53 = vmul.f32 0.35355338, %v6261_v39  ;;  %v6308_v22 = vsel %vm714_vm14, %v11927_v43, -inf  ;;  %v6320_v16 = vsel %vm714_vm14, %v11937_v14, -inf }
0x1a0e   : > { %v11902_v45 = vadd.f32 %v8959_v61, %v6279_v21  ;;  %v11912_v26 = vadd.f32 %v8959_v61, %v6283_v53 }
0x1a10   : > { %v6329_v35 = vsel %vm714_vm14, %v11902_v45, -inf  ;;  %v6341_v8 = vsel %vm714_vm14, %v11912_v26, -inf  ;;  %v6108_v28 = vpop.f32.mrf.mxu0  ;;  %v6161_v1 = vpop.f32.mrf.mxu1 }
0x1a11   : > { %6330 = vmax.xlane.f32.xlu1 %v6329_v35  ;;  %6315 = vmax.xlane.f32.xlu0 %v6314_v24  ;;  %v6273_v32 = vmul.f32 0.35355338, %v6108_v28  ;;  %v6277_v30 = vmul.f32 0.35355338, %v6161_v1 }
0x1a12   : > { %6303 = vmax.xlane.f32.xlu2 %v6302_v9 }
0x1a13   : > { %v6211_v55 = vpop.f32.mrf.mxu2  ;;  %v6264_v63 = vpop.f32.mrf.mxu3  ;;  %v11952_v34 = vadd.f32 %v8961_v23, %v6273_v32  ;;  %v11954_v19 = vadd.f32 %v8961_v23, %v6277_v30 }
0x1a14   : > { %v6280_v56 = vmul.f32 0.35355338, %v6211_v55  ;;  %v6284_v36 = vmul.f32 0.35355338, %v6264_v63 }
0x1a15   : > { %v6311_v15 = vsel %vm714_vm14, %v11952_v34, -inf  ;;  %v6323_v31 = vsel %vm714_vm14, %v11954_v19, -inf }
0x1a16   : > { %v11917_v27 = vadd.f32 %v8960_v52, %v6280_v56  ;;  %v11929_v33 = vadd.f32 %v8960_v52, %v6284_v36 }
0x1a18   : > { %v6332_v54 = vsel %vm714_vm14, %v11917_v27, -inf  ;;  %v6344_v44 = vsel %vm714_vm14, %v11929_v33, -inf }
0x1a19   : > { %6342 = vmax.xlane.f32.xlu1 %v6341_v8  ;;  %6306 = vmax.xlane.f32.xlu0 %v6305_v0 }
0x1a1a   : > { %6333 = vmax.xlane.f32.xlu2 %v6332_v54 }
0x1a1c   : > { %v6267_v49 = vpop.f32.mrf.mxu3  ;;  %v6214_v2 = vpop.f32.mrf.mxu2 }
0x1a1d   : > { %v6285_v10 = vmul.f32 0.35355338, %v6267_v49  ;;  %v6281_v62 = vmul.f32 0.35355338, %v6214_v2 }
0x1a1f   : > { %v11942_v46 = vadd.f32 %v8961_v23, %v6285_v10  ;;  %v11944_v60 = vadd.f32 %v8961_v23, %v6281_v62 }
0x1a21   : > { %6318 = vmax.xlane.f32.xlu1 %v6317_v38  ;;  %6309 = vmax.xlane.f32.xlu0 %v6308_v22  ;;  %v6347_v11 = vsel %vm714_vm14, %v11942_v46, -inf  ;;  %v6335_v13 = vsel %vm714_vm14, %v11944_v60, -inf }
0x1a22   : > { %6345 = vmax.xlane.f32.xlu2 %v6344_v44 }
0x1a29   : > { %6321 = vmax.xlane.f32.xlu1 %v6320_v16  ;;  %6348 = vmax.xlane.f32.xlu0 %v6347_v11 }
0x1a2a   : > { %6336 = vmax.xlane.f32.xlu2 %v6335_v13 }
0x1a31   : > { %6312 = vmax.xlane.f32.xlu1 %v6311_v15 }
0x1a32   : > { %6324 = vmax.xlane.f32.xlu2 %v6323_v31 }
0x1a7c   : > { %v6340_v6 = vpop.xlane.xlu0 %6339  ;;  %v6328_v48 = vpop.xlane.xlu2 %6327 }
0x1a7d   : > { %v6362_v51 = vsub.f32 %v11889_v47, %v6340_v6  ;;  %v6358_v18 = vsub.f32 %v11887_v12, %v6328_v48 }
0x1a7f   : > { %v6390_v39 = vmul.f32 1.442695, %v6362_v51  ;;  %v6382_v21 = vmul.f32 1.442695, %v6358_v18 }
0x1a81   : > { %8864 = vpow2.f32 %v6390_v39 }
0x1a82   : > { %8866 = vpow2.f32 %v6382_v21 }
0x1a84   : > { %v6331_v61 = vpop.xlane.xlu1 %6330  ;;  %v6316_v4 = vpop.xlane.xlu0 %6315 }
0x1a85   : > { %v6359_v53 = vsub.f32 %v11902_v45, %v6331_v61  ;;  %v6354_v35 = vsub.f32 %v11895_v25, %v6316_v4  ;;  %v6304_v24 = vpop.xlane.xlu2 %6303 }
0x1a86   : > { %v6350_v9 = vsub.f32 %v11897_v50, %v6304_v24 }
0x1a87   : > { %v11965_v42 = vpop.eup %8864  ;;  %v6384_v55 = vmul.f32 1.442695, %v6359_v53  ;;  %v6374_v63 = vmul.f32 1.442695, %v6354_v35 }
0x1a88   : > { %v11967_v47 = vpop.eup %8866  ;;  %v6366_v12 = vmul.f32 1.442695, %v6350_v9  ;;  %v6434_v56 = vsel %vm714_vm14, %v11965_v42, 0.0 }
0x1a89   : > { %8868 = vpow2.f32 %v6384_v55  ;;  %v6422_v20 = vsel %vm714_vm14, %v11967_v47, 0.0  ;;  %6435 = vadd.xlane.f32.xlu1 %v6434_v56 }
0x1a8a   : > { %8870 = vpow2.f32 %v6374_v63  ;;  %6423 = vadd.xlane.f32.xlu0 %v6422_v20 }
0x1a8b   : > { %8872 = vpow2.f32 %v6366_v12 }
0x1a8c   : > { %v6343_v25 = vpop.xlane.xlu1 %6342  ;;  %v6307_v50 = vpop.xlane.xlu0 %6306 }
0x1a8d   : > { %v6363_v45 = vsub.f32 %v11912_v26, %v6343_v25  ;;  %v6334_v52 = vpop.xlane.xlu2 %6333  ;;  %v6351_v7 = vsub.f32 %v11910_v17, %v6307_v50 }
0x1a8e   : > { %v6360_v3 = vsub.f32 %v11917_v27, %v6334_v52 }
0x1a8f   : > { %v11976_v8 = vpop.eup %8868  ;;  %v6392_v54 = vmul.f32 1.442695, %v6363_v45  ;;  %v6368_v0 = vmul.f32 1.442695, %v6351_v7 }
0x1a90   : > { %v11978_v36 = vpop.eup %8870  ;;  %v6386_v40 = vmul.f32 1.442695, %v6360_v3  ;;  %v6425_v49 = vsel %vm714_vm14, %v11976_v8, 0.0 }
0x1a91   : > { %v11982_v2 = vpop.eup %8872  ;;  %8874 = vpow2.f32 %v6392_v54  ;;  %6426 = vadd.xlane.f32.xlu2 %v6425_v49  ;;  %v6410_v26 = vsel %vm714_vm14, %v11978_v36, 0.0 }
0x1a92   : > { %8876 = vpow2.f32 %v6386_v40  ;;  %v6398_v17 = vsel %vm714_vm14, %v11982_v2, 0.0  ;;  %6411 = vadd.xlane.f32.xlu1 %v6410_v26 }
0x1a93   : > { %8878 = vpow2.f32 %v6368_v0  ;;  %6399 = vadd.xlane.f32.xlu0 %v6398_v17 }
0x1a94   : > { %v6319_v27 = vpop.xlane.xlu1 %6318  ;;  %v6310_v37 = vpop.xlane.xlu0 %6309 }
0x1a95   : > { %v6355_v10 = vsub.f32 %v11925_v5, %v6319_v27  ;;  %v6346_v38 = vpop.xlane.xlu2 %6345  ;;  %v6352_v22 = vsub.f32 %v11927_v43, %v6310_v37 }
0x1a96   : > { %v6364_v62 = vsub.f32 %v11929_v33, %v6346_v38 }
0x1a97   : > { %v11991_v44 = vpop.eup %8874  ;;  %v6376_v23 = vmul.f32 1.442695, %v6355_v10  ;;  %v6370_v28 = vmul.f32 1.442695, %v6352_v22 }
0x1a98   : > { %v11993_v1 = vpop.eup %8876  ;;  %v6394_v32 = vmul.f32 1.442695, %v6364_v62  ;;  %v6437_v16 = vsel %vm714_vm14, %v11991_v44, 0.0 }
0x1a99   : > { %v11997_v11 = vpop.eup %8878  ;;  %8880 = vpow2.f32 %v6376_v23  ;;  %6438 = vadd.xlane.f32.xlu2 %v6437_v16  ;;  %v6428_v5 = vsel %vm714_vm14, %v11993_v1, 0.0 }
0x1a9a   : > { %8882 = vpow2.f32 %v6394_v32  ;;  %v6401_v43 = vsel %vm714_vm14, %v11997_v11, 0.0  ;;  %v8293_v32 = vld [vmem:[%s12603_s9 + $0x68] sm:$0xff] }
0x1a9b   : > { %8884 = vpow2.f32 %v6370_v28  ;;  %6429 = vadd.xlane.f32.xlu0 %v6428_v5  ;;  %6402 = vadd.xlane.f32.xlu1 %v6401_v43 }
0x1a9c   : > { %v6322_v33 = vpop.xlane.xlu1 %6321  ;;  %v6349_v30 = vpop.xlane.xlu0 %6348  ;;  %6710 = vmatpush.msrb.mxu1 %v8293_v32 }
0x1a9d   : > { %v6356_v13 = vsub.f32 %v11937_v14, %v6322_v33  ;;  %v6337_v15 = vpop.xlane.xlu2 %6336  ;;  %v6365_v31 = vsub.f32 %v11942_v46, %v6349_v30 }
0x1a9e   : > { %v6361_v6 = vsub.f32 %v11944_v60, %v6337_v15 }
0x1a9f   : > { %v12006_v48 = vpop.eup %8880  ;;  %v6378_v51 = vmul.f32 1.442695, %v6356_v13  ;;  %v6396_v18 = vmul.f32 1.442695, %v6365_v31 }
0x1aa0   : > { %v12008_v39 = vpop.eup %8882  ;;  %v6388_v21 = vmul.f32 1.442695, %v6361_v6  ;;  %v6413_v61 = vsel %vm714_vm14, %v12006_v48, 0.0 }
0x1aa1   : > { %v12012_v4 = vpop.eup %8884  ;;  %8886 = vpow2.f32 %v6378_v51  ;;  %6414 = vadd.xlane.f32.xlu2 %v6413_v61  ;;  %v6440_v14 = vsel %vm714_vm14, %v12008_v39, 0.0 }
0x1aa2   : > { %8888 = vpow2.f32 %v6388_v21  ;;  %v6404_v46 = vsel %vm714_vm14, %v12012_v4, 0.0 }
0x1aa3   : > { %8890 = vpow2.f32 %v6396_v18  ;;  %6441 = vadd.xlane.f32.xlu0 %v6440_v14  ;;  %6405 = vadd.xlane.f32.xlu1 %v6404_v46 }
0x1aa4   : > { %v6313_v60 = vpop.xlane.xlu1 %6312 }
0x1aa5   : > { %v6325_v53 = vpop.xlane.xlu2 %6324  ;;  %v6353_v35 = vsub.f32 %v11952_v34, %v6313_v60 }
0x1aa6   : > { %v6357_v24 = vsub.f32 %v11954_v19, %v6325_v53 }
0x1aa7   : > { %v12020_v9 = vpop.eup %8886  ;;  %v6372_v55 = vmul.f32 1.442695, %v6353_v35 }
0x1aa8   : > { %v12022_v63 = vpop.eup %8888  ;;  %v6380_v12 = vmul.f32 1.442695, %v6357_v24  ;;  %v6416_v56 = vsel %vm714_vm14, %v12020_v9, 0.0 }
0x1aa9   : > { %v12026_v20 = vpop.eup %8890  ;;  %8892 = vpow2.f32 %v6372_v55  ;;  %6417 = vadd.xlane.f32.xlu2 %v6416_v56  ;;  %v6431_v25 = vsel %vm714_vm14, %v12022_v63, 0.0 }
0x1aaa   : > { %8894 = vpow2.f32 %v6380_v12  ;;  %v6443_v34 = vsel %vm714_vm14, %v12026_v20, 0.0 }
0x1aab   : > { %6432 = vadd.xlane.f32.xlu0 %v6431_v25  ;;  %6444 = vadd.xlane.f32.xlu1 %v6443_v34 }
0x1aaf   : > { %v12032_v19 = vpop.eup %8892 }
0x1ab0   : > { %v12034_v50 = vpop.eup %8894  ;;  %v6407_v45 = vsel %vm714_vm14, %v12032_v19, 0.0 }
0x1ab1   : > { %v6419_v52 = vsel %vm714_vm14, %v12034_v50, 0.0  ;;  %6408 = vadd.xlane.f32.xlu2 %v6407_v45 }
0x1ab3   : > { %6420 = vadd.xlane.f32.xlu0 %v6419_v52 }
0x1afc   : > { %v6436_v7 = vpop.xlane.xlu1 %6435 }
0x1afd   : > { %v6424_v3 = vpop.xlane.xlu0 %6423  ;;  %8896 = vrcp.f32 %v6436_v7 }
0x1afe   : > { %8898 = vrcp.f32 %v6424_v3 }
0x1b03   : > { %v8897_v54 = vpop.eup %8896 }
0x1b04   : > { %v8899_v0 = vpop.eup %8898  ;;  %v6474_v40 = vmul.f32 %v8897_v54, %v11965_v42  ;;  %v6427_v49 = vpop.xlane.xlu2 %6426 }
0x1b05   : > { %v6470_v26 = vmul.f32 %v8899_v0, %v11967_v47  ;;  %8900 = vrcp.f32 %v6427_v49  ;;  %v6412_v17 = vpop.xlane.xlu1 %6411 }
0x1b06   : > { %v6400_v27 = vpop.xlane.xlu0 %6399  ;;  %8902 = vrcp.f32 %v6412_v17  ;;  %8388 = vmatmul.msk.f32.vlgmr.msra.gmra.mxu3 %vm714_vm14, %v6474_v40 }
0x1b07   : > { %8904 = vrcp.f32 %v6400_v27  ;;  %8384 = vmatmul.msk.f32.vlgmr.msra.gmra.mxu2 %vm714_vm14, %v6470_v26 }
0x1b0b   : > { %v8901_v37 = vpop.eup %8900 }
0x1b0c   : > { %v8903_v10 = vpop.eup %8902  ;;  %v6439_v38 = vpop.xlane.xlu2 %6438  ;;  %v6471_v22 = vmul.f32 %v8901_v37, %v11976_v8  ;;  %v8294_v8 = vld [vmem:[%s12603_s9 + $0x70] sm:$0xff] }
0x1b0d   : > { %v8905_v62 = vpop.eup %8904  ;;  %v6466_v42 = vmul.f32 %v8903_v10, %v11978_v36  ;;  %8906 = vrcp.f32 %v6439_v38  ;;  %v8295_v36 = vld [vmem:[%s12603_s9 + $0x78] sm:$0xff]  ;;  %6751 = vmatpush.msrb.mxu2 %v8294_v8 }
0x1b0e   : > { %v6462_v47 = vmul.f32 %v8905_v62, %v11982_v2  ;;  %v6430_v23 = vpop.xlane.xlu0 %6429  ;;  %v6403_v28 = vpop.xlane.xlu1 %6402  ;;  %v8292_v2 = vld [vmem:[%s12603_s9 + $0x60] sm:$0xff]  ;;  %6792 = vmatpush.msrb.mxu3 %v8295_v36 }
0x1b0f   : > { %8908 = vrcp.f32 %v6430_v23  ;;  %8380 = vmatmul.msk.f32.vlgmr.msra.gmra.mxu1 %vm714_vm14, %v6466_v42  ;;  %8385 = vmatmul.msk.f32.gmra.mxu2 %vm714_vm14, %v6471_v22 }
0x1b10   : > { %8910 = vrcp.f32 %v6403_v28  ;;  %8376 = vmatmul.msk.f32.vlgmr.msrb.gmra.mxu0 %vm714_vm14, %v6462_v47 }
0x1b11   : > { %6669 = vmatpush.msra.mxu0 %v8292_v2 }
0x1b13   : > { %v8907_v16 = vpop.eup %8906 }
0x1b14   : > { %v6415_v5 = vpop.xlane.xlu2 %6414  ;;  %v6475_v43 = vmul.f32 %v8907_v16, %v11991_v44 }
0x1b15   : > { %v8909_v33 = vpop.eup %8908  ;;  %8912 = vrcp.f32 %v6415_v5 }
0x1b16   : > { %v8911_v30 = vpop.eup %8910  ;;  %v6442_v13 = vpop.xlane.xlu0 %6441  ;;  %v6472_v31 = vmul.f32 %v8909_v33, %v11993_v1  ;;  %8389 = vmatmul.msk.f32.gmra.mxu3 %vm714_vm14, %v6475_v43 }
0x1b17   : > { %v6406_v15 = vpop.xlane.xlu1 %6405  ;;  %8914 = vrcp.f32 %v6442_v13  ;;  %v6463_v6 = vmul.f32 %v8911_v30, %v11997_v11 }
0x1b18   : > { %8916 = vrcp.f32 %v6406_v15  ;;  %8386 = vmatmul.msk.f32.gmra.mxu2 %vm714_vm14, %v6472_v31 }
0x1b19   : > { %8377 = vmatmul.msk.f32.gmra.mxu0 %vm714_vm14, %v6463_v6 }
0x1b1b   : > { %v8913_v51 = vpop.eup %8912 }
0x1b1c   : > { %v6418_v18 = vpop.xlane.xlu2 %6417  ;;  %v6467_v44 = vmul.f32 %v8913_v51, %v12006_v48 }
0x1b1d   : > { %v8915_v21 = vpop.eup %8914  ;;  %8918 = vrcp.f32 %v6418_v18 }
0x1b1e   : > { %v8917_v61 = vpop.eup %8916  ;;  %v6433_v14 = vpop.xlane.xlu0 %6432  ;;  %8381 = vmatmul.msk.f32.gmra.mxu1 %vm714_vm14, %v6467_v44  ;;  %v6476_v1 = vmul.f32 %v8915_v21, %v12008_v39 }
0x1b1f   : > { %v6445_v46 = vpop.xlane.xlu1 %6444  ;;  %8920 = vrcp.f32 %v6433_v14  ;;  %v6464_v11 = vmul.f32 %v8917_v61, %v12012_v4 }
0x1b20   : > { %8922 = vrcp.f32 %v6445_v46  ;;  %8390 = vmatmul.msk.f32.gmra.mxu3 %vm714_vm14, %v6476_v1 }
0x1b21   : > { %8378 = vmatmul.msk.f32.gmra.mxu0 %vm714_vm14, %v6464_v11 }
0x1b23   : > { %v8919_v60 = vpop.eup %8918 }
0x1b24   : > { %v6409_v53 = vpop.xlane.xlu2 %6408  ;;  %v6468_v48 = vmul.f32 %v8919_v60, %v12020_v9 }
0x1b25   : > { %v8921_v35 = vpop.eup %8920  ;;  %8924 = vrcp.f32 %v6409_v53 }
0x1b26   : > { %v8923_v24 = vpop.eup %8922  ;;  %v6421_v55 = vpop.xlane.xlu0 %6420  ;;  %8382 = vmatmul.msk.f32.gmra.mxu1 %vm714_vm14, %v6468_v48  ;;  %v6473_v39 = vmul.f32 %v8921_v35, %v12022_v63 }
0x1b27   : > { %8926 = vrcp.f32 %v6421_v55  ;;  %v6477_v4 = vmul.f32 %v8923_v24, %v12026_v20 }
0x1b28   : > { %8387 = vmatmul.msk.f32.gmra.mxu2 %vm714_vm14, %v6473_v39 }
0x1b29   : > { %8391 = vmatmul.msk.f32.gmra.mxu3 %vm714_vm14, %v6477_v4 }
0x1b2b   : > { %v8925_v12 = vpop.eup %8924 }
0x1b2c   : > { %v6465_v56 = vmul.f32 %v8925_v12, %v12032_v19 }
0x1b2d   : > { %v8927_v25 = vpop.eup %8926 }
0x1b2e   : > { %8379 = vmatmul.msk.f32.gmra.mxu0 %vm714_vm14, %v6465_v56  ;;  %v6469_v9 = vmul.f32 %v8927_v25, %v12034_v50 }
0x1b30   : > { %8383 = vmatmul.msk.f32.gmra.mxu1 %vm714_vm14, %v6469_v9 }
0x1b89   : > { %v6630_v34 = vpop.f32.mrf.mxu3 }
0x1b8a   : > { %v6589_v45 = vpop.f32.mrf.mxu2  ;;  %8404 = vmatmul.msk.f32.vlgmr.msrb.gmra.mxu3 %vm1340_vm9, %v6630_v34 }
0x1b8b   : > { %8400 = vmatmul.msk.f32.vlgmr.msrb.gmra.mxu2 %vm1340_vm9, %v6589_v45 }
0x1b8c   : > { %v6548_v63 = vpop.f32.mrf.mxu1 }
0x1b8d   : > { %v6507_v20 = vpop.f32.mrf.mxu0  ;;  %8396 = vmatmul.msk.f32.vlgmr.msrb.gmra.mxu1 %vm1340_vm9, %v6548_v63 }
0x1b8e   : > { %8392 = vmatmul.msk.f32.vlgmr.msra.gmra.mxu0 %vm1340_vm9, %v6507_v20 }
0x1b92   : > { %v6592_v19 = vpop.f32.mrf.mxu2 }
0x1b93   : > { %8401 = vmatmul.msk.f32.gmra.mxu2 %vm1340_vm9, %v6592_v19 }
0x1b96   : > { %v6510_v52 = vpop.f32.mrf.mxu0 }
0x1b97   : > { %8393 = vmatmul.msk.f32.gmra.mxu0 %vm1340_vm9, %v6510_v52 }
0x1b99   : > { %v6633_v50 = vpop.f32.mrf.mxu3 }
0x1b9a   : > { %8405 = vmatmul.msk.f32.gmra.mxu3 %vm1340_vm9, %v6633_v50 }
0x1b9b   : > { %v6595_v7 = vpop.f32.mrf.mxu2  ;;  %v6551_v3 = vpop.f32.mrf.mxu1 }
0x1b9c   : > { %8402 = vmatmul.msk.f32.gmra.mxu2 %vm1340_vm9, %v6595_v7  ;;  %8397 = vmatmul.msk.f32.gmra.mxu1 %vm1340_vm9, %v6551_v3 }
0x1b9e   : > { %v6513_v54 = vpop.f32.mrf.mxu0 }
0x1b9f   : > { %8394 = vmatmul.msk.f32.gmra.mxu0 %vm1340_vm9, %v6513_v54 }
0x1ba3   : > { %v6636_v0 = vpop.f32.mrf.mxu3  ;;  %v6554_v40 = vpop.f32.mrf.mxu1 }
0x1ba4   : > { %8406 = vmatmul.msk.f32.gmra.mxu3 %vm1340_vm9, %v6636_v0  ;;  %8398 = vmatmul.msk.f32.gmra.mxu1 %vm1340_vm9, %v6554_v40 }
0x1bab   : > { %v6598_v49 = vpop.f32.mrf.mxu2  ;;  %v6516_v26 = vpop.f32.mrf.mxu0 }
0x1bac   : > { %v6639_v17 = vpop.f32.mrf.mxu3  ;;  %8403 = vmatmul.msk.f32.gmra.mxu2 %vm1340_vm9, %v6598_v49  ;;  %8395 = vmatmul.msk.f32.gmra.mxu0 %vm1340_vm9, %v6516_v26 }
0x1bad   : > { %8407 = vmatmul.msk.f32.gmra.mxu3 %vm1340_vm9, %v6639_v17  ;;  %v6557_v27 = vpop.f32.mrf.mxu1 }
0x1bae   : > { %8399 = vmatmul.msk.f32.gmra.mxu1 %vm1340_vm9, %v6557_v27 }
0x1c0a   : > { %v6712_v37 = vpop.f32.mrf.mxu1 }
0x1c0b   : > { %v6671_v10 = vpop.f32.mrf.mxu0  ;;  %v6807_v38 = vsel %vm714_vm14, %v6712_v37, 0.0 }
0x1c0c   : > { %v6806_v22 = vsel %vm714_vm14, %v6671_v10, 0.0 }
0x1c0d   : > { %v6808_v62 = vadd.f32 %v6807_v38, %v6806_v22  ;;  %v6794_v47 = vpop.f32.mrf.mxu3 }
0x1c0e   : > { %v6753_v42 = vpop.f32.mrf.mxu2  ;;  %v6811_v8 = vsel %vm714_vm14, %v6794_v47, 0.0 }
0x1c0f   : > { %v6809_v23 = vsel %vm714_vm14, %v6753_v42, 0.0 }
0x1c10   : > { %v6810_v28 = vadd.f32 %v6809_v23, %v6808_v62 }
0x1c12   : > { %v6812_v36 = vadd.f32 %v6811_v8, %v6810_v28  ;;  %v8412_v8 = vld [vmem:[%s12604_s10 + $0x78] sm:$0xff] }
0x1c13   : > { %6990 = vmatpush.msrb.mxu0 %v8412_v8 }
0x1c14   : > { %v12105_v2 = vadd.f32 %v6812_v36, %v11510_v29  ;;  %v6674_v32 = vpop.f32.mrf.mxu0  ;;  %v8411_v36 = vld [vmem:[%s12604_s10 + $0x70] sm:$0xff] }
0x1c15   : > { %v6813_v33 = vsel %vm714_vm14, %v6674_v32, 0.0  ;;  %6991 = vmatpush.msrb.mxu0 %v8411_v36  ;;  %v8410_v32 = vld [vmem:[%s12604_s10 + $0x68] sm:$0xff] }
0x1c16   : > { %v6865_v16 = vsel %vm714_vm14, %v12105_v2, 0.0  ;;  %v6756_v5 = vpop.f32.mrf.mxu2 }
0x1c17   : > { %6866 = vadd.xlane.f32.xlu1 %v6865_v16  ;;  %v6816_v15 = vsel %vm714_vm14, %v6756_v5, 0.0  ;;  %6992 = vmatpush.msrb.mxu0 %v8410_v32  ;;  %v8409_v16 = vld [vmem:[%s12604_s10 + $0x60] sm:$0xff] }
0x1c19   : > { %v6715_v43 = vpop.f32.mrf.mxu1  ;;  %6993 = vmatpush.msrb.mxu0 %v8409_v16 }
0x1c1a   : > { %v6814_v30 = vsel %vm714_vm14, %v6715_v43, 0.0 }
0x1c1b   : > { %v6815_v13 = vadd.f32 %v6814_v30, %v6813_v33 }
0x1c1c   : > { %v6677_v29 = vpop.f32.mrf.mxu0 }
0x1c1d   : > { %v6797_v31 = vpop.f32.mrf.mxu3  ;;  %v6817_v6 = vadd.f32 %v6816_v15, %v6815_v13  ;;  %v6820_v14 = vsel %vm714_vm14, %v6677_v29, 0.0 }
0x1c1e   : > { %v6818_v51 = vsel %vm714_vm14, %v6797_v31, 0.0 }
0x1c1f   : > { %v6819_v18 = vadd.f32 %v6818_v51, %v6817_v6  ;;  %v6759_v44 = vpop.f32.mrf.mxu2 }
0x1c20   : > { %v6823_v60 = vsel %vm714_vm14, %v6759_v44, 0.0 }
0x1c21   : > { %v12114_v21 = vadd.f32 %v6819_v18, %v11515_v59  ;;  %v6718_v61 = vpop.f32.mrf.mxu1  ;;  %v8408_v18 = vld [vmem:[%s12599_s5 + $0xc] sm:$0xf] }
0x1c22   : > { %v6821_v46 = vsel %vm714_vm14, %v6718_v61, 0.0 }
0x1c23   : > { %v6822_v1 = vadd.f32 %v6821_v46, %v6820_v14  ;;  %v6868_v11 = vsel %vm714_vm14, %v12114_v21, 0.0  ;;  %v6953_v14 = vperm.slane %v8408_v18, 2 }
0x1c24   : > { %6869 = vadd.xlane.f32.xlu2 %v6868_v11 }
0x1c25   : > { %v6824_v53 = vadd.f32 %v6823_v60, %v6822_v1  ;;  %v6958_v1 = vperm.slane %v8408_v18, 3  ;;  %v8415_v18 = vld [vmem:[%s12606_s12 + $0x188] sm:$0xff] }
0x1c27   : > { %v6800_v48 = vpop.f32.mrf.mxu3 }
0x1c28   : > { %v6825_v35 = vsel %vm714_vm14, %v6800_v48, 0.0 }
0x1c29   : > { %v6826_v24 = vadd.f32 %v6825_v35, %v6824_v53  ;;  %v6680_v55 = vpop.f32.mrf.mxu0 }
0x1c2a   : > { %v6827_v4 = vsel %vm714_vm14, %v6680_v55, 0.0 }
0x1c2b   : > { %v12123_v59 = vadd.f32 %v6826_v24, %v11520_v57  ;;  %v6721_v39 = vpop.f32.mrf.mxu1 }
0x1c2c   : > { %v6828_v12 = vsel %vm714_vm14, %v6721_v39, 0.0 }
0x1c2d   : > { %v6871_v56 = vsel %vm714_vm14, %v12123_v59, 0.0  ;;  %v6829_v25 = vadd.f32 %v6828_v12, %v6827_v4 }
0x1c2e   : > { %6872 = vadd.xlane.f32.xlu0 %v6871_v56  ;;  %v8429_v56 = vld [vmem:[%s12606_s12 + $0x1f8] sm:$0xff] }
0x1c2f   : > { %v6762_v9 = vpop.f32.mrf.mxu2  ;;  %7043 = vmatpush.msra.mxu1 %v8429_v56 }
0x1c30   : > { %v6830_v34 = vsel %vm714_vm14, %v6762_v9, 0.0  ;;  %v6803_v45 = vpop.f32.mrf.mxu3 }
0x1c31   : > { %v6831_v63 = vadd.f32 %v6830_v34, %v6829_v25  ;;  %v6832_v20 = vsel %vm714_vm14, %v6803_v45, 0.0  ;;  %v8428_v25 = vld [vmem:[%s12606_s12 + $0x1f0] sm:$0xff]  ;;  %v8427_v34 = vld [vmem:[%s12606_s12 + $0x1e8] sm:$0xff] }
0x1c32   : > { %7044 = vmatpush.msra.mxu1 %v8428_v25 }
0x1c33   : > { %v6833_v19 = vadd.f32 %v6832_v20, %v6831_v63 }
0x1c34   : > { %7045 = vmatpush.msra.mxu1 %v8427_v34 }
0x1c35   : > { %v12132_v57 = vadd.f32 %v6833_v19, %v11525_v41 }
0x1c37   : > { %v6874_v52 = vsel %vm714_vm14, %v12132_v57, 0.0 }
0x1c38   : > { %6875 = vadd.xlane.f32.xlu1 %v6874_v52 }
0x1c8a   : > { %v6867_v50 = vpop.xlane.xlu1 %6866 }
0x1c8b   : > { %v6877_v7 = vmul.f32 %v6867_v50, %v9253_v58 }
0x1c8d   : > { %v6881_v3 = vsub.f32 %v12105_v2, %v6877_v7 }
0x1c8f   : > { %v6885_v54 = vmul.f32 %v6881_v3, %v6881_v3 }
0x1c91   : > { %v6889_v0 = vsel %vm714_vm14, %v6885_v54, 0.0 }
0x1c92   : > { %6890 = vadd.xlane.f32.xlu2 %v6889_v0 }
0x1c97   : > { %v6870_v40 = vpop.xlane.xlu2 %6869 }
0x1c98   : > { %v6878_v49 = vmul.f32 %v6870_v40, %v9253_v58 }
0x1c9a   : > { %v12141_v26 = vsub.f32 %v12114_v21, %v6878_v49 }
0x1c9c   : > { %v6886_v41 = vmul.f32 %v12141_v26, %v12141_v26 }
0x1c9e   : > { %v6892_v17 = vsel %vm714_vm14, %v6886_v41, 0.0 }
0x1c9f   : > { %6893 = vadd.xlane.f32.xlu0 %v6892_v17 }
0x1ca1   : > { %v6873_v27 = vpop.xlane.xlu0 %6872 }
0x1ca2   : > { %v6879_v37 = vmul.f32 %v6873_v27, %v9253_v58 }
0x1ca4   : > { %v12148_v10 = vsub.f32 %v12123_v59, %v6879_v37 }
0x1ca6   : > { %v6887_v38 = vmul.f32 %v12148_v10, %v12148_v10 }
0x1ca8   : > { %v6895_v22 = vsel %vm714_vm14, %v6887_v38, 0.0 }
0x1ca9   : > { %6896 = vadd.xlane.f32.xlu1 %v6895_v22 }
0x1cab   : > { %v6876_v62 = vpop.xlane.xlu1 %6875 }
0x1cac   : > { %v6880_v42 = vmul.f32 %v6876_v62, %v9253_v58 }
0x1cae   : > { %v12155_v47 = vsub.f32 %v12132_v57, %v6880_v42 }
0x1cb0   : > { %v6888_v23 = vmul.f32 %v12155_v47, %v12155_v47 }
0x1cb2   : > { %v6898_v28 = vsel %vm714_vm14, %v6888_v23, 0.0 }
0x1cb3   : > { %6899 = vadd.xlane.f32.xlu2 %v6898_v28 }
0x1d05   : > { %v6891_v5 = vpop.xlane.xlu2 %6890 }
0x1d06   : > { %v6901_v43 = vmul.f32 %v6891_v5, %v9253_v58 }
0x1d08   : > { %v6905_v33 = vadd.f32 1e-05, %v6901_v43  ;;  %v8425_v43 = vld [vmem:[%s12606_s12 + $0x1d8] sm:$0xff] }
0x1d0a   : > { %8928 = vrsqrt.f32 %v6905_v33  ;;  %vm6915_vm10 = vweird.f32 %v6905_v33 }
0x1d10   : > { %v8929_v30 = vpop.eup %8928 }
0x1d11   : > { %v6910_v13 = vmul.f32 %v8929_v30, %v6905_v33  ;;  %vm6916_vm9 = vweird.f32 %v8929_v30  ;;  %v8424_v33 = vld [vmem:[%s12606_s12 + $0x1d0] sm:$0xff] }
0x1d12   : > { %v6894_v15 = vpop.xlane.xlu0 %6893  ;;  %vm6917_vm11 = vmor %vm6915_vm10, %vm6916_vm9 }
0x1d13   : > { %v6911_v31 = vmul.f32 %v8929_v30, %v6910_v13  ;;  %v6902_v6 = vmul.f32 %v6894_v15, %v9253_v58  ;;  %v8421_v13 = vld [vmem:[%s12606_s12 + $0x1b8] sm:$0xff]  ;;  %v8420_v15 = vld [vmem:[%s12606_s12 + $0x1b0] sm:$0xff] }
0x1d15   : > { %v6912_v51 = vmul.f32 0.5, %v6911_v31  ;;  %v6906_v29 = vadd.f32 1e-05, %v6902_v6  ;;  %v8419_v31 = vld [vmem:[%s12606_s12 + $0x1a8] sm:$0xff]  ;;  %v8418_v6 = vld [vmem:[%s12606_s12 + $0x1a0] sm:$0xff] }
0x1d17   : > { %v6913_v44 = vsub.f32 1.5, %v6912_v51  ;;  %8930 = vrsqrt.f32 %v6906_v29  ;;  %vm6925_vm13 = vweird.f32 %v6906_v29  ;;  %v8417_v51 = vld [vmem:[%s12606_s12 + $0x198] sm:$0xff] }
0x1d19   : > { %v6914_v61 = vmul.f32 %v8929_v30, %v6913_v44  ;;  %v8414_v44 = vld [vmem:[%s12606_s12 + $0x180] sm:$0xff] }
0x1d1b   : > { %v6918_v46 = vsel %vm6917_vm11, %v8929_v30, %v6914_v61  ;;  %v8422_v30 = vld [vmem:[%s12606_s12 + $0x1c0] sm:$0xff] }
0x1d1c   : > { %v6949_v11 = vmul.f32 %v6918_v46, %v6881_v3  ;;  %v6897_v60 = vpop.xlane.xlu1 %6896  ;;  %v8562_v61 = vld [vmem:[%s12605_s11 + $0x3] ss:$0 sm:$0xff] }
0x1d1d   : > { %v8931_v53 = vpop.eup %8930  ;;  %v6903_v48 = vmul.f32 %v6897_v60, %v9253_v58 }
0x1d1e   : > { %v6954_v35 = vmul.f32 %v6953_v14, %v6949_v11  ;;  %v6920_v24 = vmul.f32 %v8931_v53, %v6906_v29  ;;  %vm6926_vm12 = vweird.f32 %v8931_v53  ;;  %v8416_v29 = vld [vmem:[%s12606_s12 + $0x190] sm:$0xff] }
0x1d1f   : > { %v6907_v55 = vadd.f32 1e-05, %v6903_v48  ;;  %vm6927_vm15 = vmor %vm6925_vm13, %vm6926_vm12 }
0x1d20   : > { %v6959_v39 = vadd.f32 %v6958_v1, %v6954_v35  ;;  %v6921_v4 = vmul.f32 %v8931_v53, %v6920_v24 }
0x1d21   : > { %8932 = vrsqrt.f32 %v6907_v55  ;;  %vm6935_vm1 = vweird.f32 %v6907_v55 }
0x1d22   : > { %v6922_v12 = vmul.f32 0.5, %v6921_v4  ;;  %8431 = vmatmul.msk.f32.vlgmr.msrb.gmra.mxu0 %vm714_vm14, %v6959_v39 }
0x1d24   : > { %v6923_v9 = vsub.f32 1.5, %v6922_v12 }
0x1d26   : > { %v6924_v45 = vmul.f32 %v8931_v53, %v6923_v9  ;;  %v6900_v63 = vpop.xlane.xlu2 %6899 }
0x1d27   : > { %v8933_v20 = vpop.eup %8932  ;;  %v6904_v19 = vmul.f32 %v6900_v63, %v9253_v58 }
0x1d28   : > { %v6928_v52 = vsel %vm6927_vm15, %v8931_v53, %v6924_v45  ;;  %v6930_v50 = vmul.f32 %v8933_v20, %v6907_v55  ;;  %vm6936_vm0 = vweird.f32 %v8933_v20 }
0x1d29   : > { %v6950_v7 = vmul.f32 %v6928_v52, %v12141_v26  ;;  %v6908_v3 = vadd.f32 1e-05, %v6904_v19  ;;  %vm6937_vm2 = vmor %vm6935_vm1, %vm6936_vm0 }
0x1d2a   : > { %v6931_v54 = vmul.f32 %v8933_v20, %v6930_v50 }
0x1d2b   : > { %8934 = vrsqrt.f32 %v6908_v3  ;;  %v6955_v0 = vmul.f32 %v6953_v14, %v6950_v7  ;;  %vm6945_vm4 = vweird.f32 %v6908_v3 }
0x1d2c   : > { %v6932_v40 = vmul.f32 0.5, %v6931_v54 }
0x1d2d   : > { %v6960_v49 = vadd.f32 %v6958_v1, %v6955_v0 }
0x1d2e   : > { %v6933_v41 = vsub.f32 1.5, %v6932_v40 }
0x1d2f   : > { %8432 = vmatmul.msk.f32.gmra.mxu0 %vm714_vm14, %v6960_v49 }
0x1d30   : > { %v6934_v17 = vmul.f32 %v8933_v20, %v6933_v41 }
0x1d31   : > { %v8935_v27 = vpop.eup %8934 }
0x1d32   : > { %v6938_v37 = vsel %vm6937_vm2, %v8933_v20, %v6934_v17  ;;  %v6940_v38 = vmul.f32 %v8935_v27, %v6908_v3  ;;  %vm6946_vm3 = vweird.f32 %v8935_v27 }
0x1d33   : > { %v6951_v22 = vmul.f32 %v6938_v37, %v12148_v10  ;;  %vm6947_vm5 = vmor %vm6945_vm4, %vm6946_vm3  ;;  %v8426_v10 = vld [vmem:[%s12606_s12 + $0x1e0] sm:$0xff] }
0x1d34   : > { %v6941_v62 = vmul.f32 %v8935_v27, %v6940_v38  ;;  %7046 = vmatpush.msra.mxu1 %v8426_v10 }
0x1d35   : > { %v6956_v26 = vmul.f32 %v6953_v14, %v6951_v22 }
0x1d36   : > { %v6942_v42 = vmul.f32 0.5, %v6941_v62  ;;  %7047 = vmatpush.msra.mxu1 %v8425_v43 }
0x1d37   : > { %v6961_v23 = vadd.f32 %v6958_v1, %v6956_v26 }
0x1d38   : > { %v6943_v28 = vsub.f32 1.5, %v6942_v42  ;;  %7048 = vmatpush.msra.mxu1 %v8424_v33 }
0x1d39   : > { %8433 = vmatmul.msk.f32.gmra.mxu0 %vm714_vm14, %v6961_v23 }
0x1d3a   : > { %v6944_v8 = vmul.f32 %v8935_v27, %v6943_v28 }
0x1d3c   : > { %v6948_v36 = vsel %vm6947_vm5, %v8935_v27, %v6944_v8 }
0x1d3d   : > { %v6952_v32 = vmul.f32 %v6948_v36, %v12155_v47  ;;  %v8423_v47 = vld [vmem:[%s12606_s12 + $0x1c8] sm:$0xff] }
0x1d3e   : > { %7049 = vmatpush.msra.mxu1 %v8423_v47 }
0x1d3f   : > { %v6957_v16 = vmul.f32 %v6953_v14, %v6952_v32 }
0x1d40   : > { %7050 = vmatpush.msra.mxu1 %v8422_v30 }
0x1d41   : > { %v6962_v5 = vadd.f32 %v6958_v1, %v6957_v16 }
0x1d42   : > { %7051 = vmatpush.msra.mxu1 %v8421_v13 }
0x1d43   : > { %8434 = vmatmul.msk.f32.gmra.mxu0 %vm714_vm14, %v6962_v5  ;;  %v8563_v5 = vld [vmem:[%s12607_s13 + $0x3] ss:$0 sm:$0xff] }
0x1d44   : > { %7052 = vmatpush.msra.mxu1 %v8420_v15 }
0x1d46   : > { %7053 = vmatpush.msra.mxu1 %v8419_v31 }
0x1d48   : > { %7054 = vmatpush.msra.mxu1 %v8418_v6 }
0x1d4a   : > { %7055 = vmatpush.msra.mxu1 %v8417_v51 }
0x1d4c   : > { %7056 = vmatpush.msra.mxu1 %v8416_v29 }
0x1d4e   : > { %7057 = vmatpush.msra.mxu1 %v8415_v18 }
0x1d50   : > { %7058 = vmatpush.msra.mxu1 %v8414_v44 }
0x1d9f   : > { %v6995_v14 = vpop.f32.mrf.mxu0 }
0x1da0   : > { %v6996_v46 = vadd.f32 %v8562_v61, %v6995_v14 }
0x1da2   : > { %v7007_v1 = vmul.f32 %v6996_v46, %v6996_v46 }
0x1da4   : > { %v7011_v11 = vmul.f32 %v7007_v1, %v6996_v46 }
0x1da6   : > { %v7015_v60 = vmul.f32 0.044715, %v7011_v11 }
0x1da8   : > { %v7019_v53 = vadd.f32 %v7015_v60, %v6996_v46 }
0x1daa   : > { %v7023_v48 = vmul.f32 0.7978846, %v7019_v53 }
0x1dac   : > { %8936 = vtanh.f32 %v7023_v48  ;;  %v6998_v35 = vpop.f32.mrf.mxu0 }
0x1dad   : > { %v6999_v24 = vadd.f32 %v8562_v61, %v6998_v35 }
0x1daf   : > { %v7008_v55 = vmul.f32 %v6999_v24, %v6999_v24 }
0x1db1   : > { %v7012_v39 = vmul.f32 %v7008_v55, %v6999_v24 }
0x1db2   : > { %v8937_v4 = vpop.eup %8936 }
0x1db3   : > { %v7031_v12 = vadd.f32 1.0, %v8937_v4  ;;  %v7016_v56 = vmul.f32 0.044715, %v7012_v39 }
0x1db5   : > { %v7035_v25 = vmul.f32 0.5, %v7031_v12  ;;  %v7020_v9 = vadd.f32 %v7016_v56, %v6999_v24 }
0x1db6   : > { %v7001_v34 = vpop.f32.mrf.mxu0 }
0x1db7   : > { %v7039_v45 = vmul.f32 %v7035_v25, %v6996_v46  ;;  %v7002_v63 = vadd.f32 %v8562_v61, %v7001_v34  ;;  %v7024_v20 = vmul.f32 0.7978846, %v7020_v9 }
0x1db9   : > { %v7009_v19 = vmul.f32 %v7002_v63, %v7002_v63  ;;  %7059 = vmatmul.f32.vlgmr.msra.gmra.mxu1 %v7039_v45  ;;  %8938 = vtanh.f32 %v7024_v20 }
0x1dbb   : > { %v7013_v52 = vmul.f32 %v7009_v19, %v7002_v63 }
0x1dbd   : > { %v7017_v50 = vmul.f32 0.044715, %v7013_v52 }
0x1dbf   : > { %v8939_v7 = vpop.eup %8938  ;;  %v7021_v3 = vadd.f32 %v7017_v50, %v7002_v63 }
0x1dc0   : > { %v7004_v54 = vpop.f32.mrf.mxu0  ;;  %v7032_v0 = vadd.f32 1.0, %v8939_v7 }
0x1dc1   : > { %v7005_v40 = vadd.f32 %v8562_v61, %v7004_v54  ;;  %v7025_v49 = vmul.f32 0.7978846, %v7021_v3 }
0x1dc2   : > { %v7036_v41 = vmul.f32 0.5, %v7032_v0  ;;  %v7200_v0 = vld [vmem:[%s12609_s15 + $0x18] sm:$0xff] }
0x1dc3   : > { %v7010_v17 = vmul.f32 %v7005_v40, %v7005_v40  ;;  %8940 = vtanh.f32 %v7025_v49  ;;  %7216 = vmatpush.msra.mxu2 %v7200_v0  ;;  %v7199_v49 = vld [vmem:[%s12609_s15 + $0x10] sm:$0xff] }
0x1dc4   : > { %v7040_v27 = vmul.f32 %v7036_v41, %v6999_v24  ;;  %v8454_v41 = vld [vmem:[%s12609_s15 + $0x98] sm:$0xff] }
0x1dc5   : > { %v7014_v37 = vmul.f32 %v7010_v17, %v7005_v40  ;;  %7217 = vmatpush.msra.mxu2 %v7199_v49  ;;  %7332 = vmatpush.msra.mxu0 %v8454_v41 }
0x1dc6   : > { %7062 = vmatmul.f32.gmra.mxu1 %v7040_v27  ;;  %v8438_v27 = vld [vmem:[%s12609_s15 + $0x30] sm:$0xff] }
0x1dc7   : > { %v7018_v38 = vmul.f32 0.044715, %v7014_v37  ;;  %v7198_v37 = vld [vmem:[%s12609_s15 + $0x8] sm:$0xff] }
0x1dc8   : > { %7218 = vmatpush.msra.mxu2 %v7198_v37  ;;  %v8506_v37 = vld [vmem:[%s12609_s15 + $0x1e0] sm:$0xff] }
0x1dc9   : > { %v8941_v22 = vpop.eup %8940  ;;  %v7022_v62 = vadd.f32 %v7018_v38, %v7005_v40  ;;  %v8453_v38 = vld [vmem:[%s12609_s15 + $0x90] sm:$0xff] }
0x1dca   : > { %v7033_v26 = vadd.f32 1.0, %v8941_v22  ;;  %7333 = vmatpush.msra.mxu0 %v8453_v38 }
0x1dcb   : > { %v7026_v42 = vmul.f32 0.7978846, %v7022_v62 }
0x1dcc   : > { %v7037_v23 = vmul.f32 0.5, %v7033_v26 }
0x1dcd   : > { %8942 = vtanh.f32 %v7026_v42  ;;  %v7197_v42 = vld [vmem:[%s12609_s15] sm:$0xff] }
0x1dce   : > { %v7041_v28 = vmul.f32 %v7037_v23, %v7002_v63  ;;  %v8437_v23 = vld [vmem:[%s12609_s15 + $0x28] sm:$0xff]  ;;  %7219 = vmatpush.msra.mxu2 %v7197_v42 }
0x1dd0   : > { %7065 = vmatmul.f32.gmra.mxu1 %v7041_v28  ;;  %v8452_v28 = vld [vmem:[%s12609_s15 + $0x88] sm:$0xff] }
0x1dd1   : > { %7334 = vmatpush.msra.mxu0 %v8452_v28 }
0x1dd3   : > { %v8943_v8 = vpop.eup %8942 }
0x1dd4   : > { %v7034_v36 = vadd.f32 1.0, %v8943_v8 }
0x1dd6   : > { %v7038_v32 = vmul.f32 0.5, %v7034_v36 }
0x1dd8   : > { %v7042_v16 = vmul.f32 %v7038_v32, %v7005_v40  ;;  %v8439_v40 = vld [vmem:[%s12609_s15 + $0x38] sm:$0xff]  ;;  %v8436_v32 = vld [vmem:[%s12609_s15 + $0x20] sm:$0xff] }
0x1dd9   : > { %7245 = vmatpush.msra.mxu3 %v8439_v40 }
0x1dda   : > { %7068 = vmatmul.f32.gmra.mxu1 %v7042_v16  ;;  %v8444_v16 = vld [vmem:[%s12609_s15 + $0x58] sm:$0xff] }
0x1ddb   : > { %7246 = vmatpush.msra.mxu3 %v8438_v27  ;;  %7274 = vmatpush.msrb.mxu2 %v8444_v16 }
0x1ddd   : > { %7247 = vmatpush.msra.mxu3 %v8437_v23 }
0x1ddf   : > { %7248 = vmatpush.msra.mxu3 %v8436_v32 }
0x1e36   : > { %v7060_v10 = vpop.f32.mrf.mxu1 }
0x1e37   : > { %v7072_v43 = vadd.f32 %v7060_v10, %v12105_v2  ;;  %v9028_v10 = vmov 2.0  }
0x1e39   : > { %v7079_v33 = vadd.f32 %v8563_v5, %v7072_v43  ;;  %v8451_v43 = vld [vmem:[%s12609_s15 + $0x80] sm:$0xff] }
0x1e3a   : > { %7335 = vmatpush.msra.mxu0 %v8451_v43 }
0x1e3b   : > { %v7083_v47 = vsel %vm714_vm14, %v7079_v33, 0.0 }
0x1e3c   : > { %7084 = vadd.xlane.f32.xlu0 %v7083_v47  ;;  %v8449_v47 = vld [vmem:[%s12609_s15 + $0x78] sm:$0xff] }
0x1e3d   : > { %7303 = vmatpush.msrb.mxu3 %v8449_v47 }
0x1e43   : > { %v7063_v30 = vpop.f32.mrf.mxu1 }
0x1e44   : > { %v7073_v13 = vadd.f32 %v7063_v30, %v12114_v21  ;;  %v8469_v30 = vld [vmem:[%s12609_s15 + $0xf8] sm:$0xff] }
0x1e45   : > { %7419 = vmatpush.msrb.mxu0 %v8469_v30 }
0x1e46   : > { %v7080_v15 = vadd.f32 %v8563_v5, %v7073_v13 }
0x1e48   : > { %v7086_v31 = vsel %vm714_vm14, %v7080_v15, 0.0 }
0x1e49   : > { %7087 = vadd.xlane.f32.xlu2 %v7086_v31  ;;  %v8448_v31 = vld [vmem:[%s12609_s15 + $0x70] sm:$0xff] }
0x1e4a   : > { %7304 = vmatpush.msrb.mxu3 %v8448_v31 }
0x1e4d   : > { %v7066_v6 = vpop.f32.mrf.mxu1 }
0x1e4e   : > { %v7074_v51 = vadd.f32 %v7066_v6, %v12123_v59  ;;  %v8468_v6 = vld [vmem:[%s12609_s15 + $0xf0] sm:$0xff] }
0x1e4f   : > { %7420 = vmatpush.msrb.mxu0 %v8468_v6 }
0x1e50   : > { %v7081_v29 = vadd.f32 %v8563_v5, %v7074_v51 }
0x1e52   : > { %v7089_v18 = vsel %vm714_vm14, %v7081_v29, 0.0 }
0x1e53   : > { %7090 = vadd.xlane.f32.xlu1 %v7089_v18  ;;  %v8441_v18 = vld [vmem:[%s12609_s15 + $0x40] sm:$0xff] }
0x1e57   : > { %v7069_v44 = vpop.f32.mrf.mxu1 }
0x1e58   : > { %v7075_v2 = vadd.f32 %v7069_v44, %v12132_v57  ;;  %v8447_v44 = vld [vmem:[%s12609_s15 + $0x68] sm:$0xff] }
0x1e59   : > { %7305 = vmatpush.msrb.mxu3 %v8447_v44 }
0x1e5a   : > { %v7082_v61 = vadd.f32 %v8563_v5, %v7075_v2  ;;  %v8467_v2 = vld [vmem:[%s12609_s15 + $0xe8] sm:$0xff] }
0x1e5b   : > { %7421 = vmatpush.msrb.mxu0 %v8467_v2  ;;  %v8457_v2 = vld [vmem:[%s12609_s15 + $0xa8] sm:$0xff] }
0x1e5c   : > { %v7092_v14 = vsel %vm714_vm14, %v7082_v61, 0.0 }
0x1e5d   : > { %7093 = vadd.xlane.f32.xlu0 %v7092_v14 }
0x1eaf   : > { %v7085_v46 = vpop.xlane.xlu0 %7084 }
0x1eb0   : > { %v7095_v21 = vmul.f32 %v7085_v46, %v9253_v58 }
0x1eb2   : > { %v12249_v1 = vsub.f32 %v7079_v33, %v7095_v21  ;;  %v8443_v33 = vld [vmem:[%s12609_s15 + $0x50] sm:$0xff] }
0x1eb3   : > { %7275 = vmatpush.msrb.mxu2 %v8443_v33  ;;  %v8488_v21 = vld [vmem:[%s12609_s15 + $0x170] sm:$0xff] }
0x1eb4   : > { %v7103_v11 = vmul.f32 %v12249_v1, %v12249_v1 }
0x1eb6   : > { %v7107_v59 = vsel %vm714_vm14, %v7103_v11, 0.0  ;;  %v8446_v11 = vld [vmem:[%s12609_s15 + $0x60] sm:$0xff] }
0x1eb7   : > { %7108 = vadd.xlane.f32.xlu1 %v7107_v59  ;;  %7306 = vmatpush.msrb.mxu3 %v8446_v11  ;;  %v8462_v11 = vld [vmem:[%s12609_s15 + $0xc8] sm:$0xff] }
0x1ebc   : > { %v7088_v60 = vpop.xlane.xlu2 %7087 }
0x1ebd   : > { %v7096_v53 = vmul.f32 %v7088_v60, %v9253_v58 }
0x1ebf   : > { %v12255_v48 = vsub.f32 %v7080_v15, %v7096_v53  ;;  %v8442_v15 = vld [vmem:[%s12609_s15 + $0x48] sm:$0xff]  ;;  %v8466_v53 = vld [vmem:[%s12609_s15 + $0xe0] sm:$0xff] }
0x1ec0   : > { %7276 = vmatpush.msrb.mxu2 %v8442_v15  ;;  %7422 = vmatpush.msrb.mxu0 %v8466_v53  ;;  %v8482_v53 = vld [vmem:[%s12609_s15 + $0x148] sm:$0xff] }
0x1ec1   : > { %v7104_v57 = vmul.f32 %v12255_v48, %v12255_v48 }
0x1ec2   : > { %7277 = vmatpush.msrb.mxu2 %v8441_v18 }
0x1ec3   : > { %v7110_v35 = vsel %vm714_vm14, %v7104_v57, 0.0  ;;  %v8487_v57 = vld [vmem:[%s12609_s15 + $0x168] sm:$0xff] }
0x1ec4   : > { %7111 = vadd.xlane.f32.xlu0 %v7110_v35 }
0x1ec6   : > { %v7091_v24 = vpop.xlane.xlu1 %7090 }
0x1ec7   : > { %v7097_v55 = vmul.f32 %v7091_v24, %v9253_v58 }
0x1ec9   : > { %v12261_v39 = vsub.f32 %v7081_v29, %v7097_v55  ;;  %v8489_v29 = vld [vmem:[%s12609_s15 + $0x178] sm:$0xff] }
0x1eca   : > { %7535 = vmatpush.msrb.mxu1 %v8489_v29  ;;  %v8464_v29 = vld [vmem:[%s12609_s15 + $0xd8] sm:$0xff] }
0x1ecb   : > { %v7105_v4 = vmul.f32 %v12261_v39, %v12261_v39 }
0x1ecc   : > { %7536 = vmatpush.msrb.mxu1 %v8488_v21  ;;  %v8456_v21 = vld [vmem:[%s12609_s15 + $0xa0] sm:$0xff] }
0x1ecd   : > { %v7113_v12 = vsel %vm714_vm14, %v7105_v4, 0.0 }
0x1ece   : > { %7114 = vadd.xlane.f32.xlu2 %v7113_v12  ;;  %7537 = vmatpush.msrb.mxu1 %v8487_v57  ;;  %v8486_v12 = vld [vmem:[%s12609_s15 + $0x160] sm:$0xff] }
0x1ed0   : > { %v7094_v56 = vpop.xlane.xlu0 %7093  ;;  %7538 = vmatpush.msrb.mxu1 %v8486_v12 }
0x1ed1   : > { %v7098_v25 = vmul.f32 %v7094_v56, %v9253_v58  ;;  %v549_v56 = vld [vmem:[%s12608_s14 + $0x2] sm:$0x3] }
0x1ed3   : > { %v12267_v9 = vsub.f32 %v7082_v61, %v7098_v25 }
0x1ed5   : > { %v7106_v34 = vmul.f32 %v12267_v9, %v12267_v9 }
0x1ed7   : > { %v7116_v45 = vsel %vm714_vm14, %v7106_v34, 0.0 }
0x1ed8   : > { %7117 = vadd.xlane.f32.xlu1 %v7116_v45  ;;  %v8509_v45 = vld [vmem:[%s12609_s15 + $0x1f8] sm:$0xff] }
0x1ed9   : > { %7651 = vmatpush.msra.mxu1 %v8509_v45 }
0x1f2a   : > { %v7109_v63 = vpop.xlane.xlu1 %7108 }
0x1f2b   : > { %v7119_v20 = vmul.f32 %v7109_v63, %v9253_v58 }
0x1f2d   : > { %v12273_v19 = vadd.f32 1e-05, %v7119_v20 }
0x1f2f   : > { %8944 = vrsqrt.f32 %v12273_v19  ;;  %vm7133_vm7 = vweird.f32 %v12273_v19 }
0x1f35   : > { %v12276_v50 = vpop.eup %8944 }
0x1f36   : > { %v7128_v54 = vmul.f32 %v12276_v50, %v12273_v19  ;;  %vm7134_vm6 = vweird.f32 %v12276_v50  ;;  %v8508_v19 = vld [vmem:[%s12609_s15 + $0x1f0] sm:$0xff] }
0x1f37   : > { %v7112_v52 = vpop.xlane.xlu0 %7111  ;;  %vm12384_vm8 = vmor %vm7133_vm7, %vm7134_vm6  ;;  %7652 = vmatpush.msra.mxu1 %v8508_v19  ;;  %v8478_v19 = vld [vmem:[%s12609_s15 + $0x130] sm:$0xff] }
0x1f38   : > { %v7120_v7 = vmul.f32 %v7112_v52, %v9253_v58  ;;  %v7129_v17 = vmul.f32 %v12276_v50, %v7128_v54  ;;  %v7171_v52 = vperm.slane %v549_v56, 0 }
0x1f3a   : > { %v12279_v3 = vadd.f32 1e-05, %v7120_v7  ;;  %v7130_v8 = vmul.f32 0.5, %v7129_v17  ;;  %v7176_v17 = vperm.slane %v549_v56, 1  ;;  %v8481_v56 = vld [vmem:[%s12609_s15 + $0x140] sm:$0xff] }
0x1f3c   : > { %8946 = vrsqrt.f32 %v12279_v3  ;;  %v7131_v13 = vsub.f32 1.5, %v7130_v8  ;;  %vm7143_vm13 = vweird.f32 %v12279_v3 }
0x1f3d   : > { %8948 = vrcp.f32 %v9028_v10 }
0x1f3e   : > { %v7132_v14 = vmul.f32 %v12276_v50, %v7131_v13 }
0x1f40   : > { %v7136_v25 = vsel %vm12384_vm8, %v12276_v50, %v7132_v14  ;;  %v8507_v50 = vld [vmem:[%s12609_s15 + $0x1e8] sm:$0xff] }
0x1f41   : > { %v7115_v22 = vpop.xlane.xlu2 %7114  ;;  %v7167_v7 = vmul.f32 %v7136_v25, %v12249_v1  ;;  %7653 = vmatpush.msra.mxu1 %v8507_v50  ;;  %v8473_v25 = vld [vmem:[%s12609_s15 + $0x110] sm:$0xff]  ;;  %v8502_v50 = vld [vmem:[%s12609_s15 + $0x1c8] sm:$0xff] }
0x1f42   : > { %v12306_v62 = vpop.eup %8946  ;;  %v7121_v26 = vmul.f32 %v7115_v22, %v9253_v58 }
0x1f43   : > { %v7138_v5 = vmul.f32 %v12306_v62, %v12279_v3  ;;  %v12363_v61 = vpop.eup %8948  ;;  %vm7144_vm10 = vweird.f32 %v12306_v62  ;;  %v7172_v27 = vmul.f32 %v7171_v52, %v7167_v7  ;;  %7654 = vmatpush.msra.mxu1 %v8506_v37  ;;  %v8471_v7 = vld [vmem:[%s12609_s15 + $0x100] sm:$0xff] }
0x1f44   : > { %v12318_v36 = vadd.f32 1e-05, %v7121_v26  ;;  %v7188_v55 = vmul.f32 2.0, %v12363_v61  ;;  %vm7145_vm15 = vmor %vm7143_vm13, %vm7144_vm10  ;;  %vm7192_vm0 = vweird.f32 %v12363_v61 }
0x1f45   : > { %v7139_v51 = vmul.f32 %v12306_v62, %v7138_v5  ;;  %v7177_v28 = vadd.f32 %v7176_v17, %v7172_v27  ;;  %v8501_v27 = vld [vmem:[%s12609_s15 + $0x1c0] sm:$0xff] }
0x1f46   : > { %8950 = vrsqrt.f32 %v12318_v36  ;;  %v7189_v54 = vsub.f32 1.0, %v7188_v55  ;;  %vm7153_vm11 = vweird.f32 %v12318_v36 }
0x1f47   : > { %v7140_v35 = vmul.f32 0.5, %v7139_v51  ;;  %v7181_v10 = vsel %vm714_vm14, %v7177_v28, 0.0  ;;  %v8458_v51 = vld [vmem:[%s12609_s15 + $0xb0] sm:$0xff] }
0x1f48   : > { %v7190_v1 = vmul.f32 %v12363_v61, %v7189_v54  ;;  %v8477_v54 = vld [vmem:[%s12609_s15 + $0x128] sm:$0xff] }
0x1f49   : > { %v7141_v63 = vsub.f32 1.5, %v7140_v35 }
0x1f4a   : > { %v7191_v8 = vadd.f32 %v12363_v61, %v7190_v1  ;;  %v8493_v1 = vld [vmem:[%s12609_s15 + $0x190] sm:$0xff] }
0x1f4b   : > { %v7118_v46 = vpop.xlane.xlu1 %7117  ;;  %v7142_v40 = vmul.f32 %v12306_v62, %v7141_v63  ;;  %v8504_v63 = vld [vmem:[%s12609_s15 + $0x1d8] sm:$0xff] }
0x1f4c   : > { %v8951_v59 = vpop.eup %8950  ;;  %v7122_v60 = vmul.f32 %v7118_v46, %v9253_v58  ;;  %v7193_v43 = vsel %vm7192_vm0, %v12363_v61, %v7191_v8  ;;  %v8463_v61 = vld [vmem:[%s12609_s15 + $0xd0] sm:$0xff]  ;;  %v8474_v58 = vld [vmem:[%s12609_s15 + $0x118] sm:$0xff] }
0x1f4d   : > { %v7148_v24 = vmul.f32 %v8951_v59, %v12318_v36  ;;  %vm7154_vm9 = vweird.f32 %v8951_v59  ;;  %v7146_v42 = vsel %vm7145_vm15, %v12306_v62, %v7142_v40  ;;  %v8483_v46 = vld [vmem:[%s12609_s15 + $0x150] sm:$0xff]  ;;  %v8494_v40 = vld [vmem:[%s12609_s15 + $0x198] sm:$0xff] }
0x1f4e   : > { %v7126_v4 = vadd.f32 1e-05, %v7122_v60  ;;  %vm7155_vm12 = vmor %vm7153_vm11, %vm7154_vm9  ;;  %v7168_v16 = vmul.f32 %v7146_v42, %v12255_v48  ;;  %v8459_v48 = vld [vmem:[%s12609_s15 + $0xb8] sm:$0xff]  ;;  %v8491_v42 = vld [vmem:[%s12609_s15 + $0x180] sm:$0xff] }
0x1f4f   : > { %v7149_v34 = vmul.f32 %v8951_v59, %v7148_v24  ;;  %v8461_v24 = vld [vmem:[%s12609_s15 + $0xc0] sm:$0xff] }
0x1f50   : > { %8952 = vrsqrt.f32 %v7126_v4  ;;  %vm7163_vm2 = vweird.f32 %v7126_v4  ;;  %v7173_v47 = vmul.f32 %v7171_v52, %v7168_v16 }
0x1f51   : > { %v7150_v20 = vmul.f32 0.5, %v7149_v34  ;;  %v8479_v34 = vld [vmem:[%s12609_s15 + $0x138] sm:$0xff] }
0x1f52   : > { %v7178_v18 = vadd.f32 %v7176_v17, %v7173_v47 }
0x1f53   : > { %v7151_v0 = vsub.f32 1.5, %v7150_v20  ;;  %v8472_v20 = vld [vmem:[%s12609_s15 + $0x108] sm:$0xff] }
0x1f55   : > { %v7152_v49 = vmul.f32 %v8951_v59, %v7151_v0 }
0x1f56   : > { %v8953_v41 = vpop.eup %8952 }
0x1f57   : > { %v7156_v38 = vsel %vm7155_vm12, %v8951_v59, %v7152_v49  ;;  %v7158_v22 = vmul.f32 %v8953_v41, %v7126_v4  ;;  %vm7164_vm1 = vweird.f32 %v8953_v41  ;;  %v7184_v59 = vsel %vm714_vm14, %v7178_v18, 0.0 }
0x1f58   : > { %v7169_v26 = vmul.f32 %v7156_v38, %v12261_v39  ;;  %vm7165_vm3 = vmor %vm7163_vm2, %vm7164_vm1  ;;  %v8499_v38 = vld [vmem:[%s12609_s15 + $0x1b8] sm:$0xff] }
0x1f59   : > { %v7159_v23 = vmul.f32 %v8953_v41, %v7158_v22  ;;  %v8492_v22 = vld [vmem:[%s12609_s15 + $0x188] sm:$0xff] }
0x1f5a   : > { %v7174_v36 = vmul.f32 %v7171_v52, %v7169_v26  ;;  %v8498_v26 = vld [vmem:[%s12609_s15 + $0x1b0] sm:$0xff] }
0x1f5b   : > { %v7160_v32 = vmul.f32 0.5, %v7159_v23  ;;  %v8497_v23 = vld [vmem:[%s12609_s15 + $0x1a8] sm:$0xff] }
0x1f5c   : > { %v7179_v5 = vadd.f32 %v7176_v17, %v7174_v36  ;;  %v8496_v36 = vld [vmem:[%s12609_s15 + $0x1a0] sm:$0xff] }
0x1f5d   : > { %v7161_v3 = vsub.f32 1.5, %v7160_v32 }
0x1f5e   : > { %v7182_v39 = vsel %vm714_vm14, %v7179_v5, 0.0  ;;  %v7196_v5 = vld [vmem:[%s12610_s16] sm:$0x1] }
0x1f5f   : > { %v7183_v62 = vadd.f32 %v7182_v39, %v7181_v10  ;;  %v7162_v33 = vmul.f32 %v8953_v41, %v7161_v3 }
0x1f61   : > { %v12424_v30 = vmul.f32 %v7193_v43, %v7183_v62  ;;  %v7166_v13 = vsel %vm7165_vm3, %v8953_v41, %v7162_v33 }
0x1f62   : > { %v7170_v15 = vmul.f32 %v7166_v13, %v12267_v9  ;;  %v8484_v9 = vld [vmem:[%s12609_s15 + $0x158] sm:$0xff] }
0x1f63   : > { %8435 = vmatmul.msk.f32.vlgmr.msra.gmra.mxu2 %vm714_vm14, %v12424_v30  ;;  %v7230_v31 = vrot.slane %v12424_v30, 1  ;;  %v7317_v6 = vrot.slane %v12424_v30, 4  ;;  %v7259_v35 = vrot.slane %v12424_v30, 2  ;;  %v7288_v4 = vrot.slane %v12424_v30, 3 }
0x1f64   : > { %v7175_v44 = vmul.f32 %v7171_v52, %v7170_v15  ;;  %7361 = vmatpush.msra.mxu2 %v8459_v48  ;;  %v7404_v12 = vrot.slane %v12424_v30, 7  ;;  %v8503_v52 = vld [vmem:[%s12609_s15 + $0x1d0] sm:$0xff]  ;;  %v7346_v0 = vrot.slane %v12424_v30, 5  ;;  %v7375_v49 = vrot.slane %v12424_v30, 6 }
0x1f65   : > { %8440 = vmatmul.msk.f32.vlgmr.msra.gmra.mxu3 %vm714_vm14, %v7230_v31  ;;  %8455 = vmatmul.msk.f32.vlgmr.msra.gmra.mxu0 %vm714_vm14, %v7317_v6 }
0x1f66   : > { %v7180_v14 = vadd.f32 %v7176_v17, %v7175_v44  ;;  %7362 = vmatpush.msra.mxu2 %v8458_v51  ;;  %7390 = vmatpush.msra.mxu3 %v8464_v29  ;;  %v8476_v17 = vld [vmem:[%s12609_s15 + $0x120] sm:$0xff] }
0x1f67   : > { %7506 = vmatpush.msra.mxu0 %v8484_v9 }
0x1f68   : > { %v7185_v60 = vsel %vm714_vm14, %v7180_v14, 0.0  ;;  %7363 = vmatpush.msra.mxu2 %v8457_v2  ;;  %7391 = vmatpush.msra.mxu3 %v8463_v61 }
0x1f69   : > { %v7186_v57 = vadd.f32 %v7185_v60, %v7184_v59  ;;  %7507 = vmatpush.msra.mxu0 %v8483_v46 }
0x1f6a   : > { %7364 = vmatpush.msra.mxu2 %v8456_v21  ;;  %7392 = vmatpush.msra.mxu3 %v8462_v11 }
0x1f6b   : > { %v12472_v55 = vmul.f32 %v7193_v43, %v7186_v57  ;;  %8445 = vmatmul.msk.f32.vlgmr.msrb.gmra.mxu2 %vm714_vm14, %v7259_v35  ;;  %7508 = vmatpush.msra.mxu0 %v8482_v53 }
0x1f6c   : > { %7393 = vmatpush.msra.mxu3 %v8461_v24  ;;  %7448 = vmatpush.msrb.mxu2 %v8474_v58 }
0x1f6d   : > { %8450 = vmatmul.msk.f32.vlgmr.msrb.gmra.mxu3 %vm714_vm14, %v7288_v4  ;;  %8470 = vmatmul.msk.f32.vlgmr.msrb.gmra.mxu0 %vm714_vm14, %v7404_v12  ;;  %v7520_v45 = vrot.slane %v12472_v55, 3  ;;  %v7491_v41 = vrot.slane %v12472_v55, 2  ;;  %v7636_v37 = vrot.slane %v12472_v55, 7  ;;  %v7462_v28 = vrot.slane %v12472_v55, 1 }
0x1f6e   : > { %7509 = vmatpush.msra.mxu0 %v8481_v56  ;;  %7449 = vmatpush.msrb.mxu2 %v8473_v25  ;;  %v7607_v8 = vrot.slane %v12472_v55, 6  ;;  %v7549_v32 = vrot.slane %v12472_v55, 4  ;;  %v7578_v16 = vrot.slane %v12472_v55, 5 }
0x1f6f   : > { %8490 = vmatmul.msk.f32.vlgmr.msrb.gmra.mxu1 %vm714_vm14, %v7520_v45  ;;  %7477 = vmatpush.msrb.mxu3 %v8479_v34 }
0x1f70   : > { %7622 = vmatpush.msrb.mxu0 %v8504_v63  ;;  %7450 = vmatpush.msrb.mxu2 %v8472_v20 }
0x1f71   : > { %7478 = vmatpush.msrb.mxu3 %v8478_v19 }
0x1f72   : > { %7623 = vmatpush.msrb.mxu0 %v8503_v52  ;;  %7451 = vmatpush.msrb.mxu2 %v8471_v7 }
0x1f73   : > { %8460 = vmatmul.msk.f32.vlgmr.msra.gmra.mxu2 %vm714_vm14, %v7346_v0  ;;  %7479 = vmatpush.msrb.mxu3 %v8477_v54 }
0x1f74   : > { %7624 = vmatpush.msrb.mxu0 %v8502_v50  ;;  %7564 = vmatpush.msra.mxu2 %v8494_v40 }
0x1f75   : > { %8465 = vmatmul.msk.f32.vlgmr.msra.gmra.mxu3 %vm714_vm14, %v7375_v49  ;;  %8485 = vmatmul.msk.f32.vlgmr.msra.gmra.mxu0 %vm714_vm14, %v7491_v41 }
0x1f76   : > { %7480 = vmatpush.msrb.mxu3 %v8476_v17  ;;  %7625 = vmatpush.msrb.mxu0 %v8501_v27 }
0x1f77   : > { %8510 = vmatmul.msk.f32.vlgmr.msra.gmra.mxu1 %vm714_vm14, %v7636_v37  ;;  %7565 = vmatpush.msra.mxu2 %v8493_v1 }
0x1f78   : > { %7593 = vmatpush.msra.mxu3 %v8499_v38 }
0x1f79   : > { %7566 = vmatpush.msra.mxu2 %v8492_v22 }
0x1f7a   : > { %7594 = vmatpush.msra.mxu3 %v8498_v26 }
0x1f7b   : > { %8475 = vmatmul.msk.f32.vlgmr.msrb.gmra.mxu2 %vm714_vm14, %v12472_v55 }
0x1f7c   : > { %7567 = vmatpush.msra.mxu2 %v8491_v42  ;;  %7595 = vmatpush.msra.mxu3 %v8497_v23 }
0x1f7d   : > { %8480 = vmatmul.msk.f32.vlgmr.msrb.gmra.mxu3 %vm714_vm14, %v7462_v28  ;;  %8505 = vmatmul.msk.f32.vlgmr.msrb.gmra.mxu0 %vm714_vm14, %v7607_v8 }
0x1f7e   : > { %7596 = vmatpush.msra.mxu3 %v8496_v36 }
0x1f83   : > { %8495 = vmatmul.msk.f32.vlgmr.msra.gmra.mxu2 %vm714_vm14, %v7549_v32 }
0x1f85   : > { %8500 = vmatmul.msk.f32.vlgmr.msra.gmra.mxu3 %vm714_vm14, %v7578_v16 }
0x1fe2   : > { %v7337_v39 = vpop.f32.mrf.mxu0 }
0x1fe6   : > { %v7221_v3 = vpop.f32.mrf.mxu2 }
0x1fe7   : > { %v7224_v43 = vadd.f32 %v7221_v3, %v7196_v5 }
0x1fe8   : > { %v7250_v10 = vpop.f32.mrf.mxu3 }
0x1fe9   : > { %v7253_v62 = vadd.f32 %v7250_v10, %v7224_v43 }
0x1fea   : > { %v7424_v15 = vpop.f32.mrf.mxu0 }
0x1fec   : > { %v7540_v46 = vpop.f32.mrf.mxu1 }
0x1fee   : > { %v7279_v33 = vpop.f32.mrf.mxu2 }
0x1fef   : > { %v7282_v47 = vadd.f32 %v7279_v33, %v7253_v62 }
0x1ff0   : > { %v7308_v30 = vpop.f32.mrf.mxu3 }
0x1ff1   : > { %v7311_v13 = vadd.f32 %v7308_v30, %v7282_v47 }
0x1ff2   : > { %v7511_v2 = vpop.f32.mrf.mxu0 }
0x1ff3   : > { %v7340_v48 = vadd.f32 %v7337_v39, %v7311_v13 }
0x1ff4   : > { %v7656_v58 = vpop.f32.mrf.mxu1 }
0x1ff6   : > { %v7366_v31 = vpop.f32.mrf.mxu2 }
0x1ff7   : > { %v7369_v6 = vadd.f32 %v7366_v31, %v7340_v48 }
0x1ff8   : > { %v7395_v51 = vpop.f32.mrf.mxu3 }
0x1ff9   : > { %v7398_v29 = vadd.f32 %v7395_v51, %v7369_v6 }
0x1ffa   : > { %v7627_v35 = vpop.f32.mrf.mxu0 }
0x1ffb   : > { %v7427_v18 = vadd.f32 %v7424_v15, %v7398_v29 }
0x1ffe   : > { %v7453_v44 = vpop.f32.mrf.mxu2 }
0x1fff   : > { %v7456_v9 = vadd.f32 %v7453_v44, %v7427_v18 }
0x2000   : > { %v7482_v61 = vpop.f32.mrf.mxu3 }
0x2001   : > { %v7485_v14 = vadd.f32 %v7482_v61, %v7456_v9 }
0x2003   : > { %v7514_v21 = vadd.f32 %v7511_v2, %v7485_v14 }
0x2005   : > { %v7543_v11 = vadd.f32 %v7540_v46, %v7514_v21 }
0x2006   : > { %v7569_v59 = vpop.f32.mrf.mxu2 }
0x2007   : > { %v7572_v60 = vadd.f32 %v7569_v59, %v7543_v11 }
0x2008   : > { %v7598_v53 = vpop.f32.mrf.mxu3 }
0x2009   : > { %v7601_v57 = vadd.f32 %v7598_v53, %v7572_v60 }
0x200b   : > { %v7630_v24 = vadd.f32 %v7627_v35, %v7601_v57 }
0x200d   : > { %v7659_v55 = vadd.f32 %v7656_v58, %v7630_v24 }
0x200f   : > { %7660 = vst [vmem:[%s540_s2] sm:$0x1] %v7659_v55 }
0x2010   : > { %8989 = shalt.err (!%p8986_p3)
}
0x2011   : > { %8514 = dma.vmem_to_hbm [thread:$0]  (%p9157_p5), %s7673_s22, 16, %s7675_s23, %s7662_s29  }
0x2012 PF: > { %p8520_p4 = scmp.ge.s32.totalorder %s9024_s27, 2  ;;  %s7686_s2 = sand.u32 1, %s9012_s24  }
0x2013   : > { %s7687_s28 = scalar_lea.sflag [#allocation3], %s7686_s2 }
0x2014   : > { %p8517_p7 = pnand %p8520_p4, %p9161_p6 }
0x2016   : > { %p8518_p8 = pneg %p8517_p7 }
0x2018   : > { %9007 = dma.done.wait (%p8518_p8), %s7687_s28, 16  }
0x2019   : > { %9009 = vsyncadd (%p8518_p8), %s7687_s28, 4294967280  ;;  %s12633_s27 = sld [smem:[#allocation6_spill]]  ;;  %s12636_s24 = smov %s9016_s25 }
0x201a   : > { %s12634_s0 = sld [smem:[#allocation5_spill]] }
0x201b   : > { %s12635_s26 = sld [smem:[#allocation7_spill]] }
0x201f   : > { %p27_p9 = scmp.ge.s32.totalorder %s12633_s27, 4  }
0x2020   : > { %s12637_s25 = smov %s12634_s0 }
0x2021   :  { %29 = sbr.rel (!%p27_p9) target bundleno = 7 (0x7), region = 166 }
0x2026   :  { %7692 = vsyncpa [#allocation3], 1 }
0x2027   :  { %7694 = vsyncpa [#allocation3 + $0x1], 1 }

</bundles_post_ra>
